<compile_context>
chip_gen: v7x
topology: tpu7x:2x2x1
jax: 0.10.0
libtpu: 0.0.40
codegen_flags: <defaults>
</compile_context>

<pallas_src>
import jax
import jax.numpy as jnp
from jax.experimental import pallas as pl
from jax.experimental.pallas import tpu as pltpu


def _round_up(x, m):
    return (x + m - 1) // m * m


def _pick_tile_b(batch):
    """Batch tile: multiple of 16 (clean bf16 sublane tiling); prefer the largest
    tile in {64,32,16} that still yields a grid of >= 2 steps (v7x dual-TC
    sharding) while keeping padding waste below one tile."""
    b16 = _round_up(batch, 16)
    for t in (64, 32, 16):
        if b16 >= 2 * t:
            return t
    return 16


# ---------------------------------------------------------------------------
# Fused kernel: conv1..conv4 + flatten + fc1 + fc2 + sigmoid for one batch tile.
# In-kernel activation layout: (H, W, TB, C) bf16, TB % 16 == 0.
# ---------------------------------------------------------------------------
def _fused_forward_kernel(cols1_ref, w1_ref, b1_ref, w2_ref, b2_ref,
                          w3_ref, b3_ref, w4_ref, b4_ref,
                          wf1_ref, bf1_ref, wf2_ref, bf2_ref, o_ref):
    tb = o_ref.shape[0]

    # ---- conv1: input pre-im2col'd (bf16) to (81, TB, 9); one (81*TB,9)@(9,16).
    cols1 = cols1_ref[...].reshape(81 * tb, 9)
    y = jnp.dot(cols1, w1_ref[...], preferred_element_type=jnp.float32)
    y = jnp.maximum(y + b1_ref[...], 0.0).astype(jnp.bfloat16)   # single bf16 cast
    act = y.reshape(9, 9, tb, 16)                                 # (H, W, TB, C)

    # ---- 3x3 valid conv + ReLU: K-packed im2col -> ONE matmul per conv.
    def conv3x3_relu(a, wp_ref, b_ref):
        h, w, tbb, cin = a.shape
        oh, ow = h - 2, w - 2
        cout = wp_ref.shape[-1]
        m = oh * ow * tbb
        # 9 static leading-dim slices, lane-concat into a (m, 9*cin) bf16 matrix.
        cols = jnp.concatenate(
            [a[i:i + oh, j:j + ow].reshape(m, cin)
             for i in range(3) for j in range(3)], axis=-1)
        yy = jnp.dot(cols, wp_ref[...], preferred_element_type=jnp.float32)
        yy = jnp.maximum(yy + b_ref[...], 0.0).astype(jnp.bfloat16)
        return yy.reshape(oh, ow, tbb, cout)

    act = conv3x3_relu(act, w2_ref, b2_ref)            # (7, 7, TB, 32)
    act = conv3x3_relu(act, w3_ref, b3_ref)            # (5, 5, TB, 64)
    act = conv3x3_relu(act, w4_ref, b4_ref)            # (3, 3, TB, 32)

    # F.relu(Flatten(x)) is a no-op: conv4's ReLU output is already >= 0.
    # fc1 (K-packed): (TB, 288) @ (288, 16); PyTorch (C,H,W) flatten order is
    # folded into wf1 so the concat order (h, w, c) matches.
    flat = jnp.concatenate([act[hh, ww] for hh in range(3) for ww in range(3)],
                           axis=-1)                                 # (TB, 288) bf16
    hidden = jnp.dot(flat, wf1_ref[...], preferred_element_type=jnp.float32)
    hidden = jnp.maximum(hidden + bf1_ref[...], 0.0)                # (TB, 16) f32

    # fc2 (N=1): skip the MXU, VPU multiply + lane reduce; sigmoid on EUP.
    logits = jnp.sum(hidden * wf2_ref[...], axis=-1, keepdims=True) + bf2_ref[...]
    o_ref[...] = jax.nn.sigmoid(logits).astype(o_ref.dtype)


# ---------------------------------------------------------------------------
# Parameters: PyTorch-layout init (xavier_uniform weights, zero biases), then a
# ONE-TIME re-layout into kernel-ready form (hoisted out of the forward pass).
# ---------------------------------------------------------------------------
def init_params(key):
    def xavier(k, shape, fan_in, fan_out):
        a = jnp.sqrt(6.0 / (fan_in + fan_out))
        return jax.random.uniform(k, shape, jnp.float32, -a, a)

    ks = jax.random.split(key, 6)
    p = {}
    conv_cfg = [("conv1", 1, 16), ("conv2", 16, 32), ("conv3", 32, 64), ("conv4", 64, 32)]
    for k, (name, cin, cout) in zip(ks[:4], conv_cfg):
        p[name] = {"w": xavier(k, (cout, cin, 3, 3), cin * 9, cout * 9),
                   "b": jnp.zeros((cout,), jnp.float32)}
    p["fc1"] = {"w": xavier(ks[4], (16, 288), 288, 16), "b": jnp.zeros((16,), jnp.float32)}
    p["fc2"] = {"w": xavier(ks[5], (1, 16), 16, 1), "b": jnp.zeros((1,), jnp.float32)}
    return p


def prepare_params(p):
    """PyTorch layout -> kernel layout. Conv weights K-packed as (9*Cin, Cout)
    bf16 with K order (i, j, c) matching the in-kernel im2col concat order."""
    def conv_wp(w):  # (Cout, Cin, 3, 3) -> (9*Cin, Cout)
        cout, cin = w.shape[0], w.shape[1]
        return jnp.transpose(w, (2, 3, 1, 0)).reshape(9 * cin, cout).astype(jnp.bfloat16)

    return {
        "w1": conv_wp(p["conv1"]["w"]),                               # (9, 16)
        "b1": p["conv1"]["b"].reshape(1, 16).astype(jnp.float32),
        "w2": conv_wp(p["conv2"]["w"]),                               # (144, 32)
        "b2": p["conv2"]["b"].reshape(1, 32).astype(jnp.float32),
        "w3": conv_wp(p["conv3"]["w"]),                               # (288, 64)
        "b3": p["conv3"]["b"].reshape(1, 64).astype(jnp.float32),
        "w4": conv_wp(p["conv4"]["w"]),                               # (576, 32)
        "b4": p["conv4"]["b"].reshape(1, 32).astype(jnp.float32),
        # fc1 (16, 288): fold PyTorch (C,H,W) flatten order -> (h,w,c)-major (288, 16)
        "wf1": jnp.transpose(p["fc1"]["w"].reshape(16, 32, 3, 3),
                             (2, 3, 1, 0)).reshape(288, 16).astype(jnp.bfloat16),
        "bf1": p["fc1"]["b"].reshape(1, 16).astype(jnp.float32),
        "wf2": p["fc2"]["w"].astype(jnp.float32),                     # (1, 16) f32 (VPU fc2)
        "bf2": p["fc2"]["b"].reshape(1, 1).astype(jnp.float32),
    }


_FLOPS_PER_IMAGE = 2 * (81 * 9 * 16 + 49 * 144 * 32 + 25 * 288 * 64
                        + 9 * 576 * 32 + 288 * 16 + 16)


# ---------------------------------------------------------------------------
# Forward: one pallas_call, grid over batch tiles.
# ---------------------------------------------------------------------------
@jax.jit
def family_target_forward(kp, x_nchw):
    """x_nchw: (B, 1, 11, 11). Returns (B, 1) f32 in [0, 1]."""
    B = x_nchw.shape[0]
    tile_b = _pick_tile_b(B)
    b_pad = _round_up(B, tile_b)

    x2 = x_nchw[:, 0].astype(jnp.bfloat16)                       # (B, 11, 11) bf16
    if b_pad != B:
        x2 = jnp.pad(x2, ((0, b_pad - B), (0, 0), (0, 0)))
    # conv1 im2col (Cin=1, K=9) done once in the wrapper; layout (81, B, 9) bf16
    # = (spatial, batch, tap) so the kernel consumes it with trivial reshapes.
    # TODO(synk): could move this into the kernel (raw 11x11 blocks + in-kernel
    # broadcast MACs) to shrink the HBM stream further; low priority at these sizes.
    patches = [x2[:, i:i + 9, j:j + 9] for i in range(3) for j in range(3)]
    cols1 = jnp.stack(patches, axis=-1)                           # (B, 9, 9, 9) bf16
    cols1 = jnp.transpose(cols1, (1, 2, 0, 3)).reshape(81, b_pad, 9)

    args = (cols1, kp["w1"], kp["b1"], kp["w2"], kp["b2"], kp["w3"], kp["b3"],
            kp["w4"], kp["b4"], kp["wf1"], kp["bf1"], kp["wf2"], kp["bf2"])

    in_specs = [
        pl.BlockSpec((81, tile_b, 9), lambda g: (0, g, 0)),       # cols1 (batch-tiled)
        pl.BlockSpec((9, 16), lambda g: (0, 0)),                  # w1
        pl.BlockSpec((1, 16), lambda g: (0, 0)),                  # b1
        pl.BlockSpec((144, 32), lambda g: (0, 0)),                # w2 (K-packed)
        pl.BlockSpec((1, 32), lambda g: (0, 0)),                  # b2
        pl.BlockSpec((288, 64), lambda g: (0, 0)),                # w3 (K-packed)
        pl.BlockSpec((1, 64), lambda g: (0, 0)),                  # b3
        pl.BlockSpec((576, 32), lambda g: (0, 0)),                # w4 (K-packed)
        pl.BlockSpec((1, 32), lambda g: (0, 0)),                  # b4
        pl.BlockSpec((288, 16), lambda g: (0, 0)),                # wf1 (K-packed)
        pl.BlockSpec((1, 16), lambda g: (0, 0)),                  # bf1
        pl.BlockSpec((1, 16), lambda g: (0, 0)),                  # wf2 row (f32)
        pl.BlockSpec((1, 1), lambda g: (0, 0)),                   # bf2
    ]

    in_bytes = sum(int(a.size) * a.dtype.itemsize for a in args)
    cost = pl.CostEstimate(flops=int(_FLOPS_PER_IMAGE * b_pad),
                           transcendentals=int(b_pad),
                           bytes_accessed=int(in_bytes + b_pad * 4))

    out = pl.pallas_call(
        _fused_forward_kernel,
        out_shape=jax.ShapeDtypeStruct((b_pad, 1), jnp.float32),
        grid=(b_pad // tile_b,),
        in_specs=in_specs,
        out_specs=pl.BlockSpec((tile_b, 1), lambda g: (g, 0)),
        compiler_params=pltpu.CompilerParams(
            dimension_semantics=("parallel",),
            vmem_limit_bytes=32 * 1024 * 1024),
        cost_estimate=cost,
    )(*args)
    return out[:B]


if __name__ == "__main__":
    key = jax.random.PRNGKey(0)
    pkey, xkey = jax.random.split(key)
    params = init_params(pkey)                 # PyTorch-layout params
    kparams = prepare_params(params)           # one-time kernel re-layout (hoisted)
    # Input shape implied by the model: (B, 1, 11, 11) NCHW, small batch.
    x = jax.random.normal(xkey, (2, 1, 11, 11), jnp.float32)
    out = family_target_forward(kparams, x)
    out = jax.block_until_ready(out)
    assert out.shape == (2, 1), out.shape
    assert bool(jnp.all(jnp.isfinite(out)))
    assert bool(jnp.all((out >= 0.0) & (out <= 1.0)))
    print("KERNEL_OK")
</pallas_src>

<mosaic_0001>
module attributes {stable_mosaic.version = 11 : i64} {
  func.func @_fused_forward_kernel(%arg0: i32, %arg1: memref<81x16x9xbf16, #tpu.memory_space<vmem>>, %arg2: memref<9x16xbf16, #tpu.memory_space<vmem>>, %arg3: memref<1x16xf32, #tpu.memory_space<vmem>>, %arg4: memref<144x32xbf16, #tpu.memory_space<vmem>>, %arg5: memref<1x32xf32, #tpu.memory_space<vmem>>, %arg6: memref<288x64xbf16, #tpu.memory_space<vmem>>, %arg7: memref<1x64xf32, #tpu.memory_space<vmem>>, %arg8: memref<576x32xbf16, #tpu.memory_space<vmem>>, %arg9: memref<1x32xf32, #tpu.memory_space<vmem>>, %arg10: memref<288x16xbf16, #tpu.memory_space<vmem>>, %arg11: memref<1x16xf32, #tpu.memory_space<vmem>>, %arg12: memref<1x16xf32, #tpu.memory_space<vmem>>, %arg13: memref<1x1xf32, #tpu.memory_space<vmem>>, %arg14: memref<16x1xf32, #tpu.memory_space<vmem>>) attributes {dimension_semantics = [#tpu.dimension_semantics<parallel>], iteration_bounds = array<i64: 1>, scalar_prefetch = 0 : i64, scratch_operands = 0 : i64, tpu.core_type = #tpu.core_type<tc>, window_params = [{transform_indices = @transform_0, window_bounds = array<i64: 81, 16, 9>}, {pipeline_mode = #tpu.pipeline_mode<synchronous>, transform_indices = @transform_1, window_bounds = array<i64: 9, 16>}, {pipeline_mode = #tpu.pipeline_mode<synchronous>, transform_indices = @transform_2, window_bounds = array<i64: 1, 16>}, {pipeline_mode = #tpu.pipeline_mode<synchronous>, transform_indices = @transform_3, window_bounds = array<i64: 144, 32>}, {pipeline_mode = #tpu.pipeline_mode<synchronous>, transform_indices = @transform_4, window_bounds = array<i64: 1, 32>}, {pipeline_mode = #tpu.pipeline_mode<synchronous>, transform_indices = @transform_5, window_bounds = array<i64: 288, 64>}, {pipeline_mode = #tpu.pipeline_mode<synchronous>, transform_indices = @transform_6, window_bounds = array<i64: 1, 64>}, {pipeline_mode = #tpu.pipeline_mode<synchronous>, transform_indices = @transform_7, window_bounds = array<i64: 576, 32>}, {pipeline_mode = #tpu.pipeline_mode<synchronous>, transform_indices = @transform_8, window_bounds = array<i64: 1, 32>}, {pipeline_mode = #tpu.pipeline_mode<synchronous>, transform_indices = @transform_9, window_bounds = array<i64: 288, 16>}, {pipeline_mode = #tpu.pipeline_mode<synchronous>, transform_indices = @transform_10, window_bounds = array<i64: 1, 16>}, {pipeline_mode = #tpu.pipeline_mode<synchronous>, transform_indices = @transform_11, window_bounds = array<i64: 1, 16>}, {pipeline_mode = #tpu.pipeline_mode<synchronous>, transform_indices = @transform_12, window_bounds = array<i64: 1, 1>}, {transform_indices = @transform_13, window_bounds = array<i64: 16, 1>}]} {
    %c0 = arith.constant 0 : index
    %c0_0 = arith.constant 0 : index
    %c0_1 = arith.constant 0 : index
    %0 = vector.load %arg1[%c0, %c0_0, %c0_1] : memref<81x16x9xbf16, #tpu.memory_space<vmem>>, vector<81x16x9xbf16>
    %1 = vector.shape_cast %0 : vector<81x16x9xbf16> to vector<1296x9xbf16>
    %c0_2 = arith.constant 0 : index
    %c0_3 = arith.constant 0 : index
    %2 = vector.load %arg2[%c0_2, %c0_3] : memref<9x16xbf16, #tpu.memory_space<vmem>>, vector<9x16xbf16>
    %cst = arith.constant dense<0.000000e+00> : vector<1296x16xf32>
    %3 = tpu.matmul %1, %2, %cst {dimension_numbers = #tpu.dot_dimension_numbers<[1], [0], [0], [1], [0, 0, 1, 1], [], []>} : vector<1296x9xbf16>, vector<9x16xbf16>, vector<1296x16xf32> -> vector<1296x16xf32>
    %c0_4 = arith.constant 0 : index
    %c0_5 = arith.constant 0 : index
    %4 = vector.load %arg3[%c0_4, %c0_5] : memref<1x16xf32, #tpu.memory_space<vmem>>, vector<1x16xf32>
    %5 = vector.broadcast %4 : vector<1x16xf32> to vector<1296x16xf32>
    %6 = arith.addf %3, %5 : vector<1296x16xf32>
    %cst_6 = arith.constant 0.000000e+00 : f32
    %7 = vector.broadcast %cst_6 : f32 to vector<1296x16xf32>
    %8 = arith.maximumf %6, %7 : vector<1296x16xf32>
    %9 = arith.truncf %8 : vector<1296x16xf32> to vector<1296x16xbf16>
    %10 = vector.shape_cast %9 : vector<1296x16xbf16> to vector<9x9x16x16xbf16>
    %11 = vector.extract_strided_slice %10 {offsets = [0, 0, 0, 0], sizes = [7, 7, 16, 16], strides = [1, 1, 1, 1]} : vector<9x9x16x16xbf16> to vector<7x7x16x16xbf16>
    %12 = vector.shape_cast %11 : vector<7x7x16x16xbf16> to vector<784x16xbf16>
    %13 = vector.extract_strided_slice %10 {offsets = [0, 1, 0, 0], sizes = [7, 7, 16, 16], strides = [1, 1, 1, 1]} : vector<9x9x16x16xbf16> to vector<7x7x16x16xbf16>
    %14 = vector.shape_cast %13 : vector<7x7x16x16xbf16> to vector<784x16xbf16>
    %15 = vector.extract_strided_slice %10 {offsets = [0, 2, 0, 0], sizes = [7, 7, 16, 16], strides = [1, 1, 1, 1]} : vector<9x9x16x16xbf16> to vector<7x7x16x16xbf16>
    %16 = vector.shape_cast %15 : vector<7x7x16x16xbf16> to vector<784x16xbf16>
    %17 = vector.extract_strided_slice %10 {offsets = [1, 0, 0, 0], sizes = [7, 7, 16, 16], strides = [1, 1, 1, 1]} : vector<9x9x16x16xbf16> to vector<7x7x16x16xbf16>
    %18 = vector.shape_cast %17 : vector<7x7x16x16xbf16> to vector<784x16xbf16>
    %19 = vector.extract_strided_slice %10 {offsets = [1, 1, 0, 0], sizes = [7, 7, 16, 16], strides = [1, 1, 1, 1]} : vector<9x9x16x16xbf16> to vector<7x7x16x16xbf16>
    %20 = vector.shape_cast %19 : vector<7x7x16x16xbf16> to vector<784x16xbf16>
    %21 = vector.extract_strided_slice %10 {offsets = [1, 2, 0, 0], sizes = [7, 7, 16, 16], strides = [1, 1, 1, 1]} : vector<9x9x16x16xbf16> to vector<7x7x16x16xbf16>
    %22 = vector.shape_cast %21 : vector<7x7x16x16xbf16> to vector<784x16xbf16>
    %23 = vector.extract_strided_slice %10 {offsets = [2, 0, 0, 0], sizes = [7, 7, 16, 16], strides = [1, 1, 1, 1]} : vector<9x9x16x16xbf16> to vector<7x7x16x16xbf16>
    %24 = vector.shape_cast %23 : vector<7x7x16x16xbf16> to vector<784x16xbf16>
    %25 = vector.extract_strided_slice %10 {offsets = [2, 1, 0, 0], sizes = [7, 7, 16, 16], strides = [1, 1, 1, 1]} : vector<9x9x16x16xbf16> to vector<7x7x16x16xbf16>
    %26 = vector.shape_cast %25 : vector<7x7x16x16xbf16> to vector<784x16xbf16>
    %27 = vector.extract_strided_slice %10 {offsets = [2, 2, 0, 0], sizes = [7, 7, 16, 16], strides = [1, 1, 1, 1]} : vector<9x9x16x16xbf16> to vector<7x7x16x16xbf16>
    %28 = vector.shape_cast %27 : vector<7x7x16x16xbf16> to vector<784x16xbf16>
    %29 = tpu.concatenate %12, %14, %16, %18, %20, %22, %24, %26, %28 in 1 : vector<784x16xbf16>, vector<784x16xbf16>, vector<784x16xbf16>, vector<784x16xbf16>, vector<784x16xbf16>, vector<784x16xbf16>, vector<784x16xbf16>, vector<784x16xbf16>, vector<784x16xbf16> -> vector<784x144xbf16>
    %c0_7 = arith.constant 0 : index
    %c0_8 = arith.constant 0 : index
    %30 = vector.load %arg4[%c0_7, %c0_8] : memref<144x32xbf16, #tpu.memory_space<vmem>>, vector<144x32xbf16>
    %cst_9 = arith.constant dense<0.000000e+00> : vector<784x32xf32>
    %31 = tpu.matmul %29, %30, %cst_9 {dimension_numbers = #tpu.dot_dimension_numbers<[1], [0], [0], [1], [0, 0, 1, 1], [], []>} : vector<784x144xbf16>, vector<144x32xbf16>, vector<784x32xf32> -> vector<784x32xf32>
    %c0_10 = arith.constant 0 : index
    %c0_11 = arith.constant 0 : index
    %32 = vector.load %arg5[%c0_10, %c0_11] : memref<1x32xf32, #tpu.memory_space<vmem>>, vector<1x32xf32>
    %33 = vector.broadcast %32 : vector<1x32xf32> to vector<784x32xf32>
    %34 = arith.addf %31, %33 : vector<784x32xf32>
    %cst_12 = arith.constant 0.000000e+00 : f32
    %35 = vector.broadcast %cst_12 : f32 to vector<784x32xf32>
    %36 = arith.maximumf %34, %35 : vector<784x32xf32>
    %37 = arith.truncf %36 : vector<784x32xf32> to vector<784x32xbf16>
    %38 = vector.shape_cast %37 : vector<784x32xbf16> to vector<7x7x16x32xbf16>
    %39 = vector.extract_strided_slice %38 {offsets = [0, 0, 0, 0], sizes = [5, 5, 16, 32], strides = [1, 1, 1, 1]} : vector<7x7x16x32xbf16> to vector<5x5x16x32xbf16>
    %40 = vector.shape_cast %39 : vector<5x5x16x32xbf16> to vector<400x32xbf16>
    %41 = vector.extract_strided_slice %38 {offsets = [0, 1, 0, 0], sizes = [5, 5, 16, 32], strides = [1, 1, 1, 1]} : vector<7x7x16x32xbf16> to vector<5x5x16x32xbf16>
    %42 = vector.shape_cast %41 : vector<5x5x16x32xbf16> to vector<400x32xbf16>
    %43 = vector.extract_strided_slice %38 {offsets = [0, 2, 0, 0], sizes = [5, 5, 16, 32], strides = [1, 1, 1, 1]} : vector<7x7x16x32xbf16> to vector<5x5x16x32xbf16>
    %44 = vector.shape_cast %43 : vector<5x5x16x32xbf16> to vector<400x32xbf16>
    %45 = vector.extract_strided_slice %38 {offsets = [1, 0, 0, 0], sizes = [5, 5, 16, 32], strides = [1, 1, 1, 1]} : vector<7x7x16x32xbf16> to vector<5x5x16x32xbf16>
    %46 = vector.shape_cast %45 : vector<5x5x16x32xbf16> to vector<400x32xbf16>
    %47 = vector.extract_strided_slice %38 {offsets = [1, 1, 0, 0], sizes = [5, 5, 16, 32], strides = [1, 1, 1, 1]} : vector<7x7x16x32xbf16> to vector<5x5x16x32xbf16>
    %48 = vector.shape_cast %47 : vector<5x5x16x32xbf16> to vector<400x32xbf16>
    %49 = vector.extract_strided_slice %38 {offsets = [1, 2, 0, 0], sizes = [5, 5, 16, 32], strides = [1, 1, 1, 1]} : vector<7x7x16x32xbf16> to vector<5x5x16x32xbf16>
    %50 = vector.shape_cast %49 : vector<5x5x16x32xbf16> to vector<400x32xbf16>
    %51 = vector.extract_strided_slice %38 {offsets = [2, 0, 0, 0], sizes = [5, 5, 16, 32], strides = [1, 1, 1, 1]} : vector<7x7x16x32xbf16> to vector<5x5x16x32xbf16>
    %52 = vector.shape_cast %51 : vector<5x5x16x32xbf16> to vector<400x32xbf16>
    %53 = vector.extract_strided_slice %38 {offsets = [2, 1, 0, 0], sizes = [5, 5, 16, 32], strides = [1, 1, 1, 1]} : vector<7x7x16x32xbf16> to vector<5x5x16x32xbf16>
    %54 = vector.shape_cast %53 : vector<5x5x16x32xbf16> to vector<400x32xbf16>
    %55 = vector.extract_strided_slice %38 {offsets = [2, 2, 0, 0], sizes = [5, 5, 16, 32], strides = [1, 1, 1, 1]} : vector<7x7x16x32xbf16> to vector<5x5x16x32xbf16>
    %56 = vector.shape_cast %55 : vector<5x5x16x32xbf16> to vector<400x32xbf16>
    %57 = tpu.concatenate %40, %42, %44, %46, %48, %50, %52, %54, %56 in 1 : vector<400x32xbf16>, vector<400x32xbf16>, vector<400x32xbf16>, vector<400x32xbf16>, vector<400x32xbf16>, vector<400x32xbf16>, vector<400x32xbf16>, vector<400x32xbf16>, vector<400x32xbf16> -> vector<400x288xbf16>
    %c0_13 = arith.constant 0 : index
    %c0_14 = arith.constant 0 : index
    %58 = vector.load %arg6[%c0_13, %c0_14] : memref<288x64xbf16, #tpu.memory_space<vmem>>, vector<288x64xbf16>
    %cst_15 = arith.constant dense<0.000000e+00> : vector<400x64xf32>
    %59 = tpu.matmul %57, %58, %cst_15 {dimension_numbers = #tpu.dot_dimension_numbers<[1], [0], [0], [1], [0, 0, 1, 1], [], []>} : vector<400x288xbf16>, vector<288x64xbf16>, vector<400x64xf32> -> vector<400x64xf32>
    %c0_16 = arith.constant 0 : index
    %c0_17 = arith.constant 0 : index
    %60 = vector.load %arg7[%c0_16, %c0_17] : memref<1x64xf32, #tpu.memory_space<vmem>>, vector<1x64xf32>
    %61 = vector.broadcast %60 : vector<1x64xf32> to vector<400x64xf32>
    %62 = arith.addf %59, %61 : vector<400x64xf32>
    %cst_18 = arith.constant 0.000000e+00 : f32
    %63 = vector.broadcast %cst_18 : f32 to vector<400x64xf32>
    %64 = arith.maximumf %62, %63 : vector<400x64xf32>
    %65 = arith.truncf %64 : vector<400x64xf32> to vector<400x64xbf16>
    %66 = vector.shape_cast %65 : vector<400x64xbf16> to vector<5x5x16x64xbf16>
    %67 = vector.extract_strided_slice %66 {offsets = [0, 0, 0, 0], sizes = [3, 3, 16, 64], strides = [1, 1, 1, 1]} : vector<5x5x16x64xbf16> to vector<3x3x16x64xbf16>
    %68 = vector.shape_cast %67 : vector<3x3x16x64xbf16> to vector<144x64xbf16>
    %69 = vector.extract_strided_slice %66 {offsets = [0, 1, 0, 0], sizes = [3, 3, 16, 64], strides = [1, 1, 1, 1]} : vector<5x5x16x64xbf16> to vector<3x3x16x64xbf16>
    %70 = vector.shape_cast %69 : vector<3x3x16x64xbf16> to vector<144x64xbf16>
    %71 = vector.extract_strided_slice %66 {offsets = [0, 2, 0, 0], sizes = [3, 3, 16, 64], strides = [1, 1, 1, 1]} : vector<5x5x16x64xbf16> to vector<3x3x16x64xbf16>
    %72 = vector.shape_cast %71 : vector<3x3x16x64xbf16> to vector<144x64xbf16>
    %73 = vector.extract_strided_slice %66 {offsets = [1, 0, 0, 0], sizes = [3, 3, 16, 64], strides = [1, 1, 1, 1]} : vector<5x5x16x64xbf16> to vector<3x3x16x64xbf16>
    %74 = vector.shape_cast %73 : vector<3x3x16x64xbf16> to vector<144x64xbf16>
    %75 = vector.extract_strided_slice %66 {offsets = [1, 1, 0, 0], sizes = [3, 3, 16, 64], strides = [1, 1, 1, 1]} : vector<5x5x16x64xbf16> to vector<3x3x16x64xbf16>
    %76 = vector.shape_cast %75 : vector<3x3x16x64xbf16> to vector<144x64xbf16>
    %77 = vector.extract_strided_slice %66 {offsets = [1, 2, 0, 0], sizes = [3, 3, 16, 64], strides = [1, 1, 1, 1]} : vector<5x5x16x64xbf16> to vector<3x3x16x64xbf16>
    %78 = vector.shape_cast %77 : vector<3x3x16x64xbf16> to vector<144x64xbf16>
    %79 = vector.extract_strided_slice %66 {offsets = [2, 0, 0, 0], sizes = [3, 3, 16, 64], strides = [1, 1, 1, 1]} : vector<5x5x16x64xbf16> to vector<3x3x16x64xbf16>
    %80 = vector.shape_cast %79 : vector<3x3x16x64xbf16> to vector<144x64xbf16>
    %81 = vector.extract_strided_slice %66 {offsets = [2, 1, 0, 0], sizes = [3, 3, 16, 64], strides = [1, 1, 1, 1]} : vector<5x5x16x64xbf16> to vector<3x3x16x64xbf16>
    %82 = vector.shape_cast %81 : vector<3x3x16x64xbf16> to vector<144x64xbf16>
    %83 = vector.extract_strided_slice %66 {offsets = [2, 2, 0, 0], sizes = [3, 3, 16, 64], strides = [1, 1, 1, 1]} : vector<5x5x16x64xbf16> to vector<3x3x16x64xbf16>
    %84 = vector.shape_cast %83 : vector<3x3x16x64xbf16> to vector<144x64xbf16>
    %85 = tpu.concatenate %68, %70, %72, %74, %76, %78, %80, %82, %84 in 1 : vector<144x64xbf16>, vector<144x64xbf16>, vector<144x64xbf16>, vector<144x64xbf16>, vector<144x64xbf16>, vector<144x64xbf16>, vector<144x64xbf16>, vector<144x64xbf16>, vector<144x64xbf16> -> vector<144x576xbf16>
    %c0_19 = arith.constant 0 : index
    %c0_20 = arith.constant 0 : index
    %86 = vector.load %arg8[%c0_19, %c0_20] : memref<576x32xbf16, #tpu.memory_space<vmem>>, vector<576x32xbf16>
    %cst_21 = arith.constant dense<0.000000e+00> : vector<144x32xf32>
    %87 = tpu.matmul %85, %86, %cst_21 {dimension_numbers = #tpu.dot_dimension_numbers<[1], [0], [0], [1], [0, 0, 1, 1], [], []>} : vector<144x576xbf16>, vector<576x32xbf16>, vector<144x32xf32> -> vector<144x32xf32>
    %c0_22 = arith.constant 0 : index
    %c0_23 = arith.constant 0 : index
    %88 = vector.load %arg9[%c0_22, %c0_23] : memref<1x32xf32, #tpu.memory_space<vmem>>, vector<1x32xf32>
    %89 = vector.broadcast %88 : vector<1x32xf32> to vector<144x32xf32>
    %90 = arith.addf %87, %89 : vector<144x32xf32>
    %cst_24 = arith.constant 0.000000e+00 : f32
    %91 = vector.broadcast %cst_24 : f32 to vector<144x32xf32>
    %92 = arith.maximumf %90, %91 : vector<144x32xf32>
    %93 = arith.truncf %92 : vector<144x32xf32> to vector<144x32xbf16>
    %94 = vector.shape_cast %93 : vector<144x32xbf16> to vector<3x3x16x32xbf16>
    %95 = vector.extract_strided_slice %94 {offsets = [0, 0, 0, 0], sizes = [1, 1, 16, 32], strides = [1, 1, 1, 1]} : vector<3x3x16x32xbf16> to vector<1x1x16x32xbf16>
    %96 = vector.shape_cast %95 : vector<1x1x16x32xbf16> to vector<16x32xbf16>
    %97 = vector.extract_strided_slice %94 {offsets = [0, 1, 0, 0], sizes = [1, 1, 16, 32], strides = [1, 1, 1, 1]} : vector<3x3x16x32xbf16> to vector<1x1x16x32xbf16>
    %98 = vector.shape_cast %97 : vector<1x1x16x32xbf16> to vector<16x32xbf16>
    %99 = vector.extract_strided_slice %94 {offsets = [0, 2, 0, 0], sizes = [1, 1, 16, 32], strides = [1, 1, 1, 1]} : vector<3x3x16x32xbf16> to vector<1x1x16x32xbf16>
    %100 = vector.shape_cast %99 : vector<1x1x16x32xbf16> to vector<16x32xbf16>
    %101 = vector.extract_strided_slice %94 {offsets = [1, 0, 0, 0], sizes = [1, 1, 16, 32], strides = [1, 1, 1, 1]} : vector<3x3x16x32xbf16> to vector<1x1x16x32xbf16>
    %102 = vector.shape_cast %101 : vector<1x1x16x32xbf16> to vector<16x32xbf16>
    %103 = vector.extract_strided_slice %94 {offsets = [1, 1, 0, 0], sizes = [1, 1, 16, 32], strides = [1, 1, 1, 1]} : vector<3x3x16x32xbf16> to vector<1x1x16x32xbf16>
    %104 = vector.shape_cast %103 : vector<1x1x16x32xbf16> to vector<16x32xbf16>
    %105 = vector.extract_strided_slice %94 {offsets = [1, 2, 0, 0], sizes = [1, 1, 16, 32], strides = [1, 1, 1, 1]} : vector<3x3x16x32xbf16> to vector<1x1x16x32xbf16>
    %106 = vector.shape_cast %105 : vector<1x1x16x32xbf16> to vector<16x32xbf16>
    %107 = vector.extract_strided_slice %94 {offsets = [2, 0, 0, 0], sizes = [1, 1, 16, 32], strides = [1, 1, 1, 1]} : vector<3x3x16x32xbf16> to vector<1x1x16x32xbf16>
    %108 = vector.shape_cast %107 : vector<1x1x16x32xbf16> to vector<16x32xbf16>
    %109 = vector.extract_strided_slice %94 {offsets = [2, 1, 0, 0], sizes = [1, 1, 16, 32], strides = [1, 1, 1, 1]} : vector<3x3x16x32xbf16> to vector<1x1x16x32xbf16>
    %110 = vector.shape_cast %109 : vector<1x1x16x32xbf16> to vector<16x32xbf16>
    %111 = vector.extract_strided_slice %94 {offsets = [2, 2, 0, 0], sizes = [1, 1, 16, 32], strides = [1, 1, 1, 1]} : vector<3x3x16x32xbf16> to vector<1x1x16x32xbf16>
    %112 = vector.shape_cast %111 : vector<1x1x16x32xbf16> to vector<16x32xbf16>
    %113 = tpu.concatenate %96, %98, %100, %102, %104, %106, %108, %110, %112 in 1 : vector<16x32xbf16>, vector<16x32xbf16>, vector<16x32xbf16>, vector<16x32xbf16>, vector<16x32xbf16>, vector<16x32xbf16>, vector<16x32xbf16>, vector<16x32xbf16>, vector<16x32xbf16> -> vector<16x288xbf16>
    %c0_25 = arith.constant 0 : index
    %c0_26 = arith.constant 0 : index
    %114 = vector.load %arg10[%c0_25, %c0_26] : memref<288x16xbf16, #tpu.memory_space<vmem>>, vector<288x16xbf16>
    %cst_27 = arith.constant dense<0.000000e+00> : vector<16x16xf32>
    %115 = tpu.matmul %113, %114, %cst_27 {dimension_numbers = #tpu.dot_dimension_numbers<[1], [0], [0], [1], [0, 0, 1, 1], [], []>} : vector<16x288xbf16>, vector<288x16xbf16>, vector<16x16xf32> -> vector<16x16xf32>
    %c0_28 = arith.constant 0 : index
    %c0_29 = arith.constant 0 : index
    %116 = vector.load %arg11[%c0_28, %c0_29] : memref<1x16xf32, #tpu.memory_space<vmem>>, vector<1x16xf32>
    %117 = vector.broadcast %116 : vector<1x16xf32> to vector<16x16xf32>
    %118 = arith.addf %115, %117 : vector<16x16xf32>
    %cst_30 = arith.constant 0.000000e+00 : f32
    %119 = vector.broadcast %cst_30 : f32 to vector<16x16xf32>
    %120 = arith.maximumf %118, %119 : vector<16x16xf32>
    %c0_31 = arith.constant 0 : index
    %c0_32 = arith.constant 0 : index
    %121 = vector.load %arg12[%c0_31, %c0_32] : memref<1x16xf32, #tpu.memory_space<vmem>>, vector<1x16xf32>
    %122 = vector.broadcast %121 : vector<1x16xf32> to vector<16x16xf32>
    %123 = arith.mulf %120, %122 : vector<16x16xf32>
    %cst_33 = arith.constant dense<0.000000e+00> : vector<16xf32>
    %124 = vector.multi_reduction <add>, %123, %cst_33 [1] : vector<16x16xf32> to vector<16xf32>
    %125 = vector.shape_cast %124 : vector<16xf32> to vector<16x1xf32>
    %c0_34 = arith.constant 0 : index
    %c0_35 = arith.constant 0 : index
    %126 = vector.load %arg13[%c0_34, %c0_35] : memref<1x1xf32, #tpu.memory_space<vmem>>, vector<1x1xf32>
    %127 = vector.broadcast %126 : vector<1x1xf32> to vector<16x1xf32>
    %128 = arith.addf %125, %127 : vector<16x1xf32>
    %129 = arith.negf %128 : vector<16x1xf32>
    %130 = math.exp %129 : vector<16x1xf32>
    %cst_36 = arith.constant 1.000000e+00 : f32
    %131 = vector.broadcast %cst_36 : f32 to vector<16x1xf32>
    %132 = arith.addf %131, %130 : vector<16x1xf32>
    %133 = arith.divf %131, %132 : vector<16x1xf32>
    %c0_37 = arith.constant 0 : index
    %c0_38 = arith.constant 0 : index
    %134 = vector.load %arg14[%c0_37, %c0_38] : memref<16x1xf32, #tpu.memory_space<vmem>>, vector<16x1xf32>
    tpu.vector_store %arg14[%c0_37, %c0_38], %133 {strides = array<i32>} : memref<16x1xf32, #tpu.memory_space<vmem>>, vector<16x1xf32>,
    return
  }
  func.func @transform_0(%arg0: i32) -> (i32, i32, i32) {
    %c0_i32 = arith.constant 0 : i32
    %c0_i32_0 = arith.constant 0 : i32
    %c0_i32_1 = arith.constant 0 : i32
    return %c0_i32, %arg0, %c0_i32_0 : i32, i32, i32
  }
  func.func @transform_1(%arg0: i32) -> (i32, i32) {
    %c0_i32 = arith.constant 0 : i32
    %c0_i32_0 = arith.constant 0 : i32
    %c0_i32_1 = arith.constant 0 : i32
    return %c0_i32, %c0_i32_0 : i32, i32
  }
  func.func @transform_2(%arg0: i32) -> (i32, i32) {
    %c0_i32 = arith.constant 0 : i32
    %c0_i32_0 = arith.constant 0 : i32
    %c0_i32_1 = arith.constant 0 : i32
    return %c0_i32, %c0_i32_0 : i32, i32
  }
  func.func @transform_3(%arg0: i32) -> (i32, i32) {
    %c0_i32 = arith.constant 0 : i32
    %c0_i32_0 = arith.constant 0 : i32
    %c0_i32_1 = arith.constant 0 : i32
    return %c0_i32, %c0_i32_0 : i32, i32
  }
  func.func @transform_4(%arg0: i32) -> (i32, i32) {
    %c0_i32 = arith.constant 0 : i32
    %c0_i32_0 = arith.constant 0 : i32
    %c0_i32_1 = arith.constant 0 : i32
    return %c0_i32, %c0_i32_0 : i32, i32
  }
  func.func @transform_5(%arg0: i32) -> (i32, i32) {
    %c0_i32 = arith.constant 0 : i32
    %c0_i32_0 = arith.constant 0 : i32
    %c0_i32_1 = arith.constant 0 : i32
    return %c0_i32, %c0_i32_0 : i32, i32
  }
  func.func @transform_6(%arg0: i32) -> (i32, i32) {
    %c0_i32 = arith.constant 0 : i32
    %c0_i32_0 = arith.constant 0 : i32
    %c0_i32_1 = arith.constant 0 : i32
    return %c0_i32, %c0_i32_0 : i32, i32
  }
  func.func @transform_7(%arg0: i32) -> (i32, i32) {
    %c0_i32 = arith.constant 0 : i32
    %c0_i32_0 = arith.constant 0 : i32
    %c0_i32_1 = arith.constant 0 : i32
    return %c0_i32, %c0_i32_0 : i32, i32
  }
  func.func @transform_8(%arg0: i32) -> (i32, i32) {
    %c0_i32 = arith.constant 0 : i32
    %c0_i32_0 = arith.constant 0 : i32
    %c0_i32_1 = arith.constant 0 : i32
    return %c0_i32, %c0_i32_0 : i32, i32
  }
  func.func @transform_9(%arg0: i32) -> (i32, i32) {
    %c0_i32 = arith.constant 0 : i32
    %c0_i32_0 = arith.constant 0 : i32
    %c0_i32_1 = arith.constant 0 : i32
    return %c0_i32, %c0_i32_0 : i32, i32
  }
  func.func @transform_10(%arg0: i32) -> (i32, i32) {
    %c0_i32 = arith.constant 0 : i32
    %c0_i32_0 = arith.constant 0 : i32
    %c0_i32_1 = arith.constant 0 : i32
    return %c0_i32, %c0_i32_0 : i32, i32
  }
  func.func @transform_11(%arg0: i32) -> (i32, i32) {
    %c0_i32 = arith.constant 0 : i32
    %c0_i32_0 = arith.constant 0 : i32
    %c0_i32_1 = arith.constant 0 : i32
    return %c0_i32, %c0_i32_0 : i32, i32
  }
  func.func @transform_12(%arg0: i32) -> (i32, i32) {
    %c0_i32 = arith.constant 0 : i32
    %c0_i32_0 = arith.constant 0 : i32
    %c0_i32_1 = arith.constant 0 : i32
    return %c0_i32, %c0_i32_0 : i32, i32
  }
  func.func @transform_13(%arg0: i32) -> (i32, i32) {
    %c0_i32 = arith.constant 0 : i32
    %c0_i32_0 = arith.constant 0 : i32
    return %arg0, %c0_i32 : i32, i32
  }
}

</mosaic_0001>

<bundles_post_ra>
// kernel: family_target_forward.1
= control target key start
LH: loop header
LB: loop body
LE: loop exit
PB: predicated region body
PF: predicated region fallthrough
CT: control target
= control target key end

     0   :  { %vm872_vm0 = vcmask 1043456   ;;  %vm873_vm1 = vcmask 1044480   ;;  %v12363_v0 = vmov 0.0   ;;  %v8054_v2 = vmov 65535   ;;  %s8056_s15 = smov 16   ;;  %s8057_s18 = smov 32   ;;  %s12347_s1 = inlined_call_operand.vmem [shape: bf16[9,16], index: 1, kind: input, shape index: {}]   ;;  %s12348_s0 = inlined_call_operand.vmem [shape: bf16[81,16,9], index: 0, kind: input, shape index: {}]   ;;  %s12349_s2 = inlined_call_operand.vmem [shape: f32[1,16], index: 2, kind: input, shape index: {}]   ;;  %s12350_s3 = inlined_call_operand.vmem [shape: bf16[144,32], index: 3, kind: input, shape index: {}]   ;;  %s12351_s5 = inlined_call_operand.vmem [shape: bf16[288,64], index: 5, kind: input, shape index: {}]   ;;  %s12352_s4 = inlined_call_operand.vmem [shape: f32[1,32], index: 4, kind: input, shape index: {}]   ;;  %s12353_s7 = inlined_call_operand.vmem [shape: bf16[576,32], index: 7, kind: input, shape index: {}]   ;;  %s12354_s6 = inlined_call_operand.vmem [shape: f32[1,64], index: 6, kind: input, shape index: {}]   ;;  %s12355_s9 = inlined_call_operand.vmem [shape: bf16[288,16], index: 9, kind: input, shape index: {}]   ;;  %s12356_s8 = inlined_call_operand.vmem [shape: f32[1,32], index: 8, kind: input, shape index: {}]   ;;  %s12357_s12 = inlined_call_operand.<no memory space> [shape: f32[1,1], index: 12, kind: input, shape index: {}]   ;;  %s12358_s10 = inlined_call_operand.vmem [shape: f32[1,16], index: 10, kind: input, shape index: {}]   ;;  %s12359_s11 = inlined_call_operand.vmem [shape: f32[1,16], index: 11, kind: input, shape index: {}]   ;;  %s12360_s13 = inlined_call_operand.vmem [shape: f32[16,1], index: 13, kind: output, shape index: {}]  }
   0x1   :  { %7232 = vmatprep.subr.bf16.mxu0 %v12363_v0  ;;  %v7875_v1 = vld [vmem:[%s12347_s1] sm:$0x1f]   ;;  %v874_v3 = vsel %vm872_vm0, 4294967295, %v8054_v2  ;;  %vm8055_vm2 = vmmov 0   ;;  %vm628_vm3 = vcmask 72704   ;;  %v7877_v7 = vld [vmem:[%s12348_s0 + $0x8] sm:$0xff]  }
   0x2   :  { %v875_v4 = vsel %vm873_vm1, %v874_v3, 0  ;;  %7234 = vmatprep.mubr.msk.bf16.mxu0 %vm8055_vm2, %v12363_v0  ;;  %v7876_v6 = vld [vmem:[%s12348_s0] sm:$0xff]   ;;  %v7878_v8 = vld [vmem:[%s12348_s0 + $0x10] sm:$0xff]   ;;  %v7879_v9 = vld [vmem:[%s12348_s0 + $0x18] sm:$0xff]   ;;  %s8058_s16 = smov 48   ;;  %s8059_s20 = smov 64  }
   0x3   :  { %v877_v5 = vand.u32 %v7875_v1, %v875_v4  ;;  %v7880_v10 = vld [vmem:[%s12348_s0 + $0x20] sm:$0xff]   ;;  %v7881_v11 = vld [vmem:[%s12348_s0 + $0x28] sm:$0xff]   ;;  %v7882_v12 = vld [vmem:[%s12348_s0 + $0x30] sm:$0xff]   ;;  %s8060_s23 = smov 80   ;;  %s8062_s30 = smov 96   ;;  %vm2568_vm4 = vcmask 130048  }
   0x4   :  { %v7883_v13 = vld [vmem:[%s12348_s0 + $0x38] sm:$0xff]   ;;  %v7884_v14 = vld [vmem:[%s12348_s0 + $0x40] sm:$0xff]   ;;  %v7885_v15 = vld [vmem:[%s12348_s0 + $0x48] sm:$0xff]   ;;  %s8063_s19 = smov 112   ;;  %vm2716_vm5 = vcmask 261120   ;;  %vm2815_vm6 = vcmask 392192  }
   0x5   :  { %7233 = vmatpush3.bf16.msra.mxu0 %v877_v5  ;;  %v7886_v16 = vld [vmem:[%s12348_s0 + $0x50] sm:$0xff]   ;;  %v7887_v17 = vld [vmem:[%s12348_s0 + $0x58] sm:$0xff]   ;;  %v7888_v18 = vld [vmem:[%s12348_s0 + $0x60] sm:$0xff]   ;;  %vm2914_vm7 = vcmask 523264   ;;  %vm3013_vm8 = vcmask 654336   ;;  %vm3112_vm9 = vcmask 785408  }
   0x6   :  { %v7889_v19 = vld [vmem:[%s12348_s0 + $0x68] sm:$0xff]   ;;  %v7890_v20 = vld [vmem:[%s12348_s0 + $0x70] sm:$0xff]   ;;  %v7891_v21 = vld [vmem:[%s12348_s0 + $0x78] sm:$0xff]   ;;  %vm3211_vm10 = vcmask 916480   ;;  %vm6601_vm11 = vcmask 7168  }
   0x7   :  { %v7892_v22 = vld [vmem:[%s12348_s0 + $0x80] sm:$0xff]   ;;  %v7893_v23 = vld [vmem:[%s12348_s0 + $0x88] sm:$0xff]   ;;  %v7894_v24 = vld [vmem:[%s12348_s0 + $0x90] sm:$0xff]  }
   0x8   :  { %7235 = vmatmul.mubr.msk.bf16.vlgmr.msra.gmra.mrb[0].mxu0 %vm628_vm3, %v7876_v6  ;;  %v7895_v25 = vld [vmem:[%s12348_s0 + $0x98] sm:$0xff]   ;;  %v7896_v26 = vld [vmem:[%s12348_s0 + $0xa0] sm:$0xff]   ;;  %v7897_v27 = vld [vmem:[%s12348_s0 + $0xa8] sm:$0xff]  }
   0x9   :  { %7238 = vmatprep.mubr.msk.bf16.mxu0 %vm8055_vm2, %v12363_v0  ;;  %v7898_v28 = vld [vmem:[%s12348_s0 + $0xb0] sm:$0xff]   ;;  %v7899_v29 = vld [vmem:[%s12348_s0 + $0xb8] sm:$0xff]   ;;  %v7900_v30 = vld [vmem:[%s12348_s0 + $0xc0] sm:$0xff]  }
   0xa   :  { %v7901_v31 = vld [vmem:[%s12348_s0 + $0xc8] sm:$0xff]   ;;  %v7902_v32 = vld [vmem:[%s12348_s0 + $0xd0] sm:$0xff]   ;;  %v8303_v33 = vld [vmem:[%s12349_s2] ss:$0 sm:$0xff] }
   0xb   :  { %v7903_v37 = vld [vmem:[%s12348_s0 + $0xd8] sm:$0xff]   ;;  %v7904_v47 = vld [vmem:[%s12348_s0 + $0xe0] sm:$0xff]   ;;  %v7905_v57 = vld [vmem:[%s12348_s0 + $0xe8] sm:$0xff]  }
   0xc   :  { %v7906_v4 = vld [vmem:[%s12348_s0 + $0xf0] sm:$0xff]  }
  0x10   :  { %7239 = vmatmul.mubr.msk.bf16.gmra.mrb[4].mxu0 %vm628_vm3, %v7877_v7 }
  0x11   :  { %7242 = vmatprep.mubr.msk.bf16.mxu0 %vm8055_vm2, %v12363_v0 }
  0x18   :  { %7243 = vmatmul.mubr.msk.bf16.gmra.mrb[8].mxu0 %vm628_vm3, %v7878_v8 }
  0x19   :  { %7246 = vmatprep.mubr.msk.bf16.mxu0 %vm8055_vm2, %v12363_v0 }
  0x20   :  { %7247 = vmatmul.mubr.msk.bf16.gmra.mrb[12].mxu0 %vm628_vm3, %v7879_v9 }
  0x21   :  { %7250 = vmatprep.mubr.msk.bf16.mxu0 %vm8055_vm2, %v12363_v0 }
  0x28   :  { %7251 = vmatmul.mubr.msk.bf16.gmra.mrb[16].mxu0 %vm628_vm3, %v7880_v10 }
  0x29   :  { %7254 = vmatprep.mubr.msk.bf16.mxu0 %vm8055_vm2, %v12363_v0 }
  0x30   :  { %7255 = vmatmul.mubr.msk.bf16.gmra.mrb[20].mxu0 %vm628_vm3, %v7881_v11 }
  0x31   :  { %7258 = vmatprep.mubr.msk.bf16.mxu0 %vm8055_vm2, %v12363_v0 }
  0x38   :  { %7259 = vmatmul.mubr.msk.bf16.gmra.mrb[24].mxu0 %vm628_vm3, %v7882_v12 }
  0x39   :  { %7262 = vmatprep.mubr.msk.bf16.mxu0 %vm8055_vm2, %v12363_v0 }
  0x40   :  { %7263 = vmatmul.mubr.msk.bf16.gmra.mrb[28].mxu0 %vm628_vm3, %v7883_v13 }
  0x41   :  { %7266 = vmatprep.mubr.msk.bf16.mxu0 %vm8055_vm2, %v12363_v0 }
  0x48   :  { %7267 = vmatmul.mubr.msk.bf16.gmra.mrb[32].mxu0 %vm628_vm3, %v7884_v14  ;;  %v7907_v14 = vld [vmem:[%s12348_s0 + $0xf8] sm:$0xff]  }
  0x49   :  { %7270 = vmatprep.mubr.msk.bf16.mxu0 %vm8055_vm2, %v12363_v0 }
  0x50   :  { %7271 = vmatmul.mubr.msk.bf16.gmra.mrb[36].mxu0 %vm628_vm3, %v7885_v15 }
  0x51   :  { %7274 = vmatprep.mubr.msk.bf16.mxu0 %vm8055_vm2, %v12363_v0 }
  0x58   :  { %7275 = vmatmul.mubr.msk.bf16.gmra.mrb[40].mxu0 %vm628_vm3, %v7886_v16 }
  0x59   :  { %7278 = vmatprep.mubr.msk.bf16.mxu0 %vm8055_vm2, %v12363_v0 }
  0x60   :  { %7279 = vmatmul.mubr.msk.bf16.gmra.mrb[44].mxu0 %vm628_vm3, %v7887_v17 }
  0x61   :  { %7282 = vmatprep.mubr.msk.bf16.mxu0 %vm8055_vm2, %v12363_v0 }
  0x68   :  { %7283 = vmatmul.mubr.msk.bf16.gmra.mrb[48].mxu0 %vm628_vm3, %v7888_v18 }
  0x69   :  { %7286 = vmatprep.mubr.msk.bf16.mxu0 %vm8055_vm2, %v12363_v0 }
  0x70   :  { %7287 = vmatmul.mubr.msk.bf16.gmra.mrb[52].mxu0 %vm628_vm3, %v7889_v19 }
  0x71   :  { %7290 = vmatprep.mubr.msk.bf16.mxu0 %vm8055_vm2, %v12363_v0 }
  0x78   :  { %7291 = vmatmul.mubr.msk.bf16.gmra.mrb[56].mxu0 %vm628_vm3, %v7890_v20 }
  0x79   :  { %7294 = vmatprep.mubr.msk.bf16.mxu0 %vm8055_vm2, %v12363_v0 }
  0x80   :  { %7295 = vmatmul.mubr.msk.bf16.gmra.mrb[60].mxu0 %vm628_vm3, %v7891_v21 }
  0x81   :  { %7298 = vmatprep.mubr.msk.bf16.mxu0 %vm8055_vm2, %v12363_v0 }
  0x88   :  { %7299 = vmatmul.mubr.msk.bf16.gmra.mrb[64].mxu0 %vm628_vm3, %v7892_v22 }
  0x89   :  { %7302 = vmatprep.mubr.msk.bf16.mxu0 %vm8055_vm2, %v12363_v0 }
  0x90   :  { %7303 = vmatmul.mubr.msk.bf16.gmra.mrb[68].mxu0 %vm628_vm3, %v7893_v23 }
  0x91   :  { %7306 = vmatprep.mubr.msk.bf16.mxu0 %vm8055_vm2, %v12363_v0 }
  0x98   :  { %7307 = vmatmul.mubr.msk.bf16.gmra.mrb[72].mxu0 %vm628_vm3, %v7894_v24  ;;  %v7908_v24 = vld [vmem:[%s12348_s0 + $0x100] sm:$0xff]  }
  0x99   :  { %7310 = vmatprep.mubr.msk.bf16.mxu0 %vm8055_vm2, %v12363_v0 }
  0xa0   :  { %7311 = vmatmul.mubr.msk.bf16.gmra.mrb[76].mxu0 %vm628_vm3, %v7895_v25 }
  0xa1   :  { %7314 = vmatprep.mubr.msk.bf16.mxu0 %vm8055_vm2, %v12363_v0 }
  0xa8   :  { %7315 = vmatmul.mubr.msk.bf16.gmra.mrb[80].mxu0 %vm628_vm3, %v7896_v26 }
  0xa9   :  { %7318 = vmatprep.mubr.msk.bf16.mxu0 %vm8055_vm2, %v12363_v0 }
  0xb0   :  { %7319 = vmatmul.mubr.msk.bf16.gmra.mrb[84].mxu0 %vm628_vm3, %v7897_v27 }
  0xb1   :  { %7322 = vmatprep.mubr.msk.bf16.mxu0 %vm8055_vm2, %v12363_v0 }
  0xb8   :  { %7323 = vmatmul.mubr.msk.bf16.gmra.mrb[88].mxu0 %vm628_vm3, %v7898_v28 }
  0xb9   :  { %7326 = vmatprep.mubr.msk.bf16.mxu0 %vm8055_vm2, %v12363_v0 }
  0xc0   :  { %7327 = vmatmul.mubr.msk.bf16.gmra.mrb[92].mxu0 %vm628_vm3, %v7899_v29 }
  0xc1   :  { %7330 = vmatprep.mubr.msk.bf16.mxu0 %vm8055_vm2, %v12363_v0 }
  0xc8   :  { %7331 = vmatmul.mubr.msk.bf16.gmra.mrb[96].mxu0 %vm628_vm3, %v7900_v30 }
  0xc9   :  { %7334 = vmatprep.mubr.msk.bf16.mxu0 %vm8055_vm2, %v12363_v0 }
  0xd0   :  { %7335 = vmatmul.mubr.msk.bf16.gmra.mrb[100].mxu0 %vm628_vm3, %v7901_v31 }
  0xd1   :  { %7338 = vmatprep.mubr.msk.bf16.mxu0 %vm8055_vm2, %v12363_v0 }
  0xd8   :  { %7339 = vmatmul.mubr.msk.bf16.gmra.mrb[104].mxu0 %vm628_vm3, %v7902_v32 }
  0xd9   :  { %7342 = vmatprep.mubr.msk.bf16.mxu0 %vm8055_vm2, %v12363_v0 }
  0xdb   :  { %v913_v34 = vpop.f32.mrb[0].mxu0 }
  0xdc   :  { %v914_v35 = vadd.f32 %v8303_v33, %v913_v34  ;;  %v7236_v36 = vpop.f32.mrb[1].mxu0 }
  0xdd   :  { %v916_v38 = vpop.f32.mrb[2].mxu0 }
  0xde   :  { %v917_v39 = vadd.f32 %v8303_v33, %v916_v38  ;;  %v7237_v40 = vpop.f32.mrb[3].mxu0  ;;  %v1560_v41 = vmax.f32 %v914_v35, 0.0  ;;  %v7909_v35 = vld [vmem:[%s12348_s0 + $0x108] sm:$0xff]  }
  0xe0   :  { %v1561_v42 = vmax.f32 %v917_v39, 0.0  ;;  %7343 = vmatmul.mubr.msk.bf16.gmra.mrb[108].mxu0 %vm628_vm3, %v7903_v37 }
  0xe1   :  { %7346 = vmatprep.mubr.msk.bf16.mxu0 %vm8055_vm2, %v12363_v0 }
  0xe2   :  { %v8315_v43 = vpack.c.bf16 %v1561_v42, %v1560_v41 }
  0xe3   :  { %v921_v44 = vpop.f32.mrb[4].mxu0 }
  0xe4   :  { %v922_v45 = vadd.f32 %v8303_v33, %v921_v44  ;;  %v7240_v46 = vpop.f32.mrb[5].mxu0 }
  0xe5   :  { %v924_v48 = vpop.f32.mrb[6].mxu0  ;;  %v7910_v46 = vld [vmem:[%s12348_s0 + $0x110] sm:$0xff]  }
  0xe6   :  { %v925_v49 = vadd.f32 %v8303_v33, %v924_v48  ;;  %v7241_v50 = vpop.f32.mrb[7].mxu0  ;;  %v1562_v51 = vmax.f32 %v922_v45, 0.0 }
  0xe8   :  { %v1563_v52 = vmax.f32 %v925_v49, 0.0  ;;  %7347 = vmatmul.mubr.msk.bf16.gmra.mrb[112].mxu0 %vm628_vm3, %v7904_v47 }
  0xe9   :  { %7350 = vmatprep.mubr.msk.bf16.mxu0 %vm8055_vm2, %v12363_v0 }
  0xea   :  { %v8325_v53 = vpack.c.bf16 %v1563_v52, %v1562_v51 }
  0xeb   :  { %v929_v54 = vpop.f32.mrb[8].mxu0 }
  0xec   :  { %v930_v55 = vadd.f32 %v8303_v33, %v929_v54  ;;  %1852 = vrot.lane.b32.xlu0 %v8325_v53, %s8056_s15  ;;  %v7244_v56 = vpop.f32.mrb[9].mxu0 }
  0xed   :  { %v932_v58 = vpop.f32.mrb[10].mxu0 }
  0xee   :  { %v933_v59 = vadd.f32 %v8303_v33, %v932_v58  ;;  %v7245_v60 = vpop.f32.mrb[11].mxu0  ;;  %v1564_v61 = vmax.f32 %v930_v55, 0.0 }
  0xf0   :  { %v1565_v62 = vmax.f32 %v933_v59, 0.0  ;;  %7351 = vmatmul.mubr.msk.bf16.gmra.mrb[116].mxu0 %vm628_vm3, %v7905_v57  ;;  %v7911_v57 = vld [vmem:[%s12348_s0 + $0x118] sm:$0xff]  }
  0xf1   :  { %7354 = vmatprep.mubr.msk.bf16.mxu0 %vm8055_vm2, %v12363_v0 }
  0xf2   :  { %v8337_v63 = vpack.c.bf16 %v1565_v62, %v1564_v61 }
  0xf3   :  { %v937_v1 = vpop.f32.mrb[12].mxu0 }
  0xf4   :  { %v938_v2 = vadd.f32 %v8303_v33, %v937_v1  ;;  %1854 = vrot.lane.b32.xlu1 %v8337_v63, %s8056_s15  ;;  %1957 = vrot.lane.b32.xlu0 %v8337_v63, %s8057_s18  ;;  %v7248_v3 = vpop.f32.mrb[13].mxu0 }
  0xf5   :  { %v940_v5 = vpop.f32.mrb[14].mxu0 }
  0xf6   :  { %v941_v6 = vadd.f32 %v8303_v33, %v940_v5  ;;  %v7249_v7 = vpop.f32.mrb[15].mxu0  ;;  %v1566_v8 = vmax.f32 %v938_v2, 0.0  ;;  %v7912_v5 = vld [vmem:[%s12348_s0 + $0x120] sm:$0xff]  }
  0xf8   :  { %v1567_v9 = vmax.f32 %v941_v6, 0.0  ;;  %7355 = vmatmul.mubr.msk.bf16.gmra.mrb[120].mxu0 %vm628_vm3, %v7906_v4 }
  0xf9   :  { %7358 = vmatprep.mubr.msk.bf16.mxu0 %vm8055_vm2, %v12363_v0 }
  0xfa   :  { %v8351_v10 = vpack.c.bf16 %v1567_v9, %v1566_v8 }
  0xfb   :  { %v945_v11 = vpop.f32.mrb[16].mxu0 }
  0xfc   :  { %v946_v12 = vadd.f32 %v8303_v33, %v945_v11  ;;  %1959 = vrot.lane.b32.xlu0 %v8351_v10, %s8057_s18  ;;  %v7252_v13 = vpop.f32.mrb[17].mxu0 }
  0xfd   :  { %v948_v15 = vpop.f32.mrb[18].mxu0 }
  0xfe   :  { %v949_v16 = vadd.f32 %v8303_v33, %v948_v15  ;;  %v7253_v17 = vpop.f32.mrb[19].mxu0  ;;  %v1568_v18 = vmax.f32 %v946_v12, 0.0 }
 0x100   :  { %v1569_v19 = vmax.f32 %v949_v16, 0.0  ;;  %1856 = vrot.lane.b32.xlu0 %v8351_v10, %s8056_s15  ;;  %7359 = vmatmul.mubr.msk.bf16.gmra.mrb[124].mxu0 %vm628_vm3, %v7907_v14  ;;  %v7913_v16 = vld [vmem:[%s12348_s0 + $0x128] sm:$0xff]  }
 0x101   :  { %7362 = vmatprep.mubr.msk.bf16.mxu0 %vm8055_vm2, %v12363_v0 }
 0x102   :  { %v8365_v20 = vpack.c.bf16 %v1569_v19, %v1568_v18 }
 0x103   :  { %v953_v21 = vpop.f32.mrb[20].mxu0 }
 0x104   :  { %v954_v22 = vadd.f32 %v8303_v33, %v953_v21  ;;  %1961 = vrot.lane.b32.xlu1 %v8365_v20, %s8057_s18  ;;  %v7256_v23 = vpop.f32.mrb[21].mxu0 }
 0x105   :  { %v956_v25 = vpop.f32.mrb[22].mxu0 }
 0x106   :  { %v957_v26 = vadd.f32 %v8303_v33, %v956_v25  ;;  %v7257_v27 = vpop.f32.mrb[23].mxu0  ;;  %v1570_v28 = vmax.f32 %v954_v22, 0.0 }
 0x107   :  { %v7914_v27 = vld [vmem:[%s12348_s0 + $0x130] sm:$0xff]  }
 0x108   :  { %v1571_v29 = vmax.f32 %v957_v26, 0.0  ;;  %1858 = vrot.lane.b32.xlu1 %v8365_v20, %s8056_s15  ;;  %7363 = vmatmul.mubr.msk.bf16.gmra.mrb[128].mxu0 %vm628_vm3, %v7908_v24 }
 0x109   :  { %7366 = vmatprep.mubr.msk.bf16.mxu0 %vm8055_vm2, %v12363_v0 }
 0x10a   :  { %v8379_v30 = vpack.c.bf16 %v1571_v29, %v1570_v28 }
 0x10b   :  { %v961_v31 = vpop.f32.mrb[24].mxu0 }
 0x10c   :  { %v962_v32 = vadd.f32 %v8303_v33, %v961_v31  ;;  %1963 = vrot.lane.b32.xlu0 %v8379_v30, %s8057_s18  ;;  %v7260_v34 = vpop.f32.mrb[25].mxu0 }
 0x10d   :  { %v964_v36 = vpop.f32.mrb[26].mxu0 }
 0x10e   :  { %v965_v37 = vadd.f32 %v8303_v33, %v964_v36  ;;  %v7261_v38 = vpop.f32.mrb[27].mxu0  ;;  %v1572_v39 = vmax.f32 %v962_v32, 0.0 }
 0x110   :  { %v1573_v40 = vmax.f32 %v965_v37, 0.0  ;;  %1860 = vrot.lane.b32.xlu0 %v8379_v30, %s8056_s15  ;;  %7367 = vmatmul.mubr.msk.bf16.gmra.mrb[132].mxu0 %vm628_vm3, %v7909_v35 }
 0x111   :  { %7370 = vmatprep.mubr.msk.bf16.mxu0 %vm8055_vm2, %v12363_v0 }
 0x112   :  { %v8393_v41 = vpack.c.bf16 %v1573_v40, %v1572_v39  ;;  %v7915_v39 = vld [vmem:[%s12348_s0 + $0x138] sm:$0xff]  }
 0x113   :  { %v969_v42 = vpop.f32.mrb[28].mxu0 }
 0x114   :  { %v970_v44 = vadd.f32 %v8303_v33, %v969_v42  ;;  %1965 = vrot.lane.b32.xlu1 %v8393_v41, %s8057_s18  ;;  %v7264_v45 = vpop.f32.mrb[29].mxu0 }
 0x115   :  { %v972_v47 = vpop.f32.mrb[30].mxu0 }
 0x116   :  { %v973_v48 = vadd.f32 %v8303_v33, %v972_v47  ;;  %v7265_v49 = vpop.f32.mrb[31].mxu0  ;;  %v1574_v50 = vmax.f32 %v970_v44, 0.0 }
 0x118   :  { %v1575_v51 = vmax.f32 %v973_v48, 0.0  ;;  %1862 = vrot.lane.b32.xlu1 %v8393_v41, %s8056_s15  ;;  %7371 = vmatmul.mubr.msk.bf16.gmra.mrb[136].mxu0 %vm628_vm3, %v7910_v46 }
 0x119   :  { %7374 = vmatprep.mubr.msk.bf16.mxu0 %vm8055_vm2, %v12363_v0 }
 0x11a   :  { %v1729_v52 = vpack.c.bf16 %v1575_v51, %v1574_v50 }
 0x11b   :  { %v977_v54 = vpop.f32.mrb[32].mxu0 }
 0x11c   :  { %v978_v55 = vadd.f32 %v8303_v33, %v977_v54  ;;  %1967 = vrot.lane.b32.xlu0 %v1729_v52, %s8057_s18  ;;  %v7268_v56 = vpop.f32.mrb[33].mxu0 }
 0x11d   :  { %v980_v58 = vpop.f32.mrb[34].mxu0 }
 0x11e   :  { %v981_v59 = vadd.f32 %v8303_v33, %v980_v58  ;;  %v7269_v60 = vpop.f32.mrb[35].mxu0  ;;  %v1576_v61 = vmax.f32 %v978_v55, 0.0 }
 0x120   :  { %v1577_v62 = vmax.f32 %v981_v59, 0.0  ;;  %1864 = vrot.lane.b32.xlu0 %v1729_v52, %s8056_s15  ;;  %7375 = vmatmul.mubr.msk.bf16.gmra.mrb[140].mxu0 %vm628_vm3, %v7911_v57  ;;  %v7916_v52 = vld [vmem:[%s12348_s0 + $0x140] sm:$0xff]  }
 0x121   :  { %7378 = vmatprep.mubr.msk.bf16.mxu0 %vm8055_vm2, %v12363_v0 }
 0x122   :  { %v1730_v1 = vpack.c.bf16 %v1577_v62, %v1576_v61 }
 0x123   :  { %v985_v2 = vpop.f32.mrb[36].mxu0 }
 0x124   :  { %v986_v3 = vadd.f32 %v8303_v33, %v985_v2  ;;  %1969 = vrot.lane.b32.xlu1 %v1730_v1, %s8057_s18  ;;  %v7272_v4 = vpop.f32.mrb[37].mxu0  ;;  %v7917_v1 = vld [vmem:[%s12348_s0 + $0x148] sm:$0xff]  }
 0x125   :  { %v988_v6 = vpop.f32.mrb[38].mxu0 }
 0x126   :  { %v989_v7 = vadd.f32 %v8303_v33, %v988_v6  ;;  %v7273_v8 = vpop.f32.mrb[39].mxu0  ;;  %v1578_v9 = vmax.f32 %v986_v3, 0.0  ;;  %v12361_v6 = vmov 0  }
 0x127   :  { %3560 = vmatprep.subr.bf16.mxu1 %v12361_v6 }
 0x128   :  { %v1579_v11 = vmax.f32 %v989_v7, 0.0  ;;  %7379 = vmatmul.mubr.msk.bf16.gmra.mrb[144].mxu0 %vm628_vm3, %v7912_v5  ;;  %v7924_v7 = vld [vmem:[%s12350_s3] sm:$0xff]  }
 0x129   :  { %7382 = vmatprep.mubr.msk.bf16.mxu0 %vm8055_vm2, %v12363_v0  ;;  %3561 = vmatpush1.bf16.msra.mxu1 %v7924_v7 }
 0x12a   :  { %v8426_v12 = vpack.c.bf16 %v1579_v11, %v1578_v9  ;;  %3562 = vmatprep.subr.bf16.mxu1 %v12361_v6 }
 0x12b   :  { %v993_v13 = vpop.f32.mrb[40].mxu0 }
 0x12c   :  { %12418 = vst [vmem:[#allocation3_spill] sm:$0xff] %v8426_v12  ;;  %v994_v14 = vadd.f32 %v8303_v33, %v993_v13  ;;  %2068 = vrot.lane.b32.xlu1 %v8426_v12, %s8058_s16  ;;  %v7276_v15 = vpop.f32.mrb[41].mxu0 }
 0x12d   :  { %v996_v17 = vpop.f32.mrb[42].mxu0 }
 0x12e   :  { %v997_v18 = vadd.f32 %v8303_v33, %v996_v17  ;;  %v7277_v19 = vpop.f32.mrb[43].mxu0  ;;  %v1580_v21 = vmax.f32 %v994_v14, 0.0  ;;  %v7925_v14 = vld [vmem:[%s12350_s3 + $0x8] sm:$0xff]  }
 0x12f   :  { %3563 = vmatpush1.bf16.msra.mxu1 %v7925_v14 }
 0x130   :  { %v1581_v22 = vmax.f32 %v997_v18, 0.0  ;;  %7383 = vmatmul.mubr.msk.bf16.gmra.mrb[148].mxu0 %vm628_vm3, %v7913_v16  ;;  %v7918_v16 = vld [vmem:[%s12348_s0 + $0x150] sm:$0xff]   ;;  %3564 = vmatprep.subr.bf16.mxu1 %v12361_v6 }
 0x131   :  { %7386 = vmatprep.mubr.msk.bf16.mxu0 %vm8055_vm2, %v12363_v0 }
 0x132   :  { %v8438_v23 = vpack.c.bf16 %v1581_v22, %v1580_v21  ;;  %v7926_v22 = vld [vmem:[%s12350_s3 + $0x10] sm:$0xff]  }
 0x133   :  { %v1001_v24 = vpop.f32.mrb[44].mxu0  ;;  %3565 = vmatpush1.bf16.msra.mxu1 %v7926_v22 }
 0x134   :  { %12419 = vst [vmem:[#allocation4_spill] sm:$0xff] %v8438_v23  ;;  %v1002_v25 = vadd.f32 %v8303_v33, %v1001_v24  ;;  %2167 = vrot.lane.b32.xlu1 %v8438_v23, %s8059_s20  ;;  %v7280_v26 = vpop.f32.mrb[45].mxu0  ;;  %3566 = vmatprep.subr.bf16.mxu1 %v12361_v6 }
 0x135   :  { %v1004_v28 = vpop.f32.mrb[46].mxu0 }
 0x136   :  { %v1005_v29 = vadd.f32 %v8303_v33, %v1004_v28  ;;  %v7281_v31 = vpop.f32.mrb[47].mxu0  ;;  %v1582_v32 = vmax.f32 %v1002_v25, 0.0  ;;  %v7928_v28 = vld [vmem:[%s12350_s3 + $0x18] sm:$0xff]  }
 0x137   :  { %v7919_v31 = vld [vmem:[%s12348_s0 + $0x158] sm:$0xff]   ;;  %3567 = vmatpush1.bf16.msra.mxu1 %v7928_v28 }
 0x138   :  { %v1583_v34 = vmax.f32 %v1005_v29, 0.0  ;;  %2070 = vrot.lane.b32.xlu1 %v8438_v23, %s8058_s16  ;;  %7387 = vmatmul.mubr.msk.bf16.gmra.mrb[152].mxu0 %vm628_vm3, %v7914_v27  ;;  %v7923_v28 = vld [vmem:[%s12348_s0 + $0x178] sm:$0xff]  }
 0x139   :  { %7390 = vmatprep.mubr.msk.bf16.mxu0 %vm8055_vm2, %v12363_v0  ;;  %3568 = vmatprep.subr.bf16.mxu1 %v12361_v6 }
 0x13a   :  { %v8452_v35 = vpack.c.bf16 %v1583_v34, %v1582_v32 }
 0x13b   :  { %v1009_v36 = vpop.f32.mrb[48].mxu0 }
 0x13c   :  { %12420 = vst [vmem:[#allocation5_spill] sm:$0xff] %v8452_v35  ;;  %v1010_v37 = vadd.f32 %v8303_v33, %v1009_v36  ;;  %1866 = vrot.lane.b32.xlu1 %v8438_v23, %s8056_s15  ;;  %2266 = vrot.lane.b32.xlu0 %v8452_v35, %s8060_s23  ;;  %v7284_v38 = vpop.f32.mrb[49].mxu0 }
 0x13d   :  { %v1012_v40 = vpop.f32.mrb[50].mxu0  ;;  %v7929_v38 = vld [vmem:[%s12350_s3 + $0x20] sm:$0xff]  }
 0x13e   :  { %v1584_v42 = vmax.f32 %v1010_v37, 0.0  ;;  %v1013_v44 = vadd.f32 %v8303_v33, %v1012_v40  ;;  %v7285_v45 = vpop.f32.mrb[51].mxu0  ;;  %3569 = vmatpush1.bf16.msra.mxu1 %v7929_v38 }
 0x13f   :  { %v7930_v45 = vld [vmem:[%s12350_s3 + $0x28] sm:$0xff]   ;;  %3570 = vmatprep.subr.bf16.mxu1 %v12361_v6 }
 0x140   :  { %v1585_v46 = vmax.f32 %v1013_v44, 0.0  ;;  %2169 = vrot.lane.b32.xlu0 %v8452_v35, %s8059_s20  ;;  %7391 = vmatmul.mubr.msk.bf16.gmra.mrb[156].mxu0 %vm628_vm3, %v7915_v39 }
 0x141   :  { %7394 = vmatprep.mubr.msk.bf16.mxu0 %vm8055_vm2, %v12363_v0 }
 0x142   :  { %v8468_v47 = vpack.c.bf16 %v1585_v46, %v1584_v42  ;;  %3571 = vmatpush1.bf16.msra.mxu1 %v7930_v45 }
 0x143   :  { %v1017_v48 = vpop.f32.mrb[52].mxu0  ;;  %3572 = vmatprep.subr.bf16.mxu1 %v12361_v6 }
 0x144   :  { %12421 = vst [vmem:[#allocation6_spill] sm:$0xff] %v8468_v47  ;;  %v1018_v49 = vadd.f32 %v8303_v33, %v1017_v48  ;;  %2072 = vrot.lane.b32.xlu0 %v8452_v35, %s8058_s16  ;;  %2268 = vrot.lane.b32.xlu1 %v8468_v47, %s8060_s23  ;;  %v7288_v50 = vpop.f32.mrb[53].mxu0  ;;  %v7920_v48 = vld [vmem:[%s12348_s0 + $0x160] sm:$0xff]  }
 0x145   :  { %v1020_v51 = vpop.f32.mrb[54].mxu0 }
 0x146   :  { %v1586_v54 = vmax.f32 %v1018_v49, 0.0  ;;  %v1021_v55 = vadd.f32 %v8303_v33, %v1020_v51  ;;  %v7289_v56 = vpop.f32.mrb[55].mxu0 }
 0x148   :  { %v1587_v57 = vmax.f32 %v1021_v55, 0.0  ;;  %1971 = vrot.lane.b32.xlu0 %v8452_v35, %s8057_s18  ;;  %2171 = vrot.lane.b32.xlu1 %v8468_v47, %s8059_s20 }
 0x149   :  { %7395 = vmatmul.mubr.msk.bf16.gmra.mrb[160].mxu0 %vm628_vm3, %v7916_v52 }
 0x14a   :  { %v8484_v58 = vpack.c.bf16 %v1587_v57, %v1586_v54  ;;  %7398 = vmatprep.mubr.msk.bf16.mxu0 %vm8055_vm2, %v12363_v0  ;;  %v7932_v54 = vld [vmem:[%s12350_s3 + $0x30] sm:$0xff]  }
 0x14b   :  { %v1025_v59 = vpop.f32.mrb[56].mxu0  ;;  %3573 = vmatpush1.bf16.msra.mxu1 %v7932_v54 }
 0x14c   :  { %12422 = vst [vmem:[#allocation7_spill] sm:$0xff] %v8484_v58  ;;  %v1026_v60 = vadd.f32 %v8303_v33, %v1025_v59  ;;  %1868 = vrot.lane.b32.xlu0 %v8452_v35, %s8056_s15  ;;  %2074 = vrot.lane.b32.xlu1 %v8468_v47, %s8058_s16  ;;  %v7292_v61 = vpop.f32.mrb[57].mxu0 }
 0x14d   :  { %v1028_v62 = vpop.f32.mrb[58].mxu0  ;;  %3574 = vmatprep.subr.bf16.mxu1 %v12361_v6 }
 0x14e   :  { %v1588_v2 = vmax.f32 %v1026_v60, 0.0  ;;  %v1029_v3 = vadd.f32 %v8303_v33, %v1028_v62  ;;  %v7293_v4 = vpop.f32.mrb[59].mxu0  ;;  %v7933_v60 = vld [vmem:[%s12350_s3 + $0x38] sm:$0xff]   ;;  %v7921_v62 = vld [vmem:[%s12348_s0 + $0x168] sm:$0xff]  }
 0x14f   :  { %3575 = vmatpush1.bf16.msra.mxu1 %v7933_v60  ;;  %v7931_v60 = vld [vmem:[%s12348_s0 + $0x188] sm:$0xff]  }
 0x150   :  { %v1589_v5 = vmax.f32 %v1029_v3, 0.0  ;;  %1973 = vrot.lane.b32.xlu1 %v8468_v47, %s8057_s18  ;;  %2270 = vrot.lane.b32.xlu0 %v8484_v58, %s8060_s23 }
 0x151   :  { %7399 = vmatmul.mubr.msk.bf16.gmra.mrb[164].mxu0 %vm628_vm3, %v7917_v1  ;;  %3576 = vmatprep.subr.bf16.mxu1 %v12361_v6 }
 0x152   :  { %v8506_v8 = vpack.c.bf16 %v1589_v5, %v1588_v2  ;;  %7402 = vmatprep.mubr.msk.bf16.mxu0 %vm8055_vm2, %v12363_v0  ;;  %v7934_v5 = vld [vmem:[%s12350_s3 + $0x40] sm:$0xff]  }
 0x153   :  { %v1033_v9 = vpop.f32.mrb[60].mxu0  ;;  %3577 = vmatpush1.bf16.msra.mxu1 %v7934_v5 }
 0x154   :  { %12423 = vst [vmem:[#allocation8_spill] sm:$0xff] %v8506_v8  ;;  %v1034_v11 = vadd.f32 %v8303_v33, %v1033_v9  ;;  %1870 = vrot.lane.b32.xlu1 %v8468_v47, %s8056_s15  ;;  %2173 = vrot.lane.b32.xlu0 %v8484_v58, %s8059_s20  ;;  %v7296_v13 = vpop.f32.mrb[61].mxu0 }
 0x155   :  { %v1036_v15 = vpop.f32.mrb[62].mxu0  ;;  %4934 = vmatprep.subr.bf16.mxu1 %v12361_v6 }
 0x156   :  { %v1590_v17 = vmax.f32 %v1034_v11, 0.0  ;;  %v1037_v18 = vadd.f32 %v8303_v33, %v1036_v15  ;;  %v7297_v19 = vpop.f32.mrb[63].mxu0  ;;  %v7922_v15 = vld [vmem:[%s12348_s0 + $0x170] sm:$0xff]  }
 0x158   :  { %v1591_v21 = vmax.f32 %v1037_v18, 0.0  ;;  %2076 = vrot.lane.b32.xlu0 %v8484_v58, %s8058_s16  ;;  %2272 = vrot.lane.b32.xlu1 %v8506_v8, %s8060_s23 }
 0x159   :  { %7403 = vmatmul.mubr.msk.bf16.gmra.mrb[168].mxu0 %vm628_vm3, %v7918_v16 }
 0x15a   :  { %v8532_v24 = vpack.c.bf16 %v1591_v21, %v1590_v17  ;;  %7406 = vmatprep.mubr.msk.bf16.mxu0 %vm8055_vm2, %v12363_v0 }
 0x15b   :  { %v1041_v25 = vpop.f32.mrb[64].mxu0 }
 0x15c   :  { %12424 = vst [vmem:[#allocation9_spill] sm:$0xff] %v8532_v24  ;;  %v1042_v26 = vadd.f32 %v8303_v33, %v1041_v25  ;;  %1975 = vrot.lane.b32.xlu0 %v8484_v58, %s8057_s18  ;;  %2175 = vrot.lane.b32.xlu1 %v8506_v8, %s8059_s20  ;;  %v7300_v27 = vpop.f32.mrb[65].mxu0 }
 0x15d   :  { %v1044_v29 = vpop.f32.mrb[66].mxu0 }
 0x15e   :  { %v1592_v32 = vmax.f32 %v1042_v26, 0.0  ;;  %v1045_v34 = vadd.f32 %v8303_v33, %v1044_v29  ;;  %v7301_v36 = vpop.f32.mrb[67].mxu0 }
 0x160   :  { %v1593_v37 = vmax.f32 %v1045_v34, 0.0  ;;  %1872 = vrot.lane.b32.xlu0 %v8484_v58, %s8056_s15  ;;  %2078 = vrot.lane.b32.xlu1 %v8506_v8, %s8058_s16 }
 0x161   :  { %7407 = vmatmul.mubr.msk.bf16.gmra.mrb[172].mxu0 %vm628_vm3, %v7919_v31 }
 0x162   :  { %v1738_v39 = vpack.c.bf16 %v1593_v37, %v1592_v32  ;;  %7410 = vmatprep.mubr.msk.bf16.mxu0 %vm8055_vm2, %v12363_v0 }
 0x163   :  { %v1049_v40 = vpop.f32.mrb[68].mxu0 }
 0x164   :  { %v1050_v42 = vadd.f32 %v8303_v33, %v1049_v40  ;;  %1977 = vrot.lane.b32.xlu1 %v8506_v8, %s8057_s18  ;;  %2274 = vrot.lane.b32.xlu0 %v8532_v24, %s8060_s23  ;;  %v7304_v44 = vpop.f32.mrb[69].mxu0 }
 0x165   :  { %v1052_v46 = vpop.f32.mrb[70].mxu0 }
 0x166   :  { %v1594_v49 = vmax.f32 %v1050_v42, 0.0  ;;  %v1053_v50 = vadd.f32 %v8303_v33, %v1052_v46  ;;  %v7305_v51 = vpop.f32.mrb[71].mxu0  ;;  %v7927_v42 = vld [vmem:[%s12348_s0 + $0x180] sm:$0xff]   ;;  %v8651_v44 = vpop.permute.xlu1 %1854 }
 0x168   :  { %v1595_v52 = vmax.f32 %v1053_v50, 0.0  ;;  %1874 = vrot.lane.b32.xlu1 %v8506_v8, %s8056_s15  ;;  %2177 = vrot.lane.b32.xlu0 %v8532_v24, %s8059_s20 }
 0x169   :  { %7411 = vmatmul.mubr.msk.bf16.gmra.mrb[176].mxu0 %vm628_vm3, %v7920_v48 }
 0x16a   :  { %v1739_v55 = vpack.c.bf16 %v1595_v52, %v1594_v49  ;;  %7414 = vmatprep.mubr.msk.bf16.mxu0 %vm8055_vm2, %v12363_v0  ;;  %v8654_v49 = vpop.permute.xlu0 %1852 }
 0x16b   :  { %v1057_v56 = vpop.f32.mrb[72].mxu0 }
 0x16c   :  { %v1058_v57 = vadd.f32 %v8303_v33, %v1057_v56  ;;  %2080 = vrot.lane.b32.xlu0 %v8532_v24, %s8058_s16  ;;  %2276 = vrot.lane.b32.xlu1 %v1738_v39, %s8060_s23  ;;  %v7308_v59 = vpop.f32.mrb[73].mxu0 }
 0x16d   :  { %v1060_v61 = vpop.f32.mrb[74].mxu0 }
 0x16e   :  { %v1596_v1 = vmax.f32 %v1058_v57, 0.0  ;;  %v1061_v2 = vadd.f32 %v8303_v33, %v1060_v61  ;;  %v7309_v3 = vpop.f32.mrb[75].mxu0 }
 0x170   :  { %v1597_v4 = vmax.f32 %v1061_v2, 0.0  ;;  %1979 = vrot.lane.b32.xlu0 %v8532_v24, %s8057_s18  ;;  %2179 = vrot.lane.b32.xlu1 %v1738_v39, %s8059_s20 }
 0x171   :  { %7415 = vmatmul.mubr.msk.bf16.gmra.mrb[180].mxu0 %vm628_vm3, %v7921_v62 }
 0x172   :  { %v8604_v7 = vpack.c.bf16 %v1597_v4, %v1596_v1  ;;  %7418 = vmatprep.mubr.msk.bf16.mxu0 %vm8055_vm2, %v12363_v0 }
 0x173   :  { %v1065_v9 = vpop.f32.mrb[76].mxu0 }
 0x174   :  { %12425 = vst [vmem:[#allocation10_spill] sm:$0xff] %v8604_v7  ;;  %v1066_v11 = vadd.f32 %v8303_v33, %v1065_v9  ;;  %1876 = vrot.lane.b32.xlu0 %v8532_v24, %s8056_s15  ;;  %1981 = vrot.lane.b32.xlu1 %v1738_v39, %s8057_s18  ;;  %v7312_v13 = vpop.f32.mrb[77].mxu0 }
 0x175   :  { %v1068_v14 = vpop.f32.mrb[78].mxu0 }
 0x176   :  { %v1598_v16 = vmax.f32 %v1066_v11, 0.0  ;;  %v1069_v17 = vadd.f32 %v8303_v33, %v1068_v14  ;;  %v7313_v18 = vpop.f32.mrb[79].mxu0  ;;  %v8661_v51 = vpop.permute.xlu1 %1961 }
 0x178   :  { %v1599_v19 = vmax.f32 %v1069_v17, 0.0  ;;  %1878 = vrot.lane.b32.xlu1 %v1738_v39, %s8056_s15  ;;  %2278 = vrot.lane.b32.xlu0 %v1739_v55, %s8060_s23 }
 0x179   :  { %7419 = vmatmul.mubr.msk.bf16.gmra.mrb[184].mxu0 %vm628_vm3, %v7922_v15 }
 0x17a   :  { %v8620_v21 = vpack.c.bf16 %v1599_v19, %v1598_v16  ;;  %7422 = vmatprep.mubr.msk.bf16.mxu0 %vm8055_vm2, %v12363_v0  ;;  %v8680_v3 = vpop.permute.xlu1 %1858  ;;  %v7935_v16 = vld [vmem:[%s12348_s0 + $0x190] sm:$0xff]  }
 0x17b   :  { %v1073_v22 = vpop.f32.mrb[80].mxu0 }
 0x17c   :  { %12426 = vst [vmem:[#allocation11_spill] sm:$0xff] %v8620_v21  ;;  %v1074_v25 = vadd.f32 %v8303_v33, %v1073_v22  ;;  %1983 = vrot.lane.b32.xlu0 %v1739_v55, %s8057_s18  ;;  %2371 = vrot.lane.b32.xlu1 %v8604_v7, %s8062_s30  ;;  %v7316_v26 = vpop.f32.mrb[81].mxu0  ;;  %v8667_v55 = vpop.permute.xlu0 %1957 }
 0x17d   :  { %v1076_v27 = vpop.f32.mrb[82].mxu0 }
 0x17e   :  { %v1600_v29 = vmax.f32 %v1074_v25, 0.0  ;;  %v1077_v31 = vadd.f32 %v8303_v33, %v1076_v27  ;;  %v7317_v32 = vpop.f32.mrb[83].mxu0 }
 0x180   :  { %v1601_v34 = vmax.f32 %v1077_v31, 0.0  ;;  %2082 = vrot.lane.b32.xlu1 %v8604_v7, %s8058_s16  ;;  %2470 = vrot.lane.b32.xlu0 %v8620_v21, %s8063_s19  ;;  %v8678_v2 = vpop.permute.xlu0 %1959  ;;  %v12438_v7 = vmov 0.0  }
 0x181   :  { %7423 = vmatmul.mubr.msk.bf16.gmra.mrb[188].mxu0 %vm628_vm3, %v7923_v28 }
 0x182   :  { %v8637_v36 = vpack.c.bf16 %v1601_v34, %v1600_v29  ;;  %7426 = vmatprep.mubr.msk.bf16.mxu0 %vm8055_vm2, %v12363_v0 }
 0x183   :  { %v1081_v37 = vpop.f32.mrb[84].mxu0 }
 0x184   :  { %12427 = vst [vmem:[#allocation12_spill] sm:$0xff] %v8637_v36  ;;  %2373 = vrot.lane.b32.xlu0 %v8620_v21, %s8062_s30  ;;  %2472 = vrot.lane.b32.xlu1 %v8637_v36, %s8063_s19  ;;  %v1082_v38 = vadd.f32 %v8303_v33, %v1081_v37  ;;  %v7320_v39 = vpop.f32.mrb[85].mxu0  ;;  %v8701_v17 = vpop.permute.xlu0 %1856  ;;  %v7936_v37 = vld [vmem:[%s12348_s0 + $0x198] sm:$0xff]  }
 0x185   :  { %6782 = vmatprep.mubr.msk.bf16.mxu1 %vm2568_vm4, %v8637_v36  ;;  %v1084_v40 = vpop.f32.mrb[86].mxu0 }
 0x186   :  { %v1602_v45 = vmax.f32 %v1082_v38, 0.0  ;;  %v1085_v46 = vadd.f32 %v8303_v33, %v1084_v40  ;;  %v7321_v48 = vpop.f32.mrb[87].mxu0  ;;  %v8691_v11 = vpop.permute.xlu1 %1965 }
 0x188   :  { %2181 = vrot.lane.b32.xlu0 %v8620_v21, %s8059_s20  ;;  %2375 = vrot.lane.b32.xlu1 %v8637_v36, %s8062_s30  ;;  %v1603_v50 = vmax.f32 %v1085_v46, 0.0  ;;  %v8709_v26 = vpop.permute.xlu0 %1963 }
 0x189   :  { %7427 = vmatmul.mubr.msk.bf16.gmra.mrb[192].mxu0 %vm628_vm3, %v7927_v42 }
 0x18a   :  { %v8663_v52 = vpack.c.bf16 %v1603_v50, %v1602_v45  ;;  %7430 = vmatprep.mubr.msk.bf16.mxu0 %vm8055_vm2, %v12363_v0  ;;  %v8711_v27 = vpop.permute.xlu1 %1862 }
 0x18b   :  { %v1089_v54 = vpop.f32.mrb[88].mxu0 }
 0x18c   :  { %2084 = vrot.lane.b32.xlu0 %v8620_v21, %s8058_s16  ;;  %2280 = vrot.lane.b32.xlu1 %v8637_v36, %s8060_s23  ;;  %v1090_v56 = vadd.f32 %v8303_v33, %v1089_v54  ;;  %v7324_v57 = vpop.f32.mrb[89].mxu0  ;;  %v8728_v45 = vpop.permute.xlu0 %1860 }
 0x18d   :  { %v1092_v59 = vpop.f32.mrb[90].mxu0 }
 0x18e   :  { %v1604_v61 = vmax.f32 %v1090_v56, 0.0  ;;  %v1093_v62 = vadd.f32 %v8303_v33, %v1092_v59  ;;  %v7325_v1 = vpop.f32.mrb[91].mxu0 }
 0x190   :  { %1880 = vrot.lane.b32.xlu0 %v8620_v21, %s8056_s15  ;;  %2183 = vrot.lane.b32.xlu1 %v8637_v36, %s8059_s20  ;;  %v1605_v4 = vmax.f32 %v1093_v62, 0.0  ;;  %v8741_v56 = vpop.permute.xlu0 %1967 }
 0x191   :  { %7431 = vmatmul.mubr.msk.bf16.gmra.mrb[196].mxu0 %vm628_vm3, %v7931_v60 }
 0x192   :  { %v8687_v5 = vpack.c.bf16 %v1605_v4, %v1604_v61  ;;  %7434 = vmatprep.mubr.msk.bf16.mxu0 %vm8055_vm2, %v12363_v0  ;;  %v7937_v61 = vld [vmem:[%s12348_s0 + $0x1a0] sm:$0xff]  }
 0x193   :  { %v1097_v9 = vpop.f32.mrb[92].mxu0 }
 0x194   :  { %2086 = vrot.lane.b32.xlu1 %v8637_v36, %s8058_s16  ;;  %2474 = vrot.lane.b32.xlu0 %v8663_v52, %s8063_s19  ;;  %v1098_v13 = vadd.f32 %v8303_v33, %v1097_v9  ;;  %v7328_v14 = vpop.f32.mrb[93].mxu0 }
 0x195   :  { %v1100_v15 = vpop.f32.mrb[94].mxu0  ;;  %v8759_v14 = vpop.permute.xlu0 %1864 }
 0x196   :  { %v1606_v18 = vmax.f32 %v1098_v13, 0.0  ;;  %v1101_v19 = vadd.f32 %v8303_v33, %v1100_v15  ;;  %v7329_v22 = vpop.f32.mrb[95].mxu0  ;;  %v8725_v38 = vpop.permute.xlu1 %1969 }
 0x198   :  { %1985 = vrot.lane.b32.xlu1 %v8637_v36, %s8057_s18  ;;  %2377 = vrot.lane.b32.xlu0 %v8663_v52, %s8062_s30  ;;  %v1607_v25 = vmax.f32 %v1101_v19, 0.0 }
 0x199   :  { %7435 = vmatmul.mubr.msk.bf16.gmra.mrb[200].mxu0 %vm628_vm3, %v7935_v16 }
 0x19a   :  { %v8713_v28 = vpack.c.bf16 %v1607_v25, %v1606_v18  ;;  %7438 = vmatprep.mubr.msk.bf16.mxu0 %vm8055_vm2, %v12363_v0 }
 0x19b   :  { %v1105_v29 = vpop.f32.mrb[96].mxu0 }
 0x19c   :  { %12428 = vst [vmem:[#allocation13_spill] sm:$0xff] %v8713_v28  ;;  %1882 = vrot.lane.b32.xlu1 %v8637_v36, %s8056_s15  ;;  %2282 = vrot.lane.b32.xlu0 %v8663_v52, %s8060_s23  ;;  %v1106_v31 = vadd.f32 %v8303_v33, %v1105_v29  ;;  %v7332_v32 = vpop.f32.mrb[97].mxu0  ;;  %v7938_v29 = vld [vmem:[%s12348_s0 + $0x1a8] sm:$0xff]  }
 0x19d   :  { %v1108_v34 = vpop.f32.mrb[98].mxu0 }
 0x19e   :  { %v1608_v39 = vmax.f32 %v1106_v31, 0.0  ;;  %v1109_v40 = vadd.f32 %v8303_v33, %v1108_v34  ;;  %v7333_v42 = vpop.f32.mrb[99].mxu0  ;;  %v8735_v48 = vpop.permute.xlu1 %2068 }
 0x1a0   :  { %2185 = vrot.lane.b32.xlu0 %v8663_v52, %s8059_s20  ;;  %2476 = vrot.lane.b32.xlu1 %v8687_v5, %s8063_s19  ;;  %v1609_v46 = vmax.f32 %v1109_v40, 0.0 }
 0x1a1   :  { %7439 = vmatmul.mubr.msk.bf16.gmra.mrb[204].mxu0 %vm628_vm3, %v7936_v37 }
 0x1a2   :  { %v8737_v50 = vpack.c.bf16 %v1609_v46, %v1608_v39  ;;  %7442 = vmatprep.mubr.msk.bf16.mxu0 %vm8055_vm2, %v12363_v0 }
 0x1a3   :  { %v1113_v54 = vpop.f32.mrb[100].mxu0 }
 0x1a4   :  { %12429 = vst [vmem:[#allocation14_spill] sm:$0xff] %v8737_v50  ;;  %2088 = vrot.lane.b32.xlu0 %v8663_v52, %s8058_s16  ;;  %2379 = vrot.lane.b32.xlu1 %v8687_v5, %s8062_s30  ;;  %v1114_v57 = vadd.f32 %v8303_v33, %v1113_v54  ;;  %v7336_v59 = vpop.f32.mrb[101].mxu0 }
 0x1a5   :  { %v1116_v60 = vpop.f32.mrb[102].mxu0 }
 0x1a6   :  { %v8751_v62 = vpop.permute.xlu1 %2167  ;;  %v1610_v1 = vmax.f32 %v1114_v57, 0.0  ;;  %v1117_v4 = vadd.f32 %v8303_v33, %v1116_v60  ;;  %v7337_v9 = vpop.f32.mrb[103].mxu0 }
 0x1a8   :  { %1987 = vrot.lane.b32.xlu0 %v8663_v52, %s8057_s18  ;;  %2284 = vrot.lane.b32.xlu1 %v8687_v5, %s8060_s23  ;;  %v1611_v13 = vmax.f32 %v1117_v4, 0.0 }
 0x1a9   :  { %7443 = vmatmul.mubr.msk.bf16.gmra.mrb[208].mxu0 %vm628_vm3, %v7937_v61  ;;  %v7939_v61 = vld [vmem:[%s12348_s0 + $0x1b0] sm:$0xff]  }
 0x1aa   :  { %v8761_v15 = vpack.c.bf16 %v1611_v13, %v1610_v1  ;;  %7446 = vmatprep.mubr.msk.bf16.mxu0 %vm8055_vm2, %v12363_v0  ;;  %v8765_v18 = vpop.permute.xlu1 %2070 }
 0x1ab   :  { %v1121_v16 = vpop.f32.mrb[104].mxu0 }
 0x1ac   :  { %1884 = vrot.lane.b32.xlu0 %v8663_v52, %s8056_s15  ;;  %2187 = vrot.lane.b32.xlu1 %v8687_v5, %s8059_s20  ;;  %v1122_v19 = vadd.f32 %v8303_v33, %v1121_v16  ;;  %v7340_v22 = vpop.f32.mrb[105].mxu0 }
 0x1ad   :  { %v1124_v25 = vpop.f32.mrb[106].mxu0 }
 0x1ae   :  { %v8775_v31 = vpop.permute.xlu0 %2266  ;;  %v1612_v32 = vmax.f32 %v1122_v19, 0.0  ;;  %v1125_v34 = vadd.f32 %v8303_v33, %v1124_v25  ;;  %v7341_v37 = vpop.f32.mrb[107].mxu0 }
 0x1af   :  { %v8783_v40 = vpop.permute.xlu1 %1866 }
 0x1b0   :  { %2090 = vrot.lane.b32.xlu1 %v8687_v5, %s8058_s16  ;;  %2478 = vrot.lane.b32.xlu0 %v8713_v28, %s8063_s19  ;;  %v1613_v39 = vmax.f32 %v1125_v34, 0.0  ;;  %12430 = vst [vmem:[#allocation15_spill] sm:$0xff] %v8783_v40 }
 0x1b1   :  { %7447 = vmatmul.mubr.msk.bf16.gmra.mrb[212].mxu0 %vm628_vm3, %v7938_v29 }
 0x1b2   :  { %v8785_v42 = vpop.permute.xlu0 %2169  ;;  %v8787_v46 = vpack.c.bf16 %v1613_v39, %v1612_v32  ;;  %7450 = vmatprep.mubr.msk.bf16.mxu0 %vm8055_vm2, %v12363_v0 }
 0x1b3   :  { %v1129_v54 = vpop.f32.mrb[108].mxu0 }
 0x1b4   :  { %1989 = vrot.lane.b32.xlu1 %v8687_v5, %s8057_s18  ;;  %2381 = vrot.lane.b32.xlu0 %v8713_v28, %s8062_s30  ;;  %v1130_v57 = vadd.f32 %v8303_v33, %v1129_v54  ;;  %v7344_v59 = vpop.f32.mrb[109].mxu0  ;;  %v7940_v54 = vld [vmem:[%s12348_s0 + $0x1b8] sm:$0xff]  }
 0x1b5   :  { %v1132_v60 = vpop.f32.mrb[110].mxu0 }
 0x1b6   :  { %v8799_v1 = vpop.permute.xlu0 %2072  ;;  %v8801_v4 = vpop.permute.xlu1 %2268  ;;  %v1614_v9 = vmax.f32 %v1130_v57, 0.0  ;;  %v1133_v13 = vadd.f32 %v8303_v33, %v1132_v60 }
 0x1b7   :  { %v7345_v16 = vpop.f32.mrb[111].mxu0 }
 0x1b8   :  { %1886 = vrot.lane.b32.xlu1 %v8687_v5, %s8056_s15  ;;  %2286 = vrot.lane.b32.xlu0 %v8713_v28, %s8060_s23  ;;  %v1615_v19 = vmax.f32 %v1133_v13, 0.0 }
 0x1b9   :  { %7451 = vmatmul.mubr.msk.bf16.gmra.mrb[216].mxu0 %vm628_vm3, %v7939_v61 }
 0x1ba   :  { %v8809_v22 = vpop.permute.xlu0 %1971  ;;  %v8811_v25 = vpop.permute.xlu1 %2171  ;;  %v8813_v29 = vpack.c.bf16 %v1615_v19, %v1614_v9  ;;  %7454 = vmatprep.mubr.msk.bf16.mxu0 %vm8055_vm2, %v12363_v0 }
 0x1bb   :  { %12431 = vst [vmem:[#allocation16_spill] sm:$0xff] %v8809_v22  ;;  %v1137_v32 = vpop.f32.mrb[112].mxu0 }
 0x1bc   :  { %12432 = vst [vmem:[#allocation17_spill] sm:$0xff] %v8813_v29  ;;  %2189 = vrot.lane.b32.xlu0 %v8713_v28, %s8059_s20  ;;  %2480 = vrot.lane.b32.xlu1 %v8737_v50, %s8063_s19  ;;  %v1138_v34 = vadd.f32 %v8303_v33, %v1137_v32  ;;  %v7348_v37 = vpop.f32.mrb[113].mxu0 }
 0x1bd   :  { %v1140_v39 = vpop.f32.mrb[114].mxu0 }
 0x1be   :  { %v8825_v57 = vpop.permute.xlu0 %1868  ;;  %v8827_v59 = vpop.permute.xlu1 %2074  ;;  %v1616_v60 = vmax.f32 %v1138_v34, 0.0  ;;  %v1141_v61 = vadd.f32 %v8303_v33, %v1140_v39  ;;  %v8850_v34 = vld [vmem:[%s12349_s2] ss:$0 sm:$0xff] }
 0x1bf   :  { %12433 = vst [vmem:[#allocation18_spill] sm:$0xff] %v8825_v57  ;;  %v7349_v9 = vpop.f32.mrb[115].mxu0 }
 0x1c0   :  { %2092 = vrot.lane.b32.xlu0 %v8713_v28, %s8058_s16  ;;  %2383 = vrot.lane.b32.xlu1 %v8737_v50, %s8062_s30  ;;  %v1617_v13 = vmax.f32 %v1141_v61, 0.0 }
 0x1c1   :  { %7455 = vmatmul.mubr.msk.bf16.gmra.mrb[220].mxu0 %vm628_vm3, %v7940_v54 }
 0x1c2   :  { %v8835_v16 = vpop.permute.xlu1 %1973  ;;  %v8837_v19 = vpop.permute.xlu0 %2270  ;;  %v8839_v32 = vpack.c.bf16 %v1617_v13, %v1616_v60  ;;  %7458 = vmatprep.mubr.msk.bf16.mxu0 %vm8055_vm2, %v12363_v0  ;;  %v7941_v60 = vld [vmem:[%s12348_s0 + $0x1c0] sm:$0xff]  }
 0x1c3   :  { %12434 = vst [vmem:[#allocation19_spill] sm:$0xff] %v8835_v16  ;;  %v1145_v33 = vpop.f32.mrb[116].mxu0 }
 0x1c4   :  { %12435 = vst [vmem:[#allocation20_spill] sm:$0xff] %v8839_v32  ;;  %1991 = vrot.lane.b32.xlu0 %v8713_v28, %s8057_s18  ;;  %2288 = vrot.lane.b32.xlu1 %v8737_v50, %s8060_s23  ;;  %v1146_v37 = vadd.f32 %v8850_v34, %v1145_v33  ;;  %v7352_v39 = vpop.f32.mrb[117].mxu0 }
 0x1c5   :  { %v1148_v54 = vpop.f32.mrb[118].mxu0 }
 0x1c6   :  { %v8856_v61 = vpop.permute.xlu1 %1870  ;;  %v8858_v9 = vpop.permute.xlu0 %2173  ;;  %v1618_v13 = vmax.f32 %v1146_v37, 0.0  ;;  %v1149_v6 = vadd.f32 %v8850_v34, %v1148_v54 }
 0x1c7   :  { %12436 = vst [vmem:[#allocation21_spill] sm:$0xff] %v8856_v61  ;;  %v7353_v0 = vpop.f32.mrb[119].mxu0 }
 0x1c8   :  { %1888 = vrot.lane.b32.xlu0 %v8713_v28, %s8056_s15  ;;  %2191 = vrot.lane.b32.xlu1 %v8737_v50, %s8059_s20  ;;  %v1619_v33 = vmax.f32 %v1149_v6, 0.0 }
 0x1c9   :  { %7459 = vmatmul.mubr.msk.bf16.gmra.mrb[224].mxu0 %vm628_vm3, %v7941_v60  ;;  %v7942_v60 = vld [vmem:[%s12348_s0 + $0x1c8] sm:$0xff]  }
 0x1ca   :  { %v8866_v39 = vpop.permute.xlu0 %2076  ;;  %v8868_v36 = vpop.permute.xlu1 %2272  ;;  %v8870_v21 = vpack.c.bf16 %v1619_v33, %v1618_v13  ;;  %7462 = vmatprep.mubr.msk.bf16.mxu0 %vm8055_vm2, %v12438_v7 }
 0x1cb   :  { %v1153_v37 = vpop.f32.mrb[120].mxu0 }
 0x1cc   :  { %12437 = vst [vmem:[#allocation22_spill] sm:$0xff] %v8870_v21  ;;  %2094 = vrot.lane.b32.xlu1 %v8737_v50, %s8058_s16  ;;  %2482 = vrot.lane.b32.xlu0 %v8761_v15, %s8063_s19  ;;  %v1154_v0 = vadd.f32 %v8850_v34, %v1153_v37  ;;  %v7356_v6 = vpop.f32.mrb[121].mxu0 }
 0x1cd   :  { %v1156_v54 = vpop.f32.mrb[122].mxu0 }
 0x1ce   :  { %v8882_v13 = vpop.permute.xlu0 %1975  ;;  %v8884_v33 = vpop.permute.xlu1 %2175  ;;  %v1620_v24 = vmax.f32 %v1154_v0, 0.0  ;;  %v1157_v8 = vadd.f32 %v8850_v34, %v1156_v54 }
 0x1cf   :  { %12439 = vst [vmem:[#allocation23_spill] sm:$0xff] %v8882_v13  ;;  %v7357_v58 = vpop.f32.mrb[123].mxu0 }
 0x1d0   :  { %1993 = vrot.lane.b32.xlu1 %v8737_v50, %s8057_s18  ;;  %2290 = vrot.lane.b32.xlu0 %v8761_v15, %s8060_s23  ;;  %v1621_v37 = vmax.f32 %v1157_v8, 0.0 }
 0x1d1   :  { %7463 = vmatmul.mubr.msk.bf16.gmra.mrb[228].mxu0 %vm628_vm3, %v7942_v60  ;;  %v7943_v60 = vld [vmem:[%s12348_s0 + $0x1d0] sm:$0xff]  }
 0x1d2   :  { %v8892_v6 = vpop.permute.xlu0 %1872  ;;  %v8894_v47 = vpop.permute.xlu1 %2078  ;;  %v8896_v13 = vpack.c.bf16 %v1621_v37, %v1620_v24  ;;  %7466 = vmatprep.mubr.msk.bf16.mxu0 %vm8055_vm2, %v12438_v7 }
 0x1d3   :  { %12440 = vst [vmem:[#allocation24_spill] sm:$0xff] %v8892_v6  ;;  %v1161_v0 = vpop.f32.mrb[124].mxu0 }
 0x1d4   :  { %12441 = vst [vmem:[#allocation25_spill] sm:$0xff] %v8896_v13  ;;  %1890 = vrot.lane.b32.xlu1 %v8737_v50, %s8056_s15  ;;  %2193 = vrot.lane.b32.xlu0 %v8761_v15, %s8059_s20  ;;  %v1162_v58 = vadd.f32 %v8850_v34, %v1161_v0  ;;  %v7360_v8 = vpop.f32.mrb[125].mxu0 }
 0x1d5   :  { %v1164_v54 = vpop.f32.mrb[126].mxu0 }
 0x1d6   :  { %v8908_v24 = vpop.permute.xlu1 %1977  ;;  %v8910_v37 = vpop.permute.xlu0 %2274  ;;  %v1622_v6 = vmax.f32 %v1162_v58, 0.0  ;;  %v1165_v35 = vadd.f32 %v8850_v34, %v1164_v54 }
 0x1d7   :  { %12442 = vst [vmem:[#allocation26_spill] sm:$0xff] %v8908_v24  ;;  %v7361_v61 = vpop.f32.mrb[127].mxu0 }
 0x1d8   :  { %1995 = vrot.lane.b32.xlu0 %v8761_v15, %s8057_s18  ;;  %2292 = vrot.lane.b32.xlu1 %v8787_v46, %s8060_s23  ;;  %v1623_v0 = vmax.f32 %v1165_v35, 0.0 }
 0x1d9   :  { %7467 = vmatmul.mubr.msk.bf16.gmra.mrb[232].mxu0 %vm628_vm3, %v7943_v60  ;;  %v7944_v60 = vld [vmem:[%s12348_s0 + $0x1d8] sm:$0xff]  }
 0x1da   :  { %v8918_v8 = vpop.permute.xlu1 %1874  ;;  %v8920_v16 = vpop.permute.xlu0 %2177  ;;  %v8922_v24 = vpack.c.bf16 %v1623_v0, %v1622_v6  ;;  %7470 = vmatprep.mubr.msk.bf16.mxu0 %vm8055_vm2, %v12438_v7 }
 0x1db   :  { %12443 = vst [vmem:[#allocation27_spill] sm:$0xff] %v8918_v8  ;;  %v1169_v58 = vpop.f32.mrb[128].mxu0 }
 0x1dc   :  { %12444 = vst [vmem:[#allocation28_spill] sm:$0xff] %v8922_v24  ;;  %1892 = vrot.lane.b32.xlu0 %v8761_v15, %s8056_s15  ;;  %1997 = vrot.lane.b32.xlu1 %v8787_v46, %s8057_s18  ;;  %v1170_v35 = vadd.f32 %v8850_v34, %v1169_v58  ;;  %v7364_v61 = vpop.f32.mrb[129].mxu0 }
 0x1dd   :  { %v1172_v54 = vpop.f32.mrb[130].mxu0 }
 0x1de   :  { %v8934_v6 = vpop.permute.xlu0 %2080  ;;  %v8936_v0 = vpop.permute.xlu1 %2276  ;;  %v1624_v8 = vmax.f32 %v1170_v35, 0.0  ;;  %v1173_v23 = vadd.f32 %v8850_v34, %v1172_v54 }
 0x1df   :  { %v7365_v57 = vpop.f32.mrb[131].mxu0 }
 0x1e0   :  { %2385 = vrot.lane.b32.xlu0 %v8813_v29, %s8062_s30  ;;  %2484 = vrot.lane.b32.xlu1 %v8839_v32, %s8063_s19  ;;  %v1625_v58 = vmax.f32 %v1173_v23, 0.0 }
 0x1e1   :  { %7471 = vmatmul.mubr.msk.bf16.gmra.mrb[236].mxu0 %vm628_vm3, %v7944_v60  ;;  %v7945_v60 = vld [vmem:[%s12348_s0 + $0x1e0] sm:$0xff]  }
 0x1e2   :  { %v8944_v61 = vpop.permute.xlu0 %1979  ;;  %v8946_v22 = vpop.permute.xlu1 %2179  ;;  %v8948_v12 = vpack.c.bf16 %v1625_v58, %v1624_v8  ;;  %7474 = vmatprep.mubr.msk.bf16.mxu0 %vm8055_vm2, %v12438_v7 }
 0x1e3   :  { %12445 = vst [vmem:[#allocation29_spill] sm:$0xff] %v8944_v61  ;;  %12446 = vst [vmem:[#allocation30_spill] sm:$0xff] %v8946_v22  ;;  %v1177_v35 = vpop.f32.mrb[132].mxu0 }
 0x1e4   :  { %12447 = vst [vmem:[#allocation31_spill] sm:$0xff] %v8948_v12  ;;  %2096 = vrot.lane.b32.xlu0 %v8813_v29, %s8058_s16  ;;  %2387 = vrot.lane.b32.xlu1 %v8839_v32, %s8062_s30  ;;  %v1178_v23 = vadd.f32 %v8850_v34, %v1177_v35  ;;  %v7368_v57 = vpop.f32.mrb[133].mxu0 }
 0x1e5   :  { %v1180_v54 = vpop.f32.mrb[134].mxu0 }
 0x1e6   :  { %v8960_v8 = vpop.permute.xlu0 %1876  ;;  %v8962_v58 = vpop.permute.xlu1 %1981  ;;  %v1626_v61 = vmax.f32 %v1178_v23, 0.0  ;;  %v1181_v40 = vadd.f32 %v8850_v34, %v1180_v54 }
 0x1e7   :  { %12448 = vst [vmem:[#allocation32_spill] sm:$0xff] %v8960_v8  ;;  %12449 = vst [vmem:[#allocation33_spill] sm:$0xff] %v8962_v58  ;;  %v7369_v22 = vpop.f32.mrb[135].mxu0 }
 0x1e8   :  { %2195 = vrot.lane.b32.xlu1 %v8839_v32, %s8059_s20  ;;  %2486 = vrot.lane.b32.xlu0 %v8870_v21, %s8063_s19  ;;  %v1627_v35 = vmax.f32 %v1181_v40, 0.0 }
 0x1e9   :  { %7475 = vmatmul.mubr.msk.bf16.gmra.mrb[240].mxu0 %vm628_vm3, %v7945_v60  ;;  %v7946_v60 = vld [vmem:[%s12348_s0 + $0x1e8] sm:$0xff]  }
 0x1ea   :  { %v8970_v57 = vpop.permute.xlu1 %1878  ;;  %v8972_v29 = vpop.permute.xlu0 %2278  ;;  %v8974_v8 = vpack.c.bf16 %v1627_v35, %v1626_v61  ;;  %7478 = vmatprep.mubr.msk.bf16.mxu0 %vm8055_vm2, %v12438_v7  ;;  %v2571_v61 = vsel %vm2568_vm4, %v8315_v43, %v8654_v49 }
 0x1eb   :  { %12450 = vst [vmem:[#allocation34_spill] sm:$0xff] %v8970_v57  ;;  %12451 = vst [vmem:[#allocation35_spill] sm:$0xff] %v8972_v29  ;;  %v1185_v22 = vpop.f32.mrb[136].mxu0  ;;  %v2718_v35 = vsel %vm2716_vm5, %v2571_v61, %v8667_v55 }
 0x1ec   :  { %12452 = vst [vmem:[#allocation36_spill] sm:$0xff] %v8974_v8  ;;  %2098 = vrot.lane.b32.xlu1 %v8839_v32, %s8058_s16  ;;  %2389 = vrot.lane.b32.xlu0 %v8870_v21, %s8062_s30  ;;  %v1186_v40 = vadd.f32 %v8850_v34, %v1185_v22  ;;  %v7372_v23 = vpop.f32.mrb[137].mxu0 }
 0x1ed   :  { %v1188_v54 = vpop.f32.mrb[138].mxu0  ;;  %v2817_v23 = vsel %vm2815_vm6, %v2718_v35, %v8735_v48 }
 0x1ee   :  { %v8991_v57 = vpop.permute.xlu0 %1983  ;;  %v2372_v58 = vpop.permute.xlu1 %2371  ;;  %v1628_v29 = vmax.f32 %v1186_v40, 0.0  ;;  %v1189_v22 = vadd.f32 %v8850_v34, %v1188_v54  ;;  %v2916_v49 = vsel %vm2914_vm7, %v2817_v23, %v8751_v62  ;;  %v2574_v62 = vsel %vm2568_vm4, %v8325_v53, %v8651_v44  ;;  %v7947_v44 = vld [vmem:[%s12348_s0 + $0x1f0] sm:$0xff]  }
 0x1ef   :  { %v7373_v43 = vpop.f32.mrb[139].mxu0  ;;  %v3015_v40 = vsel %vm3013_vm8, %v2916_v49, %v8775_v31  ;;  %v2720_v31 = vsel %vm2716_vm5, %v2574_v62, %v8678_v2 }
 0x1f0   :  { %1894 = vrot.lane.b32.xlu1 %v8839_v32, %s8056_s15  ;;  %2294 = vrot.lane.b32.xlu0 %v8870_v21, %s8060_s23  ;;  %v1629_v55 = vmax.f32 %v1189_v22, 0.0  ;;  %v3114_v48 = vsel %vm3112_vm9, %v3015_v40, %v2372_v58  ;;  %v12466_v32 = vld [vmem:[#allocation3_spill] sm:$0xff] }
 0x1f1   :  { %7479 = vmatmul.mubr.msk.bf16.gmra.mrb[244].mxu0 %vm628_vm3, %v7946_v60  ;;  %v2819_v60 = vsel %vm2815_vm6, %v2720_v31, %v8765_v18 }
 0x1f2   :  { %v9006_v61 = vpop.permute.xlu1 %2082  ;;  %v2471_v54 = vpop.permute.xlu0 %2470  ;;  %v9008_v35 = vpack.c.bf16 %v1629_v55, %v1628_v29  ;;  %7482 = vmatprep.mubr.msk.bf16.mxu0 %vm8055_vm2, %v12438_v7  ;;  %v2918_v2 = vsel %vm2914_vm7, %v2819_v60, %v8785_v42 }
 0x1f3   :  { %v3213_v22 = vsel %vm3211_vm10, %v3114_v48, %v2471_v54  ;;  %v1193_v23 = vpop.f32.mrb[140].mxu0  ;;  %v3017_v18 = vsel %vm3013_vm8, %v2918_v2, %v8801_v4 }
 0x1f4   :  { %3593 = vmatmul.mubr.bf16.vlgmr.msra.gmra.mrb[0].mxu1 %v3213_v22  ;;  %2197 = vrot.lane.b32.xlu0 %v8870_v21, %s8059_s20  ;;  %v1194_v29 = vadd.f32 %v8850_v34, %v1193_v23  ;;  %v7376_v58 = vpop.f32.mrb[141].mxu0 }
 0x1f5   :  { %2488 = vrot.lane.b32.xlu1 %v8896_v13, %s8063_s19  ;;  %6783 = vmatprep.mubr.msk.bf16.mxu1 %vm2568_vm4, %v8663_v52  ;;  %v1196_v53 = vpop.f32.mrb[142].mxu0 }
 0x1f6   :  { %v2374_v43 = vpop.permute.xlu0 %2373  ;;  %v2473_v49 = vpop.permute.xlu1 %2472  ;;  %v1630_v55 = vmax.f32 %v1194_v29, 0.0  ;;  %v1197_v40 = vadd.f32 %v8850_v34, %v1196_v53  ;;  %v7948_v53 = vld [vmem:[%s12348_s0 + $0x1f8] sm:$0xff]  }
 0x1f7   :  { %v7377_v48 = vpop.f32.mrb[143].mxu0  ;;  %v3116_v54 = vsel %vm3112_vm9, %v3017_v18, %v2374_v43  ;;  %v2577_v18 = vsel %vm2568_vm4, %v8337_v63, %v8701_v17 }
 0x1f8   :  { %2100 = vrot.lane.b32.xlu0 %v8870_v21, %s8058_s16  ;;  %v1631_v62 = vmax.f32 %v1197_v40, 0.0  ;;  %v3216_v4 = vsel %vm3211_vm10, %v3116_v54, %v2473_v49  ;;  %v2722_v48 = vsel %vm2716_vm5, %v2577_v18, %v8661_v51 }
 0x1f9   :  { %2391 = vrot.lane.b32.xlu1 %v8896_v13, %s8062_s30  ;;  %7483 = vmatmul.mubr.msk.bf16.gmra.mrb[248].mxu0 %vm628_vm3, %v7947_v44  ;;  %v2821_v63 = vsel %vm2815_vm6, %v2722_v48, %v8799_v1 }
 0x1fa   :  { %v9041_v42 = vpop.permute.xlu0 %2181  ;;  %v2376_v22 = vpop.permute.xlu1 %2375  ;;  %v9043_v23 = vpack.c.bf16 %v1631_v62, %v1630_v55  ;;  %7486 = vmatprep.mubr.msk.bf16.mxu0 %vm8055_vm2, %v12438_v7 }
 0x1fb   :  { %v1201_v31 = vpop.f32.mrb[144].mxu0 }
 0x1fc   :  { %3601 = vmatmul.mubr.bf16.gmra.mrb[4].mxu1 %v3216_v4  ;;  %1999 = vrot.lane.b32.xlu0 %v8870_v21, %s8057_s18  ;;  %v1202_v29 = vadd.f32 %v8850_v34, %v1201_v31  ;;  %v7380_v58 = vpop.f32.mrb[145].mxu0  ;;  %v2920_v31 = vsel %vm2914_vm7, %v2821_v63, %v8811_v25 }
 0x1fd   :  { %2296 = vrot.lane.b32.xlu1 %v8896_v13, %s8060_s23  ;;  %6784 = vmatprep.mubr.msk.bf16.mxu1 %vm2568_vm4, %v8687_v5  ;;  %v1204_v60 = vpop.f32.mrb[146].mxu0  ;;  %v3019_v58 = vsel %vm3013_vm8, %v2920_v31, %v8837_v19 }
 0x1fe   :  { %v9058_v44 = vpop.permute.xlu0 %2084  ;;  %v9060_v2 = vpop.permute.xlu1 %2280  ;;  %v1632_v43 = vmax.f32 %v1202_v29, 0.0  ;;  %v1205_v49 = vadd.f32 %v8850_v34, %v1204_v60 }
 0x1ff   :  { %v7381_v55 = vpop.f32.mrb[147].mxu0 }
 0x200   :  { %1896 = vrot.lane.b32.xlu0 %v8870_v21, %s8056_s15  ;;  %v1633_v40 = vmax.f32 %v1205_v49, 0.0  ;;  %v7949_v55 = vld [vmem:[%s12348_s0 + $0x200] sm:$0xff]  }
 0x201   :  { %2199 = vrot.lane.b32.xlu1 %v8896_v13, %s8059_s20  ;;  %7487 = vmatmul.mubr.msk.bf16.gmra.mrb[252].mxu0 %vm628_vm3, %v7948_v53  ;;  %v3118_v53 = vsel %vm3112_vm9, %v3019_v58, %v2376_v22 }
 0x202   :  { %v9073_v54 = vpop.permute.xlu0 %1880  ;;  %v9075_v62 = vpop.permute.xlu1 %2183  ;;  %v9077_v4 = vpack.c.bf16 %v1633_v40, %v1632_v43  ;;  %7490 = vmatprep.mubr.msk.bf16.mxu0 %vm8055_vm2, %v12438_v7 }
 0x203   :  { %v1209_v17 = vpop.f32.mrb[148].mxu0 }
 0x204   :  { %12453 = vst [vmem:[#allocation37_spill] sm:$0xff] %v9077_v4  ;;  %2490 = vrot.lane.b32.xlu0 %v8922_v24, %s8063_s19  ;;  %v1210_v51 = vadd.f32 %v8850_v34, %v1209_v17  ;;  %v7384_v29 = vpop.f32.mrb[149].mxu0 }
 0x205   :  { %2102 = vrot.lane.b32.xlu1 %v8896_v13, %s8058_s16  ;;  %v1212_v60 = vpop.f32.mrb[150].mxu0  ;;  %v2580_v29 = vsel %vm2568_vm4, %v8351_v10, %v8680_v3 }
 0x206   :  { %v9093_v1 = vpop.permute.xlu1 %2086  ;;  %v2475_v43 = vpop.permute.xlu0 %2474  ;;  %v1634_v49 = vmax.f32 %v1210_v51, 0.0  ;;  %v1213_v25 = vadd.f32 %v8850_v34, %v1212_v60  ;;  %v2724_v60 = vsel %vm2716_vm5, %v2580_v29, %v8709_v26 }
 0x207   :  { %v3219_v40 = vsel %vm3211_vm10, %v3118_v53, %v2475_v43  ;;  %v7385_v18 = vpop.f32.mrb[151].mxu0  ;;  %v2823_v10 = vsel %vm2815_vm6, %v2724_v60, %v8827_v59 }
 0x208   :  { %3609 = vmatmul.mubr.bf16.gmra.mrb[8].mxu1 %v3219_v40  ;;  %2393 = vrot.lane.b32.xlu0 %v8922_v24, %s8062_s30  ;;  %v1635_v19 = vmax.f32 %v1213_v25, 0.0  ;;  %v2922_v40 = vsel %vm2914_vm7, %v2823_v10, %v8858_v9 }
 0x209   :  { %2001 = vrot.lane.b32.xlu1 %v8896_v13, %s8057_s18  ;;  %6785 = vmatprep.mubr.msk.bf16.mxu1 %vm2568_vm4, %v8713_v28  ;;  %v3021_v18 = vsel %vm3013_vm8, %v2922_v40, %v8868_v36 }
 0x20a   :  { %v9106_v22 = vpop.permute.xlu1 %1985  ;;  %v2378_v48 = vpop.permute.xlu0 %2377  ;;  %v9108_v63 = vpack.c.bf16 %v1635_v19, %v1634_v49  ;;  %7491 = vmatmul.mubr.msk.bf16.gmra.mrb[0].mxu0 %vm628_vm3, %v7949_v55  ;;  %v7950_v55 = vld [vmem:[%s12348_s0 + $0x208] sm:$0xff]  }
 0x20b   :  { %v1217_v17 = vpop.f32.mrb[152].mxu0  ;;  %7494 = vmatprep.mubr.msk.bf16.mxu0 %vm8055_vm2, %v12438_v7  ;;  %v3120_v19 = vsel %vm3112_vm9, %v3021_v18, %v2378_v48 }
 0x20c   :  { %12454 = vst [vmem:[#allocation38_spill] sm:$0xff] %v9108_v63  ;;  %2298 = vrot.lane.b32.xlu0 %v8922_v24, %s8060_s23  ;;  %v1218_v31 = vadd.f32 %v8850_v34, %v1217_v17  ;;  %v7388_v51 = vpop.f32.mrb[153].mxu0 }
 0x20d   :  { %1898 = vrot.lane.b32.xlu1 %v8896_v13, %s8056_s15  ;;  %v1220_v58 = vpop.f32.mrb[154].mxu0 }
 0x20e   :  { %v9123_v53 = vpop.permute.xlu1 %1882  ;;  %v9125_v43 = vpop.permute.xlu0 %2282  ;;  %v1636_v49 = vmax.f32 %v1218_v31, 0.0  ;;  %v1221_v25 = vadd.f32 %v8850_v34, %v1220_v58 }
 0x20f   :  { %v7389_v3 = vpop.f32.mrb[155].mxu0 }
 0x210   :  { %2201 = vrot.lane.b32.xlu0 %v8922_v24, %s8059_s20  ;;  %v1637_v26 = vmax.f32 %v1221_v25, 0.0 }
 0x211   :  { %2492 = vrot.lane.b32.xlu1 %v8948_v12, %s8063_s19 }
 0x212   :  { %v9142_v17 = vpop.permute.xlu0 %2185  ;;  %v2477_v31 = vpop.permute.xlu1 %2476  ;;  %v9144_v59 = vpack.c.bf16 %v1637_v26, %v1636_v49  ;;  %7495 = vmatmul.mubr.msk.bf16.gmra.mrb[4].mxu0 %vm628_vm3, %v7950_v55  ;;  %v7951_v55 = vld [vmem:[%s12348_s0 + $0x210] sm:$0xff]  }
 0x213   :  { %v3222_v9 = vsel %vm3211_vm10, %v3120_v19, %v2477_v31  ;;  %v1225_v51 = vpop.f32.mrb[156].mxu0  ;;  %7498 = vmatprep.mubr.msk.bf16.mxu0 %vm8055_vm2, %v12438_v7  ;;  %v2583_v31 = vsel %vm2568_vm4, %v8365_v20, %v8728_v45 }
 0x214   :  { %12455 = vst [vmem:[#allocation39_spill] sm:$0xff] %v9144_v59  ;;  %3617 = vmatmul.mubr.bf16.gmra.mrb[12].mxu1 %v3222_v9  ;;  %2104 = vrot.lane.b32.xlu0 %v8922_v24, %s8058_s16  ;;  %v1226_v36 = vadd.f32 %v8850_v34, %v1225_v51  ;;  %v7392_v48 = vpop.f32.mrb[157].mxu0 }
 0x215   :  { %2395 = vrot.lane.b32.xlu1 %v8948_v12, %s8062_s30  ;;  %6786 = vmatprep.mubr.msk.bf16.mxu1 %vm2568_vm4, %v8737_v50  ;;  %v1228_v29 = vpop.f32.mrb[158].mxu0 }
 0x216   :  { %v9157_v58 = vpop.permute.xlu0 %2088  ;;  %v2380_v60 = vpop.permute.xlu1 %2379  ;;  %v1638_v49 = vmax.f32 %v1226_v36, 0.0  ;;  %v1229_v25 = vadd.f32 %v8850_v34, %v1228_v29  ;;  %v2726_v36 = vsel %vm2716_vm5, %v2583_v31, %v8691_v11 }
 0x217   :  { %v7393_v10 = vpop.f32.mrb[159].mxu0  ;;  %v2825_v20 = vsel %vm2815_vm6, %v2726_v36, %v8866_v39 }
 0x218   :  { %2003 = vrot.lane.b32.xlu0 %v8922_v24, %s8057_s18  ;;  %v1639_v3 = vmax.f32 %v1229_v25, 0.0  ;;  %v2924_v25 = vsel %vm2914_vm7, %v2825_v20, %v8884_v33 }
 0x219   :  { %2300 = vrot.lane.b32.xlu1 %v8948_v12, %s8060_s23 }
 0x21a   :  { %v9167_v40 = vpop.permute.xlu0 %1987  ;;  %v9169_v26 = vpop.permute.xlu1 %2284  ;;  %v9171_v18 = vpack.c.bf16 %v1639_v3, %v1638_v49  ;;  %7499 = vmatmul.mubr.msk.bf16.gmra.mrb[8].mxu0 %vm628_vm3, %v7951_v55  ;;  %v7952_v49 = vld [vmem:[%s12348_s0 + $0x218] sm:$0xff]   ;;  %v3023_v3 = vsel %vm3013_vm8, %v2924_v25, %v8910_v37 }
 0x21b   :  { %7502 = vmatprep.mubr.msk.bf16.mxu0 %vm8055_vm2, %v12438_v7 }
 0x21c   :  { %12456 = vst [vmem:[#allocation40_spill] sm:$0xff] %v9171_v18  ;;  %1900 = vrot.lane.b32.xlu0 %v8922_v24, %s8056_s15  ;;  %v1233_v19 = vpop.f32.mrb[160].mxu0 }
 0x21d   :  { %2203 = vrot.lane.b32.xlu1 %v8948_v12, %s8059_s20  ;;  %v1234_v9 = vadd.f32 %v8850_v34, %v1233_v19  ;;  %v7396_v51 = vpop.f32.mrb[161].mxu0  ;;  %v3122_v19 = vsel %vm3112_vm9, %v3023_v3, %v2380_v60 }
 0x21e   :  { %v9186_v48 = vpop.permute.xlu0 %1884  ;;  %v9188_v29 = vpop.permute.xlu1 %2187 }
 0x21f   :  { %v1236_v45 = vpop.f32.mrb[162].mxu0  ;;  %v1640_v55 = vmax.f32 %v1234_v9, 0.0 }
 0x220   :  { %2494 = vrot.lane.b32.xlu0 %v8974_v8, %s8063_s19  ;;  %v1237_v11 = vadd.f32 %v8850_v34, %v1236_v45  ;;  %v7397_v10 = vpop.f32.mrb[163].mxu0  ;;  %v7953_v45 = vld [vmem:[%s12348_s0 + $0x220] sm:$0xff]  }
 0x221   :  { %2106 = vrot.lane.b32.xlu1 %v8948_v12, %s8058_s16 }
 0x222   :  { %v9205_v39 = vpop.permute.xlu1 %2090  ;;  %v2479_v31 = vpop.permute.xlu0 %2478  ;;  %v1641_v51 = vmax.f32 %v1237_v11, 0.0  ;;  %7503 = vmatmul.mubr.msk.bf16.gmra.mrb[12].mxu0 %vm628_vm3, %v7952_v49 }
 0x223   :  { %v3225_v33 = vsel %vm3211_vm10, %v3122_v19, %v2479_v31  ;;  %7506 = vmatprep.mubr.msk.bf16.mxu0 %vm8055_vm2, %v12438_v7 }
 0x224   :  { %3625 = vmatmul.mubr.bf16.gmra.mrb[16].mxu1 %v3225_v33  ;;  %2397 = vrot.lane.b32.xlu0 %v8974_v8, %s8062_s30  ;;  %v9213_v37 = vpack.c.bf16 %v1641_v51, %v1640_v55  ;;  %v1241_v9 = vpop.f32.mrb[164].mxu0 }
 0x225   :  { %2005 = vrot.lane.b32.xlu1 %v8948_v12, %s8057_s18  ;;  %6787 = vmatprep.mubr.msk.bf16.mxu1 %vm2568_vm4, %v8761_v15  ;;  %v1242_v60 = vadd.f32 %v8850_v34, %v1241_v9  ;;  %v7400_v36 = vpop.f32.mrb[165].mxu0  ;;  %v2586_v15 = vsel %vm2568_vm4, %v8379_v30, %v8711_v27 }
 0x226   :  { %12457 = vst [vmem:[#allocation41_spill] sm:$0xff] %v9213_v37  ;;  %v9220_v49 = vpop.permute.xlu1 %1989  ;;  %v2382_v20 = vpop.permute.xlu0 %2381  ;;  %v2728_v3 = vsel %vm2716_vm5, %v2586_v15, %v8741_v56 }
 0x227   :  { %v1244_v25 = vpop.f32.mrb[166].mxu0  ;;  %v1642_v55 = vmax.f32 %v1242_v60, 0.0  ;;  %v2827_v33 = vsel %vm2815_vm6, %v2728_v3, %v8894_v47 }
 0x228   :  { %2302 = vrot.lane.b32.xlu0 %v8974_v8, %s8060_s23  ;;  %v1245_v11 = vadd.f32 %v8850_v34, %v1244_v25  ;;  %v7401_v10 = vpop.f32.mrb[167].mxu0  ;;  %v2926_v30 = vsel %vm2914_vm7, %v2827_v33, %v8920_v16  ;;  %v7954_v25 = vld [vmem:[%s12348_s0 + $0x228] sm:$0xff]  }
 0x229   :  { %1902 = vrot.lane.b32.xlu1 %v8948_v12, %s8056_s15  ;;  %v3025_v9 = vsel %vm3013_vm8, %v2926_v30, %v8936_v0 }
 0x22a   :  { %v9235_v19 = vpop.permute.xlu1 %1886  ;;  %v9237_v31 = vpop.permute.xlu0 %2286  ;;  %v1643_v51 = vmax.f32 %v1245_v11, 0.0  ;;  %7507 = vmatmul.mubr.msk.bf16.gmra.mrb[16].mxu0 %vm628_vm3, %v7953_v45  ;;  %v3124_v36 = vsel %vm3112_vm9, %v3025_v9, %v2382_v20 }
 0x22b   :  { %7510 = vmatprep.mubr.msk.bf16.mxu0 %vm8055_vm2, %v12438_v7 }
 0x22c   :  { %2205 = vrot.lane.b32.xlu0 %v8974_v8, %s8059_s20  ;;  %v9248_v27 = vpack.c.bf16 %v1643_v51, %v1642_v55  ;;  %v1249_v56 = vpop.f32.mrb[168].mxu0 }
 0x22d   :  { %2496 = vrot.lane.b32.xlu1 %v9008_v35, %s8063_s19  ;;  %v1250_v47 = vadd.f32 %v8850_v34, %v1249_v56  ;;  %v7404_v60 = vpop.f32.mrb[169].mxu0 }
 0x22e   :  { %12458 = vst [vmem:[#allocation42_spill] sm:$0xff] %v9248_v27  ;;  %v9256_v45 = vpop.permute.xlu0 %2189  ;;  %v2481_v16 = vpop.permute.xlu1 %2480  ;;  %v7955_v60 = vld [vmem:[%s12348_s0 + $0x230] sm:$0xff]  }
 0x22f   :  { %v3228_v55 = vsel %vm3211_vm10, %v3124_v36, %v2481_v16  ;;  %v1252_v11 = vpop.f32.mrb[170].mxu0  ;;  %v1644_v0 = vmax.f32 %v1250_v47, 0.0 }
 0x230   :  { %3633 = vmatmul.mubr.bf16.gmra.mrb[20].mxu1 %v3228_v55  ;;  %2108 = vrot.lane.b32.xlu0 %v8974_v8, %s8058_s16  ;;  %v1253_v10 = vadd.f32 %v8850_v34, %v1252_v11  ;;  %v7405_v15 = vpop.f32.mrb[171].mxu0  ;;  %v2589_v11 = vsel %vm2568_vm4, %v8393_v41, %v8759_v14  ;;  %v12460_v41 = vld [vmem:[#allocation30_spill] sm:$0xff] }
 0x231   :  { %2304 = vrot.lane.b32.xlu1 %v9008_v35, %s8060_s23  ;;  %6788 = vmatprep.mubr.msk.bf16.mxu1 %vm2568_vm4, %v8787_v46 }
 0x232   :  { %v9269_v20 = vpop.permute.xlu0 %2092  ;;  %v2384_v3 = vpop.permute.xlu1 %2383  ;;  %v1645_v51 = vmax.f32 %v1253_v10, 0.0  ;;  %7511 = vmatmul.mubr.msk.bf16.gmra.mrb[20].mxu0 %vm628_vm3, %v7954_v25 }
 0x233   :  { %7514 = vmatprep.mubr.msk.bf16.mxu0 %vm8055_vm2, %v12438_v7 }
 0x234   :  { %2007 = vrot.lane.b32.xlu0 %v8974_v8, %s8057_s18  ;;  %v9276_v33 = vpack.c.bf16 %v1645_v51, %v1644_v0  ;;  %v1257_v30 = vpop.f32.mrb[172].mxu0  ;;  %v2730_v0 = vsel %vm2716_vm5, %v2589_v11, %v8725_v38 }
 0x235   :  { %2207 = vrot.lane.b32.xlu1 %v9008_v35, %s8059_s20  ;;  %v1258_v46 = vadd.f32 %v8850_v34, %v1257_v30  ;;  %v7408_v56 = vpop.f32.mrb[173].mxu0  ;;  %v2829_v30 = vsel %vm2815_vm6, %v2730_v0, %v8934_v6 }
 0x236   :  { %12459 = vst [vmem:[#allocation43_spill] sm:$0xff] %v9276_v33  ;;  %v9281_v9 = vpop.permute.xlu0 %1991  ;;  %v9283_v47 = vpop.permute.xlu1 %2288  ;;  %v2928_v14 = vsel %vm2914_vm7, %v2829_v30, %v12460_v41  ;;  %v12461_v56 = vld [vmem:[#allocation35_spill] sm:$0xff] }
 0x237   :  { %v1260_v36 = vpop.f32.mrb[174].mxu0  ;;  %v1646_v16 = vmax.f32 %v1258_v46, 0.0 }
 0x238   :  { %1904 = vrot.lane.b32.xlu0 %v8974_v8, %s8056_s15  ;;  %v1261_v25 = vadd.f32 %v8850_v34, %v1260_v36  ;;  %v7409_v55 = vpop.f32.mrb[175].mxu0  ;;  %v3027_v36 = vsel %vm3013_vm8, %v2928_v14, %v12461_v56 }
 0x239   :  { %2009 = vrot.lane.b32.xlu1 %v9008_v35, %s8057_s18 }
 0x23a   :  { %v9298_v10 = vpop.permute.xlu0 %1888  ;;  %v9300_v15 = vpop.permute.xlu1 %2191  ;;  %v1647_v51 = vmax.f32 %v1261_v25, 0.0  ;;  %7515 = vmatmul.mubr.msk.bf16.gmra.mrb[24].mxu0 %vm628_vm3, %v7955_v60  ;;  %v3126_v25 = vsel %vm3112_vm9, %v3027_v36, %v2384_v3 }
 0x23b   :  { %7518 = vmatprep.mubr.msk.bf16.mxu0 %vm8055_vm2, %v12438_v7 }
 0x23c   :  { %2306 = vrot.lane.b32.xlu0 %v9043_v23, %s8060_s23  ;;  %v9311_v38 = vpack.c.bf16 %v1647_v51, %v1646_v16  ;;  %v1265_v46 = vpop.f32.mrb[176].mxu0  ;;  %v7956_v16 = vld [vmem:[%s12348_s0 + $0x238] sm:$0xff]  }
 0x23d   :  { %1906 = vrot.lane.b32.xlu1 %v9008_v35, %s8056_s15  ;;  %v1266_v6 = vadd.f32 %v8850_v34, %v1265_v46  ;;  %v7412_v60 = vpop.f32.mrb[177].mxu0 }
 0x23e   :  { %v9319_v55 = vpop.permute.xlu1 %2094  ;;  %v2483_v11 = vpop.permute.xlu0 %2482 }
 0x23f   :  { %v3231_v0 = vsel %vm3211_vm10, %v3126_v25, %v2483_v11  ;;  %v1268_v51 = vpop.f32.mrb[178].mxu0  ;;  %v1648_v30 = vmax.f32 %v1266_v6, 0.0 }
 0x240   :  { %3641 = vmatmul.mubr.bf16.gmra.mrb[24].mxu1 %v3231_v0  ;;  %2011 = vrot.lane.b32.xlu0 %v9043_v23, %s8057_s18  ;;  %v1269_v41 = vadd.f32 %v8850_v34, %v1268_v51  ;;  %v7413_v14 = vpop.f32.mrb[179].mxu0 }
 0x241   :  { %2399 = vrot.lane.b32.xlu1 %v9077_v4, %s8062_s30  ;;  %6789 = vmatprep.mubr.msk.bf16.mxu1 %vm2568_vm4, %v8870_v21  ;;  %v12465_v21 = vld [vmem:[#allocation15_spill] sm:$0xff] }
 0x242   :  { %v9332_v3 = vpop.permute.xlu1 %1993  ;;  %v9334_v46 = vpop.permute.xlu0 %2290  ;;  %v1649_v56 = vmax.f32 %v1269_v41, 0.0  ;;  %7519 = vmatmul.mubr.msk.bf16.gmra.mrb[28].mxu0 %vm628_vm3, %v7956_v16  ;;  %v7957_v16 = vld [vmem:[%s12348_s0 + $0x240] sm:$0xff]  }
 0x243   :  { %7522 = vmatprep.mubr.msk.bf16.mxu0 %vm8055_vm2, %v12438_v7 }
 0x244   :  { %2498 = vrot.lane.b32.xlu0 %v9108_v63, %s8063_s19  ;;  %v9341_v36 = vpack.c.bf16 %v1649_v56, %v1648_v30  ;;  %v1273_v6 = vpop.f32.mrb[180].mxu0 }
 0x245   :  { %2110 = vrot.lane.b32.xlu1 %v9077_v4, %s8058_s16  ;;  %v1274_v60 = vadd.f32 %v8850_v34, %v1273_v6  ;;  %v7416_v25 = vpop.f32.mrb[181].mxu0 }
 0x246   :  { %v9346_v11 = vpop.permute.xlu1 %1890  ;;  %v9348_v0 = vpop.permute.xlu0 %2193 }
 0x247   :  { %12462 = vst [vmem:[#allocation30_spill] sm:$0xff] %v9346_v11  ;;  %v1276_v51 = vpop.f32.mrb[182].mxu0  ;;  %v1650_v30 = vmax.f32 %v1274_v60, 0.0 }
 0x248   :  { %2401 = vrot.lane.b32.xlu0 %v9108_v63, %s8062_s30  ;;  %v1277_v41 = vadd.f32 %v8850_v34, %v1276_v51  ;;  %v7417_v14 = vpop.f32.mrb[183].mxu0 }
 0x249   :  { %2500 = vrot.lane.b32.xlu1 %v9144_v59, %s8063_s19 }
 0x24a   :  { %v9358_v56 = vpop.permute.xlu0 %1995  ;;  %v9360_v6 = vpop.permute.xlu1 %2292  ;;  %v1651_v25 = vmax.f32 %v1277_v41, 0.0  ;;  %7523 = vmatmul.mubr.msk.bf16.gmra.mrb[32].mxu0 %vm628_vm3, %v7957_v16  ;;  %v2592_v41 = vsel %vm2568_vm4, %v12466_v32, %v12465_v21 }
 0x24b   :  { %12463 = vst [vmem:[#allocation35_spill] sm:$0xff] %v9358_v56  ;;  %7526 = vmatprep.mubr.msk.bf16.mxu0 %vm8055_vm2, %v12438_v7 }
 0x24c   :  { %2209 = vrot.lane.b32.xlu0 %v9108_v63, %s8059_s20  ;;  %v9367_v60 = vpack.c.bf16 %v1651_v25, %v1650_v30  ;;  %v1281_v51 = vpop.f32.mrb[184].mxu0  ;;  %v7958_v30 = vld [vmem:[%s12348_s0 + $0x248] sm:$0xff]  }
 0x24d   :  { %2403 = vrot.lane.b32.xlu1 %v9144_v59, %s8062_s30  ;;  %v1282_v14 = vadd.f32 %v8850_v34, %v1281_v51  ;;  %v7420_v4 = vpop.f32.mrb[185].mxu0  ;;  %v12469_v25 = vld [vmem:[#allocation16_spill] sm:$0xff] }
 0x24e   :  { %12464 = vst [vmem:[#allocation44_spill] sm:$0xff] %v9367_v60  ;;  %v9375_v16 = vpop.permute.xlu0 %1892  ;;  %v9377_v50 = vpop.permute.xlu1 %1997  ;;  %v2732_v56 = vsel %vm2716_vm5, %v2592_v41, %v12469_v25 }
 0x24f   :  { %12467 = vst [vmem:[#allocation15_spill] sm:$0xff] %v9375_v16  ;;  %12468 = vst [vmem:[#allocation3_spill] sm:$0xff] %v9377_v50  ;;  %v1284_v28 = vpop.f32.mrb[186].mxu0  ;;  %v2831_v51 = vsel %vm2815_vm6, %v2732_v56, %v9006_v61  ;;  %v1652_v4 = vmax.f32 %v1282_v14, 0.0  ;;  %v12471_v14 = vld [vmem:[#allocation18_spill] sm:$0xff] }
 0x250   :  { %2112 = vrot.lane.b32.xlu0 %v9108_v63, %s8058_s16  ;;  %v1285_v21 = vadd.f32 %v8850_v34, %v1284_v28  ;;  %v7421_v32 = vpop.f32.mrb[187].mxu0  ;;  %v2930_v50 = vsel %vm2914_vm7, %v2831_v51, %v9041_v42 }
 0x251   :  { %2308 = vrot.lane.b32.xlu1 %v9144_v59, %s8060_s23  ;;  %v3029_v41 = vsel %vm3013_vm8, %v2930_v50, %v9060_v2  ;;  %v12472_v50 = vld [vmem:[#allocation4_spill] sm:$0xff] }
 0x252   :  { %v2386_v25 = vpop.permute.xlu0 %2385  ;;  %v2485_v16 = vpop.permute.xlu1 %2484  ;;  %v1653_v11 = vmax.f32 %v1285_v21, 0.0  ;;  %7527 = vmatmul.mubr.msk.bf16.gmra.mrb[36].mxu0 %vm628_vm3, %v7958_v30  ;;  %v2595_v2 = vsel %vm2568_vm4, %v12472_v50, %v12471_v14  ;;  %v12473_v21 = vld [vmem:[#allocation19_spill] sm:$0xff] }
 0x253   :  { %v3128_v61 = vsel %vm3112_vm9, %v3029_v41, %v2386_v25  ;;  %7530 = vmatprep.mubr.msk.bf16.mxu0 %vm8055_vm2, %v12438_v7  ;;  %v2734_v32 = vsel %vm2716_vm5, %v2595_v2, %v12473_v21 }
 0x254   :  { %1908 = vrot.lane.b32.xlu0 %v9108_v63, %s8056_s15  ;;  %v3234_v28 = vsel %vm3211_vm10, %v3128_v61, %v2485_v16  ;;  %v9402_v42 = vpack.c.bf16 %v1653_v11, %v1652_v4  ;;  %v1289_v56 = vpop.f32.mrb[188].mxu0  ;;  %v7959_v11 = vld [vmem:[%s12348_s0 + $0x250] sm:$0xff]   ;;  %v2833_v4 = vsel %vm2815_vm6, %v2734_v32, %v9058_v44 }
 0x255   :  { %2211 = vrot.lane.b32.xlu1 %v9144_v59, %s8059_s20  ;;  %3649 = vmatmul.mubr.bf16.gmra.mrb[28].mxu1 %v3234_v28  ;;  %v1290_v30 = vadd.f32 %v8850_v34, %v1289_v56  ;;  %v7424_v51 = vpop.f32.mrb[189].mxu0  ;;  %v2932_v61 = vsel %vm2914_vm7, %v2833_v4, %v9075_v62 }
 0x256   :  { %12470 = vst [vmem:[#allocation16_spill] sm:$0xff] %v9402_v42  ;;  %v9412_v41 = vpop.permute.xlu0 %2096  ;;  %v2388_v16 = vpop.permute.xlu1 %2387  ;;  %6790 = vmatprep.mubr.msk.bf16.mxu1 %vm2568_vm4, %v8896_v13  ;;  %v3031_v50 = vsel %vm3013_vm8, %v2932_v61, %v9125_v43 }
 0x257   :  { %v1292_v25 = vpop.f32.mrb[190].mxu0  ;;  %v1654_v28 = vmax.f32 %v1290_v30, 0.0  ;;  %v3130_v2 = vsel %vm3112_vm9, %v3031_v50, %v2388_v16  ;;  %v12475_v50 = vld [vmem:[#allocation21_spill] sm:$0xff] }
 0x258   :  { %2502 = vrot.lane.b32.xlu0 %v9171_v18, %s8063_s19  ;;  %v1293_v56 = vadd.f32 %v8850_v34, %v1292_v25  ;;  %v7425_v14 = vpop.f32.mrb[191].mxu0  ;;  %v7960_v25 = vld [vmem:[%s12348_s0 + $0x258] sm:$0xff]  }
 0x259   :  { %2114 = vrot.lane.b32.xlu1 %v9144_v59, %s8058_s16 }
 0x25a   :  { %v9431_v44 = vpop.permute.xlu1 %2195  ;;  %v2487_v51 = vpop.permute.xlu0 %2486  ;;  %v1655_v21 = vmax.f32 %v1293_v56, 0.0  ;;  %7531 = vmatmul.mubr.msk.bf16.gmra.mrb[40].mxu0 %vm628_vm3, %v7959_v11 }
 0x25b   :  { %v3237_v62 = vsel %vm3211_vm10, %v3130_v2, %v2487_v51  ;;  %7534 = vmatprep.mubr.msk.bf16.mxu0 %vm8055_vm2, %v12438_v7  ;;  %v12476_v2 = vld [vmem:[#allocation5_spill] sm:$0xff] }
 0x25c   :  { %2405 = vrot.lane.b32.xlu0 %v9171_v18, %s8062_s30  ;;  %v9439_v43 = vpack.c.bf16 %v1655_v21, %v1654_v28  ;;  %v1297_v30 = vpop.f32.mrb[192].mxu0  ;;  %v2598_v51 = vsel %vm2568_vm4, %v12476_v2, %v12475_v50 }
 0x25d   :  { %2013 = vrot.lane.b32.xlu1 %v9144_v59, %s8057_s18  ;;  %3657 = vmatmul.mubr.bf16.gmra.mrb[32].mxu1 %v3237_v62  ;;  %v1298_v32 = vadd.f32 %v8850_v34, %v1297_v30  ;;  %v7428_v16 = vpop.f32.mrb[193].mxu0 }
 0x25e   :  { %12474 = vst [vmem:[#allocation18_spill] sm:$0xff] %v9439_v43  ;;  %v9444_v4 = vpop.permute.xlu1 %2098  ;;  %v2390_v11 = vpop.permute.xlu0 %2389  ;;  %6791 = vmatprep.mubr.msk.bf16.mxu1 %vm2568_vm4, %v8922_v24  ;;  %v12478_v16 = vld [vmem:[#allocation23_spill] sm:$0xff]  ;;  %v12484_v24 = vld [vmem:[#allocation26_spill] sm:$0xff] }
 0x25f   :  { %v1300_v61 = vpop.f32.mrb[194].mxu0  ;;  %v1656_v28 = vmax.f32 %v1298_v32, 0.0  ;;  %v2736_v32 = vsel %vm2716_vm5, %v2598_v51, %v12478_v16 }
 0x260   :  { %2310 = vrot.lane.b32.xlu0 %v9171_v18, %s8060_s23  ;;  %v1301_v56 = vadd.f32 %v8850_v34, %v1300_v61  ;;  %v7429_v14 = vpop.f32.mrb[195].mxu0  ;;  %v2835_v61 = vsel %vm2815_vm6, %v2736_v32, %v9093_v1 }
 0x261   :  { %1910 = vrot.lane.b32.xlu1 %v9144_v59, %s8056_s15 }
 0x262   :  { %v9459_v21 = vpop.permute.xlu1 %1894  ;;  %v9461_v62 = vpop.permute.xlu0 %2294  ;;  %v1657_v30 = vmax.f32 %v1301_v56, 0.0  ;;  %7535 = vmatmul.mubr.msk.bf16.gmra.mrb[44].mxu0 %vm628_vm3, %v7960_v25  ;;  %v2934_v56 = vsel %vm2914_vm7, %v2835_v61, %v9142_v17 }
 0x263   :  { %12477 = vst [vmem:[#allocation4_spill] sm:$0xff] %v9459_v21  ;;  %7538 = vmatprep.mubr.msk.bf16.mxu0 %vm8055_vm2, %v12438_v7  ;;  %v3033_v51 = vsel %vm3013_vm8, %v2934_v56, %v9169_v26 }
 0x264   :  { %2213 = vrot.lane.b32.xlu0 %v9171_v18, %s8059_s20  ;;  %v9472_v14 = vpack.c.bf16 %v1657_v30, %v1656_v28  ;;  %v1305_v50 = vpop.f32.mrb[196].mxu0  ;;  %v7961_v28 = vld [vmem:[%s12348_s0 + $0x260] sm:$0xff]   ;;  %v3132_v30 = vsel %vm3112_vm9, %v3033_v51, %v2390_v11 }
 0x265   :  { %2504 = vrot.lane.b32.xlu1 %v9213_v37, %s8063_s19  ;;  %v1306_v25 = vadd.f32 %v8850_v34, %v1305_v50  ;;  %v7432_v2 = vpop.f32.mrb[197].mxu0 }
 0x266   :  { %12479 = vst [vmem:[#allocation19_spill] sm:$0xff] %v9472_v14  ;;  %v9481_v16 = vpop.permute.xlu0 %2197  ;;  %v1308_v1 = vpop.f32.mrb[198].mxu0 }
 0x267   :  { %v2489_v32 = vpop.permute.xlu1 %2488  ;;  %v1658_v17 = vmax.f32 %v1306_v25, 0.0  ;;  %v1309_v61 = vadd.f32 %v8850_v34, %v1308_v1  ;;  %v7433_v63 = vpop.f32.mrb[199].mxu0  ;;  %v9509_v25 = vld [vmem:[%s12349_s2] ss:$0 sm:$0xff] }
 0x268   :  { %v3240_v50 = vsel %vm3211_vm10, %v3132_v30, %v2489_v32  ;;  %2116 = vrot.lane.b32.xlu0 %v9171_v18, %s8058_s16  ;;  %v7962_v30 = vld [vmem:[%s12348_s0 + $0x268] sm:$0xff]  }
 0x269   :  { %3665 = vmatmul.mubr.bf16.gmra.mrb[36].mxu1 %v3240_v50  ;;  %2407 = vrot.lane.b32.xlu1 %v9213_v37, %s8062_s30  ;;  %v1659_v26 = vmax.f32 %v1309_v61, 0.0 }
 0x26a   :  { %6792 = vmatprep.mubr.msk.bf16.mxu1 %vm2568_vm4, %v8948_v12  ;;  %v9495_v56 = vpop.permute.xlu0 %2100  ;;  %7539 = vmatmul.mubr.msk.bf16.gmra.mrb[48].mxu0 %vm628_vm3, %v7961_v28  ;;  %v12483_v12 = vld [vmem:[#allocation6_spill] sm:$0xff] }
 0x26b   :  { %v2392_v11 = vpop.permute.xlu1 %2391  ;;  %v9498_v34 = vpack.c.bf16 %v1659_v26, %v1658_v17  ;;  %7542 = vmatprep.mubr.msk.bf16.mxu0 %vm8055_vm2, %v12438_v7  ;;  %v12482_v26 = vld [vmem:[#allocation24_spill] sm:$0xff] }
 0x26c   :  { %2015 = vrot.lane.b32.xlu0 %v9171_v18, %s8057_s18  ;;  %v1313_v63 = vpop.f32.mrb[200].mxu0 }
 0x26d   :  { %12480 = vst [vmem:[#allocation21_spill] sm:$0xff] %v9498_v34  ;;  %2312 = vrot.lane.b32.xlu1 %v9213_v37, %s8060_s23  ;;  %v1314_v2 = vadd.f32 %v9509_v25, %v1313_v63  ;;  %v7436_v51 = vpop.f32.mrb[201].mxu0  ;;  %v2601_v63 = vsel %vm2568_vm4, %v12483_v12, %v12482_v26 }
 0x26e   :  { %v9512_v1 = vpop.permute.xlu0 %1999  ;;  %v1316_v28 = vpop.f32.mrb[202].mxu0  ;;  %v2738_v13 = vsel %vm2716_vm5, %v2601_v63, %v12484_v24 }
 0x26f   :  { %12481 = vst [vmem:[#allocation5_spill] sm:$0xff] %v9512_v1  ;;  %v9517_v32 = vpop.permute.xlu1 %2296  ;;  %v1660_v17 = vmax.f32 %v1314_v2, 0.0  ;;  %v1317_v61 = vadd.f32 %v9509_v25, %v1316_v28  ;;  %v7437_v50 = vpop.f32.mrb[203].mxu0  ;;  %v2837_v2 = vsel %vm2815_vm6, %v2738_v13, %v9157_v58 }
 0x270   :  { %1912 = vrot.lane.b32.xlu0 %v9171_v18, %s8056_s15  ;;  %v2936_v12 = vsel %vm2914_vm7, %v2837_v2, %v9188_v29  ;;  %v7963_v29 = vld [vmem:[%s12348_s0 + $0x270] sm:$0xff]  }
 0x271   :  { %2215 = vrot.lane.b32.xlu1 %v9213_v37, %s8059_s20  ;;  %v1661_v51 = vmax.f32 %v1317_v61, 0.0 }
 0x272   :  { %v9529_v1 = vpop.permute.xlu0 %1896  ;;  %7543 = vmatmul.mubr.msk.bf16.gmra.mrb[52].mxu0 %vm628_vm3, %v7962_v30  ;;  %v3035_v30 = vsel %vm3013_vm8, %v2936_v12, %v9237_v31 }
 0x273   :  { %12485 = vst [vmem:[#allocation23_spill] sm:$0xff] %v9529_v1  ;;  %v9534_v28 = vpop.permute.xlu1 %2199  ;;  %v9536_v50 = vpack.c.bf16 %v1661_v51, %v1660_v17  ;;  %7546 = vmatprep.mubr.msk.bf16.mxu0 %vm8055_vm2, %v12438_v7  ;;  %v3134_v17 = vsel %vm3112_vm9, %v3035_v30, %v2392_v11 }
 0x274   :  { %2506 = vrot.lane.b32.xlu0 %v9248_v27, %s8063_s19  ;;  %v1321_v24 = vpop.f32.mrb[204].mxu0 }
 0x275   :  { %12486 = vst [vmem:[#allocation24_spill] sm:$0xff] %v9536_v50  ;;  %2118 = vrot.lane.b32.xlu1 %v9213_v37, %s8058_s16  ;;  %v1322_v13 = vadd.f32 %v9509_v25, %v1321_v24  ;;  %v7440_v58 = vpop.f32.mrb[205].mxu0 }
 0x276   :  { %v2491_v61 = vpop.permute.xlu0 %2490  ;;  %v1324_v26 = vpop.f32.mrb[206].mxu0 }
 0x277   :  { %v9553_v63 = vpop.permute.xlu1 %2102  ;;  %v3243_v51 = vsel %vm3211_vm10, %v3134_v17, %v2491_v61  ;;  %v1662_v2 = vmax.f32 %v1322_v13, 0.0  ;;  %v1325_v31 = vadd.f32 %v9509_v25, %v1324_v26  ;;  %v7441_v12 = vpop.f32.mrb[207].mxu0  ;;  %v12489_v26 = vld [vmem:[#allocation27_spill] sm:$0xff] }
 0x278   :  { %3673 = vmatmul.mubr.bf16.gmra.mrb[40].mxu1 %v3243_v51  ;;  %2409 = vrot.lane.b32.xlu0 %v9248_v27, %s8062_s30  ;;  %v12490_v51 = vld [vmem:[#allocation7_spill] sm:$0xff]  ;;  %v12491_v12 = vld [vmem:[#allocation29_spill] sm:$0xff] }
 0x279   :  { %2017 = vrot.lane.b32.xlu1 %v9213_v37, %s8057_s18  ;;  %6793 = vmatprep.mubr.msk.bf16.mxu1 %vm2568_vm4, %v8974_v8  ;;  %v1663_v11 = vmax.f32 %v1325_v31, 0.0 }
 0x27a   :  { %v2394_v24 = vpop.permute.xlu0 %2393  ;;  %7547 = vmatmul.mubr.msk.bf16.gmra.mrb[56].mxu0 %vm628_vm3, %v7963_v29  ;;  %v2604_v29 = vsel %vm2568_vm4, %v12490_v51, %v12489_v26 }
 0x27b   :  { %v9564_v30 = vpop.permute.xlu1 %2001  ;;  %v9566_v13 = vpack.c.bf16 %v1663_v11, %v1662_v2  ;;  %7550 = vmatprep.mubr.msk.bf16.mxu0 %vm8055_vm2, %v12438_v7  ;;  %v2740_v11 = vsel %vm2716_vm5, %v2604_v29, %v12491_v12 }
 0x27c   :  { %12487 = vst [vmem:[#allocation6_spill] sm:$0xff] %v9564_v30  ;;  %2314 = vrot.lane.b32.xlu0 %v9248_v27, %s8060_s23  ;;  %v1329_v58 = vpop.f32.mrb[208].mxu0 }
 0x27d   :  { %12488 = vst [vmem:[#allocation26_spill] sm:$0xff] %v9566_v13  ;;  %1914 = vrot.lane.b32.xlu1 %v9213_v37, %s8056_s15  ;;  %v1330_v17 = vadd.f32 %v9509_v25, %v1329_v58  ;;  %v7444_v61 = vpop.f32.mrb[209].mxu0  ;;  %v2839_v58 = vsel %vm2815_vm6, %v2740_v11, %v9205_v39  ;;  %v7964_v39 = vld [vmem:[%s12348_s0 + $0x278] sm:$0xff]  }
 0x27e   :  { %v9578_v31 = vpop.permute.xlu0 %2298  ;;  %v1332_v2 = vpop.f32.mrb[210].mxu0  ;;  %v2938_v61 = vsel %vm2914_vm7, %v2839_v58, %v9256_v45 }
 0x27f   :  { %v9582_v8 = vpop.permute.xlu1 %1898  ;;  %v1664_v30 = vmax.f32 %v1330_v17, 0.0  ;;  %v1333_v1 = vadd.f32 %v9509_v25, %v1332_v2  ;;  %v7445_v21 = vpop.f32.mrb[211].mxu0  ;;  %v3037_v51 = vsel %vm3013_vm8, %v2938_v61, %v9283_v47 }
 0x280   :  { %12492 = vst [vmem:[#allocation27_spill] sm:$0xff] %v9582_v8  ;;  %2217 = vrot.lane.b32.xlu0 %v9248_v27, %s8059_s20  ;;  %v3136_v21 = vsel %vm3112_vm9, %v3037_v51, %v2394_v24 }
 0x281   :  { %2508 = vrot.lane.b32.xlu1 %v9276_v33, %s8063_s19  ;;  %v1665_v26 = vmax.f32 %v1333_v1, 0.0 }
 0x282   :  { %v9595_v17 = vpop.permute.xlu0 %2201  ;;  %7551 = vmatmul.mubr.msk.bf16.gmra.mrb[60].mxu0 %vm628_vm3, %v7964_v39 }
 0x283   :  { %v2493_v29 = vpop.permute.xlu1 %2492  ;;  %v9598_v2 = vpack.c.bf16 %v1665_v26, %v1664_v30  ;;  %7554 = vmatprep.mubr.msk.bf16.mxu0 %vm8055_vm2, %v12438_v7 }
 0x284   :  { %v3246_v45 = vsel %vm3211_vm10, %v3136_v21, %v2493_v29  ;;  %2120 = vrot.lane.b32.xlu0 %v9248_v27, %s8058_s16  ;;  %v1337_v1 = vpop.f32.mrb[212].mxu0  ;;  %v12494_v21 = vld [vmem:[#allocation32_spill] sm:$0xff] }
 0x285   :  { %3681 = vmatmul.mubr.bf16.gmra.mrb[44].mxu1 %v3246_v45  ;;  %2411 = vrot.lane.b32.xlu1 %v9276_v33, %s8062_s30  ;;  %v1338_v47 = vadd.f32 %v9509_v25, %v1337_v1  ;;  %v7448_v24 = vpop.f32.mrb[213].mxu0  ;;  %v12495_v29 = vld [vmem:[#allocation8_spill] sm:$0xff] }
 0x286   :  { %6794 = vmatprep.mubr.msk.bf16.mxu1 %vm2568_vm4, %v9008_v35  ;;  %v9611_v30 = vpop.permute.xlu0 %2104  ;;  %v1340_v12 = vpop.f32.mrb[214].mxu0  ;;  %v2607_v39 = vsel %vm2568_vm4, %v12495_v29, %v12494_v21 }
 0x287   :  { %v2396_v11 = vpop.permute.xlu1 %2395  ;;  %v1666_v58 = vmax.f32 %v1338_v47, 0.0  ;;  %v1341_v61 = vadd.f32 %v9509_v25, %v1340_v12  ;;  %v7449_v26 = vpop.f32.mrb[215].mxu0 }
 0x288   :  { %2019 = vrot.lane.b32.xlu0 %v9248_v27, %s8057_s18 }
 0x289   :  { %2316 = vrot.lane.b32.xlu1 %v9276_v33, %s8060_s23  ;;  %v1667_v35 = vmax.f32 %v1341_v61, 0.0  ;;  %v12497_v61 = vld [vmem:[#allocation33_spill] sm:$0xff] }
 0x28a   :  { %v9621_v51 = vpop.permute.xlu0 %2003  ;;  %v2742_v26 = vsel %vm2716_vm5, %v2607_v39, %v12497_v61 }
 0x28b   :  { %12493 = vst [vmem:[#allocation7_spill] sm:$0xff] %v9621_v51  ;;  %v9626_v45 = vpop.permute.xlu1 %2300  ;;  %v9628_v1 = vpack.c.bf16 %v1667_v35, %v1666_v58  ;;  %v2841_v58 = vsel %vm2815_vm6, %v2742_v26, %v9269_v20 }
 0x28c   :  { %1916 = vrot.lane.b32.xlu0 %v9248_v27, %s8056_s15  ;;  %v1345_v47 = vpop.f32.mrb[216].mxu0 }
 0x28d   :  { %12496 = vst [vmem:[#allocation29_spill] sm:$0xff] %v9628_v1  ;;  %2219 = vrot.lane.b32.xlu1 %v9276_v33, %s8059_s20  ;;  %v1346_v24 = vadd.f32 %v9509_v25, %v1345_v47  ;;  %v7452_v12 = vpop.f32.mrb[217].mxu0  ;;  %v2940_v1 = vsel %vm2914_vm7, %v2841_v58, %v9300_v15 }
 0x28e   :  { %v9637_v7 = vpop.permute.xlu0 %1900  ;;  %v1348_v21 = vpop.f32.mrb[218].mxu0  ;;  %v3039_v39 = vsel %vm3013_vm8, %v2940_v1, %v9334_v46 }
 0x28f   :  { %v9641_v35 = vpop.permute.xlu1 %2203  ;;  %v1668_v29 = vmax.f32 %v1346_v24, 0.0  ;;  %v1349_v51 = vadd.f32 %v9509_v25, %v1348_v21  ;;  %v7453_v8 = vpop.f32.mrb[219].mxu0  ;;  %v3138_v20 = vsel %vm3112_vm9, %v3039_v39, %v2396_v11 }
 0x290   :  { %2510 = vrot.lane.b32.xlu0 %v9311_v38, %s8063_s19 }
 0x291   :  { %2122 = vrot.lane.b32.xlu1 %v9276_v33, %s8058_s16  ;;  %v1669_v47 = vmax.f32 %v1349_v51, 0.0 }
 0x292   :  { %v2495_v12 = vpop.permute.xlu0 %2494 }
 0x293   :  { %v9653_v24 = vpop.permute.xlu1 %2106  ;;  %v3249_v8 = vsel %vm3211_vm10, %v3138_v20, %v2495_v12  ;;  %v9656_v61 = vpack.c.bf16 %v1669_v47, %v1668_v29  ;;  %v12499_v47 = vld [vmem:[#allocation34_spill] sm:$0xff] }
 0x294   :  { %3689 = vmatmul.mubr.bf16.gmra.mrb[48].mxu1 %v3249_v8  ;;  %2318 = vrot.lane.b32.xlu0 %v9311_v38, %s8060_s23  ;;  %v1353_v15 = vpop.f32.mrb[220].mxu0 }
 0x295   :  { %12498 = vst [vmem:[#allocation32_spill] sm:$0xff] %v9656_v61  ;;  %2021 = vrot.lane.b32.xlu1 %v9276_v33, %s8057_s18  ;;  %6795 = vmatprep.mubr.msk.bf16.mxu1 %vm2568_vm4, %v9043_v23  ;;  %v1354_v46 = vadd.f32 %v9509_v25, %v1353_v15  ;;  %v7456_v11 = vpop.f32.mrb[221].mxu0  ;;  %v12500_v23 = vld [vmem:[#allocation9_spill] sm:$0xff] }
 0x296   :  { %v2398_v51 = vpop.permute.xlu0 %2397  ;;  %v1356_v1 = vpop.f32.mrb[222].mxu0  ;;  %v2610_v20 = vsel %vm2568_vm4, %v12500_v23, %v12499_v47 }
 0x297   :  { %v9665_v26 = vpop.permute.xlu1 %2005  ;;  %v1670_v21 = vmax.f32 %v1354_v46, 0.0  ;;  %v1357_v58 = vadd.f32 %v9509_v25, %v1356_v1  ;;  %v7457_v29 = vpop.f32.mrb[223].mxu0  ;;  %v2744_v8 = vsel %vm2716_vm5, %v2610_v20, %v8991_v57 }
 0x298   :  { %2221 = vrot.lane.b32.xlu0 %v9311_v38, %s8059_s20  ;;  %v2843_v11 = vsel %vm2815_vm6, %v2744_v8, %v9319_v55 }
 0x299   :  { %1918 = vrot.lane.b32.xlu1 %v9276_v33, %s8056_s15  ;;  %v1671_v39 = vmax.f32 %v1357_v58, 0.0  ;;  %v2942_v58 = vsel %vm2914_vm7, %v2843_v11, %v9348_v0 }
 0x29a   :  { %v9675_v12 = vpop.permute.xlu0 %2302 }
 0x29b   :  { %v9679_v15 = vpop.permute.xlu1 %1902  ;;  %v9681_v46 = vpack.c.bf16 %v1671_v39, %v1670_v21  ;;  %v3041_v21 = vsel %vm3013_vm8, %v2942_v58, %v9360_v6 }
 0x29c   :  { %12501 = vst [vmem:[#allocation8_spill] sm:$0xff] %v9679_v15  ;;  %2023 = vrot.lane.b32.xlu0 %v9311_v38, %s8057_s18  ;;  %v1361_v1 = vpop.f32.mrb[224].mxu0  ;;  %v3140_v55 = vsel %vm3112_vm9, %v3041_v21, %v2398_v51 }
 0x29d   :  { %12502 = vst [vmem:[#allocation33_spill] sm:$0xff] %v9681_v46  ;;  %2320 = vrot.lane.b32.xlu1 %v9341_v36, %s8060_s23  ;;  %v1362_v29 = vadd.f32 %v9509_v25, %v1361_v1  ;;  %v7460_v57 = vpop.f32.mrb[225].mxu0 }
 0x29e   :  { %v9694_v39 = vpop.permute.xlu0 %2205  ;;  %v1364_v47 = vpop.f32.mrb[226].mxu0 }
 0x29f   :  { %v2497_v23 = vpop.permute.xlu1 %2496  ;;  %v1672_v20 = vmax.f32 %v1362_v29, 0.0  ;;  %v1365_v8 = vadd.f32 %v9509_v25, %v1364_v47  ;;  %v7461_v15 = vpop.f32.mrb[227].mxu0 }
 0x2a0   :  { %v3252_v0 = vsel %vm3211_vm10, %v3140_v55, %v2497_v23  ;;  %1920 = vrot.lane.b32.xlu0 %v9311_v38, %s8056_s15 }
 0x2a1   :  { %3697 = vmatmul.mubr.bf16.gmra.mrb[52].mxu1 %v3252_v0  ;;  %2025 = vrot.lane.b32.xlu1 %v9341_v36, %s8057_s18  ;;  %v1673_v6 = vmax.f32 %v1365_v8, 0.0 }
 0x2a2   :  { %6796 = vmatprep.mubr.msk.bf16.mxu1 %vm2568_vm4, %v9144_v59  ;;  %v9705_v11 = vpop.permute.xlu0 %2108 }
 0x2a3   :  { %v9707_v51 = vpop.permute.xlu1 %2304  ;;  %v9709_v1 = vpack.c.bf16 %v1673_v6, %v1672_v20 }
 0x2a4   :  { %2413 = vrot.lane.b32.xlu0 %v9367_v60, %s8062_s30  ;;  %v1369_v15 = vpop.f32.mrb[228].mxu0 }
 0x2a5   :  { %12503 = vst [vmem:[#allocation34_spill] sm:$0xff] %v9709_v1  ;;  %2512 = vrot.lane.b32.xlu1 %v9402_v42, %s8063_s19  ;;  %v1370_v58 = vadd.f32 %v9509_v25, %v1369_v15  ;;  %v7464_v29 = vpop.f32.mrb[229].mxu0 }
 0x2a6   :  { %v9716_v57 = vpop.permute.xlu0 %2007  ;;  %v1372_v21 = vpop.f32.mrb[230].mxu0 }
 0x2a7   :  { %12504 = vst [vmem:[#allocation9_spill] sm:$0xff] %v9716_v57  ;;  %v9718_v47 = vpop.permute.xlu1 %2207  ;;  %v1674_v55 = vmax.f32 %v1370_v58, 0.0  ;;  %v1373_v23 = vadd.f32 %v9509_v25, %v1372_v21  ;;  %v7465_v20 = vpop.f32.mrb[231].mxu0 }
 0x2a8   :  { %2124 = vrot.lane.b32.xlu0 %v9367_v60, %s8058_s16 }
 0x2a9   :  { %2415 = vrot.lane.b32.xlu1 %v9402_v42, %s8062_s30  ;;  %v1675_v8 = vmax.f32 %v1373_v23, 0.0 }
 0x2aa   :  { %v9725_v0 = vpop.permute.xlu0 %1904 }
 0x2ab   :  { %12505 = vst [vmem:[#allocation45_spill] sm:$0xff] %v9725_v0  ;;  %v9727_v6 = vpop.permute.xlu1 %2009  ;;  %v9729_v15 = vpack.c.bf16 %v1675_v8, %v1674_v55  ;;  %v12509_v8 = vld [vmem:[#allocation10_spill] sm:$0xff] }
 0x2ac   :  { %12506 = vst [vmem:[#allocation46_spill] sm:$0xff] %v9727_v6  ;;  %2514 = vrot.lane.b32.xlu0 %v9439_v43, %s8063_s19  ;;  %v1377_v58 = vpop.f32.mrb[232].mxu0  ;;  %v2613_v0 = vsel %vm2568_vm4, %v12509_v8, %v9073_v54 }
 0x2ad   :  { %12507 = vst [vmem:[#allocation47_spill] sm:$0xff] %v9729_v15  ;;  %2223 = vrot.lane.b32.xlu1 %v9402_v42, %s8059_s20  ;;  %v1378_v29 = vadd.f32 %v9509_v25, %v1377_v58  ;;  %v7468_v21 = vpop.f32.mrb[233].mxu0 }
 0x2ae   :  { %v9736_v20 = vpop.permute.xlu0 %2306  ;;  %v1380_v60 = vpop.f32.mrb[234].mxu0  ;;  %v2746_v21 = vsel %vm2716_vm5, %v2613_v0, %v9106_v22 }
 0x2af   :  { %v9738_v23 = vpop.permute.xlu1 %1906  ;;  %v1676_v59 = vmax.f32 %v1378_v29, 0.0  ;;  %v1381_v6 = vadd.f32 %v9509_v25, %v1380_v60  ;;  %v7469_v55 = vpop.f32.mrb[235].mxu0  ;;  %v2845_v60 = vsel %vm2815_vm6, %v2746_v21, %v9412_v41 }
 0x2b0   :  { %12508 = vst [vmem:[#allocation48_spill] sm:$0xff] %v9738_v23  ;;  %2417 = vrot.lane.b32.xlu0 %v9439_v43, %s8062_s30  ;;  %v2944_v23 = vsel %vm2914_vm7, %v2845_v60, %v9431_v44  ;;  %v7965_v44 = vld [vmem:[%s12351_s5] sm:$0xff]  }
 0x2b1   :  { %2126 = vrot.lane.b32.xlu1 %v9402_v42, %s8058_s16  ;;  %v1677_v58 = vmax.f32 %v1381_v6, 0.0  ;;  %v3043_v6 = vsel %vm3013_vm8, %v2944_v23, %v9461_v62  ;;  %4935 = vmatpush1.bf16.msra.mxu1 %v7965_v44 }
 0x2b2   :  { %v9750_v57 = vpop.permute.xlu0 %2011 }
 0x2b3   :  { %v2400_v29 = vpop.permute.xlu1 %2399  ;;  %v9754_v55 = vpack.c.bf16 %v1677_v58, %v1676_v59  ;;  %v12511_v58 = vld [vmem:[#allocation11_spill] sm:$0xff] }
 0x2b4   :  { %2322 = vrot.lane.b32.xlu0 %v9439_v43, %s8060_s23  ;;  %v1385_v54 = vpop.f32.mrb[236].mxu0  ;;  %v3142_v41 = vsel %vm3112_vm9, %v3043_v6, %v2400_v29  ;;  %v2616_v21 = vsel %vm2568_vm4, %v12511_v58, %v9123_v53  ;;  %v12513_v58 = vmov 0  }
 0x2b5   :  { %12510 = vst [vmem:[#allocation10_spill] sm:$0xff] %v9754_v55  ;;  %1922 = vrot.lane.b32.xlu1 %v9402_v42, %s8056_s15  ;;  %v1386_v22 = vadd.f32 %v9509_v25, %v1385_v54  ;;  %v7472_v0 = vpop.f32.mrb[237].mxu0  ;;  %v2748_v29 = vsel %vm2716_vm5, %v2616_v21, %v9167_v40  ;;  %4936 = vmatprep.subr.bf16.mxu1 %v12513_v58 }
 0x2b6   :  { %v2499_v59 = vpop.permute.xlu0 %2498  ;;  %v1388_v8 = vpop.f32.mrb[238].mxu0  ;;  %v2847_v6 = vsel %vm2815_vm6, %v2748_v29, %v9444_v4 }
 0x2b7   :  { %v9772_v60 = vpop.permute.xlu1 %2110  ;;  %v3255_v62 = vsel %vm3211_vm10, %v3142_v41, %v2499_v59  ;;  %v1678_v23 = vmax.f32 %v1386_v22, 0.0  ;;  %v1389_v54 = vadd.f32 %v9509_v25, %v1388_v8  ;;  %v7473_v0 = vpop.f32.mrb[239].mxu0  ;;  %v2946_v22 = vsel %vm2914_vm7, %v2847_v6, %v9481_v16 }
 0x2b8   :  { %3705 = vmatmul.mubr.bf16.gmra.mrb[56].mxu1 %v3255_v62  ;;  %2225 = vrot.lane.b32.xlu0 %v9439_v43, %s8059_s20  ;;  %v3045_v40 = vsel %vm3013_vm8, %v2946_v22, %v9517_v32 }
 0x2b9   :  { %2516 = vrot.lane.b32.xlu1 %v9472_v14, %s8063_s19  ;;  %6797 = vmatprep.mubr.msk.bf16.mxu1 %vm2568_vm4, %v9171_v18  ;;  %v1679_v53 = vmax.f32 %v1389_v54, 0.0 }
 0x2ba   :  { %v2402_v41 = vpop.permute.xlu0 %2401 }
 0x2bb   :  { %v2501_v59 = vpop.permute.xlu1 %2500  ;;  %v9790_v8 = vpack.c.bf16 %v1679_v53, %v1678_v23  ;;  %v3144_v4 = vsel %vm3112_vm9, %v3045_v40, %v2402_v41 }
 0x2bc   :  { %2128 = vrot.lane.b32.xlu0 %v9439_v43, %s8058_s16  ;;  %v1393_v21 = vpop.f32.mrb[240].mxu0  ;;  %v3258_v23 = vsel %vm3211_vm10, %v3144_v4, %v2501_v59  ;;  %v12515_v4 = vld [vmem:[#allocation12_spill] sm:$0xff] }
 0x2bd   :  { %12512 = vst [vmem:[#allocation11_spill] sm:$0xff] %v9790_v8  ;;  %2419 = vrot.lane.b32.xlu1 %v9472_v14, %s8062_s30  ;;  %v1394_v16 = vadd.f32 %v9509_v25, %v1393_v21  ;;  %v7476_v44 = vpop.f32.mrb[241].mxu0  ;;  %v2619_v21 = vsel %vm2568_vm4, %v12515_v4, %v9186_v48 }
 0x2be   :  { %v9799_v62 = vpop.permute.xlu0 %2209  ;;  %v1396_v32 = vpop.f32.mrb[242].mxu0 }
 0x2bf   :  { %v2404_v54 = vpop.permute.xlu1 %2403  ;;  %v1680_v0 = vmax.f32 %v1394_v16, 0.0  ;;  %v1397_v29 = vadd.f32 %v9509_v25, %v1396_v32  ;;  %v7477_v6 = vpop.f32.mrb[243].mxu0  ;;  %v9825_v16 = vld [vmem:[%s12352_s4] ss:$0 sm:$0xff] }
 0x2c0   :  { %3713 = vmatmul.mubr.bf16.gmra.mrb[60].mxu1 %v3258_v23  ;;  %2027 = vrot.lane.b32.xlu0 %v9439_v43, %s8057_s18  ;;  %v2750_v23 = vsel %vm2716_vm5, %v2619_v21, %v9220_v49 }
 0x2c1   :  { %2324 = vrot.lane.b32.xlu1 %v9472_v14, %s8060_s23  ;;  %6798 = vmatprep.mubr.msk.bf16.mxu1 %vm2568_vm4, %v9213_v37  ;;  %v1681_v53 = vmax.f32 %v1397_v29, 0.0  ;;  %v2849_v48 = vsel %vm2815_vm6, %v2750_v23, %v9495_v56 }
 0x2c2   :  { %v9809_v22 = vpop.permute.xlu0 %2112  ;;  %v2948_v37 = vsel %vm2914_vm7, %v2849_v48, %v9534_v28 }
 0x2c3   :  { %v9811_v41 = vpop.permute.xlu1 %2308  ;;  %v9813_v40 = vpack.c.bf16 %v1681_v53, %v1680_v0  ;;  %v3047_v21 = vsel %vm3013_vm8, %v2948_v37, %v9578_v31 }
 0x2c4   :  { %1924 = vrot.lane.b32.xlu0 %v9439_v43, %s8056_s15  ;;  %v1401_v59 = vpop.f32.mrb[244].mxu0  ;;  %v3146_v23 = vsel %vm3112_vm9, %v3047_v21, %v2404_v54 }
 0x2c5   :  { %12514 = vst [vmem:[#allocation49_spill] sm:$0xff] %v9813_v40  ;;  %2227 = vrot.lane.b32.xlu1 %v9472_v14, %s8059_s20  ;;  %v1402_v44 = vadd.f32 %v9509_v25, %v1401_v59  ;;  %v7480_v32 = vpop.f32.mrb[245].mxu0 }
 0x2c6   :  { %v9830_v0 = vpop.permute.xlu0 %1908  ;;  %v1404_v29 = vpop.f32.mrb[246].mxu0 }
 0x2c7   :  { %12516 = vst [vmem:[#allocation12_spill] sm:$0xff] %v9830_v0  ;;  %v9834_v6 = vpop.permute.xlu1 %2211  ;;  %v3594_v53 = vpop.f32.mrb[0].mxu1  ;;  %v1682_v4 = vmax.f32 %v1402_v44, 0.0  ;;  %v1405_v42 = vadd.f32 %v9509_v25, %v1404_v29 }
 0x2c8   :  { %v3595_v59 = vadd.f32 %v9825_v16, %v3594_v53  ;;  %v3596_v32 = vpop.f32.mrb[1].mxu1  ;;  %2518 = vrot.lane.b32.xlu0 %v9498_v34, %s8063_s19  ;;  %v7481_v49 = vpop.f32.mrb[247].mxu0 }
 0x2c9   :  { %2130 = vrot.lane.b32.xlu1 %v9472_v14, %s8058_s16  ;;  %v3597_v56 = vpop.f32.mrb[2].mxu1  ;;  %v1683_v44 = vmax.f32 %v1405_v42, 0.0 }
 0x2ca   :  { %v3598_v29 = vadd.f32 %v9825_v16, %v3597_v56  ;;  %v3599_v28 = vpop.f32.mrb[3].mxu1  ;;  %v2503_v48 = vpop.permute.xlu0 %2502  ;;  %v3985_v49 = vmax.f32 %v3595_v59, 0.0 }
 0x2cb   :  { %v9848_v53 = vpop.permute.xlu1 %2114  ;;  %v3261_v32 = vsel %vm3211_vm10, %v3146_v23, %v2503_v48  ;;  %v9851_v18 = vpack.c.bf16 %v1683_v44, %v1682_v4 }
 0x2cc   :  { %v3986_v0 = vmax.f32 %v3598_v29, 0.0  ;;  %3721 = vmatmul.mubr.bf16.gmra.mrb[64].mxu1 %v3261_v32  ;;  %2421 = vrot.lane.b32.xlu0 %v9498_v34, %s8062_s30  ;;  %v1409_v37 = vpop.f32.mrb[248].mxu0 }
 0x2cd   :  { %2029 = vrot.lane.b32.xlu1 %v9472_v14, %s8057_s18  ;;  %6799 = vmatprep.mubr.msk.bf16.mxu1 %vm2568_vm4, %v9248_v27  ;;  %v1410_v42 = vadd.f32 %v9509_v25, %v1409_v37  ;;  %v7484_v31 = vpop.f32.mrb[249].mxu0 }
 0x2ce   :  { %v2406_v54 = vpop.permute.xlu0 %2405  ;;  %v1412_v21 = vpop.f32.mrb[250].mxu0  ;;  %v9860_v4 = vpack.c.bf16 %v3986_v0, %v3985_v49  ;;  %v2622_v0 = vsel %vm2568_vm4, %v8663_v52, %v9235_v19 }
 0x2cf   :  { %v9862_v59 = vpop.permute.xlu1 %2013  ;;  %v3602_v56 = vpop.f32.mrb[4].mxu1  ;;  %v1684_v44 = vmax.f32 %v1410_v42, 0.0  ;;  %v1413_v23 = vadd.f32 %v9509_v25, %v1412_v21  ;;  %v7966_v21 = vld [vmem:[%s12351_s5 + $0x8] sm:$0xff]  }
 0x2d0   :  { %12517 = vst [vmem:[#allocation50_spill] sm:$0xff] %v9860_v4  ;;  %v3603_v29 = vadd.f32 %v9825_v16, %v3602_v56  ;;  %v3604_v28 = vpop.f32.mrb[5].mxu1  ;;  %2326 = vrot.lane.b32.xlu0 %v9498_v34, %s8060_s23  ;;  %v7485_v48 = vpop.f32.mrb[251].mxu0  ;;  %v2752_v56 = vsel %vm2716_vm5, %v2622_v0, %v9281_v9  ;;  %4937 = vmatpush1.bf16.msra.mxu1 %v7966_v21 }
 0x2d1   :  { %1926 = vrot.lane.b32.xlu1 %v9472_v14, %s8056_s15  ;;  %v3605_v32 = vpop.f32.mrb[6].mxu1  ;;  %v1685_v37 = vmax.f32 %v1413_v23, 0.0  ;;  %v2851_v23 = vsel %vm2815_vm6, %v2752_v56, %v9553_v63  ;;  %4938 = vmatprep.subr.bf16.mxu1 %v12513_v58  ;;  %v2625_v4 = vsel %vm2568_vm4, %v8687_v5, %v9298_v10 }
 0x2d2   :  { %v3606_v49 = vadd.f32 %v9825_v16, %v3605_v32  ;;  %v3607_v42 = vpop.f32.mrb[7].mxu1  ;;  %v9874_v31 = vpop.permute.xlu0 %2310  ;;  %v3987_v52 = vmax.f32 %v3603_v29, 0.0 }
 0x2d3   :  { %v9881_v28 = vpop.permute.xlu1 %1910  ;;  %v9883_v48 = vpack.c.bf16 %v1685_v37, %v1684_v44  ;;  %v2950_v42 = vsel %vm2914_vm7, %v2851_v23, %v9595_v17 }
 0x2d4   :  { %v3988_v19 = vmax.f32 %v3606_v49, 0.0  ;;  %2229 = vrot.lane.b32.xlu0 %v9498_v34, %s8059_s20  ;;  %v1417_v32 = vpop.f32.mrb[252].mxu0  ;;  %v3049_v63 = vsel %vm3013_vm8, %v2950_v42, %v9626_v45 }
 0x2d5   :  { %2520 = vrot.lane.b32.xlu1 %v9536_v50, %s8063_s19  ;;  %v1418_v9 = vadd.f32 %v9509_v25, %v1417_v32  ;;  %v7488_v44 = vpop.f32.mrb[253].mxu0  ;;  %v3148_v49 = vsel %vm3112_vm9, %v3049_v63, %v2406_v54 }
 0x2d6   :  { %v9897_v29 = vpop.permute.xlu0 %2213  ;;  %v1420_v37 = vpop.f32.mrb[254].mxu0  ;;  %v9899_v0 = vpack.c.bf16 %v3988_v19, %v3987_v52 }
 0x2d7   :  { %v2505_v21 = vpop.permute.xlu1 %2504  ;;  %v1686_v17 = vmax.f32 %v1418_v9, 0.0  ;;  %v1421_v56 = vadd.f32 %v9509_v25, %v1420_v37  ;;  %v7489_v23 = vpop.f32.mrb[255].mxu0 }
 0x2d8   :  { %12518 = vst [vmem:[#allocation51_spill] sm:$0xff] %v9899_v0  ;;  %v3264_v32 = vsel %vm3211_vm10, %v3148_v49, %v2505_v21  ;;  %2132 = vrot.lane.b32.xlu0 %v9498_v34, %s8058_s16 }
 0x2d9   :  { %3729 = vmatmul.mubr.bf16.gmra.mrb[68].mxu1 %v3264_v32  ;;  %2423 = vrot.lane.b32.xlu1 %v9536_v50, %s8062_s30  ;;  %v1687_v45 = vmax.f32 %v1421_v56, 0.0 }
 0x2da   :  { %6800 = vmatprep.mubr.msk.bf16.mxu1 %vm2568_vm4, %v9276_v33  ;;  %v9910_v52 = vpop.permute.xlu0 %2116 }
 0x2db   :  { %v2408_v54 = vpop.permute.xlu1 %2407  ;;  %v3610_v19 = vpop.f32.mrb[8].mxu1  ;;  %v9912_v42 = vpack.c.bf16 %v1687_v45, %v1686_v17 }
 0x2dc   :  { %v3611_v9 = vadd.f32 %v9825_v16, %v3610_v19  ;;  %v3612_v44 = vpop.f32.mrb[9].mxu1  ;;  %2031 = vrot.lane.b32.xlu0 %v9498_v34, %s8057_s18 }
 0x2dd   :  { %2328 = vrot.lane.b32.xlu1 %v9536_v50, %s8060_s23  ;;  %v3613_v63 = vpop.f32.mrb[10].mxu1  ;;  %v1425_v37 = vpop.f32.mrb[0].mxu0 }
 0x2de   :  { %v3614_v49 = vadd.f32 %v9825_v16, %v3613_v63  ;;  %v3615_v21 = vpop.f32.mrb[11].mxu1  ;;  %v9920_v56 = vpop.permute.xlu0 %2015  ;;  %v1426_v23 = vadd.f32 %v9509_v25, %v1425_v37  ;;  %v3989_v45 = vmax.f32 %v3611_v9, 0.0 }
 0x2df   :  { %12519 = vst [vmem:[#allocation52_spill] sm:$0xff] %v9920_v56  ;;  %v9923_v17 = vpop.permute.xlu1 %2312  ;;  %v7492_v32 = vpop.f32.mrb[1].mxu0 }
 0x2e0   :  { %v3990_v19 = vmax.f32 %v3614_v49, 0.0  ;;  %1928 = vrot.lane.b32.xlu0 %v9498_v34, %s8056_s15  ;;  %v1428_v44 = vpop.f32.mrb[2].mxu0  ;;  %v1688_v63 = vmax.f32 %v1426_v23, 0.0  ;;  %v2754_v32 = vsel %vm2716_vm5, %v2625_v4, %v9332_v3 }
 0x2e1   :  { %2231 = vrot.lane.b32.xlu1 %v9536_v50, %s8059_s20  ;;  %v1429_v21 = vadd.f32 %v9509_v25, %v1428_v44  ;;  %v7493_v37 = vpop.f32.mrb[3].mxu0  ;;  %v2853_v0 = vsel %vm2815_vm6, %v2754_v32, %v9611_v30 }
 0x2e2   :  { %v9935_v9 = vpop.permute.xlu0 %1912  ;;  %v9937_v49 = vpack.c.bf16 %v3990_v19, %v3989_v45  ;;  %v2952_v10 = vsel %vm2914_vm7, %v2853_v0, %v9641_v35 }
 0x2e3   :  { %12520 = vst [vmem:[#allocation53_spill] sm:$0xff] %v9935_v9  ;;  %v9941_v33 = vpop.permute.xlu1 %2215  ;;  %v1689_v5 = vmax.f32 %v1429_v21, 0.0  ;;  %v3051_v23 = vsel %vm3013_vm8, %v2952_v10, %v9675_v12 }
 0x2e4   :  { %12521 = vst [vmem:[#allocation54_spill] sm:$0xff] %v9937_v49  ;;  %2522 = vrot.lane.b32.xlu0 %v9566_v13, %s8063_s19  ;;  %v3150_v30 = vsel %vm3112_vm9, %v3051_v23, %v2408_v54 }
 0x2e5   :  { %2134 = vrot.lane.b32.xlu1 %v9536_v50, %s8058_s16  ;;  %v9951_v3 = vpack.c.bf16 %v1689_v5, %v1688_v63  ;;  %v1433_v4 = vpop.f32.mrb[4].mxu0 }
 0x2e6   :  { %v2507_v45 = vpop.permute.xlu0 %2506  ;;  %v1434_v19 = vadd.f32 %v9509_v25, %v1433_v4  ;;  %v7496_v44 = vpop.f32.mrb[5].mxu0 }
 0x2e7   :  { %v9955_v21 = vpop.permute.xlu1 %2118  ;;  %v3618_v35 = vpop.f32.mrb[12].mxu1  ;;  %v3267_v0 = vsel %vm3211_vm10, %v3150_v30, %v2507_v45  ;;  %v7967_v45 = vld [vmem:[%s12351_s5 + $0x10] sm:$0xff]  }
 0x2e8   :  { %v3619_v37 = vadd.f32 %v9825_v16, %v3618_v35  ;;  %v3620_v12 = vpop.f32.mrb[13].mxu1  ;;  %3737 = vmatmul.mubr.bf16.gmra.mrb[72].mxu1 %v3267_v0  ;;  %2425 = vrot.lane.b32.xlu0 %v9566_v13, %s8062_s30  ;;  %v1436_v63 = vpop.f32.mrb[6].mxu0  ;;  %v1690_v32 = vmax.f32 %v1434_v19, 0.0 }
 0x2e9   :  { %2033 = vrot.lane.b32.xlu1 %v9536_v50, %s8057_s18  ;;  %v3621_v54 = vpop.f32.mrb[14].mxu1  ;;  %6801 = vmatprep.mubr.msk.bf16.mxu1 %vm2568_vm4, %v9311_v38  ;;  %v1437_v5 = vadd.f32 %v9509_v25, %v1436_v63  ;;  %v7497_v10 = vpop.f32.mrb[7].mxu0  ;;  %v12523_v63 = vld [vmem:[#allocation30_spill] sm:$0xff] }
 0x2ea   :  { %v3622_v23 = vadd.f32 %v9825_v16, %v3621_v54  ;;  %v3623_v4 = vpop.f32.mrb[15].mxu1  ;;  %v2410_v30 = vpop.permute.xlu0 %2409  ;;  %v3991_v0 = vmax.f32 %v3619_v37, 0.0  ;;  %4939 = vmatpush1.bf16.msra.mxu1 %v7967_v45  ;;  %v12524_v54 = vld [vmem:[#allocation13_spill] sm:$0xff]  ;;  %v12526_v45 = vld [vmem:[#allocation35_spill] sm:$0xff] }
 0x2eb   :  { %v9970_v44 = vpop.permute.xlu1 %2017  ;;  %v1691_v35 = vmax.f32 %v1437_v5, 0.0  ;;  %4940 = vmatprep.subr.bf16.mxu1 %v12513_v58  ;;  %v2628_v10 = vsel %vm2568_vm4, %v12524_v54, %v12523_v63 }
 0x2ec   :  { %12522 = vst [vmem:[#allocation55_spill] sm:$0xff] %v9970_v44  ;;  %v3992_v12 = vmax.f32 %v3622_v23, 0.0  ;;  %2330 = vrot.lane.b32.xlu0 %v9566_v13, %s8060_s23  ;;  %v2756_v49 = vsel %vm2716_vm5, %v2628_v10, %v12526_v45  ;;  %v7968_v45 = vld [vmem:[%s12348_s0 + $0x280] sm:$0xff]  }
 0x2ed   :  { %1930 = vrot.lane.b32.xlu1 %v9536_v50, %s8056_s15  ;;  %v9976_v38 = vpack.c.bf16 %v1691_v35, %v1690_v32  ;;  %v1441_v19 = vpop.f32.mrb[8].mxu0  ;;  %v2855_v35 = vsel %vm2815_vm6, %v2756_v49, %v9653_v24  ;;  %7555 = vmatmul.mubr.msk.bf16.gmra.mrb[64].mxu0 %vm628_vm3, %v7968_v45 }
 0x2ee   :  { %v9982_v4 = vpop.permute.xlu0 %2314  ;;  %v1442_v37 = vadd.f32 %v9509_v25, %v1441_v19  ;;  %v7500_v5 = vpop.f32.mrb[9].mxu0  ;;  %v9985_v23 = vpack.c.bf16 %v3992_v12, %v3991_v0  ;;  %v2954_v0 = vsel %vm2914_vm7, %v2855_v35, %v9694_v39 }
 0x2ef   :  { %v9989_v27 = vpop.permute.xlu1 %1914  ;;  %v1444_v32 = vpop.f32.mrb[10].mxu0  ;;  %v3053_v12 = vsel %vm3013_vm8, %v2954_v0, %v9707_v51 }
 0x2f0   :  { %12525 = vst [vmem:[#allocation30_spill] sm:$0xff] %v9985_v23  ;;  %12527 = vst [vmem:[#allocation13_spill] sm:$0xff] %v9989_v27  ;;  %2233 = vrot.lane.b32.xlu0 %v9566_v13, %s8059_s20  ;;  %v1692_v63 = vmax.f32 %v1442_v37, 0.0  ;;  %v1445_v54 = vadd.f32 %v9509_v25, %v1444_v32  ;;  %v7501_v44 = vpop.f32.mrb[11].mxu0  ;;  %v3152_v24 = vsel %vm3112_vm9, %v3053_v12, %v2410_v30 }
 0x2f1   :  { %2524 = vrot.lane.b32.xlu1 %v9598_v2, %s8063_s19 }
 0x2f2   :  { %v10002_v19 = vpop.permute.xlu0 %2217  ;;  %v1693_v10 = vmax.f32 %v1445_v54, 0.0 }
 0x2f3   :  { %v2509_v49 = vpop.permute.xlu1 %2508 }
 0x2f4   :  { %v3270_v37 = vsel %vm3211_vm10, %v3152_v24, %v2509_v49  ;;  %2136 = vrot.lane.b32.xlu0 %v9566_v13, %s8058_s16  ;;  %v10008_v44 = vpack.c.bf16 %v1693_v10, %v1692_v63 }
 0x2f5   :  { %3745 = vmatmul.mubr.bf16.gmra.mrb[76].mxu1 %v3270_v37  ;;  %2332 = vrot.lane.b32.xlu1 %v9598_v2, %s8060_s23  ;;  %v1449_v39 = vpop.f32.mrb[12].mxu0 }
 0x2f6   :  { %6802 = vmatprep.mubr.msk.bf16.mxu1 %vm2568_vm4, %v9341_v36  ;;  %v10014_v51 = vpop.permute.xlu0 %2120  ;;  %v1450_v30 = vadd.f32 %v9509_v25, %v1449_v39  ;;  %v7504_v5 = vpop.f32.mrb[13].mxu0 }
 0x2f7   :  { %v2412_v32 = vpop.permute.xlu1 %2411  ;;  %v3626_v35 = vpop.f32.mrb[16].mxu1  ;;  %v12529_v5 = vld [vmem:[#allocation15_spill] sm:$0xff] }
 0x2f8   :  { %v3627_v63 = vadd.f32 %v9825_v16, %v3626_v35  ;;  %v3628_v54 = vpop.f32.mrb[17].mxu1  ;;  %2035 = vrot.lane.b32.xlu0 %v9566_v13, %s8057_s18  ;;  %v1452_v0 = vpop.f32.mrb[14].mxu0  ;;  %v1694_v12 = vmax.f32 %v1450_v30, 0.0  ;;  %v12530_v35 = vld [vmem:[#allocation14_spill] sm:$0xff] }
 0x2f9   :  { %2235 = vrot.lane.b32.xlu1 %v9598_v2, %s8059_s20  ;;  %v3629_v36 = vpop.f32.mrb[18].mxu1  ;;  %v1453_v10 = vadd.f32 %v9509_v25, %v1452_v0  ;;  %v7505_v24 = vpop.f32.mrb[15].mxu0  ;;  %v2631_v54 = vsel %vm2568_vm4, %v12530_v35, %v12529_v5 }
 0x2fa   :  { %v3630_v49 = vadd.f32 %v9825_v16, %v3629_v36  ;;  %v3631_v37 = vpop.f32.mrb[19].mxu1  ;;  %v10028_v39 = vpop.permute.xlu0 %2019  ;;  %v3993_v27 = vmax.f32 %v3627_v63, 0.0  ;;  %v12531_v36 = vld [vmem:[#allocation3_spill] sm:$0xff] }
 0x2fb   :  { %12528 = vst [vmem:[#allocation35_spill] sm:$0xff] %v10028_v39  ;;  %v10033_v23 = vpop.permute.xlu1 %2316  ;;  %v1695_v45 = vmax.f32 %v1453_v10, 0.0  ;;  %v2758_v24 = vsel %vm2716_vm5, %v2631_v54, %v12531_v36 }
 0x2fc   :  { %v3994_v9 = vmax.f32 %v3630_v49, 0.0  ;;  %1932 = vrot.lane.b32.xlu0 %v9566_v13, %s8056_s15  ;;  %v2857_v63 = vsel %vm2815_vm6, %v2758_v24, %v9705_v11 }
 0x2fd   :  { %2037 = vrot.lane.b32.xlu1 %v9598_v2, %s8057_s18  ;;  %v10039_v30 = vpack.c.bf16 %v1695_v45, %v1694_v12  ;;  %v1457_v0 = vpop.f32.mrb[16].mxu0  ;;  %v7969_v12 = vld [vmem:[%s12351_s5 + $0x18] sm:$0xff]   ;;  %v2956_v54 = vsel %vm2914_vm7, %v2857_v63, %v9718_v47 }
 0x2fe   :  { %v10043_v37 = vpop.permute.xlu0 %1916  ;;  %v1458_v5 = vadd.f32 %v9509_v25, %v1457_v0  ;;  %v7508_v35 = vpop.f32.mrb[17].mxu0  ;;  %v10046_v10 = vpack.c.bf16 %v3994_v9, %v3993_v27  ;;  %v12534_v45 = vld [vmem:[#allocation29_spill] sm:$0xff]  ;;  %v10062_v27 = vld [vmem:[%s12349_s2] ss:$0 sm:$0xff]  ;;  %v3055_v0 = vsel %vm3013_vm8, %v2956_v54, %v9736_v20  ;;  %4941 = vmatpush1.bf16.msra.mxu1 %v7969_v12 }
 0x2ff   :  { %12532 = vst [vmem:[#allocation15_spill] sm:$0xff] %v10043_v37  ;;  %v10050_v49 = vpop.permute.xlu1 %2219  ;;  %v1460_v39 = vpop.f32.mrb[18].mxu0  ;;  %v3154_v47 = vsel %vm3112_vm9, %v3055_v0, %v2412_v32  ;;  %4942 = vmatprep.subr.bf16.mxu1 %v12513_v58 }
 0x300   :  { %12533 = vst [vmem:[#allocation14_spill] sm:$0xff] %v10046_v10  ;;  %2334 = vrot.lane.b32.xlu0 %v12534_v45, %s8060_s23  ;;  %v1696_v25 = vmax.f32 %v1458_v5, 0.0  ;;  %v1461_v11 = vadd.f32 %v10062_v27, %v1460_v39  ;;  %v7509_v9 = vpop.f32.mrb[19].mxu0 }
 0x301   :  { %1934 = vrot.lane.b32.xlu1 %v9598_v2, %s8056_s15 }
 0x302   :  { %v2511_v36 = vpop.permute.xlu0 %2510  ;;  %v1697_v24 = vmax.f32 %v1461_v11, 0.0 }
 0x303   :  { %v10071_v5 = vpop.permute.xlu1 %2122  ;;  %v3634_v35 = vpop.f32.mrb[20].mxu1  ;;  %v3273_v63 = vsel %vm3211_vm10, %v3154_v47, %v2511_v36 }
 0x304   :  { %v3635_v39 = vadd.f32 %v9825_v16, %v3634_v35  ;;  %v3636_v9 = vpop.f32.mrb[21].mxu1  ;;  %3753 = vmatmul.mubr.bf16.gmra.mrb[80].mxu1 %v3273_v63  ;;  %2039 = vrot.lane.b32.xlu0 %v12534_v45, %s8057_s18  ;;  %v10077_v20 = vpack.c.bf16 %v1697_v24, %v1696_v25 }
 0x305   :  { %2427 = vrot.lane.b32.xlu1 %v9656_v61, %s8062_s30  ;;  %v3637_v32 = vpop.f32.mrb[22].mxu1  ;;  %6803 = vmatprep.mubr.msk.bf16.mxu1 %vm2568_vm4, %v9439_v43  ;;  %v1465_v12 = vpop.f32.mrb[20].mxu0 }
 0x306   :  { %v3638_v54 = vadd.f32 %v9825_v16, %v3637_v32  ;;  %v3639_v11 = vpop.f32.mrb[23].mxu1  ;;  %v10084_v0 = vpop.permute.xlu0 %2318  ;;  %v1466_v47 = vadd.f32 %v10062_v27, %v1465_v12  ;;  %v3995_v25 = vmax.f32 %v3635_v39, 0.0 }
 0x307   :  { %v10087_v36 = vpop.permute.xlu1 %2021  ;;  %v7512_v35 = vpop.f32.mrb[21].mxu0 }
 0x308   :  { %12535 = vst [vmem:[#allocation3_spill] sm:$0xff] %v10087_v36  ;;  %v3996_v24 = vmax.f32 %v3638_v54, 0.0  ;;  %2526 = vrot.lane.b32.xlu0 %v9681_v46, %s8063_s19  ;;  %v1468_v63 = vpop.f32.mrb[22].mxu0  ;;  %v1698_v9 = vmax.f32 %v1466_v47, 0.0 }
 0x309   :  { %2138 = vrot.lane.b32.xlu1 %v9656_v61, %s8058_s16  ;;  %v1469_v32 = vadd.f32 %v10062_v27, %v1468_v63  ;;  %v7513_v11 = vpop.f32.mrb[23].mxu0 }
 0x30a   :  { %v10094_v10 = vpop.permute.xlu0 %2221  ;;  %v10096_v43 = vpack.c.bf16 %v3996_v24, %v3995_v25 }
 0x30b   :  { %v10098_v12 = vpop.permute.xlu1 %1918  ;;  %v1699_v35 = vmax.f32 %v1469_v32, 0.0 }
 0x30c   :  { %12536 = vst [vmem:[#allocation29_spill] sm:$0xff] %v10096_v43  ;;  %12537 = vst [vmem:[#allocation56_spill] sm:$0xff] %v10098_v12  ;;  %2429 = vrot.lane.b32.xlu0 %v9681_v46, %s8062_s30 }
 0x30d   :  { %2528 = vrot.lane.b32.xlu1 %v9709_v1, %s8063_s19  ;;  %v10104_v39 = vpack.c.bf16 %v1699_v35, %v1698_v9  ;;  %v1473_v54 = vpop.f32.mrb[24].mxu0  ;;  %v12540_v9 = vld [vmem:[#allocation4_spill] sm:$0xff]  ;;  %v12541_v35 = vld [vmem:[#allocation17_spill] sm:$0xff] }
 0x30e   :  { %v10106_v47 = vpop.permute.xlu0 %2023  ;;  %v1474_v63 = vadd.f32 %v10062_v27, %v1473_v54  ;;  %v7516_v11 = vpop.f32.mrb[25].mxu0 }
 0x30f   :  { %12538 = vst [vmem:[#allocation57_spill] sm:$0xff] %v10104_v39  ;;  %12539 = vst [vmem:[#allocation58_spill] sm:$0xff] %v10106_v47  ;;  %v10109_v61 = vpop.permute.xlu1 %2320  ;;  %v1476_v25 = vpop.f32.mrb[26].mxu0  ;;  %v2634_v47 = vsel %vm2568_vm4, %v12541_v35, %v12540_v9  ;;  %v12543_v11 = vld [vmem:[#allocation5_spill] sm:$0xff] }
 0x310   :  { %2237 = vrot.lane.b32.xlu0 %v9681_v46, %s8059_s20  ;;  %v1700_v24 = vmax.f32 %v1474_v63, 0.0  ;;  %v1477_v32 = vadd.f32 %v10062_v27, %v1476_v25  ;;  %v7517_v43 = vpop.f32.mrb[27].mxu0  ;;  %v2760_v36 = vsel %vm2716_vm5, %v2634_v47, %v12543_v11 }
 0x311   :  { %2431 = vrot.lane.b32.xlu1 %v9709_v1, %s8062_s30  ;;  %v2859_v63 = vsel %vm2815_vm6, %v2760_v36, %v9772_v60 }
 0x312   :  { %v10119_v12 = vpop.permute.xlu0 %1920  ;;  %v1701_v54 = vmax.f32 %v1477_v32, 0.0  ;;  %v2958_v32 = vsel %vm2914_vm7, %v2859_v63, %v9799_v62 }
 0x313   :  { %12542 = vst [vmem:[#allocation4_spill] sm:$0xff] %v10119_v12  ;;  %v10123_v37 = vpop.permute.xlu1 %2025  ;;  %v3642_v39 = vpop.f32.mrb[24].mxu1  ;;  %v3057_v35 = vsel %vm3013_vm8, %v2958_v32, %v9811_v41  ;;  %v12547_v41 = vld [vmem:[#allocation20_spill] sm:$0xff] }
 0x314   :  { %12544 = vst [vmem:[#allocation17_spill] sm:$0xff] %v10123_v37  ;;  %v3643_v43 = vadd.f32 %v9825_v16, %v3642_v39  ;;  %v3644_v25 = vpop.f32.mrb[25].mxu1  ;;  %2140 = vrot.lane.b32.xlu0 %v9681_v46, %s8058_s16  ;;  %v10130_v56 = vpack.c.bf16 %v1701_v54, %v1700_v24 }
 0x315   :  { %2336 = vrot.lane.b32.xlu1 %v9709_v1, %s8060_s23  ;;  %v3645_v47 = vpop.f32.mrb[26].mxu1  ;;  %v1481_v9 = vpop.f32.mrb[28].mxu0 }
 0x316   :  { %12545 = vst [vmem:[#allocation5_spill] sm:$0xff] %v10130_v56  ;;  %v3646_v60 = vadd.f32 %v9825_v16, %v3645_v47  ;;  %v3647_v36 = vpop.f32.mrb[27].mxu1  ;;  %v2414_v39 = vpop.permute.xlu0 %2413  ;;  %v1482_v11 = vadd.f32 %v10062_v27, %v1481_v9  ;;  %v3997_v37 = vmax.f32 %v3643_v43, 0.0  ;;  %v12546_v56 = vld [vmem:[#allocation23_spill] sm:$0xff]  ;;  %v12548_v43 = vld [vmem:[#allocation6_spill] sm:$0xff] }
 0x317   :  { %v3156_v24 = vsel %vm3112_vm9, %v3057_v35, %v2414_v39  ;;  %v2513_v54 = vpop.permute.xlu1 %2512  ;;  %v7520_v25 = vpop.f32.mrb[29].mxu0  ;;  %v2637_v32 = vsel %vm2568_vm4, %v12547_v41, %v12546_v56  ;;  %v7970_v56 = vld [vmem:[%s12351_s5 + $0x20] sm:$0xff]  }
 0x318   :  { %v3998_v62 = vmax.f32 %v3646_v60, 0.0  ;;  %1936 = vrot.lane.b32.xlu0 %v9681_v46, %s8056_s15  ;;  %v3276_v63 = vsel %vm3211_vm10, %v3156_v24, %v2513_v54  ;;  %v1484_v12 = vpop.f32.mrb[30].mxu0  ;;  %v1702_v47 = vmax.f32 %v1482_v11, 0.0  ;;  %v2762_v60 = vsel %vm2716_vm5, %v2637_v32, %v12548_v43  ;;  %4943 = vmatpush1.bf16.msra.mxu1 %v7970_v56 }
 0x319   :  { %2239 = vrot.lane.b32.xlu1 %v9709_v1, %s8059_s20  ;;  %3761 = vmatmul.mubr.bf16.gmra.mrb[84].mxu1 %v3276_v63  ;;  %v1485_v9 = vadd.f32 %v10062_v27, %v1484_v12  ;;  %v7521_v35 = vpop.f32.mrb[31].mxu0  ;;  %v2861_v11 = vsel %vm2815_vm6, %v2762_v60, %v9809_v22 }
 0x31a   :  { %v10152_v36 = vpop.permute.xlu0 %2124  ;;  %6804 = vmatprep.mubr.msk.bf16.mxu1 %vm2568_vm4, %v9472_v14  ;;  %v10159_v39 = vpack.c.bf16 %v3998_v62, %v3997_v37  ;;  %v2960_v54 = vsel %vm2914_vm7, %v2861_v11, %v9834_v6  ;;  %4944 = vmatprep.subr.bf16.mxu1 %v12513_v58 }
 0x31b   :  { %v2416_v24 = vpop.permute.xlu1 %2415  ;;  %v1703_v12 = vmax.f32 %v1485_v9, 0.0  ;;  %v3059_v25 = vsel %vm3013_vm8, %v2960_v54, %v9874_v31  ;;  %v12550_v54 = vld [vmem:[#allocation27_spill] sm:$0xff] }
 0x31c   :  { %12549 = vst [vmem:[#allocation23_spill] sm:$0xff] %v10159_v39  ;;  %2530 = vrot.lane.b32.xlu0 %v9729_v15, %s8063_s19  ;;  %v3158_v22 = vsel %vm3112_vm9, %v3059_v25, %v2416_v24  ;;  %v12551_v25 = vld [vmem:[#allocation22_spill] sm:$0xff] }
 0x31d   :  { %2142 = vrot.lane.b32.xlu1 %v9709_v1, %s8058_s16  ;;  %v10171_v37 = vpack.c.bf16 %v1703_v12, %v1702_v47  ;;  %v1489_v62 = vpop.f32.mrb[32].mxu0 }
 0x31e   :  { %v2515_v63 = vpop.permute.xlu0 %2514  ;;  %v1490_v6 = vadd.f32 %v10062_v27, %v1489_v62  ;;  %v7524_v41 = vpop.f32.mrb[33].mxu0  ;;  %v2640_v62 = vsel %vm2568_vm4, %v12551_v25, %v12550_v54 }
 0x31f   :  { %v10176_v32 = vpop.permute.xlu1 %2223  ;;  %v3279_v9 = vsel %vm3211_vm10, %v3158_v22, %v2515_v63  ;;  %v1492_v35 = vpop.f32.mrb[34].mxu0  ;;  %v12552_v41 = vld [vmem:[#allocation7_spill] sm:$0xff] }
 0x320   :  { %2433 = vrot.lane.b32.xlu0 %v9729_v15, %s8062_s30  ;;  %v1704_v31 = vmax.f32 %v1490_v6, 0.0  ;;  %v1493_v47 = vadd.f32 %v10062_v27, %v1492_v35  ;;  %v7525_v43 = vpop.f32.mrb[35].mxu0 }
 0x321   :  { %2041 = vrot.lane.b32.xlu1 %v9709_v1, %s8057_s18  ;;  %3769 = vmatmul.mubr.bf16.gmra.mrb[88].mxu1 %v3279_v9  ;;  %v2764_v9 = vsel %vm2716_vm5, %v2640_v62, %v12552_v41 }
 0x322   :  { %v2418_v60 = vpop.permute.xlu0 %2417  ;;  %6805 = vmatprep.mubr.msk.bf16.mxu1 %vm2568_vm4, %v9498_v34  ;;  %v1705_v56 = vmax.f32 %v1493_v47, 0.0  ;;  %v2863_v47 = vsel %vm2815_vm6, %v2764_v9, %v9848_v53 }
 0x323   :  { %v10186_v11 = vpop.permute.xlu1 %2126 }
 0x324   :  { %2338 = vrot.lane.b32.xlu0 %v9729_v15, %s8060_s23  ;;  %v10190_v24 = vpack.c.bf16 %v1705_v56, %v1704_v31 }
 0x325   :  { %1938 = vrot.lane.b32.xlu1 %v9709_v1, %s8056_s15  ;;  %v1497_v12 = vpop.f32.mrb[36].mxu0 }
 0x326   :  { %v10197_v22 = vpop.permute.xlu0 %2322  ;;  %v1498_v63 = vadd.f32 %v10062_v27, %v1497_v12  ;;  %v7528_v6 = vpop.f32.mrb[37].mxu0  ;;  %v2962_v12 = vsel %vm2914_vm7, %v2863_v47, %v9897_v29 }
 0x327   :  { %v10202_v35 = vpop.permute.xlu1 %1922  ;;  %v1500_v31 = vpop.f32.mrb[38].mxu0  ;;  %v3061_v53 = vsel %vm3013_vm8, %v2962_v12, %v9923_v17 }
 0x328   :  { %v3650_v43 = vpop.f32.mrb[28].mxu1  ;;  %2241 = vrot.lane.b32.xlu0 %v9729_v15, %s8059_s20  ;;  %v1706_v56 = vmax.f32 %v1498_v63, 0.0  ;;  %v1501_v54 = vadd.f32 %v10062_v27, %v1500_v31  ;;  %v7529_v25 = vpop.f32.mrb[39].mxu0  ;;  %v3160_v63 = vsel %vm3112_vm9, %v3061_v53, %v2418_v60 }
 0x329   :  { %v3651_v6 = vadd.f32 %v9825_v16, %v3650_v43  ;;  %2532 = vrot.lane.b32.xlu1 %v9754_v55, %s8063_s19  ;;  %v3652_v62 = vpop.f32.mrb[29].mxu1 }
 0x32a   :  { %v3653_v41 = vpop.f32.mrb[30].mxu1  ;;  %v10216_v9 = vpop.permute.xlu0 %2225  ;;  %v1707_v46 = vmax.f32 %v1501_v54, 0.0 }
 0x32b   :  { %v3654_v31 = vadd.f32 %v9825_v16, %v3653_v41  ;;  %v2517_v25 = vpop.permute.xlu1 %2516  ;;  %v3655_v39 = vpop.f32.mrb[31].mxu1  ;;  %v3999_v43 = vmax.f32 %v3651_v6, 0.0 }
 0x32c   :  { %v3282_v29 = vsel %vm3211_vm10, %v3160_v63, %v2517_v25  ;;  %2144 = vrot.lane.b32.xlu0 %v9729_v15, %s8058_s16  ;;  %v10223_v47 = vpack.c.bf16 %v1707_v46, %v1706_v56 }
 0x32d   :  { %v4000_v62 = vmax.f32 %v3654_v31, 0.0  ;;  %3777 = vmatmul.mubr.bf16.gmra.mrb[92].mxu1 %v3282_v29  ;;  %2435 = vrot.lane.b32.xlu1 %v9754_v55, %s8062_s30  ;;  %v1505_v17 = vpop.f32.mrb[40].mxu0 }
 0x32e   :  { %6806 = vmatprep.mubr.msk.bf16.mxu1 %vm2568_vm4, %v9536_v50  ;;  %v10229_v60 = vpop.permute.xlu0 %2128  ;;  %v1506_v39 = vadd.f32 %v10062_v27, %v1505_v17  ;;  %v7532_v54 = vpop.f32.mrb[41].mxu0 }
 0x32f   :  { %v2420_v12 = vpop.permute.xlu1 %2419  ;;  %v1508_v53 = vpop.f32.mrb[42].mxu0  ;;  %v10232_v41 = vpack.c.bf16 %v4000_v62, %v3999_v43 }
 0x330   :  { %v3658_v46 = vpop.f32.mrb[32].mxu1  ;;  %2043 = vrot.lane.b32.xlu0 %v9729_v15, %s8057_s18  ;;  %v1708_v56 = vmax.f32 %v1506_v39, 0.0  ;;  %v1509_v6 = vadd.f32 %v10062_v27, %v1508_v53  ;;  %v7533_v63 = vpop.f32.mrb[43].mxu0  ;;  %v7971_v39 = vld [vmem:[%s12351_s5 + $0x28] sm:$0xff]  }
 0x331   :  { %12553 = vst [vmem:[#allocation20_spill] sm:$0xff] %v10232_v41  ;;  %v3659_v31 = vadd.f32 %v9825_v16, %v3658_v46  ;;  %2340 = vrot.lane.b32.xlu1 %v9754_v55, %s8060_s23  ;;  %v3660_v25 = vpop.f32.mrb[33].mxu1  ;;  %v12555_v46 = vld [vmem:[#allocation25_spill] sm:$0xff]  ;;  %4945 = vmatpush1.bf16.msra.mxu1 %v7971_v39 }
 0x332   :  { %v3661_v29 = vpop.f32.mrb[34].mxu1  ;;  %v10240_v17 = vpop.permute.xlu0 %2027  ;;  %v1709_v54 = vmax.f32 %v1509_v6, 0.0  ;;  %v2643_v63 = vsel %vm2568_vm4, %v12555_v46, %v9637_v7  ;;  %4946 = vmatprep.subr.bf16.mxu1 %v12513_v58  ;;  %v12561_v41 = vld [vmem:[#allocation9_spill] sm:$0xff] }
 0x333   :  { %12554 = vst [vmem:[#allocation6_spill] sm:$0xff] %v10240_v17  ;;  %v3662_v43 = vadd.f32 %v9825_v16, %v3661_v29  ;;  %v10243_v62 = vpop.permute.xlu1 %2324  ;;  %v3663_v50 = vpop.f32.mrb[35].mxu1  ;;  %v4001_v25 = vmax.f32 %v3659_v31, 0.0 }
 0x334   :  { %1940 = vrot.lane.b32.xlu0 %v9729_v15, %s8056_s15  ;;  %v10250_v53 = vpack.c.bf16 %v1709_v54, %v1708_v56  ;;  %v2766_v50 = vsel %vm2716_vm5, %v2643_v63, %v9665_v26 }
 0x335   :  { %v4002_v6 = vmax.f32 %v3662_v43, 0.0  ;;  %2243 = vrot.lane.b32.xlu1 %v9754_v55, %s8059_s20  ;;  %v1513_v29 = vpop.f32.mrb[44].mxu0  ;;  %v2865_v7 = vsel %vm2815_vm6, %v2766_v50, %v9910_v52 }
 0x336   :  { %v10259_v34 = vpop.permute.xlu0 %1924  ;;  %v1514_v14 = vadd.f32 %v10062_v27, %v1513_v29  ;;  %v7536_v56 = vpop.f32.mrb[45].mxu0  ;;  %v2964_v39 = vsel %vm2914_vm7, %v2865_v7, %v9941_v33 }
 0x337   :  { %12556 = vst [vmem:[#allocation27_spill] sm:$0xff] %v10259_v34  ;;  %v10265_v31 = vpop.permute.xlu1 %2227  ;;  %v1516_v54 = vpop.f32.mrb[46].mxu0  ;;  %v10267_v43 = vpack.c.bf16 %v4002_v6, %v4001_v25  ;;  %v3063_v29 = vsel %vm3013_vm8, %v2964_v39, %v9982_v4 }
 0x338   :  { %2534 = vrot.lane.b32.xlu0 %v9790_v8, %s8063_s19  ;;  %v1710_v26 = vmax.f32 %v1514_v14, 0.0  ;;  %v1517_v46 = vadd.f32 %v10062_v27, %v1516_v54  ;;  %v7537_v63 = vpop.f32.mrb[47].mxu0  ;;  %v3162_v52 = vsel %vm3112_vm9, %v3063_v29, %v2420_v12 }
 0x339   :  { %12557 = vst [vmem:[#allocation22_spill] sm:$0xff] %v10267_v43  ;;  %2146 = vrot.lane.b32.xlu1 %v9754_v55, %s8058_s16 }
 0x33a   :  { %v2519_v25 = vpop.permute.xlu0 %2518  ;;  %v1711_v6 = vmax.f32 %v1517_v46, 0.0 }
 0x33b   :  { %v10279_v50 = vpop.permute.xlu1 %2130  ;;  %v3285_v33 = vsel %vm3211_vm10, %v3162_v52, %v2519_v25 }
 0x33c   :  { %v3666_v56 = vpop.f32.mrb[36].mxu1  ;;  %3785 = vmatmul.mubr.bf16.gmra.mrb[96].mxu1 %v3285_v33  ;;  %2437 = vrot.lane.b32.xlu0 %v9790_v8, %s8062_s30  ;;  %v10284_v14 = vpack.c.bf16 %v1711_v6, %v1710_v26 }
 0x33d   :  { %v3667_v4 = vadd.f32 %v9825_v16, %v3666_v56  ;;  %v3668_v7 = vpop.f32.mrb[37].mxu1  ;;  %2045 = vrot.lane.b32.xlu1 %v9754_v55, %s8057_s18  ;;  %6807 = vmatprep.mubr.msk.bf16.mxu1 %vm2568_vm4, %v9566_v13  ;;  %v1521_v12 = vpop.f32.mrb[48].mxu0  ;;  %v12559_v56 = vld [vmem:[#allocation8_spill] sm:$0xff] }
 0x33e   :  { %v3669_v54 = vpop.f32.mrb[38].mxu1  ;;  %v2422_v39 = vpop.permute.xlu0 %2421  ;;  %v1522_v46 = vadd.f32 %v10062_v27, %v1521_v12  ;;  %v12560_v7 = vld [vmem:[#allocation28_spill] sm:$0xff] }
 0x33f   :  { %v3670_v63 = vadd.f32 %v9825_v16, %v3669_v54  ;;  %v3671_v29 = vpop.f32.mrb[39].mxu1  ;;  %v10293_v52 = vpop.permute.xlu1 %2029  ;;  %v4003_v25 = vmax.f32 %v3667_v4, 0.0  ;;  %v2646_v13 = vsel %vm2568_vm4, %v12560_v7, %v12559_v56 }
 0x340   :  { %12558 = vst [vmem:[#allocation7_spill] sm:$0xff] %v10293_v52  ;;  %2342 = vrot.lane.b32.xlu0 %v9790_v8, %s8060_s23  ;;  %v7540_v26 = vpop.f32.mrb[49].mxu0  ;;  %v1712_v54 = vmax.f32 %v1522_v46, 0.0  ;;  %v2768_v52 = vsel %vm2716_vm5, %v2646_v13, %v12561_v41 }
 0x341   :  { %v4004_v6 = vmax.f32 %v3670_v63, 0.0  ;;  %2536 = vrot.lane.b32.xlu1 %v9813_v40, %s8063_s19  ;;  %v1524_v33 = vpop.f32.mrb[50].mxu0  ;;  %v2867_v63 = vsel %vm2815_vm6, %v2768_v52, %v9955_v21 }
 0x342   :  { %v10302_v12 = vpop.permute.xlu0 %2326  ;;  %v1525_v29 = vadd.f32 %v10062_v27, %v1524_v33  ;;  %v7541_v43 = vpop.f32.mrb[51].mxu0  ;;  %v2966_v46 = vsel %vm2914_vm7, %v2867_v63, %v10002_v19 }
 0x343   :  { %v10307_v26 = vpop.permute.xlu1 %1926  ;;  %v10309_v4 = vpack.c.bf16 %v4004_v6, %v4003_v25  ;;  %v3065_v13 = vsel %vm3013_vm8, %v2966_v46, %v10033_v23 }
 0x344   :  { %12562 = vst [vmem:[#allocation25_spill] sm:$0xff] %v10307_v26  ;;  %2245 = vrot.lane.b32.xlu0 %v9790_v8, %s8059_s20  ;;  %v1713_v56 = vmax.f32 %v1525_v29, 0.0  ;;  %v3164_v6 = vsel %vm3112_vm9, %v3065_v13, %v2422_v39 }
 0x345   :  { %2439 = vrot.lane.b32.xlu1 %v9813_v40, %s8062_s30  ;;  %v1529_v43 = vpop.f32.mrb[52].mxu0 }
 0x346   :  { %v10321_v41 = vpop.permute.xlu0 %2229  ;;  %v10323_v25 = vpack.c.bf16 %v1713_v56, %v1712_v54  ;;  %v1530_v21 = vadd.f32 %v10062_v27, %v1529_v43  ;;  %v7544_v52 = vpop.f32.mrb[53].mxu0 }
 0x347   :  { %v2521_v33 = vpop.permute.xlu1 %2520  ;;  %v1532_v7 = vpop.f32.mrb[54].mxu0 }
 0x348   :  { %12563 = vst [vmem:[#allocation8_spill] sm:$0xff] %v10323_v25  ;;  %v3288_v19 = vsel %vm3211_vm10, %v3164_v6, %v2521_v33  ;;  %2148 = vrot.lane.b32.xlu0 %v9790_v8, %s8058_s16  ;;  %v1714_v29 = vmax.f32 %v1530_v21, 0.0  ;;  %v1533_v63 = vadd.f32 %v10062_v27, %v1532_v7  ;;  %v7545_v23 = vpop.f32.mrb[55].mxu0 }
 0x349   :  { %3793 = vmatmul.mubr.bf16.gmra.mrb[100].mxu1 %v3288_v19  ;;  %2344 = vrot.lane.b32.xlu1 %v9813_v40, %s8060_s23  ;;  %v12567_v23 = vld [vmem:[#allocation31_spill] sm:$0xff] }
 0x34a   :  { %6808 = vmatprep.mubr.msk.bf16.mxu1 %vm2568_vm4, %v9598_v2  ;;  %v10335_v54 = vpop.permute.xlu0 %2132  ;;  %v1715_v39 = vmax.f32 %v1533_v63, 0.0  ;;  %v12566_v63 = vld [vmem:[#allocation45_spill] sm:$0xff] }
 0x34b   :  { %v2424_v56 = vpop.permute.xlu1 %2423  ;;  %v3674_v46 = vpop.f32.mrb[40].mxu1 }
 0x34c   :  { %v3675_v43 = vadd.f32 %v9825_v16, %v3674_v46  ;;  %v3676_v13 = vpop.f32.mrb[41].mxu1  ;;  %2538 = vrot.lane.b32.xlu0 %v9851_v18, %s8063_s19  ;;  %v10340_v21 = vpack.c.bf16 %v1715_v39, %v1714_v29  ;;  %v2649_v46 = vsel %vm2568_vm4, %v12567_v23, %v12566_v63  ;;  %v7972_v39 = vld [vmem:[%s12351_s5 + $0x30] sm:$0xff]   ;;  %v12568_v63 = vld [vmem:[#allocation46_spill] sm:$0xff] }
 0x34d   :  { %2247 = vrot.lane.b32.xlu1 %v9813_v40, %s8059_s20  ;;  %v3677_v52 = vpop.f32.mrb[42].mxu1  ;;  %v1537_v6 = vpop.f32.mrb[56].mxu0  ;;  %4947 = vmatpush1.bf16.msra.mxu1 %v7972_v39  ;;  %v2770_v23 = vsel %vm2716_vm5, %v2649_v46, %v12568_v63 }
 0x34e   :  { %12564 = vst [vmem:[#allocation28_spill] sm:$0xff] %v10340_v21  ;;  %v3678_v2 = vadd.f32 %v9825_v16, %v3677_v52  ;;  %v3679_v33 = vpop.f32.mrb[43].mxu1  ;;  %v10345_v7 = vpop.permute.xlu0 %2031  ;;  %v1538_v19 = vadd.f32 %v10062_v27, %v1537_v6  ;;  %v4005_v26 = vmax.f32 %v3675_v43, 0.0  ;;  %4948 = vmatprep.subr.bf16.mxu1 %v12513_v58  ;;  %v2869_v43 = vsel %vm2815_vm6, %v2770_v23, %v10014_v51 }
 0x34f   :  { %12565 = vst [vmem:[#allocation9_spill] sm:$0xff] %v10345_v7  ;;  %v10351_v13 = vpop.permute.xlu1 %2328  ;;  %v7548_v29 = vpop.f32.mrb[57].mxu0 }
 0x350   :  { %v4006_v34 = vmax.f32 %v3678_v2, 0.0  ;;  %2346 = vrot.lane.b32.xlu0 %v9851_v18, %s8060_s23  ;;  %v1540_v16 = vpop.f32.mrb[58].mxu0  ;;  %v1716_v52 = vmax.f32 %v1538_v19, 0.0  ;;  %v2968_v19 = vsel %vm2914_vm7, %v2869_v43, %v10050_v49  ;;  %v10391_v49 = vld [vmem:[%s12352_s4] ss:$0 sm:$0xff] }
 0x351   :  { %2150 = vrot.lane.b32.xlu1 %v9813_v40, %s8058_s16  ;;  %v1541_v6 = vadd.f32 %v10062_v27, %v1540_v16  ;;  %v7549_v33 = vpop.f32.mrb[59].mxu0 }
 0x352   :  { %v10363_v29 = vpack.c.bf16 %v4006_v34, %v4005_v26  ;;  %v10365_v7 = vpop.permute.xlu0 %1928  ;;  %v3067_v34 = vsel %vm3013_vm8, %v2968_v19, %v10084_v0 }
 0x353   :  { %v10370_v2 = vpop.permute.xlu1 %2231  ;;  %v1717_v17 = vmax.f32 %v1541_v6, 0.0  ;;  %v3166_v46 = vsel %vm3112_vm9, %v3067_v34, %v2424_v56 }
 0x354   :  { %2249 = vrot.lane.b32.xlu0 %v9851_v18, %s8059_s20 }
 0x355   :  { %2348 = vrot.lane.b32.xlu1 %v9883_v48, %s8060_s23  ;;  %v10380_v26 = vpack.c.bf16 %v1717_v17, %v1716_v52  ;;  %v1545_v56 = vpop.f32.mrb[60].mxu0 }
 0x356   :  { %v2523_v51 = vpop.permute.xlu0 %2522  ;;  %v1546_v63 = vadd.f32 %v10062_v27, %v1545_v56  ;;  %v7552_v34 = vpop.f32.mrb[61].mxu0 }
 0x357   :  { %v10383_v39 = vpop.permute.xlu1 %2134  ;;  %v3291_v16 = vsel %vm3211_vm10, %v3166_v46, %v2523_v51 }
 0x358   :  { %v3682_v6 = vpop.f32.mrb[44].mxu1  ;;  %3801 = vmatmul.mubr.bf16.gmra.mrb[104].mxu1 %v3291_v16  ;;  %2441 = vrot.lane.b32.xlu0 %v9912_v42, %s8062_s30  ;;  %v12570_v16 = vld [vmem:[#allocation48_spill] sm:$0xff] }
 0x359   :  { %v3683_v0 = vadd.f32 %v10391_v49, %v3682_v6  ;;  %v3684_v17 = vpop.f32.mrb[45].mxu1  ;;  %2540 = vrot.lane.b32.xlu1 %v9951_v3, %s8063_s19  ;;  %6809 = vmatprep.mubr.msk.bf16.mxu1 %vm2568_vm4, %v12534_v45  ;;  %v1548_v45 = vpop.f32.mrb[62].mxu0  ;;  %v12571_v6 = vld [vmem:[#allocation36_spill] sm:$0xff] }
 0x35a   :  { %v3685_v52 = vpop.f32.mrb[46].mxu1  ;;  %v2426_v33 = vpop.permute.xlu0 %2425  ;;  %v2652_v17 = vsel %vm2568_vm4, %v12571_v6, %v12570_v16 }
 0x35b   :  { %v3686_v23 = vadd.f32 %v10391_v49, %v3685_v52  ;;  %v3687_v43 = vpop.f32.mrb[47].mxu1  ;;  %v10400_v19 = vpop.permute.xlu1 %2033  ;;  %v4007_v46 = vmax.f32 %v3683_v0, 0.0  ;;  %v1718_v52 = vmax.f32 %v1546_v63, 0.0 }
 0x35c   :  { %12569 = vst [vmem:[#allocation45_spill] sm:$0xff] %v10400_v19  ;;  %2152 = vrot.lane.b32.xlu0 %v9912_v42, %s8058_s16  ;;  %v1549_v43 = vadd.f32 %v10062_v27, %v1548_v45  ;;  %v7553_v19 = vpop.f32.mrb[63].mxu0  ;;  %v2772_v42 = vsel %vm2716_vm5, %v2652_v17, %v9750_v57  ;;  %v7973_v57 = vld [vmem:[%s12351_s5 + $0x38] sm:$0xff]  }
 0x35d   :  { %v4008_v51 = vmax.f32 %v3686_v23, 0.0  ;;  %2443 = vrot.lane.b32.xlu1 %v9951_v3, %s8062_s30  ;;  %v2871_v23 = vsel %vm2815_vm6, %v2772_v42, %v10071_v5  ;;  %4949 = vmatpush1.bf16.msra.mxu1 %v7973_v57 }
 0x35e   :  { %v10409_v56 = vpop.permute.xlu0 %2330  ;;  %v1719_v16 = vmax.f32 %v1549_v43, 0.0  ;;  %v2970_v63 = vsel %vm2914_vm7, %v2871_v23, %v10094_v10  ;;  %4950 = vmatprep.subr.bf16.mxu1 %v12513_v58 }
 0x35f   :  { %v10414_v34 = vpack.c.bf16 %v4008_v51, %v4007_v46  ;;  %v10416_v0 = vpop.permute.xlu1 %1930  ;;  %v3069_v27 = vsel %vm3013_vm8, %v2970_v63, %v10109_v61 }
 0x360   :  { %2542 = vrot.lane.b32.xlu0 %v9976_v38, %s8063_s19  ;;  %v10433_v5 = vpack.c.bf16 %v1719_v16, %v1718_v52  ;;  %v3168_v46 = vsel %vm3112_vm9, %v3069_v27, %v2426_v33 }
 0x361   :  { %2251 = vrot.lane.b32.xlu1 %v9951_v3, %s8059_s20 }
 0x362   :  { %v10431_v19 = vpop.permute.xlu0 %2233 }
 0x363   :  { %v2525_v51 = vpop.permute.xlu1 %2524 }
 0x364   :  { %v3294_v10 = vsel %vm3211_vm10, %v3168_v46, %v2525_v51  ;;  %2445 = vrot.lane.b32.xlu0 %v9976_v38, %s8062_s30 }
 0x365   :  { %3809 = vmatmul.mubr.bf16.gmra.mrb[108].mxu1 %v3294_v10  ;;  %2154 = vrot.lane.b32.xlu1 %v9951_v3, %s8058_s16 }
 0x366   :  { %6810 = vmatprep.mubr.msk.bf16.mxu1 %vm2568_vm4, %v9709_v1  ;;  %v10444_v61 = vpop.permute.xlu0 %2136 }
 0x367   :  { %v10446_v45 = vpop.permute.xlu1 %2332  ;;  %v3690_v33 = vpop.f32.mrb[48].mxu1 }
 0x368   :  { %v3691_v6 = vadd.f32 %v10391_v49, %v3690_v33  ;;  %v3692_v17 = vpop.f32.mrb[49].mxu1  ;;  %2350 = vrot.lane.b32.xlu0 %v9976_v38, %s8060_s23 }
 0x369   :  { %2544 = vrot.lane.b32.xlu1 %v10008_v44, %s8063_s19  ;;  %v3693_v52 = vpop.f32.mrb[50].mxu1  ;;  %v12577_v17 = vld [vmem:[#allocation37_spill] sm:$0xff] }
 0x36a   :  { %v3694_v3 = vadd.f32 %v10391_v49, %v3693_v52  ;;  %v3695_v43 = vpop.f32.mrb[51].mxu1  ;;  %v10454_v42 = vpop.permute.xlu0 %2035  ;;  %v4009_v16 = vmax.f32 %v3691_v6, 0.0  ;;  %v12576_v6 = vld [vmem:[#allocation12_spill] sm:$0xff] }
 0x36b   :  { %12572 = vst [vmem:[#allocation31_spill] sm:$0xff] %v10454_v42  ;;  %v10456_v23 = vpop.permute.xlu1 %2235  ;;  %v2655_v52 = vsel %vm2568_vm4, %v12577_v17, %v12576_v6 }
 0x36c   :  { %v4010_v63 = vmax.f32 %v3694_v3, 0.0  ;;  %2253 = vrot.lane.b32.xlu0 %v9976_v38, %s8059_s20 }
 0x36d   :  { %2447 = vrot.lane.b32.xlu1 %v10008_v44, %s8062_s30 }
 0x36e   :  { %v10462_v57 = vpack.c.bf16 %v4010_v63, %v4009_v16  ;;  %v10464_v27 = vpop.permute.xlu0 %1932  ;;  %v2774_v16 = vsel %vm2716_vm5, %v2655_v52, %v9862_v59 }
 0x36f   :  { %12573 = vst [vmem:[#allocation46_spill] sm:$0xff] %v10464_v27  ;;  %v10466_v46 = vpop.permute.xlu1 %2037 }
 0x370   :  { %12574 = vst [vmem:[#allocation48_spill] sm:$0xff] %v10466_v46  ;;  %2546 = vrot.lane.b32.xlu0 %v10039_v30, %s8063_s19 }
 0x371   :  { %2352 = vrot.lane.b32.xlu1 %v10008_v44, %s8060_s23 }
 0x372   :  { %v10472_v51 = vpop.permute.xlu0 %2334 }
 0x373   :  { %v10474_v10 = vpop.permute.xlu1 %1934 }
 0x374   :  { %12575 = vst [vmem:[#allocation36_spill] sm:$0xff] %v10474_v10  ;;  %v3698_v33 = vpop.f32.mrb[52].mxu1  ;;  %2156 = vrot.lane.b32.xlu0 %v9976_v38, %s8058_s16  ;;  %v2873_v10 = vsel %vm2815_vm6, %v2774_v16, %v10152_v36 }
 0x375   :  { %v3699_v3 = vadd.f32 %v10391_v49, %v3698_v33  ;;  %v3700_v43 = vpop.f32.mrb[53].mxu1  ;;  %2255 = vrot.lane.b32.xlu1 %v10008_v44, %s8059_s20  ;;  %v2972_v33 = vsel %vm2914_vm7, %v2873_v10, %v10176_v32 }
 0x376   :  { %v3701_v63 = vpop.f32.mrb[54].mxu1  ;;  %v10486_v1 = vpop.permute.xlu0 %2039  ;;  %v3071_v6 = vsel %vm3013_vm8, %v2972_v33, %v10197_v22  ;;  %v7974_v22 = vld [vmem:[%s12351_s5 + $0x40] sm:$0xff]  }
 0x377   :  { %v3702_v46 = vadd.f32 %v10391_v49, %v3701_v63  ;;  %v3703_v27 = vpop.f32.mrb[55].mxu1  ;;  %v2428_v42 = vpop.permute.xlu1 %2427  ;;  %v4011_v59 = vmax.f32 %v3699_v3, 0.0  ;;  %4951 = vmatpush1.bf16.msra.mxu1 %v7974_v22  ;;  %v12583_v22 = vld [vmem:[#allocation5_spill] sm:$0xff] }
 0x378   :  { %2449 = vrot.lane.b32.xlu0 %v10039_v30, %s8062_s30  ;;  %v3170_v36 = vsel %vm3112_vm9, %v3071_v6, %v2428_v42  ;;  %v12578_v27 = vld [vmem:[#allocation38_spill] sm:$0xff]  ;;  %4952 = vmatprep.subr.bf16.mxu1 %v12513_v58 }
 0x379   :  { %v4012_v17 = vmax.f32 %v3702_v46, 0.0  ;;  %2548 = vrot.lane.b32.xlu1 %v10077_v20, %s8063_s19  ;;  %v2658_v43 = vsel %vm2568_vm4, %v12578_v27, %v9881_v28  ;;  %v12579_v46 = vld [vmem:[#allocation52_spill] sm:$0xff]  ;;  %v12581_v27 = vld [vmem:[#allocation53_spill] sm:$0xff] }
 0x37a   :  { %v2527_v52 = vpop.permute.xlu0 %2526  ;;  %v2776_v3 = vsel %vm2716_vm5, %v2658_v43, %v12579_v46  ;;  %v12582_v43 = vld [vmem:[#allocation39_spill] sm:$0xff] }
 0x37b   :  { %v10503_v16 = vpack.c.bf16 %v4012_v17, %v4011_v59  ;;  %v10505_v32 = vpop.permute.xlu1 %2138  ;;  %v3297_v10 = vsel %vm3211_vm10, %v3170_v36, %v2527_v52  ;;  %v2875_v28 = vsel %vm2815_vm6, %v2776_v3, %v10186_v11  ;;  %v12580_v11 = vld [vmem:[#allocation57_spill] sm:$0xff]  ;;  %v12584_v46 = vld [vmem:[#allocation55_spill] sm:$0xff] }
 0x37c   :  { %3817 = vmatmul.mubr.bf16.gmra.mrb[112].mxu1 %v3297_v10  ;;  %2354 = vrot.lane.b32.xlu0 %v10039_v30, %s8060_s23  ;;  %v2974_v42 = vsel %vm2914_vm7, %v2875_v28, %v10216_v9  ;;  %v2661_v10 = vsel %vm2568_vm4, %v12582_v43, %v12581_v27 }
 0x37d   :  { %2451 = vrot.lane.b32.xlu1 %v10077_v20, %s8062_s30  ;;  %6811 = vmatprep.mubr.msk.bf16.mxu1 %vm2568_vm4, %v9729_v15  ;;  %v3073_v33 = vsel %vm3013_vm8, %v2974_v42, %v10243_v62  ;;  %v2778_v3 = vsel %vm2716_vm5, %v2661_v10, %v12584_v46 }
 0x37e   :  { %v2430_v63 = vpop.permute.xlu0 %2429  ;;  %v2877_v42 = vsel %vm2815_vm6, %v2778_v3, %v10229_v60 }
 0x37f   :  { %v2529_v6 = vpop.permute.xlu1 %2528  ;;  %v3172_v59 = vsel %vm3112_vm9, %v3073_v33, %v2430_v63 }
 0x380   :  { %2550 = vrot.lane.b32.xlu0 %v12580_v11, %s8063_s19  ;;  %v3300_v9 = vsel %vm3211_vm10, %v3172_v59, %v2529_v6  ;;  %v2976_v6 = vsel %vm2914_vm7, %v2877_v42, %v10265_v31 }
 0x381   :  { %1942 = vrot.lane.b32.xlu1 %v9754_v55, %s8056_s15  ;;  %v3075_v27 = vsel %vm3013_vm8, %v2976_v6, %v10302_v12 }
 0x382   :  { %v10531_v17 = vpop.permute.xlu0 %2237 }
 0x383   :  { %v2432_v36 = vpop.permute.xlu1 %2431 }
 0x384   :  { %3825 = vmatmul.mubr.bf16.gmra.mrb[116].mxu1 %v3300_v9  ;;  %2047 = vrot.lane.b32.xlu0 %v9790_v8, %s8057_s18  ;;  %v3174_v60 = vsel %vm3112_vm9, %v3075_v27, %v2432_v36 }
 0x385   :  { %2158 = vrot.lane.b32.xlu1 %v10008_v44, %s8058_s16  ;;  %6812 = vmatprep.mubr.msk.bf16.mxu1 %vm2568_vm4, %v9754_v55 }
 0x386   :  { %v10540_v62 = vpop.permute.xlu0 %2140 }
 0x387   :  { %v10542_v52 = vpop.permute.xlu1 %2336 }
 0x388   :  { %2453 = vrot.lane.b32.xlu0 %v12580_v11, %s8062_s30 }
 0x389   :  { %2552 = vrot.lane.b32.xlu1 %v12583_v22, %s8063_s19 }
 0x38a   :  { %v10553_v28 = vpop.permute.xlu0 %1936 }
 0x38b   :  { %v10557_v63 = vpop.permute.xlu1 %2239  ;;  %v3706_v33 = vpop.f32.mrb[56].mxu1 }
 0x38c   :  { %v3707_v59 = vadd.f32 %v10391_v49, %v3706_v33  ;;  %v3708_v9 = vpop.f32.mrb[57].mxu1  ;;  %2257 = vrot.lane.b32.xlu0 %v10039_v30, %s8059_s20 }
 0x38d   :  { %2455 = vrot.lane.b32.xlu1 %v10190_v24, %s8062_s30  ;;  %v3709_v43 = vpop.f32.mrb[58].mxu1 }
 0x38e   :  { %v3710_v10 = vadd.f32 %v10391_v49, %v3709_v43  ;;  %v3711_v46 = vpop.f32.mrb[59].mxu1  ;;  %v2531_v3 = vpop.permute.xlu0 %2530  ;;  %v4013_v33 = vmax.f32 %v3707_v59, 0.0 }
 0x38f   :  { %v10570_v31 = vpop.permute.xlu1 %2142  ;;  %v3303_v42 = vsel %vm3211_vm10, %v3174_v60, %v2531_v3  ;;  %v12586_v60 = vld [vmem:[#allocation13_spill] sm:$0xff] }
 0x390   :  { %v4014_v9 = vmax.f32 %v3710_v10, 0.0  ;;  %3833 = vmatmul.mubr.bf16.gmra.mrb[120].mxu1 %v3303_v42  ;;  %2554 = vrot.lane.b32.xlu0 %v10223_v47, %s8063_s19  ;;  %v12587_v10 = vld [vmem:[#allocation40_spill] sm:$0xff] }
 0x391   :  { %2356 = vrot.lane.b32.xlu1 %v10077_v20, %s8060_s23  ;;  %6813 = vmatprep.mubr.msk.bf16.mxu1 %vm2568_vm4, %v9790_v8  ;;  %v2664_v46 = vsel %vm2568_vm4, %v12587_v10, %v12586_v60 }
 0x392   :  { %v10579_v24 = vpack.c.bf16 %v4014_v9, %v4013_v33  ;;  %v2434_v12 = vpop.permute.xlu0 %2433  ;;  %v7975_v9 = vld [vmem:[%s12351_s5 + $0x48] sm:$0xff]  }
 0x393   :  { %v10581_v36 = vpop.permute.xlu1 %2041  ;;  %v3714_v6 = vpop.f32.mrb[60].mxu1  ;;  %4953 = vmatpush1.bf16.msra.mxu1 %v7975_v9 }
 0x394   :  { %12585 = vst [vmem:[#allocation12_spill] sm:$0xff] %v10581_v36  ;;  %v3715_v27 = vadd.f32 %v10391_v49, %v3714_v6  ;;  %v3716_v59 = vpop.f32.mrb[61].mxu1  ;;  %1944 = vrot.lane.b32.xlu0 %v9790_v8, %s8056_s15  ;;  %v12588_v6 = vld [vmem:[#allocation35_spill] sm:$0xff]  ;;  %4954 = vmatprep.subr.bf16.mxu1 %v12513_v58 }
 0x395   :  { %2049 = vrot.lane.b32.xlu1 %v9813_v40, %s8057_s18  ;;  %v3717_v43 = vpop.f32.mrb[62].mxu1  ;;  %v2780_v59 = vsel %vm2716_vm5, %v2664_v46, %v12588_v6 }
 0x396   :  { %v3718_v3 = vadd.f32 %v10391_v49, %v3717_v43  ;;  %v3719_v42 = vpop.f32.mrb[63].mxu1  ;;  %v10592_v33 = vpop.permute.xlu0 %2338  ;;  %v2879_v55 = vsel %vm2815_vm6, %v2780_v59, %v10279_v50  ;;  %v4015_v15 = vmax.f32 %v3715_v27, 0.0 }
 0x397   :  { %v10599_v8 = vpop.permute.xlu1 %1938  ;;  %v2978_v43 = vsel %vm2914_vm7, %v2879_v55, %v10321_v41 }
 0x398   :  { %v4016_v36 = vmax.f32 %v3718_v3, 0.0  ;;  %2457 = vrot.lane.b32.xlu0 %v10223_v47, %s8062_s30  ;;  %v3077_v60 = vsel %vm3013_vm8, %v2978_v43, %v10351_v13 }
 0x399   :  { %2556 = vrot.lane.b32.xlu1 %v10250_v53, %s8063_s19  ;;  %v3176_v27 = vsel %vm3112_vm9, %v3077_v60, %v2434_v12  ;;  %v12589_v60 = vld [vmem:[#allocation15_spill] sm:$0xff] }
 0x39a   :  { %v10612_v10 = vpack.c.bf16 %v4016_v36, %v4015_v15  ;;  %v10614_v50 = vpop.permute.xlu0 %2241 }
 0x39b   :  { %v2533_v46 = vpop.permute.xlu1 %2532 }
 0x39c   :  { %v3306_v47 = vsel %vm3211_vm10, %v3176_v27, %v2533_v46  ;;  %2160 = vrot.lane.b32.xlu0 %v10039_v30, %s8058_s16  ;;  %v12590_v27 = vld [vmem:[#allocation41_spill] sm:$0xff] }
 0x39d   :  { %3841 = vmatmul.mubr.bf16.gmra.mrb[124].mxu1 %v3306_v47  ;;  %2459 = vrot.lane.b32.xlu1 %v10250_v53, %s8062_s30  ;;  %v2667_v46 = vsel %vm2568_vm4, %v12590_v27, %v12589_v60  ;;  %v12591_v47 = vld [vmem:[#allocation3_spill] sm:$0xff] }
 0x39e   :  { %6814 = vmatprep.mubr.msk.bf16.mxu1 %vm2568_vm4, %v9813_v40  ;;  %v10624_v55 = vpop.permute.xlu0 %2144 }
 0x39f   :  { %v2436_v15 = vpop.permute.xlu1 %2435  ;;  %v3722_v41 = vpop.f32.mrb[64].mxu1 }
 0x3a0   :  { %v3723_v13 = vadd.f32 %v10391_v49, %v3722_v41  ;;  %v3724_v12 = vpop.f32.mrb[65].mxu1  ;;  %2558 = vrot.lane.b32.xlu0 %v10284_v14, %s8063_s19  ;;  %v2782_v41 = vsel %vm2716_vm5, %v2667_v46, %v12591_v47 }
 0x3a1   :  { %2259 = vrot.lane.b32.xlu1 %v10077_v20, %s8059_s20  ;;  %v3725_v36 = vpop.f32.mrb[66].mxu1 }
 0x3a2   :  { %v3726_v3 = vadd.f32 %v10391_v49, %v3725_v36  ;;  %v3727_v42 = vpop.f32.mrb[67].mxu1  ;;  %v10632_v9 = vpop.permute.xlu0 %2043  ;;  %v4017_v59 = vmax.f32 %v3723_v13, 0.0  ;;  %v2881_v13 = vsel %vm2815_vm6, %v2782_v41, %v10335_v54 }
 0x3a3   :  { %v10634_v6 = vpop.permute.xlu1 %2340  ;;  %v2980_v42 = vsel %vm2914_vm7, %v2881_v13, %v10370_v2 }
 0x3a4   :  { %v4018_v43 = vmax.f32 %v3726_v3, 0.0  ;;  %2358 = vrot.lane.b32.xlu0 %v12580_v11, %s8060_s23  ;;  %v3079_v60 = vsel %vm3013_vm8, %v2980_v42, %v10409_v56  ;;  %v12593_v56 = vld [vmem:[#allocation56_spill] sm:$0xff] }
 0x3a5   :  { %1946 = vrot.lane.b32.xlu1 %v9813_v40, %s8056_s15 }
 0x3a6   :  { %v10645_v12 = vpack.c.bf16 %v4018_v43, %v4017_v59  ;;  %v10647_v36 = vpop.permute.xlu0 %1940  ;;  %v3178_v59 = vsel %vm3112_vm9, %v3079_v60, %v2436_v15  ;;  %v12594_v15 = vld [vmem:[#allocation42_spill] sm:$0xff]  ;;  %v7976_v60 = vld [vmem:[%s12351_s5 + $0x50] sm:$0xff]  }
 0x3a7   :  { %12592 = vst [vmem:[#allocation37_spill] sm:$0xff] %v10647_v36  ;;  %v10651_v3 = vpop.permute.xlu1 %2243  ;;  %v2670_v41 = vsel %vm2568_vm4, %v12594_v15, %v12593_v56  ;;  %4955 = vmatpush1.bf16.msra.mxu1 %v7976_v60 }
 0x3a8   :  { %2461 = vrot.lane.b32.xlu0 %v10284_v14, %s8062_s30  ;;  %4956 = vmatprep.subr.bf16.mxu1 %v12513_v58 }
 0x3a9   :  { %2560 = vrot.lane.b32.xlu1 %v10323_v25, %s8063_s19 }
 0x3aa   :  { %v2535_v43 = vpop.permute.xlu0 %2534 }
 0x3ab   :  { %v10662_v27 = vpop.permute.xlu1 %2146  ;;  %v3309_v54 = vsel %vm3211_vm10, %v3178_v59, %v2535_v43  ;;  %v12595_v59 = vld [vmem:[#allocation58_spill] sm:$0xff] }
 0x3ac   :  { %v3730_v46 = vpop.f32.mrb[68].mxu1  ;;  %3849 = vmatmul.mubr.bf16.gmra.mrb[128].mxu1 %v3309_v54  ;;  %2051 = vrot.lane.b32.xlu0 %v9851_v18, %s8057_s18  ;;  %v2784_v43 = vsel %vm2716_vm5, %v2670_v41, %v12595_v59 }
 0x3ad   :  { %v3731_v2 = vadd.f32 %v10391_v49, %v3730_v46  ;;  %v3732_v47 = vpop.f32.mrb[69].mxu1  ;;  %2463 = vrot.lane.b32.xlu1 %v10323_v25, %s8062_s30  ;;  %6815 = vmatprep.mubr.msk.bf16.mxu1 %vm2568_vm4, %v9851_v18  ;;  %v2883_v40 = vsel %vm2815_vm6, %v2784_v43, %v10383_v39 }
 0x3ae   :  { %v3733_v13 = vpop.f32.mrb[70].mxu1  ;;  %v2438_v42 = vpop.permute.xlu0 %2437  ;;  %v2982_v56 = vsel %vm2914_vm7, %v2883_v40, %v10431_v19  ;;  %v12597_v19 = vld [vmem:[#allocation4_spill] sm:$0xff] }
 0x3af   :  { %v3734_v54 = vadd.f32 %v10391_v49, %v3733_v13  ;;  %v3735_v46 = vpop.f32.mrb[71].mxu1  ;;  %v10681_v47 = vpop.permute.xlu1 %2045  ;;  %v4019_v15 = vmax.f32 %v3731_v2, 0.0  ;;  %v3081_v41 = vsel %vm3013_vm8, %v2982_v56, %v10446_v45 }
 0x3b0   :  { %12596 = vst [vmem:[#allocation38_spill] sm:$0xff] %v10681_v47  ;;  %2562 = vrot.lane.b32.xlu0 %v10340_v21, %s8063_s19  ;;  %v3180_v59 = vsel %vm3112_vm9, %v3081_v41, %v2438_v42  ;;  %v12599_v42 = vld [vmem:[#allocation17_spill] sm:$0xff] }
 0x3b1   :  { %v4020_v25 = vmax.f32 %v3734_v54, 0.0  ;;  %2162 = vrot.lane.b32.xlu1 %v10077_v20, %s8058_s16 }
 0x3b2   :  { %v10694_v13 = vpop.permute.xlu0 %2342 }
 0x3b3   :  { %v10696_v39 = vpack.c.bf16 %v4020_v25, %v4019_v15  ;;  %v2537_v60 = vpop.permute.xlu1 %2536  ;;  %v12598_v25 = vld [vmem:[#allocation43_spill] sm:$0xff] }
 0x3b4   :  { %v3312_v43 = vsel %vm3211_vm10, %v3180_v59, %v2537_v60  ;;  %2261 = vrot.lane.b32.xlu0 %v12580_v11, %s8059_s20  ;;  %v2673_v45 = vsel %vm2568_vm4, %v12598_v25, %v12597_v19 }
 0x3b5   :  { %3857 = vmatmul.mubr.bf16.gmra.mrb[132].mxu1 %v3312_v43  ;;  %2360 = vrot.lane.b32.xlu1 %v12583_v22, %s8060_s23  ;;  %v2786_v54 = vsel %vm2716_vm5, %v2673_v45, %v12599_v42 }
 0x3b6   :  { %6816 = vmatprep.mubr.msk.bf16.mxu1 %vm2568_vm4, %v9883_v48  ;;  %v10706_v40 = vpop.permute.xlu0 %2245  ;;  %v2885_v56 = vsel %vm2815_vm6, %v2786_v54, %v10444_v61 }
 0x3b7   :  { %v2440_v2 = vpop.permute.xlu1 %2439  ;;  %v2984_v59 = vsel %vm2914_vm7, %v2885_v56, %v10456_v23 }
 0x3b8   :  { %2465 = vrot.lane.b32.xlu0 %v10340_v21, %s8062_s30  ;;  %v3083_v19 = vsel %vm3013_vm8, %v2984_v59, %v10472_v51  ;;  %v12600_v59 = vld [vmem:[#allocation44_spill] sm:$0xff] }
 0x3b9   :  { %2564 = vrot.lane.b32.xlu1 %v10380_v26, %s8063_s19  ;;  %v3182_v61 = vsel %vm3112_vm9, %v3083_v19, %v2440_v2  ;;  %v7977_v2 = vld [vmem:[%s12351_s5 + $0x58] sm:$0xff]  }
 0x3ba   :  { %v10717_v46 = vpop.permute.xlu0 %2148  ;;  %4957 = vmatpush1.bf16.msra.mxu1 %v7977_v2  ;;  %v12601_v19 = vld [vmem:[#allocation6_spill] sm:$0xff] }
 0x3bb   :  { %v10721_v15 = vpop.permute.xlu1 %2344  ;;  %v3738_v41 = vpop.f32.mrb[72].mxu1  ;;  %4958 = vmatprep.subr.bf16.mxu1 %v12513_v58 }
 0x3bc   :  { %v3739_v60 = vadd.f32 %v10391_v49, %v3738_v41  ;;  %v3740_v43 = vpop.f32.mrb[73].mxu1  ;;  %1948 = vrot.lane.b32.xlu0 %v9851_v18, %s8056_s15 }
 0x3bd   :  { %2053 = vrot.lane.b32.xlu1 %v9883_v48, %s8057_s18  ;;  %v3741_v25 = vpop.f32.mrb[74].mxu1 }
 0x3be   :  { %v3742_v45 = vadd.f32 %v10391_v49, %v3741_v25  ;;  %v3743_v42 = vpop.f32.mrb[75].mxu1  ;;  %v2539_v54 = vpop.permute.xlu0 %2538  ;;  %v4021_v41 = vmax.f32 %v3739_v60, 0.0 }
 0x3bf   :  { %v10734_v23 = vpop.permute.xlu1 %2247  ;;  %v3315_v56 = vsel %vm3211_vm10, %v3182_v61, %v2539_v54  ;;  %v12602_v54 = vld [vmem:[#allocation51_spill] sm:$0xff] }
 0x3c0   :  { %v4022_v43 = vmax.f32 %v3742_v45, 0.0  ;;  %3865 = vmatmul.mubr.bf16.gmra.mrb[136].mxu1 %v3315_v56  ;;  %2164 = vrot.lane.b32.xlu0 %v12580_v11, %s8058_s16 }
 0x3c1   :  { %2263 = vrot.lane.b32.xlu1 %v12583_v22, %s8059_s20  ;;  %6817 = vmatprep.mubr.msk.bf16.mxu1 %vm2568_vm4, %v9976_v38  ;;  %v2676_v38 = vsel %vm2568_vm4, %v12600_v59, %v10202_v35 }
 0x3c2   :  { %v10743_v18 = vpack.c.bf16 %v4022_v43, %v4021_v41  ;;  %v10745_v48 = vpop.permute.xlu0 %2346  ;;  %v2788_v25 = vsel %vm2716_vm5, %v2676_v38, %v12601_v19 }
 0x3c3   :  { %v10747_v51 = vpop.permute.xlu1 %2150  ;;  %v2887_v45 = vsel %vm2815_vm6, %v2788_v25, %v10505_v32 }
 0x3c4   :  { %2362 = vrot.lane.b32.xlu0 %v10171_v37, %s8060_s23  ;;  %v2986_v35 = vsel %vm2914_vm7, %v2887_v45, %v10531_v17  ;;  %v1553_v45 = vpop.f32.mrb[64].mxu0 }
 0x3c5   :  { %4169 = vrot.lane.b32.xlu1 %v10309_v4, %s8057_s18  ;;  %v3085_v43 = vsel %vm3013_vm8, %v2986_v35, %v10542_v52  ;;  %v12605_v52 = vld [vmem:[#allocation16_spill] sm:$0xff] }
 0x3c6   :  { %v10759_v60 = vpop.permute.xlu0 %2249 }
 0x3c7   :  { %v10763_v61 = vpop.permute.xlu1 %2348 }
 0x3c8   :  { %v3746_v42 = vpop.f32.mrb[76].mxu1  ;;  %4157 = vrot.lane.b32.xlu0 %v12602_v54, %s8057_s18  ;;  %v12603_v54 = vld [vmem:[#allocation54_spill] sm:$0xff] }
 0x3c9   :  { %v3747_v56 = vadd.f32 %v10391_v49, %v3746_v42  ;;  %v3748_v41 = vpop.f32.mrb[77].mxu1  ;;  %4171 = vrot.lane.b32.xlu1 %v10363_v29, %s8057_s18  ;;  %v7978_v42 = vld [vmem:[%s12351_s5 + $0x60] sm:$0xff]  }
 0x3ca   :  { %v3749_v2 = vpop.f32.mrb[78].mxu1  ;;  %v2442_v59 = vpop.permute.xlu0 %2441  ;;  %v12604_v41 = vld [vmem:[#allocation27_spill] sm:$0xff]  ;;  %4959 = vmatpush1.bf16.msra.mxu1 %v7978_v42 }
 0x3cb   :  { %v3750_v32 = vadd.f32 %v10391_v49, %v3749_v2  ;;  %v3751_v38 = vpop.f32.mrb[79].mxu1  ;;  %v3184_v19 = vsel %vm3112_vm9, %v3085_v43, %v2442_v59  ;;  %v2541_v25 = vpop.permute.xlu1 %2540  ;;  %v2679_v35 = vsel %vm2568_vm4, %v12605_v52, %v12604_v41  ;;  %v4023_v21 = vmax.f32 %v3747_v56, 0.0  ;;  %v8050_v43 = vld [vmem:[%s12349_s2] ss:$0 sm:$0xff]  ;;  %4960 = vmatprep.subr.bf16.mxu1 %v12513_v58 }
 0x3cc   :  { %4212 = vrot.lane.b32.xlu0 %v12603_v54, %s8059_s20  ;;  %v3318_v17 = vsel %vm3211_vm10, %v3184_v19, %v2541_v25  ;;  %v1554_v59 = vadd.f32 %v8050_v43, %v1553_v45  ;;  %v7556_v38 = vpop.f32.mrb[65].mxu0  ;;  %v12606_v19 = vld [vmem:[#allocation7_spill] sm:$0xff] }
 0x3cd   :  { %v4024_v2 = vmax.f32 %v3750_v32, 0.0  ;;  %4173 = vrot.lane.b32.xlu1 %v10414_v34, %s8057_s18  ;;  %3873 = vmatmul.mubr.bf16.gmra.mrb[140].mxu1 %v3318_v17  ;;  %v2790_v25 = vsel %vm2716_vm5, %v2679_v35, %v12606_v19  ;;  %v1556_v56 = vpop.f32.mrb[66].mxu0  ;;  %v12607_v38 = vld [vmem:[#allocation20_spill] sm:$0xff]  ;;  %v12609_v19 = vld [vmem:[#allocation18_spill] sm:$0xff] }
 0x3ce   :  { %v10795_v47 = vpop.permute.xlu0 %2152  ;;  %6818 = vmatprep.mubr.msk.bf16.mxu1 %vm2568_vm4, %v10008_v44  ;;  %v2889_v32 = vsel %vm2815_vm6, %v2790_v25, %v10540_v62  ;;  %v1720_v52 = vmax.f32 %v1554_v59, 0.0  ;;  %v1557_v36 = vadd.f32 %v8050_v43, %v1556_v56  ;;  %v7557_v45 = vpop.f32.mrb[67].mxu0  ;;  %v7979_v44 = vld [vmem:[%s12351_s5 + $0x68] sm:$0xff]  }
 0x3cf   :  { %v10801_v17 = vpack.c.bf16 %v4024_v2, %v4023_v21  ;;  %v2444_v41 = vpop.permute.xlu1 %2443  ;;  %v2988_v35 = vsel %vm2914_vm7, %v2889_v32, %v10557_v63  ;;  %4961 = vmatpush1.bf16.msra.mxu1 %v7979_v44  ;;  %v12610_v32 = vld [vmem:[#allocation9_spill] sm:$0xff] }
 0x3d0   :  { %4271 = vrot.lane.b32.xlu0 %v12607_v38, %s8062_s30  ;;  %v3087_v21 = vsel %vm3013_vm8, %v2988_v35, %v10592_v33  ;;  %v1721_v62 = vmax.f32 %v1557_v36, 0.0  ;;  %4962 = vmatprep.subr.bf16.mxu1 %v12513_v58  ;;  %v7980_v33 = vld [vmem:[%s12351_s5 + $0x70] sm:$0xff]  }
 0x3d1   :  { %2467 = vrot.lane.b32.xlu1 %v10380_v26, %s8062_s30  ;;  %v3186_v42 = vsel %vm3112_vm9, %v3087_v21, %v2444_v41  ;;  %v12608_v36 = vld [vmem:[#allocation25_spill] sm:$0xff] }
 0x3d2   :  { %v2543_v2 = vpop.permute.xlu0 %2542  ;;  %v10819_v59 = vpack.c.bf16 %v1721_v62, %v1720_v52  ;;  %v2682_v25 = vsel %vm2568_vm4, %v12609_v19, %v12608_v36  ;;  %v12611_v62 = vld [vmem:[#allocation30_spill] sm:$0xff] }
 0x3d3   :  { %v10816_v43 = vpop.permute.xlu1 %2251  ;;  %v3321_v63 = vsel %vm3211_vm10, %v3186_v42, %v2543_v2  ;;  %4963 = vmatpush1.bf16.msra.mxu1 %v7980_v33  ;;  %v2792_v41 = vsel %vm2716_vm5, %v2682_v25, %v12610_v32  ;;  %v12612_v25 = vmov 0.0  }
 0x3d4   :  { %4159 = vrot.lane.b32.xlu0 %v12603_v54, %s8057_s18  ;;  %4964 = vmatprep.subr.bf16.mxu1 %v12513_v58  ;;  %v2891_v35 = vsel %vm2815_vm6, %v2792_v41, %v10570_v31  ;;  %v12613_v41 = vld [vmem:[#allocation22_spill] sm:$0xff] }
 0x3d5   :  { %4175 = vrot.lane.b32.xlu1 %v10462_v57, %s8057_s18  ;;  %3881 = vmatmul.mubr.bf16.gmra.mrb[144].mxu1 %v3321_v63  ;;  %v2990_v42 = vsel %vm2914_vm7, %v2891_v35, %v10614_v50 }
 0x3d6   :  { %v2446_v56 = vpop.permute.xlu0 %2445  ;;  %6819 = vmatprep.mubr.msk.bf16.mxu1 %vm2568_vm4, %v10039_v30  ;;  %v7981_v30 = vld [vmem:[%s12351_s5 + $0x78] sm:$0xff]   ;;  %v3089_v31 = vsel %vm3013_vm8, %v2990_v42, %v10634_v6  ;;  %v12614_v6 = vld [vmem:[#allocation19_spill] sm:$0xff] }
 0x3d7   :  { %v10836_v52 = vpop.permute.xlu1 %2154  ;;  %v3754_v45 = vpop.f32.mrb[80].mxu1  ;;  %4965 = vmatpush1.bf16.msra.mxu1 %v7981_v30  ;;  %v3188_v36 = vsel %vm3112_vm9, %v3089_v31, %v2446_v56  ;;  %v2685_v35 = vsel %vm2568_vm4, %v12614_v6, %v10365_v7  ;;  %v12618_v6 = vld [vmem:[#allocation14_spill] sm:$0xff] }
 0x3d8   :  { %v3755_v44 = vadd.f32 %v10391_v49, %v3754_v45  ;;  %v3756_v21 = vpop.f32.mrb[81].mxu1  ;;  %4214 = vrot.lane.b32.xlu0 %v12611_v62, %s8059_s20  ;;  %7558 = vmatprep.subr.bf16.mxu1 %v12612_v25 }
 0x3d9   :  { %4323 = vrot.lane.b32.xlu1 %v10503_v16, %s8057_s18  ;;  %v3757_v58 = vpop.f32.mrb[82].mxu1  ;;  %v12615_v21 = vld [vmem:[#allocation45_spill] sm:$0xff] }
 0x3da   :  { %v3758_v2 = vadd.f32 %v10391_v49, %v3757_v58  ;;  %v3759_v63 = vpop.f32.mrb[83].mxu1  ;;  %v10854_v33 = vpop.permute.xlu0 %2350  ;;  %v4025_v32 = vmax.f32 %v3755_v44, 0.0  ;;  %v2794_v56 = vsel %vm2716_vm5, %v2685_v35, %v12615_v21  ;;  %v12619_v21 = vld [vmem:[#allocation46_spill] sm:$0xff] }
 0x3db   :  { %v2545_v19 = vpop.permute.xlu1 %2544  ;;  %v2893_v42 = vsel %vm2815_vm6, %v2794_v56, %v10624_v55  ;;  %v12620_v56 = vld [vmem:[#allocation24_spill] sm:$0xff] }
 0x3dc   :  { %v4026_v50 = vmax.f32 %v3758_v2, 0.0  ;;  %4273 = vrot.lane.b32.xlu0 %v12613_v41, %s8062_s30  ;;  %v3324_v45 = vsel %vm3211_vm10, %v3188_v36, %v2545_v19  ;;  %v2992_v7 = vsel %vm2914_vm7, %v2893_v42, %v10651_v3  ;;  %v12616_v3 = vld [vmem:[#allocation21_spill] sm:$0xff]  ;;  %v12617_v19 = vld [vmem:[#allocation31_spill] sm:$0xff]  ;;  %v2691_v42 = vsel %vm2568_vm4, %v12620_v56, %v12619_v21 }
 0x3dd   :  { %4346 = vrot.lane.b32.xlu1 %v10579_v24, %s8059_s20  ;;  %3889 = vmatmul.mubr.bf16.gmra.mrb[148].mxu1 %v3324_v45  ;;  %v3091_v31 = vsel %vm3013_vm8, %v2992_v7, %v10694_v13  ;;  %v2688_v13 = vsel %vm2568_vm4, %v12616_v3, %v10416_v0 }
 0x3de   :  { %v10868_v30 = vpack.c.bf16 %v4026_v50, %v4025_v32  ;;  %v10870_v44 = vpop.permute.xlu0 %2253  ;;  %6820 = vmatprep.mubr.msk.bf16.mxu1 %vm2568_vm4, %v10077_v20  ;;  %v2796_v32 = vsel %vm2716_vm5, %v2688_v13, %v12617_v19 }
 0x3df   :  { %v2448_v58 = vpop.permute.xlu1 %2447  ;;  %v2895_v45 = vsel %vm2815_vm6, %v2796_v32, %v10662_v27 }
 0x3e0   :  { %2566 = vrot.lane.b32.xlu0 %v10433_v5, %s8063_s19  ;;  %v3190_v2 = vsel %vm3112_vm9, %v3091_v31, %v2448_v58  ;;  %v2994_v35 = vsel %vm2914_vm7, %v2895_v45, %v10706_v40 }
 0x3e1   :  { %4283 = vrot.lane.b32.xlu1 %v10612_v10, %s8062_s30  ;;  %v3093_v0 = vsel %vm3013_vm8, %v2994_v35, %v10721_v15 }
 0x3e2   :  { %v2547_v63 = vpop.permute.xlu0 %2546 }
 0x3e3   :  { %v10885_v20 = vpop.permute.xlu1 %2352  ;;  %v3327_v55 = vsel %vm3211_vm10, %v3190_v2, %v2547_v63  ;;  %v12621_v2 = vld [vmem:[#allocation48_spill] sm:$0xff] }
 0x3e4   :  { %4161 = vrot.lane.b32.xlu0 %v12611_v62, %s8057_s18  ;;  %v2798_v63 = vsel %vm2716_vm5, %v2691_v42, %v12621_v2 }
 0x3e5   :  { %4348 = vrot.lane.b32.xlu1 %v10612_v10, %s8059_s20  ;;  %3897 = vmatmul.mubr.bf16.gmra.mrb[152].mxu1 %v3327_v55  ;;  %v2897_v13 = vsel %vm2815_vm6, %v2798_v63, %v10717_v46 }
 0x3e6   :  { %v10895_v36 = vpop.permute.xlu0 %2156  ;;  %6821 = vmatprep.mubr.msk.bf16.mxu1 %vm2568_vm4, %v12580_v11  ;;  %v2996_v35 = vsel %vm2914_vm7, %v2897_v13, %v10734_v23 }
 0x3e7   :  { %v10901_v50 = vpop.permute.xlu1 %2255 }
 0x3e8   :  { %4216 = vrot.lane.b32.xlu0 %v12618_v6, %s8059_s20 }
 0x3e9   :  { %4285 = vrot.lane.b32.xlu1 %v10645_v12, %s8062_s30 }
 0x3ea   :  { %v2450_v11 = vpop.permute.xlu0 %2449 }
 0x3eb   :  { %v3192_v58 = vsel %vm3112_vm9, %v3093_v0, %v2450_v11  ;;  %v2549_v27 = vpop.permute.xlu1 %2548  ;;  %v3095_v0 = vsel %vm3013_vm8, %v2996_v35, %v10745_v48  ;;  %v12624_v48 = vld [vmem:[#allocation29_spill] sm:$0xff] }
 0x3ec   :  { %v3762_v7 = vpop.f32.mrb[84].mxu1  ;;  %4275 = vrot.lane.b32.xlu0 %v10309_v4, %s8062_s30  ;;  %v3330_v40 = vsel %vm3211_vm10, %v3192_v58, %v2549_v27  ;;  %v12622_v58 = vld [vmem:[#allocation36_spill] sm:$0xff]  ;;  %v12623_v27 = vld [vmem:[#allocation26_spill] sm:$0xff] }
 0x3ed   :  { %v3763_v31 = vadd.f32 %v10391_v49, %v3762_v7  ;;  %4232 = vrot.lane.b32.xlu1 %v10645_v12, %s8059_s20  ;;  %v3764_v15 = vpop.f32.mrb[85].mxu1  ;;  %3905 = vmatmul.mubr.bf16.gmra.mrb[156].mxu1 %v3330_v40  ;;  %v2694_v7 = vsel %vm2568_vm4, %v12623_v27, %v12622_v58 }
 0x3ee   :  { %v3765_v55 = vpop.f32.mrb[86].mxu1  ;;  %v10925_v3 = vpop.permute.xlu0 %2354  ;;  %6822 = vmatprep.mubr.msk.bf16.mxu1 %vm2568_vm4, %v12583_v22 }
 0x3ef   :  { %v3766_v19 = vadd.f32 %v10391_v49, %v3765_v55  ;;  %v2452_v32 = vpop.permute.xlu1 %2451  ;;  %v3767_v45 = vpop.f32.mrb[87].mxu1  ;;  %v4027_v11 = vmax.f32 %v3763_v31, 0.0  ;;  %v2800_v31 = vsel %vm2716_vm5, %v2694_v7, %v10486_v1 }
 0x3f0   :  { %4163 = vrot.lane.b32.xlu0 %v12618_v6, %s8057_s18  ;;  %v3194_v22 = vsel %vm3112_vm9, %v3095_v0, %v2452_v32  ;;  %v2899_v63 = vsel %vm2815_vm6, %v2800_v31, %v10747_v51  ;;  %v12627_v31 = vld [vmem:[#allocation23_spill] sm:$0xff] }
 0x3f1   :  { %v4028_v21 = vmax.f32 %v3766_v19, 0.0  ;;  %4179 = vrot.lane.b32.xlu1 %v10645_v12, %s8057_s18  ;;  %v2998_v19 = vsel %vm2914_vm7, %v2899_v63, %v10759_v60 }
 0x3f2   :  { %v2551_v46 = vpop.permute.xlu0 %2550  ;;  %v3097_v51 = vsel %vm3013_vm8, %v2998_v19, %v10763_v61  ;;  %v12626_v61 = vld [vmem:[#allocation12_spill] sm:$0xff] }
 0x3f3   :  { %v10941_v56 = vpack.c.bf16 %v4028_v21, %v4027_v11  ;;  %v10943_v42 = vpop.permute.xlu1 %1942  ;;  %v3333_v23 = vsel %vm3211_vm10, %v3194_v22, %v2551_v46  ;;  %v12625_v46 = vld [vmem:[#allocation32_spill] sm:$0xff] }
 0x3f4   :  { %v3770_v40 = vpop.f32.mrb[88].mxu1  ;;  %4218 = vrot.lane.b32.xlu0 %v12624_v48, %s8059_s20 }
 0x3f5   :  { %v3771_v15 = vadd.f32 %v10391_v49, %v3770_v40  ;;  %4287 = vrot.lane.b32.xlu1 %v10696_v39, %s8062_s30  ;;  %v3772_v2 = vpop.f32.mrb[89].mxu1  ;;  %3913 = vmatmul.mubr.bf16.gmra.mrb[160].mxu1 %v3333_v23  ;;  %v2697_v23 = vsel %vm2568_vm4, %v12625_v46, %v10553_v28 }
 0x3f6   :  { %v3773_v55 = vpop.f32.mrb[90].mxu1  ;;  %v10958_v13 = vpop.permute.xlu0 %2047  ;;  %6823 = vmatprep.mubr.msk.bf16.mxu1 %vm2568_vm4, %v10171_v37  ;;  %v2802_v58 = vsel %vm2716_vm5, %v2697_v23, %v12626_v61  ;;  %v12629_v23 = vld [vmem:[#allocation37_spill] sm:$0xff]  ;;  %v12630_v61 = vld [vmem:[#allocation34_spill] sm:$0xff] }
 0x3f7   :  { %v3774_v1 = vadd.f32 %v10391_v49, %v3773_v55  ;;  %v10965_v32 = vpop.permute.xlu1 %2158  ;;  %v3775_v45 = vpop.f32.mrb[91].mxu1  ;;  %v4029_v35 = vmax.f32 %v3771_v15, 0.0  ;;  %v2901_v7 = vsel %vm2815_vm6, %v2802_v58, %v10795_v47  ;;  %v2703_v58 = vsel %vm2568_vm4, %v12630_v61, %v12629_v23 }
 0x3f8   :  { %4277 = vrot.lane.b32.xlu0 %v10363_v29, %s8062_s30 }
 0x3f9   :  { %v4030_v0 = vmax.f32 %v3774_v1, 0.0  ;;  %4234 = vrot.lane.b32.xlu1 %v10696_v39, %s8059_s20 }
 0x3fa   :  { %v2454_v37 = vpop.permute.xlu0 %2453 }
 0x3fb   :  { %v10973_v11 = vpack.c.bf16 %v4030_v0, %v4029_v35  ;;  %v3196_v60 = vsel %vm3112_vm9, %v3097_v51, %v2454_v37  ;;  %v2553_v21 = vpop.permute.xlu1 %2552  ;;  %v12628_v0 = vld [vmem:[#allocation33_spill] sm:$0xff] }
 0x3fc   :  { %4165 = vrot.lane.b32.xlu0 %v12624_v48, %s8057_s18  ;;  %v3336_v22 = vsel %vm3211_vm10, %v3196_v60, %v2553_v21  ;;  %v3000_v48 = vsel %vm2914_vm7, %v2901_v7, %v10816_v43  ;;  %v2700_v51 = vsel %vm2568_vm4, %v12628_v0, %v10599_v8  ;;  %v12633_v0 = vld [vmem:[#allocation47_spill] sm:$0xff] }
 0x3fd   :  { %4289 = vrot.lane.b32.xlu1 %v10743_v18, %s8062_s30  ;;  %3921 = vmatmul.mubr.bf16.gmra.mrb[164].mxu1 %v3336_v22  ;;  %v3099_v15 = vsel %vm3013_vm8, %v3000_v48, %v10854_v33  ;;  %v2804_v60 = vsel %vm2716_vm5, %v2700_v51, %v10632_v9  ;;  %v2706_v51 = vsel %vm2568_vm4, %v12633_v0, %v10943_v42  ;;  %v12636_v0 = vld [vmem:[#allocation11_spill] sm:$0xff] }
 0x3fe   :  { %v10986_v27 = vpop.permute.xlu0 %2257  ;;  %6824 = vmatprep.mubr.msk.bf16.mxu1 %vm2568_vm4, %v10250_v53  ;;  %v2903_v46 = vsel %vm2815_vm6, %v2804_v60, %v10836_v52 }
 0x3ff   :  { %v2456_v40 = vpop.permute.xlu1 %2455  ;;  %v3002_v8 = vsel %vm2914_vm7, %v2903_v46, %v10870_v44 }
 0x400   :  { %v3778_v28 = vpop.f32.mrb[92].mxu1  ;;  %4220 = vrot.lane.b32.xlu0 %v12627_v31, %s8059_s20  ;;  %v3198_v53 = vsel %vm3112_vm9, %v3099_v15, %v2456_v40  ;;  %v12631_v40 = vld [vmem:[#allocation38_spill] sm:$0xff]  ;;  %v12632_v31 = vld [vmem:[#allocation8_spill] sm:$0xff] }
 0x401   :  { %v3779_v2 = vadd.f32 %v10391_v49, %v3778_v28  ;;  %v3780_v63 = vpop.f32.mrb[93].mxu1  ;;  %4236 = vrot.lane.b32.xlu1 %v10743_v18, %s8059_s20  ;;  %v2806_v48 = vsel %vm2716_vm5, %v2703_v58, %v12631_v40  ;;  %v12635_v58 = vld [vmem:[#allocation10_spill] sm:$0xff] }
 0x402   :  { %v3781_v47 = vpop.f32.mrb[94].mxu1  ;;  %v2555_v55 = vpop.permute.xlu0 %2554  ;;  %v2905_v28 = vsel %vm2815_vm6, %v2806_v48, %v10895_v36 }
 0x403   :  { %v3782_v19 = vadd.f32 %v10391_v49, %v3781_v47  ;;  %v3783_v43 = vpop.f32.mrb[95].mxu1  ;;  %v2357_v1 = vpop.permute.xlu1 %2356  ;;  %v3339_v45 = vsel %vm3211_vm10, %v3198_v53, %v2555_v55  ;;  %v4031_v33 = vmax.f32 %v3779_v2, 0.0  ;;  %v3004_v63 = vsel %vm2914_vm7, %v2905_v28, %v10901_v50 }
 0x404   :  { %4279 = vrot.lane.b32.xlu0 %v10414_v34, %s8062_s30  ;;  %v3103_v36 = vsel %vm3013_vm8, %v3004_v63, %v10925_v3  ;;  %v2808_v3 = vsel %vm2716_vm5, %v2706_v51, %v10958_v13 }
 0x405   :  { %v4032_v35 = vmax.f32 %v3782_v19, 0.0  ;;  %4379 = vrot.lane.b32.xlu1 %v10801_v17, %s8062_s30  ;;  %3929 = vmatmul.mubr.bf16.gmra.mrb[168].mxu1 %v3339_v45  ;;  %v2907_v42 = vsel %vm2815_vm6, %v2808_v3, %v10965_v32  ;;  %v7982_v32 = vld [vmem:[%s12353_s7 + $0x40] sm:$0xff]  }
 0x406   :  { %v1945_v37 = vpop.permute.xlu0 %1944  ;;  %6825 = vmatprep.mubr.msk.bf16.mxu1 %vm2568_vm4, %v10284_v14  ;;  %v3101_v14 = vsel %vm3013_vm8, %v3002_v8, %v10885_v20  ;;  %v3006_v13 = vsel %vm2914_vm7, %v2907_v42, %v10986_v27  ;;  %7054 = vmatprep.subr.bf16.mxu0 %v7982_v32 }
 0x407   :  { %v11015_v21 = vpack.c.bf16 %v4032_v35, %v4031_v33  ;;  %v11017_v22 = vpop.permute.xlu1 %2049  ;;  %v3105_v23 = vsel %vm3013_vm8, %v3006_v13, %v2357_v1  ;;  %v7983_v1 = vld [vmem:[%s12353_s7] sm:$0xff]  }
 0x408   :  { %4167 = vrot.lane.b32.xlu0 %v12613_v41, %s8057_s18  ;;  %7055 = vmatpush3.bf16.msra.mxu0 %v7983_v1 }
 0x409   :  { %4350 = vrot.lane.b32.xlu1 %v10941_v56, %s8059_s20 }
 0x40a   :  { %v2458_v9 = vpop.permute.xlu0 %2457 }
 0x40b   :  { %v3200_v7 = vsel %vm3112_vm9, %v3101_v14, %v2458_v9  ;;  %v2557_v52 = vpop.permute.xlu1 %2556  ;;  %v12634_v14 = vld [vmem:[#allocation28_spill] sm:$0xff] }
 0x40c   :  { %4222 = vrot.lane.b32.xlu0 %v10309_v4, %s8059_s20  ;;  %v3342_v44 = vsel %vm3211_vm10, %v3200_v7, %v2557_v52  ;;  %v2709_v7 = vsel %vm2568_vm4, %v12635_v58, %v1945_v37  ;;  %v11093_v37 = vld [vmem:[%s12352_s4] ss:$0 sm:$0xff] }
 0x40d   :  { %4293 = vrot.lane.b32.xlu1 %v10973_v11, %s8062_s30  ;;  %3937 = vmatmul.mubr.bf16.gmra.mrb[172].mxu1 %v3342_v44 }
 0x40e   :  { %v2161_v20 = vpop.permute.xlu0 %2160  ;;  %6826 = vmatprep.mubr.msk.bf16.mxu1 %vm2568_vm4, %v12632_v31  ;;  %v2810_v31 = vsel %vm2716_vm5, %v2709_v7, %v11017_v22 }
 0x40f   :  { %v2460_v15 = vpop.permute.xlu1 %2459  ;;  %v3786_v2 = vpop.f32.mrb[96].mxu1  ;;  %v2909_v63 = vsel %vm2815_vm6, %v2810_v31, %v2161_v20 }
 0x410   :  { %v3787_v53 = vadd.f32 %v10391_v49, %v3786_v2  ;;  %v3788_v47 = vpop.f32.mrb[97].mxu1  ;;  %4281 = vrot.lane.b32.xlu0 %v10579_v24, %s8062_s30  ;;  %v3202_v19 = vsel %vm3112_vm9, %v3103_v36, %v2460_v15 }
 0x411   :  { %4181 = vrot.lane.b32.xlu1 %v10696_v39, %s8057_s18  ;;  %v3789_v55 = vpop.f32.mrb[98].mxu1 }
 0x412   :  { %v3790_v43 = vadd.f32 %v10391_v49, %v3789_v55  ;;  %v3791_v45 = vpop.f32.mrb[99].mxu1  ;;  %v2559_v33 = vpop.permute.xlu0 %2558  ;;  %v4033_v60 = vmax.f32 %v3787_v53, 0.0 }
 0x413   :  { %v2260_v50 = vpop.permute.xlu1 %2259  ;;  %v3345_v35 = vsel %vm3211_vm10, %v3202_v19, %v2559_v33 }
 0x414   :  { %v4034_v46 = vmax.f32 %v3790_v43, 0.0  ;;  %4352 = vrot.lane.b32.xlu0 %v10973_v11, %s8059_s20  ;;  %v3008_v55 = vsel %vm2914_vm7, %v2909_v63, %v2260_v50 }
 0x415   :  { %4224 = vrot.lane.b32.xlu1 %v10363_v29, %s8059_s20  ;;  %3945 = vmatmul.mubr.bf16.gmra.mrb[176].mxu1 %v3345_v35 }
 0x416   :  { %v11065_v49 = vpack.c.bf16 %v4034_v46, %v4033_v60  ;;  %v2359_v8 = vpop.permute.xlu0 %2358  ;;  %6827 = vmatprep.mubr.msk.bf16.mxu1 %vm2568_vm4, %v12634_v14 }
 0x417   :  { %v1947_v9 = vpop.permute.xlu1 %1946  ;;  %v3107_v22 = vsel %vm3013_vm8, %v3008_v55, %v2359_v8 }
 0x418   :  { %4295 = vrot.lane.b32.xlu0 %v11015_v21, %s8062_s30  ;;  %v2712_v50 = vsel %vm2568_vm4, %v12636_v0, %v1947_v9 }
 0x419   :  { %4183 = vrot.lane.b32.xlu1 %v10743_v18, %s8057_s18 }
 0x41a   :  { %v2462_v61 = vpop.permute.xlu0 %2461 }
 0x41b   :  { %v3204_v52 = vsel %vm3112_vm9, %v3105_v23, %v2462_v61  ;;  %v2561_v40 = vpop.permute.xlu1 %2560 }
 0x41c   :  { %v3794_v48 = vpop.f32.mrb[100].mxu1  ;;  %4242 = vrot.lane.b32.xlu0 %v11015_v21, %s8059_s20  ;;  %v3348_v27 = vsel %vm3211_vm10, %v3204_v52, %v2561_v40 }
 0x41d   :  { %v3795_v44 = vadd.f32 %v11093_v37, %v3794_v48  ;;  %v3796_v28 = vpop.f32.mrb[101].mxu1  ;;  %4226 = vrot.lane.b32.xlu1 %v10414_v34, %s8059_s20  ;;  %3953 = vmatmul.mubr.bf16.gmra.mrb[180].mxu1 %v3348_v27 }
 0x41e   :  { %v3797_v15 = vpop.f32.mrb[102].mxu1  ;;  %v2052_v2 = vpop.permute.xlu0 %2051  ;;  %6828 = vmatprep.mubr.msk.bf16.mxu1 %vm2568_vm4, %v10380_v26 }
 0x41f   :  { %v3798_v53 = vadd.f32 %v11093_v37, %v3797_v15  ;;  %v3799_v47 = vpop.f32.mrb[103].mxu1  ;;  %v2464_v36 = vpop.permute.xlu1 %2463  ;;  %v4035_v19 = vmax.f32 %v3795_v44, 0.0  ;;  %v2812_v51 = vsel %vm2716_vm5, %v2712_v50, %v2052_v2 }
 0x420   :  { %4297 = vrot.lane.b32.xlu0 %v11065_v49, %s8062_s30  ;;  %v3206_v26 = vsel %vm3112_vm9, %v3107_v22, %v2464_v36 }
 0x421   :  { %v4036_v43 = vmax.f32 %v3798_v53, 0.0  ;;  %4185 = vrot.lane.b32.xlu1 %v10801_v17, %s8057_s18 }
 0x422   :  { %v2563_v20 = vpop.permute.xlu0 %2562 }
 0x423   :  { %v11111_v45 = vpack.c.bf16 %v4036_v43, %v4035_v19  ;;  %v2163_v33 = vpop.permute.xlu1 %2162  ;;  %v3351_v35 = vsel %vm3211_vm10, %v3206_v26, %v2563_v20 }
 0x424   :  { %4244 = vrot.lane.b32.xlu0 %v11065_v49, %s8059_s20  ;;  %v2911_v60 = vsel %vm2815_vm6, %v2812_v51, %v2163_v33 }
 0x425   :  { %4228 = vrot.lane.b32.xlu1 %v10462_v57, %s8059_s20  ;;  %3961 = vmatmul.mubr.bf16.gmra.mrb[184].mxu1 %v3351_v35 }
 0x426   :  { %v2262_v46 = vpop.permute.xlu0 %2261  ;;  %6829 = vmatprep.mubr.msk.bf16.mxu1 %vm2568_vm4, %v10433_v5 }
 0x427   :  { %v2361_v3 = vpop.permute.xlu1 %2360  ;;  %v3010_v8 = vsel %vm2914_vm7, %v2911_v60, %v2262_v46  ;;  %v12637_v60 = vld [vmem:[#allocation49_spill] sm:$0xff] }
 0x428   :  { %4299 = vrot.lane.b32.xlu0 %v11111_v45, %s8062_s30  ;;  %v3109_v14 = vsel %vm3013_vm8, %v3010_v8, %v2361_v3 }
 0x429   :  { %4325 = vrot.lane.b32.xlu1 %v10868_v30, %s8057_s18 }
 0x42a   :  { %v2466_v9 = vpop.permute.xlu0 %2465 }
 0x42b   :  { %v3208_v42 = vsel %vm3112_vm9, %v3109_v14, %v2466_v9  ;;  %v2565_v13 = vpop.permute.xlu1 %2564  ;;  %v3802_v23 = vpop.f32.mrb[104].mxu1 }
 0x42c   :  { %v3803_v61 = vadd.f32 %v11093_v37, %v3802_v23  ;;  %v3804_v58 = vpop.f32.mrb[105].mxu1  ;;  %4246 = vrot.lane.b32.xlu0 %v11111_v45, %s8059_s20  ;;  %v3354_v5 = vsel %vm3211_vm10, %v3208_v42, %v2565_v13 }
 0x42d   :  { %4230 = vrot.lane.b32.xlu1 %v10503_v16, %s8059_s20  ;;  %v3805_v7 = vpop.f32.mrb[106].mxu1  ;;  %3969 = vmatmul.mubr.bf16.gmra.mrb[188].mxu1 %v3354_v5 }
 0x42e   :  { %v3806_v52 = vadd.f32 %v11093_v37, %v3805_v7  ;;  %v3807_v40 = vpop.f32.mrb[107].mxu1  ;;  %v1949_v32 = vpop.permute.xlu0 %1948  ;;  %6830 = vmatprep.mubr.msk.bf16.mxu1 %vm2568_vm4, %v10819_v59  ;;  %v4037_v27 = vmax.f32 %v3803_v61, 0.0 }
 0x42f   :  { %v2054_v48 = vpop.permute.xlu1 %2053  ;;  %v2715_v46 = vsel %vm2568_vm4, %v12637_v60, %v1949_v32 }
 0x430   :  { %v4038_v1 = vmax.f32 %v3806_v52, 0.0  ;;  %v2814_v14 = vsel %vm2716_vm5, %v2715_v46, %v2054_v48  ;;  %v7984_v46 = vld [vmem:[%s12351_s5 + $0x80] sm:$0xff]  }
 0x431   :  { %4189 = vrot.lane.b32.xlu1 %v11015_v21, %s8057_s18 }
 0x432   :  { %v11142_v44 = vpack.c.bf16 %v4038_v1, %v4037_v27  ;;  %v2165_v28 = vpop.permute.xlu0 %2164 }
 0x433   :  { %v2264_v31 = vpop.permute.xlu1 %2263  ;;  %v2913_v9 = vsel %vm2815_vm6, %v2814_v14, %v2165_v28 }
 0x434   :  { %4381 = vrot.lane.b32.xlu0 %v11142_v44, %s8062_s30  ;;  %v3012_v61 = vsel %vm2914_vm7, %v2913_v9, %v2264_v31 }
 0x436   :  { %v2363_v16 = vpop.permute.xlu0 %2362 }
 0x437   :  { %v4170_v15 = vpop.permute.xlu1 %4169  ;;  %v3111_v7 = vsel %vm3013_vm8, %v3012_v61, %v2363_v16 }
 0x438   :  { %v3810_v2 = vpop.f32.mrb[108].mxu1  ;;  %4177 = vrot.lane.b32.xlu0 %v10612_v10, %s8057_s18  ;;  %v11167_v40 = vsel %vm2716_vm5, %v12613_v41, %v4170_v15 }
 0x439   :  { %v3811_v59 = vadd.f32 %v11093_v37, %v3810_v2  ;;  %v3812_v63 = vpop.f32.mrb[109].mxu1 }
 0x43a   :  { %v3813_v53 = vpop.f32.mrb[110].mxu1  ;;  %v4158_v47 = vpop.permute.xlu0 %4157 }
 0x43b   :  { %v3814_v36 = vadd.f32 %v11093_v37, %v3813_v53  ;;  %v3815_v55 = vpop.f32.mrb[111].mxu1  ;;  %v4172_v22 = vpop.permute.xlu1 %4171  ;;  %v4039_v19 = vmax.f32 %v3811_v59, 0.0 }
 0x43c   :  { %v11190_v14 = vsel %vm2716_vm5, %v10309_v4, %v4172_v22 }
 0x43d   :  { %v4040_v43 = vmax.f32 %v3814_v36, 0.0 }
 0x43e   :  { %v4213_v26 = vpop.permute.xlu0 %4212 }
 0x43f   :  { %v11150_v20 = vpack.c.bf16 %v4040_v43, %v4039_v19  ;;  %v11152_v33 = vpop.permute.xlu1 %4173  ;;  %v12638_v43 = vld [vmem:[#allocation50_spill] sm:$0xff] }
 0x442   :  { %v4272_v35 = vpop.permute.xlu0 %4271 }
 0x443   :  { %v2468_v0 = vpop.permute.xlu1 %2467 }
 0x444   :  { %v3210_v32 = vsel %vm3112_vm9, %v3111_v7, %v2468_v0  ;;  %v4399_v0 = vsel %vm2716_vm5, %v12638_v43, %v4158_v47 }
 0x445   :  { %v4473_v9 = vsel %vm2914_vm7, %v4399_v0, %v4213_v26 }
 0x446   :  { %v4160_v50 = vpop.permute.xlu0 %4159 }
 0x447   :  { %v11154_v51 = vpop.permute.xlu1 %4175 }
 0x44a   :  { %v4215_v3 = vpop.permute.xlu0 %4214 }
 0x44b   :  { %v11158_v8 = vpop.permute.xlu1 %4323 }
 0x44e   :  { %v4274_v42 = vpop.permute.xlu0 %4273 }
 0x44f   :  { %v4347_v13 = vpop.permute.xlu1 %4346  ;;  %v3818_v23 = vpop.f32.mrb[112].mxu1 }
 0x450   :  { %v3819_v58 = vadd.f32 %v11093_v37, %v3818_v23  ;;  %v3820_v5 = vpop.f32.mrb[113].mxu1  ;;  %v4625_v28 = vsel %vm2914_vm7, %v11167_v40, %v4347_v13 }
 0x451   :  { %v3821_v52 = vpop.f32.mrb[114].mxu1 }
 0x452   :  { %v3822_v48 = vadd.f32 %v11093_v37, %v3821_v52  ;;  %v3823_v27 = vpop.f32.mrb[115].mxu1  ;;  %v2567_v1 = vpop.permute.xlu0 %2566  ;;  %v4041_v59 = vmax.f32 %v3819_v58, 0.0  ;;  %v4523_v58 = vsel %vm3112_vm9, %v4473_v9, %v4272_v35 }
 0x453   :  { %v11173_v31 = vpop.permute.xlu1 %4283  ;;  %v3357_v2 = vsel %vm3211_vm10, %v3210_v32, %v2567_v1  ;;  %v12639_v32 = vld [vmem:[#allocation51_spill] sm:$0xff] }
 0x454   :  { %v4042_v16 = vmax.f32 %v3822_v48, 0.0  ;;  %3977 = vmatmul.mubr.bf16.gmra.mrb[192].mxu1 %v3357_v2  ;;  %v4665_v41 = vsel %vm3112_vm9, %v4625_v28, %v11173_v31  ;;  %v4402_v48 = vsel %vm2716_vm5, %v12639_v32, %v4160_v50  ;;  %v11226_v50 = vsel %vm2716_vm5, %v10363_v29, %v11152_v33 }
 0x455   :  { %4966 = vmatprep.mubr.bf16.mxu1 %v4665_v41  ;;  %v4475_v1 = vsel %vm2914_vm7, %v4402_v48, %v4215_v3 }
 0x456   :  { %v11178_v15 = vpack.c.bf16 %v4042_v16, %v4041_v59  ;;  %v4162_v63 = vpop.permute.xlu0 %4161  ;;  %v4526_v41 = vsel %vm3112_vm9, %v4475_v1, %v4274_v42  ;;  %v7985_v42 = vld [vmem:[%s12353_s7 + $0x48] sm:$0xff]  }
 0x457   :  { %v4349_v53 = vpop.permute.xlu1 %4348  ;;  %v3826_v36 = vpop.f32.mrb[116].mxu1  ;;  %7056 = vmatprep.subr.bf16.mxu0 %v7985_v42  ;;  %v4405_v33 = vsel %vm2716_vm5, %v12603_v54, %v4162_v63  ;;  %v11255_v54 = vsel %vm2716_vm5, %v10414_v34, %v11154_v51 }
 0x458   :  { %v3827_v55 = vadd.f32 %v11093_v37, %v3826_v36  ;;  %v3828_v19 = vpop.f32.mrb[117].mxu1  ;;  %4354 = vrot.lane.b32.xlu1 %v11178_v15, %s8059_s20  ;;  %v4627_v47 = vsel %vm2914_vm7, %v11190_v14, %v4349_v53 }
 0x459   :  { %v3829_v60 = vpop.f32.mrb[118].mxu1 }
 0x45a   :  { %v3830_v13 = vadd.f32 %v11093_v37, %v3829_v60  ;;  %v3831_v23 = vpop.f32.mrb[119].mxu1  ;;  %v4217_v61 = vpop.permute.xlu0 %4216  ;;  %v4043_v7 = vmax.f32 %v3827_v55, 0.0 }
 0x45b   :  { %v11197_v5 = vpop.permute.xlu1 %4285 }
 0x45c   :  { %v4044_v52 = vmax.f32 %v3830_v13, 0.0  ;;  %4291 = vrot.lane.b32.xlu1 %v10941_v56, %s8062_s30  ;;  %4967 = vmatmul.mubr.bf16.vlgmr.msra.gmra.mrb[196].mxu1 %v4523_v58  ;;  %v4667_v4 = vsel %vm3112_vm9, %v4627_v47, %v11197_v5  ;;  %v4477_v13 = vsel %vm2914_vm7, %v4405_v33, %v4217_v61  ;;  %v7986_v58 = vld [vmem:[%s12353_s7 + $0x8] sm:$0xff]  }
 0x45d   :  { %4974 = vmatprep.mubr.bf16.mxu1 %v4667_v4  ;;  %7559 = vmatpush3.bf16.msra.mxu1 %v7984_v46 }
 0x45e   :  { %v11203_v22 = vpack.c.bf16 %v4044_v52, %v4043_v7  ;;  %v4276_v26 = vpop.permute.xlu0 %4275  ;;  %7560 = vmatprep.subr.bf16.mxu1 %v12612_v25  ;;  %7057 = vmatpush3.bf16.msra.mxu0 %v7986_v58 }
 0x45f   :  { %v11206_v35 = vpop.permute.xlu1 %4232  ;;  %v4529_v47 = vsel %vm3112_vm9, %v4477_v13, %v4276_v26 }
 0x460   :  { %4356 = vrot.lane.b32.xlu1 %v11203_v22, %s8059_s20  ;;  %4303 = vrot.lane.b32.xlu0 %v11203_v22, %s8062_s30  ;;  %v4628_v19 = vsel %vm2914_vm7, %v11226_v50, %v11206_v35 }
 0x462   :  { %v4164_v27 = vpop.permute.xlu0 %4163 }
 0x463   :  { %v11215_v28 = vpop.permute.xlu1 %4179  ;;  %v3834_v2 = vpop.f32.mrb[120].mxu1  ;;  %v4408_v34 = vsel %vm2716_vm5, %v12611_v62, %v4164_v27  ;;  %v4599_v62 = vsel %vm2716_vm5, %v10462_v57, %v11158_v8 }
 0x464   :  { %v3835_v59 = vadd.f32 %v11093_v37, %v3834_v2  ;;  %v3836_v16 = vpop.f32.mrb[121].mxu1  ;;  %4193 = vrot.lane.b32.xlu1 %v11111_v45, %s8057_s18  ;;  %4191 = vrot.lane.b32.xlu0 %v11065_v49, %s8057_s18  ;;  %v11299_v33 = vsel %vm2716_vm5, %v10612_v10, %v11215_v28 }
 0x465   :  { %4975 = vmatmul.mubr.bf16.gmra.mrb[200].mxu1 %v4526_v41  ;;  %v3837_v53 = vpop.f32.mrb[122].mxu1 }
 0x466   :  { %v3838_v3 = vadd.f32 %v11093_v37, %v3837_v53  ;;  %v3839_v36 = vpop.f32.mrb[123].mxu1  ;;  %v4219_v55 = vpop.permute.xlu0 %4218  ;;  %v4045_v0 = vmax.f32 %v3835_v59, 0.0 }
 0x467   :  { %v11232_v43 = vpop.permute.xlu1 %4287  ;;  %v4479_v1 = vsel %vm2914_vm7, %v4408_v34, %v4219_v55 }
 0x468   :  { %v4046_v60 = vmax.f32 %v3838_v3, 0.0  ;;  %v4669_v29 = vsel %vm3112_vm9, %v4628_v19, %v11232_v43 }
 0x469   :  { %4982 = vmatprep.mubr.bf16.mxu1 %v4669_v29 }
 0x46a   :  { %v11241_v46 = vpack.c.bf16 %v4046_v60, %v4045_v0  ;;  %v4278_v9 = vpop.permute.xlu0 %4277 }
 0x46b   :  { %v11244_v23 = vpop.permute.xlu1 %4234  ;;  %v4532_v41 = vsel %vm3112_vm9, %v4479_v1, %v4278_v9 }
 0x46c   :  { %4305 = vrot.lane.b32.xlu0 %v11241_v46, %s8062_s30  ;;  %v4629_v61 = vsel %vm2914_vm7, %v11255_v54, %v11244_v23 }
 0x46d   :  { %4983 = vmatmul.mubr.bf16.gmra.mrb[204].mxu1 %v4529_v47 }
 0x46e   :  { %v4166_v63 = vpop.permute.xlu0 %4165 }
 0x46f   :  { %v11260_v7 = vpop.permute.xlu1 %4289  ;;  %v4411_v0 = vsel %vm2716_vm5, %v12618_v6, %v4166_v63 }
 0x470   :  { %v3842_v52 = vpop.f32.mrb[124].mxu1  ;;  %4252 = vrot.lane.b32.xlu0 %v11241_v46, %s8059_s20  ;;  %v4671_v4 = vsel %vm3112_vm9, %v4629_v61, %v11260_v7 }
 0x471   :  { %v3843_v26 = vadd.f32 %v11093_v37, %v3842_v52  ;;  %v3844_v32 = vpop.f32.mrb[125].mxu1  ;;  %4990 = vmatprep.mubr.bf16.mxu1 %v4671_v4 }
 0x472   :  { %v3845_v51 = vpop.f32.mrb[126].mxu1  ;;  %v4221_v48 = vpop.permute.xlu0 %4220 }
 0x473   :  { %v3846_v2 = vadd.f32 %v11093_v37, %v3845_v51  ;;  %v3847_v59 = vpop.f32.mrb[127].mxu1  ;;  %v11271_v16 = vpop.permute.xlu1 %4236  ;;  %v4047_v53 = vmax.f32 %v3843_v26, 0.0  ;;  %v4481_v8 = vsel %vm2914_vm7, %v4411_v0, %v4221_v48 }
 0x474   :  { %4195 = vrot.lane.b32.xlu0 %v11142_v44, %s8057_s18  ;;  %v4630_v55 = vsel %vm2914_vm7, %v4599_v62, %v11271_v16 }
 0x475   :  { %v4048_v3 = vmax.f32 %v3846_v2, 0.0  ;;  %4991 = vmatmul.mubr.bf16.gmra.mrb[208].mxu1 %v4532_v41 }
 0x476   :  { %v4280_v27 = vpop.permute.xlu0 %4279 }
 0x477   :  { %v11279_v36 = vpack.c.bf16 %v4048_v3, %v4047_v53  ;;  %v4380_v19 = vpop.permute.xlu1 %4379  ;;  %v4535_v29 = vsel %vm3112_vm9, %v4481_v8, %v4280_v27 }
 0x478   :  { %4238 = vrot.lane.b32.xlu0 %v10801_v17, %s8059_s20  ;;  %v4674_v42 = vsel %vm3112_vm9, %v4630_v55, %v4380_v19 }
 0x479   :  { %4307 = vrot.lane.b32.xlu1 %v11279_v36, %s8062_s30  ;;  %4998 = vmatprep.mubr.bf16.mxu1 %v4674_v42 }
 0x47a   :  { %v4168_v57 = vpop.permute.xlu0 %4167 }
 0x47b   :  { %v4351_v60 = vpop.permute.xlu1 %4350  ;;  %v4414_v10 = vsel %vm2716_vm5, %v12607_v38, %v4168_v57 }
 0x47c   :  { %4327 = vrot.lane.b32.xlu0 %v11150_v20, %s8057_s18  ;;  %v4632_v6 = vsel %vm2914_vm7, %v11299_v33, %v4351_v60 }
 0x47d   :  { %4254 = vrot.lane.b32.xlu1 %v11279_v36, %s8059_s20  ;;  %4999 = vmatmul.mubr.bf16.gmra.mrb[212].mxu1 %v4535_v29 }
 0x47e   :  { %v4223_v9 = vpop.permute.xlu0 %4222 }
 0x47f   :  { %v11303_v13 = vpop.permute.xlu1 %4293  ;;  %v3850_v58 = vpop.f32.mrb[128].mxu1  ;;  %v4483_v52 = vsel %vm2914_vm7, %v4414_v10, %v4223_v9 }
 0x480   :  { %v3851_v47 = vadd.f32 %v11093_v37, %v3850_v58  ;;  %v3852_v63 = vpop.f32.mrb[129].mxu1  ;;  %4240 = vrot.lane.b32.xlu0 %v10868_v30, %s8059_s20  ;;  %v4676_v61 = vsel %vm3112_vm9, %v4632_v6, %v11303_v13 }
 0x481   :  { %5006 = vmatprep.mubr.bf16.mxu1 %v4676_v61  ;;  %v3853_v28 = vpop.f32.mrb[130].mxu1 }
 0x482   :  { %v3854_v4 = vadd.f32 %v11093_v37, %v3853_v28  ;;  %v3855_v26 = vpop.f32.mrb[131].mxu1  ;;  %v4282_v32 = vpop.permute.xlu0 %4281  ;;  %v4049_v48 = vmax.f32 %v3851_v47, 0.0 }
 0x483   :  { %v4182_v34 = vpop.permute.xlu1 %4181  ;;  %v4538_v51 = vsel %vm3112_vm9, %v4483_v52, %v4282_v32 }
 0x484   :  { %v4050_v1 = vmax.f32 %v3854_v4, 0.0  ;;  %4199 = vrot.lane.b32.xlu0 %v11241_v46, %s8057_s18  ;;  %v11323_v53 = vsel %vm2716_vm5, %v10645_v12, %v4182_v34 }
 0x485   :  { %5007 = vmatmul.mubr.bf16.gmra.mrb[216].mxu1 %v4538_v51 }
 0x486   :  { %v11317_v2 = vpack.c.bf16 %v4050_v1, %v4049_v48  ;;  %v4353_v38 = vpop.permute.xlu0 %4352 }
 0x487   :  { %v4225_v59 = vpop.permute.xlu1 %4224  ;;  %v4634_v55 = vsel %vm2914_vm7, %v11323_v53, %v4353_v38 }
 0x488   :  { %v3858_v41 = vpop.f32.mrb[132].mxu1  ;;  %4309 = vrot.lane.b32.xlu1 %v11317_v2, %s8062_s30  ;;  %v4485_v3 = vsel %vm2914_vm7, %v11167_v40, %v4225_v59 }
 0x489   :  { %v3859_v62 = vadd.f32 %v11093_v37, %v3858_v41  ;;  %v3860_v27 = vpop.f32.mrb[133].mxu1  ;;  %v4541_v40 = vsel %vm3112_vm9, %v4485_v3, %v11173_v31 }
 0x48a   :  { %v3861_v19 = vpop.f32.mrb[134].mxu1  ;;  %v11330_v42 = vpop.permute.xlu0 %4295 }
 0x48b   :  { %v3862_v0 = vadd.f32 %v11093_v37, %v3861_v19  ;;  %v3863_v57 = vpop.f32.mrb[135].mxu1  ;;  %v4184_v8 = vpop.permute.xlu1 %4183  ;;  %v4678_v60 = vsel %vm3112_vm9, %v4634_v55, %v11330_v42  ;;  %v4051_v29 = vmax.f32 %v3859_v62, 0.0 }
 0x48c   :  { %4256 = vrot.lane.b32.xlu1 %v11317_v2, %s8059_s20  ;;  %5014 = vmatprep.mubr.bf16.mxu1 %v4678_v60  ;;  %v11345_v63 = vsel %vm2716_vm5, %v10696_v39, %v4184_v8 }
 0x48d   :  { %v4052_v9 = vmax.f32 %v3862_v0, 0.0  ;;  %5015 = vmatmul.mubr.bf16.gmra.mrb[220].mxu1 %v4541_v40 }
 0x48e   :  { %v11339_v6 = vpop.permute.xlu0 %4242 }
 0x48f   :  { %v11341_v58 = vpack.c.bf16 %v4052_v9, %v4051_v29  ;;  %v4227_v47 = vpop.permute.xlu1 %4226  ;;  %v4635_v31 = vsel %vm2914_vm7, %v11345_v63, %v11339_v6 }
 0x490   :  { %v4487_v61 = vsel %vm2914_vm7, %v11190_v14, %v4227_v47 }
 0x491   :  { %4383 = vrot.lane.b32.xlu1 %v11341_v58, %s8062_s30  ;;  %v4544_v14 = vsel %vm3112_vm9, %v4487_v61, %v11197_v5 }
 0x492   :  { %v11354_v10 = vpop.permute.xlu0 %4297 }
 0x493   :  { %v4186_v28 = vpop.permute.xlu1 %4185  ;;  %v3866_v52 = vpop.f32.mrb[136].mxu1  ;;  %v4680_v4 = vsel %vm3112_vm9, %v4635_v31, %v11354_v10 }
 0x494   :  { %v3867_v26 = vadd.f32 %v11093_v37, %v3866_v52  ;;  %v3868_v32 = vpop.f32.mrb[137].mxu1  ;;  %5022 = vmatprep.mubr.bf16.mxu1 %v4680_v4  ;;  %v11366_v3 = vsel %vm2716_vm5, %v10743_v18, %v4186_v28 }
 0x495   :  { %4187 = vrot.lane.b32.xlu1 %v10973_v11, %s8057_s18  ;;  %v3869_v34 = vpop.f32.mrb[138].mxu1  ;;  %5023 = vmatmul.mubr.bf16.gmra.mrb[224].mxu1 %v4544_v14 }
 0x496   :  { %v3870_v51 = vadd.f32 %v11093_v37, %v3869_v34  ;;  %v3871_v48 = vpop.f32.mrb[139].mxu1  ;;  %v4245_v1 = vpop.permute.xlu0 %4244  ;;  %v4053_v59 = vmax.f32 %v3867_v26, 0.0 }
 0x497   :  { %v4229_v38 = vpop.permute.xlu1 %4228  ;;  %v4636_v27 = vsel %vm2914_vm7, %v11366_v3, %v4245_v1 }
 0x498   :  { %v4054_v41 = vmax.f32 %v3870_v51, 0.0  ;;  %v4489_v62 = vsel %vm2914_vm7, %v11226_v50, %v4229_v38  ;;  %v7987_v50 = vld [vmem:[%s12351_s5 + $0x88] sm:$0xff]  }
 0x499   :  { %v4547_v57 = vsel %vm3112_vm9, %v4489_v62, %v11232_v43  ;;  %7561 = vmatpush3.bf16.msra.mxu1 %v7987_v50 }
 0x49a   :  { %v11370_v5 = vpack.c.bf16 %v4054_v41, %v4053_v59  ;;  %v11374_v55 = vpop.permute.xlu0 %4299 }
 0x49b   :  { %v4326_v19 = vpop.permute.xlu1 %4325  ;;  %v4682_v0 = vsel %vm3112_vm9, %v4636_v27, %v11374_v55 }
 0x49c   :  { %5030 = vmatprep.mubr.bf16.mxu1 %v4682_v0  ;;  %v4602_v43 = vsel %vm2716_vm5, %v10801_v17, %v4326_v19 }
 0x49d   :  { %5031 = vmatmul.mubr.bf16.gmra.mrb[228].mxu1 %v4547_v57 }
 0x49e   :  { %v11384_v9 = vpop.permute.xlu0 %4246 }
 0x49f   :  { %v4231_v8 = vpop.permute.xlu1 %4230  ;;  %v4637_v34 = vsel %vm2914_vm7, %v4602_v43, %v11384_v9 }
 0x4a0   :  { %v3874_v60 = vpop.f32.mrb[140].mxu1  ;;  %v4491_v4 = vsel %vm2914_vm7, %v11255_v54, %v4231_v8 }
 0x4a1   :  { %v3875_v40 = vadd.f32 %v11093_v37, %v3874_v60  ;;  %v3876_v29 = vpop.f32.mrb[141].mxu1 }
 0x4a2   :  { %v3877_v47 = vpop.f32.mrb[142].mxu1 }
 0x4a3   :  { %v3878_v61 = vadd.f32 %v11093_v37, %v3877_v47  ;;  %v4190_v31 = vpop.permute.xlu1 %4189  ;;  %v3879_v28 = vpop.f32.mrb[143].mxu1  ;;  %v4055_v26 = vmax.f32 %v3875_v40, 0.0 }
 0x4a4   :  { %v11391_v52 = vsel %vm2716_vm5, %v10973_v11, %v4190_v31  ;;  %v4550_v11 = vsel %vm3112_vm9, %v4491_v4, %v11260_v7 }
 0x4a5   :  { %v4056_v32 = vmax.f32 %v3878_v61, 0.0  ;;  %v11397_v14 = vsel %vm2914_vm7, %v11391_v52, %v4245_v1 }
 0x4a6   :  { %v4382_v51 = vpop.permute.xlu0 %4381 }
 0x4a7   :  { %v11401_v48 = vpack.c.bf16 %v4056_v32, %v4055_v26  ;;  %v4685_v38 = vsel %vm3112_vm9, %v4637_v34, %v4382_v51  ;;  %v7988_v26 = vld [vmem:[%s12353_s7 + $0x50] sm:$0xff]  }
 0x4a8   :  { %v3882_v59 = vpop.f32.mrb[144].mxu1  ;;  %5038 = vmatprep.mubr.bf16.mxu1 %v4685_v38  ;;  %v7989_v32 = vld [vmem:[%s12353_s7 + $0x10] sm:$0xff]   ;;  %7058 = vmatprep.subr.bf16.mxu0 %v7988_v26 }
 0x4a9   :  { %v3883_v54 = vadd.f32 %v11093_v37, %v3882_v59  ;;  %v3884_v41 = vpop.f32.mrb[145].mxu1  ;;  %4358 = vrot.lane.b32.xlu0 %v11401_v48, %s8059_s20  ;;  %5039 = vmatmul.mubr.bf16.gmra.mrb[232].mxu1 %v4550_v11 }
 0x4aa   :  { %v3885_v1 = vpop.f32.mrb[146].mxu1  ;;  %7059 = vmatpush3.bf16.msra.mxu0 %v7989_v32  ;;  %v4178_v32 = vpop.permute.xlu0 %4177 }
 0x4ab   :  { %v3886_v62 = vadd.f32 %v11093_v37, %v3885_v1  ;;  %v3887_v27 = vpop.f32.mrb[147].mxu1  ;;  %v4057_v19 = vmax.f32 %v3883_v54, 0.0 }
 0x4ad   :  { %v4058_v0 = vmax.f32 %v3886_v62, 0.0  ;;  %4301 = vrot.lane.b32.xlu0 %v11178_v15, %s8062_s30 }
 0x4af   :  { %v11412_v57 = vpack.c.bf16 %v4058_v0, %v4057_v19 }
 0x4b0   :  { %v3890_v8 = vpop.f32.mrb[148].mxu1 }
 0x4b1   :  { %v3891_v7 = vadd.f32 %v11093_v37, %v3890_v8  ;;  %v3892_v60 = vpop.f32.mrb[149].mxu1  ;;  %4313 = vrot.lane.b32.xlu1 %v11412_v57, %s8062_s30  ;;  %4360 = vrot.lane.b32.xlu0 %v11412_v57, %s8059_s20 }
 0x4b2   :  { %v3893_v50 = vpop.f32.mrb[150].mxu1 }
 0x4b3   :  { %v3894_v40 = vadd.f32 %v11093_v37, %v3893_v50  ;;  %v3895_v29 = vpop.f32.mrb[151].mxu1  ;;  %v4059_v47 = vmax.f32 %v3891_v7, 0.0 }
 0x4b5   :  { %v4060_v61 = vmax.f32 %v3894_v40, 0.0  ;;  %4201 = vrot.lane.b32.xlu1 %v11279_v36, %s8057_s18  ;;  %4203 = vrot.lane.b32.xlu0 %v11317_v2, %s8057_s18 }
 0x4b7   :  { %v11424_v31 = vpack.c.bf16 %v4060_v61, %v4059_v47 }
 0x4b8   :  { %v3898_v28 = vpop.f32.mrb[152].mxu1 }
 0x4b9   :  { %v3899_v43 = vadd.f32 %v11093_v37, %v3898_v28  ;;  %v3900_v4 = vpop.f32.mrb[153].mxu1  ;;  %4315 = vrot.lane.b32.xlu1 %v11424_v31, %s8062_s30 }
 0x4ba   :  { %v3901_v34 = vpop.f32.mrb[154].mxu1 }
 0x4bb   :  { %v3902_v51 = vadd.f32 %v11093_v37, %v3901_v34  ;;  %v3903_v38 = vpop.f32.mrb[155].mxu1  ;;  %v4061_v59 = vmax.f32 %v3899_v43, 0.0 }
 0x4bc   :  { %v4429_v38 = vsel %vm2716_vm5, %v10579_v24, %v4178_v32 }
 0x4bd   :  { %v4062_v11 = vmax.f32 %v3902_v51, 0.0  ;;  %4362 = vrot.lane.b32.xlu1 %v11424_v31, %s8059_s20 }
 0x4bf   :  { %v11438_v54 = vpack.c.bf16 %v4062_v11, %v4061_v59 }
 0x4c0   :  { %v3906_v41 = vpop.f32.mrb[156].mxu1 }
 0x4c1   :  { %v3907_v1 = vadd.f32 %v11093_v37, %v3906_v41  ;;  %v3908_v62 = vpop.f32.mrb[157].mxu1  ;;  %4205 = vrot.lane.b32.xlu1 %v11341_v58, %s8057_s18  ;;  %4317 = vrot.lane.b32.xlu0 %v11438_v54, %s8062_s30 }
 0x4c2   :  { %v3909_v27 = vpop.f32.mrb[158].mxu1 }
 0x4c3   :  { %v3910_v19 = vadd.f32 %v11093_v37, %v3909_v27  ;;  %v3911_v0 = vpop.f32.mrb[159].mxu1  ;;  %v4063_v8 = vmax.f32 %v3907_v1, 0.0 }
 0x4c5   :  { %v4064_v7 = vmax.f32 %v3910_v19, 0.0  ;;  %4248 = vrot.lane.b32.xlu1 %v11142_v44, %s8059_s20  ;;  %4364 = vrot.lane.b32.xlu0 %v11438_v54, %s8059_s20 }
 0x4c7   :  { %v11450_v60 = vpack.c.bf16 %v4064_v7, %v4063_v8  ;;  %v4493_v7 = vsel %vm2914_vm7, %v4429_v38, %v11206_v35 }
 0x4c8   :  { %v3914_v50 = vpop.f32.mrb[160].mxu1 }
 0x4c9   :  { %v3915_v40 = vadd.f32 %v11093_v37, %v3914_v50  ;;  %v3916_v29 = vpop.f32.mrb[161].mxu1  ;;  %4329 = vrot.lane.b32.xlu1 %v11370_v5, %s8057_s18  ;;  %4319 = vrot.lane.b32.xlu0 %v11450_v60, %s8062_s30 }
 0x4ca   :  { %v3917_v47 = vpop.f32.mrb[162].mxu1  ;;  %v4355_v43 = vpop.permute.xlu1 %4354 }
 0x4cb   :  { %v3918_v61 = vadd.f32 %v11093_v37, %v3917_v47  ;;  %v3919_v28 = vpop.f32.mrb[163].mxu1  ;;  %v4065_v4 = vmax.f32 %v3915_v40, 0.0  ;;  %v4639_v62 = vsel %vm2914_vm7, %v11391_v52, %v4355_v43 }
 0x4cd   :  { %v4066_v26 = vmax.f32 %v3918_v61, 0.0  ;;  %4250 = vrot.lane.b32.xlu1 %v11150_v20, %s8059_s20  ;;  %4366 = vrot.lane.b32.xlu0 %v11450_v60, %s8059_s20 }
 0x4ce   :  { %v4292_v41 = vpop.permute.xlu1 %4291 }
 0x4cf   :  { %v11462_v34 = vpack.c.bf16 %v4066_v26, %v4065_v4  ;;  %v4553_v52 = vsel %vm3112_vm9, %v4493_v7, %v4292_v41 }
 0x4d0   :  { %v3922_v51 = vpop.f32.mrb[164].mxu1 }
 0x4d1   :  { %v3923_v59 = vadd.f32 %v11093_v37, %v3922_v51  ;;  %v3924_v11 = vpop.f32.mrb[165].mxu1  ;;  %4331 = vrot.lane.b32.xlu1 %v11424_v31, %s8057_s18  ;;  %4385 = vrot.lane.b32.xlu0 %v11462_v34, %s8062_s30 }
 0x4d2   :  { %v3925_v1 = vpop.f32.mrb[166].mxu1  ;;  %v4304_v19 = vpop.permute.xlu0 %4303 }
 0x4d3   :  { %v3926_v27 = vadd.f32 %v11093_v37, %v3925_v1  ;;  %v3927_v0 = vpop.f32.mrb[167].mxu1  ;;  %v11476_v24 = vsel %vm3112_vm9, %v11397_v14, %v4304_v19  ;;  %v4687_v8 = vsel %vm3112_vm9, %v4639_v62, %v4304_v19  ;;  %v4067_v50 = vmax.f32 %v3923_v59, 0.0  ;;  %v4357_v51 = vpop.permute.xlu1 %4356 }
 0x4d4   :  { %5046 = vmatprep.mubr.bf16.mxu1 %v4687_v8  ;;  %v4495_v1 = vsel %vm2914_vm7, %v11299_v33, %v11244_v23 }
 0x4d5   :  { %v4068_v40 = vmax.f32 %v3926_v27, 0.0  ;;  %4197 = vrot.lane.b32.xlu0 %v11203_v22, %s8057_s18  ;;  %5047 = vmatmul.mubr.bf16.gmra.mrb[236].mxu1 %v4553_v52  ;;  %v4556_v0 = vsel %vm3112_vm9, %v4495_v1, %v11303_v13 }
 0x4d6   :  { %v4192_v47 = vpop.permute.xlu0 %4191 }
 0x4d7   :  { %v11484_v29 = vpack.c.bf16 %v4068_v40, %v4067_v50  ;;  %v4450_v14 = vsel %vm2716_vm5, %v11015_v21, %v4192_v47 }
 0x4d8   :  { %v3930_v61 = vpop.f32.mrb[168].mxu1  ;;  %v4507_v35 = vsel %vm2914_vm7, %v4450_v14, %v11384_v9  ;;  %v4641_v41 = vsel %vm2914_vm7, %v4450_v14, %v4357_v51  ;;  %v11522_v51 = vld [vmem:[%s12352_s4] ss:$0 sm:$0xff] }
 0x4d9   :  { %v3931_v28 = vadd.f32 %v11093_v37, %v3930_v61  ;;  %v3932_v43 = vpop.f32.mrb[169].mxu1  ;;  %v4194_v61 = vpop.permute.xlu1 %4193 }
 0x4da   :  { %v3933_v4 = vpop.f32.mrb[170].mxu1 }
 0x4db   :  { %v3934_v26 = vadd.f32 %v11093_v37, %v3933_v4  ;;  %v3935_v32 = vpop.f32.mrb[171].mxu1  ;;  %v4069_v38 = vmax.f32 %v3931_v28, 0.0  ;;  %v11514_v4 = vsel %vm2716_vm5, %v11065_v49, %v4194_v61 }
 0x4dd   :  { %v4070_v59 = vmax.f32 %v3934_v26, 0.0 }
 0x4de   :  { %v4306_v11 = vpop.permute.xlu0 %4305 }
 0x4df   :  { %v4125_v62 = vpack.c.bf16 %v4070_v59, %v4069_v38  ;;  %v11497_v27 = vsel %vm3112_vm9, %v4507_v35, %v4306_v11  ;;  %v4689_v9 = vsel %vm3112_vm9, %v4641_v41, %v4306_v11  ;;  %v4497_v41 = vsel %vm2914_vm7, %v11323_v53, %v11271_v16 }
 0x4e0   :  { %v3938_v19 = vpop.f32.mrb[172].mxu1  ;;  %5054 = vmatprep.mubr.bf16.mxu1 %v4689_v9  ;;  %v4559_v9 = vsel %vm3112_vm9, %v4497_v41, %v11330_v42 }
 0x4e1   :  { %v3939_v8 = vadd.f32 %v11093_v37, %v3938_v19  ;;  %v3940_v7 = vpop.f32.mrb[173].mxu1  ;;  %4368 = vrot.lane.b32.xlu1 %v4125_v62, %s8059_s20  ;;  %5055 = vmatmul.mubr.bf16.gmra.mrb[240].mxu1 %v4556_v0 }
 0x4e2   :  { %v3941_v50 = vpop.f32.mrb[174].mxu1  ;;  %v11504_v40 = vpop.permute.xlu0 %4252 }
 0x4e3   :  { %v3942_v23 = vadd.f32 %v11093_v37, %v3941_v50  ;;  %v3943_v33 = vpop.f32.mrb[175].mxu1  ;;  %v4071_v52 = vmax.f32 %v3939_v8, 0.0 }
 0x4e5   :  { %v4072_v47 = vmax.f32 %v3942_v23, 0.0  ;;  %4311 = vrot.lane.b32.xlu1 %v11401_v48, %s8062_s30  ;;  %v4642_v48 = vsel %vm2914_vm7, %v11514_v4, %v11504_v40 }
 0x4e6   :  { %v4196_v14 = vpop.permute.xlu0 %4195 }
 0x4e7   :  { %v4126_v13 = vpack.c.bf16 %v4072_v47, %v4071_v52 }
 0x4e8   :  { %v3946_v28 = vpop.f32.mrb[176].mxu1 }
 0x4e9   :  { %v3947_v43 = vadd.f32 %v11093_v37, %v3946_v28  ;;  %v3948_v35 = vpop.f32.mrb[177].mxu1  ;;  %4370 = vrot.lane.b32.xlu1 %v4126_v13, %s8059_s20  ;;  %4387 = vrot.lane.b32.xlu0 %v4126_v13, %s8062_s30 }
 0x4ea   :  { %v3949_v26 = vpop.f32.mrb[178].mxu1  ;;  %v4239_v32 = vpop.permute.xlu0 %4238 }
 0x4eb   :  { %v3950_v37 = vadd.f32 %v11522_v51, %v3949_v26  ;;  %v11525_v38 = vpop.permute.xlu1 %4307  ;;  %v3951_v59 = vpop.f32.mrb[179].mxu1  ;;  %v4073_v1 = vmax.f32 %v3947_v43, 0.0  ;;  %v11553_v26 = vsel %vm2716_vm5, %v11111_v45, %v4196_v14 }
 0x4ec   :  { %v4691_v11 = vsel %vm3112_vm9, %v4642_v48, %v11525_v38  ;;  %v4499_v48 = vsel %vm2914_vm7, %v11345_v63, %v4239_v32 }
 0x4ed   :  { %v4074_v62 = vmax.f32 %v3950_v37, 0.0  ;;  %5062 = vmatprep.mubr.bf16.mxu1 %v4691_v11  ;;  %4335 = vrot.lane.b32.xlu1 %v11450_v60, %s8057_s18  ;;  %v4562_v32 = vsel %vm3112_vm9, %v4499_v48, %v11354_v10 }
 0x4ee   :  { %4333 = vrot.lane.b32.xlu0 %v11438_v54, %s8057_s18  ;;  %5063 = vmatmul.mubr.bf16.gmra.mrb[244].mxu1 %v4559_v9  ;;  %v4328_v19 = vpop.permute.xlu0 %4327 }
 0x4ef   :  { %v11538_v0 = vpack.c.bf16 %v4074_v62, %v4073_v1  ;;  %v4255_v47 = vpop.permute.xlu1 %4254  ;;  %v4605_v10 = vsel %vm2716_vm5, %v11142_v44, %v4328_v19 }
 0x4f0   :  { %v3954_v8 = vpop.f32.mrb[180].mxu1  ;;  %v4643_v11 = vsel %vm2914_vm7, %v11553_v26, %v4255_v47 }
 0x4f1   :  { %v3955_v7 = vadd.f32 %v11522_v51, %v3954_v8  ;;  %v3956_v16 = vpop.f32.mrb[181].mxu1 }
 0x4f2   :  { %4389 = vrot.lane.b32.xlu0 %v11538_v0, %s8062_s30  ;;  %v3957_v53 = vpop.f32.mrb[182].mxu1  ;;  %v4241_v50 = vpop.permute.xlu0 %4240 }
 0x4f3   :  { %v3958_v23 = vadd.f32 %v11522_v51, %v3957_v53  ;;  %v3959_v33 = vpop.f32.mrb[183].mxu1  ;;  %v4075_v42 = vmax.f32 %v3955_v7, 0.0 }
 0x4f4   :  { %v4501_v33 = vsel %vm2914_vm7, %v11366_v3, %v4241_v50  ;;  %v7990_v50 = vld [vmem:[%s12353_s7 + $0x58] sm:$0xff]  }
 0x4f5   :  { %v4076_v52 = vmax.f32 %v3958_v23, 0.0  ;;  %v4565_v3 = vsel %vm3112_vm9, %v4501_v33, %v11374_v55  ;;  %7060 = vmatprep.subr.bf16.mxu0 %v7990_v50 }
 0x4f6   :  { %4372 = vrot.lane.b32.xlu0 %v11538_v0, %s8059_s20  ;;  %v4200_v61 = vpop.permute.xlu0 %4199 }
 0x4f7   :  { %v11546_v13 = vpack.c.bf16 %v4076_v52, %v4075_v42  ;;  %v4462_v28 = vsel %vm2716_vm5, %v11203_v22, %v4200_v61 }
 0x4f8   :  { %v3962_v43 = vpop.f32.mrb[184].mxu1  ;;  %v4515_v35 = vsel %vm2914_vm7, %v4462_v28, %v4255_v47 }
 0x4f9   :  { %v3963_v37 = vadd.f32 %v11522_v51, %v3962_v43  ;;  %4391 = vrot.lane.b32.xlu1 %v11546_v13, %s8062_s30  ;;  %v3964_v59 = vpop.f32.mrb[185].mxu1 }
 0x4fa   :  { %4337 = vrot.lane.b32.xlu0 %v11462_v34, %s8057_s18  ;;  %v11564_v22 = vpop.permute.xlu1 %4309  ;;  %v3965_v41 = vpop.f32.mrb[186].mxu1 }
 0x4fb   :  { %v3966_v14 = vadd.f32 %v11522_v51, %v3965_v41  ;;  %v3967_v1 = vpop.f32.mrb[187].mxu1  ;;  %v4693_v63 = vsel %vm3112_vm9, %v4643_v11, %v11564_v22  ;;  %v4077_v62 = vmax.f32 %v3963_v37, 0.0  ;;  %v7991_v11 = vld [vmem:[%s12353_s7 + $0x18] sm:$0xff]  }
 0x4fc   :  { %5070 = vmatprep.mubr.bf16.mxu1 %v4693_v63  ;;  %7061 = vmatpush3.bf16.msra.mxu0 %v7991_v11 }
 0x4fd   :  { %v4078_v9 = vmax.f32 %v3966_v14, 0.0  ;;  %4374 = vrot.lane.b32.xlu1 %v11546_v13, %s8059_s20  ;;  %5071 = vmatmul.mubr.bf16.gmra.mrb[248].mxu1 %v4562_v32 }
 0x4fe   :  { %4258 = vrot.lane.b32.xlu0 %v11341_v58, %s8059_s20  ;;  %v4257_v8 = vpop.permute.xlu1 %4256 }
 0x4ff   :  { %v11575_v7 = vpack.c.bf16 %v4078_v9, %v4077_v62  ;;  %v4644_v52 = vsel %vm2914_vm7, %v4605_v10, %v4257_v8 }
 0x500   :  { %v3970_v16 = vpop.f32.mrb[188].mxu1 }
 0x501   :  { %v3971_v53 = vadd.f32 %v11522_v51, %v3970_v16  ;;  %4393 = vrot.lane.b32.xlu1 %v11575_v7, %s8062_s30  ;;  %v3972_v23 = vpop.f32.mrb[189].mxu1 }
 0x502   :  { %4339 = vrot.lane.b32.xlu0 %v11484_v29, %s8057_s18  ;;  %v3973_v42 = vpop.f32.mrb[190].mxu1 }
 0x503   :  { %v4384_v47 = vpop.permute.xlu1 %4383  ;;  %v3974_v61 = vadd.f32 %v11522_v51, %v3973_v42  ;;  %v3975_v43 = vpop.f32.mrb[191].mxu1  ;;  %v4079_v37 = vmax.f32 %v3971_v53, 0.0 }
 0x504   :  { %v4696_v48 = vsel %vm3112_vm9, %v4644_v52, %v4384_v47 }
 0x505   :  { %v4080_v59 = vmax.f32 %v3974_v61, 0.0  ;;  %5078 = vmatprep.mubr.bf16.mxu1 %v4696_v48  ;;  %4376 = vrot.lane.b32.xlu1 %v11575_v7, %s8059_s20 }
 0x506   :  { %4260 = vrot.lane.b32.xlu0 %v11370_v5, %s8059_s20  ;;  %5079 = vmatmul.mubr.bf16.gmra.mrb[252].mxu1 %v4565_v3 }
 0x507   :  { %v11595_v19 = vpack.c.bf16 %v4080_v59, %v4079_v37  ;;  %v4188_v41 = vpop.permute.xlu1 %4187 }
 0x508   :  { %v4444_v14 = vsel %vm2716_vm5, %v10941_v56, %v4188_v41 }
 0x509   :  { %4395 = vrot.lane.b32.xlu1 %v11595_v19, %s8062_s30  ;;  %v4503_v62 = vsel %vm2914_vm7, %v4444_v14, %v11339_v6 }
 0x51b   :  { %v4359_v55 = vpop.permute.xlu0 %4358 }
 0x51c   :  { %v4646_v63 = vsel %vm2914_vm7, %v4462_v28, %v4359_v55 }
 0x51f   :  { %v4302_v1 = vpop.permute.xlu0 %4301 }
 0x520   :  { %v4568_v53 = vsel %vm3112_vm9, %v4503_v62, %v4302_v1 }
 0x523   :  { %v4314_v32 = vpop.permute.xlu1 %4313  ;;  %v4361_v33 = vpop.permute.xlu0 %4360 }
 0x524   :  { %v11611_v9 = vsel %vm3112_vm9, %v4515_v35, %v4314_v32  ;;  %v4698_v16 = vsel %vm3112_vm9, %v4646_v63, %v4314_v32 }
 0x525   :  { %5086 = vmatprep.mubr.bf16.mxu1 %v4698_v16 }
 0x526   :  { %5087 = vmatmul.mubr.bf16.gmra.mrb[0].mxu1 %v4568_v53 }
 0x527   :  { %v4202_v23 = vpop.permute.xlu1 %4201  ;;  %v3978_v10 = vpop.f32.mrb[192].mxu1 }
 0x528   :  { %v4465_v56 = vsel %vm2716_vm5, %v11241_v46, %v4202_v23  ;;  %v3979_v28 = vadd.f32 %v11522_v51, %v3978_v10  ;;  %v3980_v42 = vpop.f32.mrb[193].mxu1  ;;  %v4204_v50 = vpop.permute.xlu0 %4203 }
 0x529   :  { %v4517_v6 = vsel %vm2914_vm7, %v4465_v56, %v4257_v8  ;;  %v3981_v52 = vpop.f32.mrb[194].mxu1  ;;  %v4648_v43 = vsel %vm2914_vm7, %v4465_v56, %v4361_v33 }
 0x52a   :  { %v3982_v35 = vadd.f32 %v11522_v51, %v3981_v52  ;;  %v3983_v47 = vpop.f32.mrb[195].mxu1  ;;  %v4081_v59 = vmax.f32 %v3979_v28, 0.0  ;;  %v11630_v51 = vsel %vm2716_vm5, %v11279_v36, %v4204_v50 }
 0x52b   :  { %v4316_v61 = vpop.permute.xlu1 %4315 }
 0x52c   :  { %v11622_v48 = vsel %vm3112_vm9, %v4517_v6, %v4316_v61  ;;  %v4700_v37 = vsel %vm3112_vm9, %v4648_v43, %v4316_v61  ;;  %v4082_v3 = vmax.f32 %v3982_v35, 0.0  ;;  %v7992_v43 = vld [vmem:[%s12353_s7 + $0x60] sm:$0xff]  }
 0x52d   :  { %5094 = vmatprep.mubr.bf16.mxu1 %v4700_v37  ;;  %7062 = vmatprep.subr.bf16.mxu0 %v7992_v43 }
 0x52e   :  { %5095 = vmatmul.mubr.bf16.gmra.mrb[4].mxu1 %v11476_v24  ;;  %v11626_v11 = vpack.c.bf16 %v4082_v3, %v4081_v59 }
 0x52f   :  { %v4363_v8 = vpop.permute.xlu1 %4362 }
 0x530   :  { %v4650_v55 = vsel %vm2914_vm7, %v11630_v51, %v4363_v8 }
 0x533   :  { %v4206_v41 = vpop.permute.xlu1 %4205  ;;  %v11634_v14 = vpop.permute.xlu0 %4317 }
 0x534   :  { %v4702_v1 = vsel %vm3112_vm9, %v4650_v55, %v11634_v14  ;;  %v11641_v32 = vsel %vm2716_vm5, %v11317_v2, %v4206_v41 }
 0x535   :  { %5102 = vmatprep.mubr.bf16.mxu1 %v4702_v1 }
 0x536   :  { %5103 = vmatmul.mubr.bf16.gmra.mrb[8].mxu1 %v11497_v27 }
 0x537   :  { %v4249_v24 = vpop.permute.xlu1 %4248  ;;  %v4365_v63 = vpop.permute.xlu0 %4364 }
 0x538   :  { %v4509_v62 = vsel %vm2914_vm7, %v11514_v4, %v4249_v24  ;;  %v4652_v16 = vsel %vm2914_vm7, %v11641_v32, %v4365_v63 }
 0x539   :  { %v4577_v27 = vsel %vm3112_vm9, %v4509_v62, %v11525_v38 }
 0x53b   :  { %v4330_v53 = vpop.permute.xlu1 %4329  ;;  %v11647_v23 = vpop.permute.xlu0 %4319 }
 0x53c   :  { %v4704_v56 = vsel %vm3112_vm9, %v4652_v16, %v11647_v23  ;;  %v4608_v28 = vsel %vm2716_vm5, %v11341_v58, %v4330_v53 }
 0x53d   :  { %5110 = vmatprep.mubr.bf16.mxu1 %v4704_v56 }
 0x53e   :  { %5111 = vmatmul.mubr.bf16.gmra.mrb[12].mxu1 %v4577_v27 }
 0x53f   :  { %v4251_v10 = vpop.permute.xlu1 %4250  ;;  %v4367_v33 = vpop.permute.xlu0 %4366 }
 0x540   :  { %v4511_v4 = vsel %vm2914_vm7, %v11553_v26, %v4251_v10  ;;  %v4654_v42 = vsel %vm2914_vm7, %v4608_v28, %v4367_v33  ;;  %v7993_v26 = vld [vmem:[%s12353_s7 + $0x20] sm:$0xff]  }
 0x541   :  { %v4580_v35 = vsel %vm3112_vm9, %v4511_v4, %v11564_v22  ;;  %7063 = vmatpush3.bf16.msra.mxu0 %v7993_v26 }
 0x543   :  { %v4386_v6 = vpop.permute.xlu0 %4385  ;;  %v4332_v38 = vpop.permute.xlu1 %4331 }
 0x544   :  { %v4707_v52 = vsel %vm3112_vm9, %v4654_v42, %v4386_v6  ;;  %v4611_v22 = vsel %vm2716_vm5, %v11412_v57, %v4332_v38 }
 0x545   :  { %5118 = vmatprep.mubr.bf16.mxu1 %v4707_v52 }
 0x546   :  { %5119 = vmatmul.mubr.bf16.gmra.mrb[16].mxu1 %v4580_v35 }
 0x547   :  { %v4198_v61 = vpop.permute.xlu0 %4197 }
 0x548   :  { %v4459_v37 = vsel %vm2716_vm5, %v11178_v15, %v4198_v61 }
 0x549   :  { %v4513_v8 = vsel %vm2914_vm7, %v4459_v37, %v11504_v40 }
 0x553   :  { %v4369_v47 = vpop.permute.xlu1 %4368 }
 0x554   :  { %v4656_v3 = vsel %vm2914_vm7, %v4611_v22, %v4369_v47 }
 0x557   :  { %v4312_v59 = vpop.permute.xlu1 %4311 }
 0x558   :  { %v4583_v41 = vsel %vm3112_vm9, %v4513_v8, %v4312_v59 }
 0x55b   :  { %v4388_v50 = vpop.permute.xlu0 %4387  ;;  %v4371_v15 = vpop.permute.xlu1 %4370 }
 0x55c   :  { %v4710_v55 = vsel %vm3112_vm9, %v4656_v3, %v4388_v50 }
 0x55d   :  { %5126 = vmatprep.mubr.bf16.mxu1 %v4710_v55 }
 0x55e   :  { %5127 = vmatmul.mubr.bf16.gmra.mrb[20].mxu1 %v4583_v41 }
 0x55f   :  { %v4336_v16 = vpop.permute.xlu1 %4335 }
 0x560   :  { %v4334_v1 = vpop.permute.xlu0 %4333  ;;  %v4617_v53 = vsel %vm2716_vm5, %v11438_v54, %v4336_v16 }
 0x561   :  { %v4614_v24 = vsel %vm2716_vm5, %v11424_v31, %v4334_v1 }
 0x562   :  { %v4658_v63 = vsel %vm2914_vm7, %v4614_v24, %v4371_v15 }
 0x564   :  { %v4390_v57 = vpop.permute.xlu0 %4389 }
 0x565   :  { %v4713_v62 = vsel %vm3112_vm9, %v4658_v63, %v4390_v57 }
 0x566   :  { %5134 = vmatprep.mubr.bf16.mxu1 %v4713_v62 }
 0x567   :  { %5135 = vmatmul.mubr.bf16.gmra.mrb[24].mxu1 %v11611_v9 }
 0x568   :  { %v4373_v40 = vpop.permute.xlu0 %4372 }
 0x569   :  { %v4660_v56 = vsel %vm2914_vm7, %v4617_v53, %v4373_v40 }
 0x56b   :  { %v4392_v27 = vpop.permute.xlu1 %4391 }
 0x56c   :  { %v4338_v10 = vpop.permute.xlu0 %4337  ;;  %v4716_v33 = vsel %vm3112_vm9, %v4660_v56, %v4392_v27 }
 0x56d   :  { %5142 = vmatprep.mubr.bf16.mxu1 %v4716_v33  ;;  %v4620_v42 = vsel %vm2716_vm5, %v11450_v60, %v4338_v10 }
 0x56f   :  { %5143 = vmatmul.mubr.bf16.gmra.mrb[28].mxu1 %v11622_v48  ;;  %v4375_v28 = vpop.permute.xlu1 %4374 }
 0x570   :  { %v4259_v4 = vpop.permute.xlu0 %4258  ;;  %v4662_v9 = vsel %vm2914_vm7, %v4620_v42, %v4375_v28 }
 0x571   :  { %v4519_v6 = vsel %vm2914_vm7, %v11630_v51, %v4259_v4 }
 0x572   :  { %v4592_v47 = vsel %vm3112_vm9, %v4519_v6, %v11634_v14 }
 0x573   :  { %v4394_v52 = vpop.permute.xlu1 %4393 }
 0x574   :  { %v4340_v35 = vpop.permute.xlu0 %4339  ;;  %v4719_v38 = vsel %vm3112_vm9, %v4662_v9, %v4394_v52 }
 0x575   :  { %5150 = vmatprep.mubr.bf16.mxu1 %v4719_v38  ;;  %v4623_v43 = vsel %vm2716_vm5, %v11462_v34, %v4340_v35 }
 0x577   :  { %5151 = vmatmul.mubr.bf16.gmra.mrb[32].mxu1 %v4592_v47  ;;  %v4377_v48 = vpop.permute.xlu1 %4376 }
 0x578   :  { %v4261_v61 = vpop.permute.xlu0 %4260  ;;  %v4664_v26 = vsel %vm2914_vm7, %v4623_v43, %v4377_v48 }
 0x579   :  { %v4521_v37 = vsel %vm2914_vm7, %v11641_v32, %v4261_v61 }
 0x57a   :  { %v4595_v59 = vsel %vm3112_vm9, %v4521_v37, %v11647_v23 }
 0x57b   :  { %v4396_v51 = vpop.permute.xlu1 %4395 }
 0x57c   :  { %v4722_v22 = vsel %vm3112_vm9, %v4664_v26, %v4396_v51 }
 0x57d   :  { %5158 = vmatprep.mubr.bf16.mxu1 %v4722_v22 }
 0x57f   :  { %5159 = vmatmul.mubr.bf16.gmra.mrb[36].mxu1 %v4595_v59 }
 0x580   :  { %7562 = vmatprep.mubr.msk.bf16.mxu1 %vm8055_vm2, %v12612_v25 }
 0x587   :  { %7563 = vmatmul.mubr.msk.bf16.vlgmr.msra.gmra.mrb[196].mxu1 %vm2716_vm5, %v10645_v12  ;;  %v7994_v12 = vld [vmem:[%s12353_s7 + $0x68] sm:$0xff]  }
 0x588   :  { %7566 = vmatprep.mubr.msk.bf16.mxu1 %vm8055_vm2, %v12612_v25  ;;  %7064 = vmatprep.subr.bf16.mxu0 %v7994_v12 }
 0x58f   :  { %7567 = vmatmul.mubr.msk.bf16.gmra.mrb[200].mxu1 %vm2716_vm5, %v10696_v39  ;;  %v7995_v39 = vld [vmem:[%s12353_s7 + $0x28] sm:$0xff]  }
 0x590   :  { %7570 = vmatprep.mubr.msk.bf16.mxu1 %vm8055_vm2, %v12612_v25  ;;  %7065 = vmatpush3.bf16.msra.mxu0 %v7995_v39 }
 0x597   :  { %7571 = vmatmul.mubr.msk.bf16.gmra.mrb[204].mxu1 %vm2716_vm5, %v10743_v18  ;;  %v7996_v18 = vld [vmem:[%s12353_s7 + $0x70] sm:$0xff]  }
 0x598   :  { %7574 = vmatprep.mubr.msk.bf16.mxu1 %vm8055_vm2, %v12612_v25  ;;  %7066 = vmatprep.subr.bf16.mxu0 %v7996_v18 }
 0x59f   :  { %7575 = vmatmul.mubr.msk.bf16.gmra.mrb[208].mxu1 %vm2716_vm5, %v10801_v17  ;;  %v7997_v17 = vld [vmem:[%s12353_s7 + $0x30] sm:$0xff]  }
 0x5a0   :  { %7578 = vmatprep.mubr.msk.bf16.mxu1 %vm8055_vm2, %v12612_v25  ;;  %7067 = vmatpush3.bf16.msra.mxu0 %v7997_v17 }
 0x5a7   :  { %7579 = vmatmul.mubr.msk.bf16.gmra.mrb[212].mxu1 %vm2716_vm5, %v10868_v30  ;;  %v7998_v30 = vld [vmem:[%s12353_s7 + $0x78] sm:$0xff]  }
 0x5a8   :  { %7582 = vmatprep.mubr.msk.bf16.mxu1 %vm8055_vm2, %v12612_v25  ;;  %7068 = vmatprep.subr.bf16.mxu0 %v7998_v30 }
 0x5af   :  { %7583 = vmatmul.mubr.msk.bf16.gmra.mrb[216].mxu1 %vm2716_vm5, %v11015_v21  ;;  %v7999_v21 = vld [vmem:[%s12353_s7 + $0x38] sm:$0xff]  }
 0x5b0   :  { %7586 = vmatprep.mubr.msk.bf16.mxu1 %vm8055_vm2, %v12612_v25  ;;  %7069 = vmatpush3.bf16.msra.mxu0 %v7999_v21 }
 0x5b7   :  { %7587 = vmatmul.mubr.msk.bf16.gmra.mrb[220].mxu1 %vm2716_vm5, %v11065_v49  ;;  %v11823_v49 = vld [vmem:[%s12354_s6] ss:$0 sm:$0xff] }
 0x5b8   :  { %7590 = vmatprep.mubr.msk.bf16.mxu1 %vm8055_vm2, %v12612_v25 }
 0x5bf   :  { %7591 = vmatmul.mubr.msk.bf16.gmra.mrb[224].mxu1 %vm2716_vm5, %v11111_v45 }
 0x5c0   :  { %7594 = vmatprep.mubr.msk.bf16.mxu1 %vm8055_vm2, %v12612_v25 }
 0x5c7   :  { %7595 = vmatmul.mubr.msk.bf16.gmra.mrb[228].mxu1 %vm2716_vm5, %v11142_v44 }
 0x5c8   :  { %7598 = vmatprep.mubr.msk.bf16.mxu1 %vm8055_vm2, %v12612_v25 }
 0x5cf   :  { %7599 = vmatmul.mubr.msk.bf16.gmra.mrb[232].mxu1 %vm2716_vm5, %v11150_v20 }
 0x5d0   :  { %7602 = vmatprep.mubr.msk.bf16.mxu1 %vm8055_vm2, %v12612_v25 }
 0x5d7   :  { %7603 = vmatmul.mubr.msk.bf16.gmra.mrb[236].mxu1 %vm2716_vm5, %v11241_v46 }
 0x5d8   :  { %7606 = vmatprep.mubr.msk.bf16.mxu1 %vm8055_vm2, %v12612_v25 }
 0x5df   :  { %7607 = vmatmul.mubr.msk.bf16.gmra.mrb[240].mxu1 %vm2716_vm5, %v11279_v36 }
 0x5e0   :  { %7610 = vmatprep.mubr.msk.bf16.mxu1 %vm8055_vm2, %v12612_v25 }
 0x5e7   :  { %7611 = vmatmul.mubr.msk.bf16.gmra.mrb[244].mxu1 %vm2716_vm5, %v11317_v2 }
 0x5e8   :  { %7614 = vmatprep.mubr.msk.bf16.mxu1 %vm8055_vm2, %v12612_v25 }
 0x5ef   :  { %7615 = vmatmul.mubr.msk.bf16.gmra.mrb[248].mxu1 %vm2716_vm5, %v11341_v58 }
 0x5f0   :  { %7618 = vmatprep.mubr.msk.bf16.mxu1 %vm8055_vm2, %v12612_v25 }
 0x5f7   :  { %7619 = vmatmul.mubr.msk.bf16.gmra.mrb[252].mxu1 %vm2716_vm5, %v11370_v5 }
 0x5f8   :  { %7622 = vmatprep.mubr.msk.bf16.mxu1 %vm8055_vm2, %v12612_v25 }
 0x5ff   :  { %7623 = vmatmul.mubr.msk.bf16.gmra.mrb[0].mxu1 %vm2716_vm5, %v11424_v31 }
 0x600   :  { %7626 = vmatprep.mubr.msk.bf16.mxu1 %vm8055_vm2, %v12612_v25 }
 0x607   :  { %7627 = vmatmul.mubr.msk.bf16.gmra.mrb[4].mxu1 %vm2716_vm5, %v11438_v54 }
 0x608   :  { %7630 = vmatprep.mubr.msk.bf16.mxu1 %vm8055_vm2, %v12612_v25 }
 0x60f   :  { %7631 = vmatmul.mubr.msk.bf16.gmra.mrb[8].mxu1 %vm2716_vm5, %v11450_v60 }
 0x610   :  { %7634 = vmatprep.mubr.msk.bf16.mxu1 %vm8055_vm2, %v12612_v25 }
 0x617   :  { %7635 = vmatmul.mubr.msk.bf16.gmra.mrb[12].mxu1 %vm2716_vm5, %v11462_v34 }
 0x618   :  { %7638 = vmatprep.mubr.msk.bf16.mxu1 %vm8055_vm2, %v12612_v25 }
 0x61f   :  { %7639 = vmatmul.mubr.msk.bf16.gmra.mrb[16].mxu1 %vm2716_vm5, %v11484_v29 }
 0x620   :  { %7642 = vmatprep.mubr.msk.bf16.mxu1 %vm8055_vm2, %v12612_v25 }
 0x627   :  { %7643 = vmatmul.mubr.msk.bf16.gmra.mrb[20].mxu1 %vm2716_vm5, %v11538_v0 }
 0x628   :  { %7646 = vmatprep.mubr.msk.bf16.mxu1 %vm8055_vm2, %v12612_v25 }
 0x62f   :  { %7647 = vmatmul.mubr.msk.bf16.gmra.mrb[24].mxu1 %vm2716_vm5, %v11546_v13 }
 0x630   :  { %7650 = vmatprep.mubr.msk.bf16.mxu1 %vm8055_vm2, %v12612_v25 }
 0x637   :  { %7651 = vmatmul.mubr.msk.bf16.gmra.mrb[28].mxu1 %vm2716_vm5, %v11575_v7 }
 0x638   :  { %7654 = vmatprep.mubr.msk.bf16.mxu1 %vm8055_vm2, %v12612_v25 }
 0x63f   :  { %7655 = vmatmul.mubr.msk.bf16.gmra.mrb[32].mxu1 %vm2716_vm5, %v11595_v19 }
 0x640   :  { %7658 = vmatprep.mubr.msk.bf16.mxu1 %vm8055_vm2, %v12612_v25 }
 0x647   :  { %7659 = vmatmul.mubr.msk.bf16.gmra.mrb[36].mxu1 %vm2716_vm5, %v11626_v11 }
 0x65a   :  { %v5201_v45 = vpop.f32.mrb[196].mxu1 }
 0x65b   :  { %v7714_v44 = vadd.f32 %v11823_v49, %v5201_v45  ;;  %v7564_v20 = vpop.f32.mrb[197].mxu1 }
 0x65c   :  { %v5204_v46 = vpop.f32.mrb[198].mxu1 }
 0x65d   :  { %v7715_v36 = vadd.f32 %v11823_v49, %v5204_v46  ;;  %v7565_v2 = vpop.f32.mrb[199].mxu1  ;;  %v5400_v58 = vmax.f32 %v7714_v44, 0.0 }
 0x65f   :  { %v5401_v5 = vmax.f32 %v7715_v36, 0.0 }
 0x661   :  { %v11827_v31 = vpack.c.bf16 %v5401_v5, %v5400_v58 }
 0x662   :  { %v5209_v54 = vpop.f32.mrb[200].mxu1 }
 0x663   :  { %v7716_v60 = vadd.f32 %v11823_v49, %v5209_v54  ;;  %v7568_v34 = vpop.f32.mrb[201].mxu1 }
 0x664   :  { %v5212_v29 = vpop.f32.mrb[202].mxu1 }
 0x665   :  { %v7717_v0 = vadd.f32 %v11823_v49, %v5212_v29  ;;  %v7569_v13 = vpop.f32.mrb[203].mxu1  ;;  %v5402_v7 = vmax.f32 %v7716_v60, 0.0 }
 0x667   :  { %v5403_v19 = vmax.f32 %v7717_v0, 0.0 }
 0x669   :  { %v11831_v11 = vpack.c.bf16 %v5403_v19, %v5402_v7 }
 0x66a   :  { %v5217_v14 = vpop.f32.mrb[204].mxu1 }
 0x66b   :  { %v7718_v32 = vadd.f32 %v11823_v49, %v5217_v14  ;;  %5484 = vrot.lane.b32.xlu1 %v11831_v11, %s8059_s20  ;;  %v7572_v23 = vpop.f32.mrb[205].mxu1 }
 0x66c   :  { %v5220_v3 = vpop.f32.mrb[206].mxu1 }
 0x66d   :  { %v7719_v50 = vadd.f32 %v11823_v49, %v5220_v3  ;;  %v7573_v8 = vpop.f32.mrb[207].mxu1  ;;  %v5404_v55 = vmax.f32 %v7718_v32, 0.0  ;;  %v8000_v3 = vld [vmem:[%s12353_s7 + $0xc0] sm:$0xff]  }
 0x66e   :  { %7124 = vmatprep.subr.bf16.mxu0 %v8000_v3 }
 0x66f   :  { %v5405_v41 = vmax.f32 %v7719_v50, 0.0 }
 0x671   :  { %v11837_v1 = vpack.c.bf16 %v5405_v41, %v5404_v55 }
 0x672   :  { %v5225_v15 = vpop.f32.mrb[208].mxu1 }
 0x673   :  { %v7720_v24 = vadd.f32 %v11823_v49, %v5225_v15  ;;  %5486 = vrot.lane.b32.xlu1 %v11837_v1, %s8059_s20  ;;  %v7576_v57 = vpop.f32.mrb[209].mxu1 }
 0x674   :  { %v5228_v63 = vpop.f32.mrb[210].mxu1 }
 0x675   :  { %v7721_v62 = vadd.f32 %v11823_v49, %v5228_v63  ;;  %v7577_v16 = vpop.f32.mrb[211].mxu1  ;;  %v5406_v40 = vmax.f32 %v7720_v24, 0.0 }
 0x677   :  { %v5407_v53 = vmax.f32 %v7721_v62, 0.0 }
 0x679   :  { %v11843_v56 = vpack.c.bf16 %v5407_v53, %v5406_v40 }
 0x67a   :  { %v5233_v27 = vpop.f32.mrb[212].mxu1 }
 0x67b   :  { %v7722_v10 = vadd.f32 %v11823_v49, %v5233_v27  ;;  %5488 = vrot.lane.b32.xlu1 %v11843_v56, %s8059_s20  ;;  %v7580_v33 = vpop.f32.mrb[213].mxu1 }
 0x67c   :  { %v5236_v28 = vpop.f32.mrb[214].mxu1 }
 0x67d   :  { %v7723_v4 = vadd.f32 %v11823_v49, %v5236_v28  ;;  %v7581_v42 = vpop.f32.mrb[215].mxu1  ;;  %v5408_v9 = vmax.f32 %v7722_v10, 0.0 }
 0x67f   :  { %v5409_v6 = vmax.f32 %v7723_v4, 0.0 }
 0x681   :  { %v11849_v52 = vpack.c.bf16 %v5409_v6, %v5408_v9 }
 0x682   :  { %v5241_v35 = vpop.f32.mrb[216].mxu1 }
 0x683   :  { %v7724_v38 = vadd.f32 %v11823_v49, %v5241_v35  ;;  %v7584_v47 = vpop.f32.mrb[217].mxu1 }
 0x684   :  { %v5244_v48 = vpop.f32.mrb[218].mxu1 }
 0x685   :  { %v7725_v61 = vadd.f32 %v11823_v49, %v5244_v48  ;;  %v7585_v43 = vpop.f32.mrb[219].mxu1  ;;  %v5410_v26 = vmax.f32 %v7724_v38, 0.0 }
 0x687   :  { %v5411_v37 = vmax.f32 %v7725_v61, 0.0 }
 0x689   :  { %v11853_v51 = vpack.c.bf16 %v5411_v37, %v5410_v26 }
 0x68a   :  { %v5249_v22 = vpop.f32.mrb[220].mxu1 }
 0x68b   :  { %v7726_v59 = vadd.f32 %v11823_v49, %v5249_v22  ;;  %5507 = vrot.lane.b32.xlu0 %v11853_v51, %s8059_s20  ;;  %v7588_v12 = vpop.f32.mrb[221].mxu1 }
 0x68c   :  { %v5252_v39 = vpop.f32.mrb[222].mxu1 }
 0x68d   :  { %v7727_v18 = vadd.f32 %v11823_v49, %v5252_v39  ;;  %v7589_v17 = vpop.f32.mrb[223].mxu1  ;;  %v5412_v30 = vmax.f32 %v7726_v59, 0.0 }
 0x68f   :  { %v5413_v21 = vmax.f32 %v7727_v18, 0.0 }
 0x691   :  { %v11859_v45 = vpack.c.bf16 %v5413_v21, %v5412_v30 }
 0x692   :  { %v5257_v44 = vpop.f32.mrb[224].mxu1 }
 0x693   :  { %v7728_v20 = vadd.f32 %v11823_v49, %v5257_v44  ;;  %5490 = vrot.lane.b32.xlu0 %v11859_v45, %s8059_s20  ;;  %v7592_v46 = vpop.f32.mrb[225].mxu1 }
 0x694   :  { %v5260_v36 = vpop.f32.mrb[226].mxu1 }
 0x695   :  { %v7729_v2 = vadd.f32 %v11823_v49, %v5260_v36  ;;  %v7593_v58 = vpop.f32.mrb[227].mxu1  ;;  %v5414_v5 = vmax.f32 %v7728_v20, 0.0 }
 0x697   :  { %v5415_v54 = vmax.f32 %v7729_v2, 0.0 }
 0x699   :  { %v11865_v60 = vpack.c.bf16 %v5415_v54, %v5414_v5 }
 0x69a   :  { %v5265_v34 = vpop.f32.mrb[228].mxu1 }
 0x69b   :  { %v7730_v29 = vadd.f32 %v11823_v49, %v5265_v34  ;;  %5492 = vrot.lane.b32.xlu0 %v11865_v60, %s8059_s20  ;;  %v7596_v0 = vpop.f32.mrb[229].mxu1 }
 0x69c   :  { %v5268_v13 = vpop.f32.mrb[230].mxu1 }
 0x69d   :  { %v7731_v7 = vadd.f32 %v11823_v49, %v5268_v13  ;;  %v7597_v19 = vpop.f32.mrb[231].mxu1  ;;  %v5416_v14 = vmax.f32 %v7730_v29, 0.0 }
 0x69f   :  { %v5417_v32 = vmax.f32 %v7731_v7, 0.0 }
 0x6a1   :  { %v11871_v23 = vpack.c.bf16 %v5417_v32, %v5416_v14 }
 0x6a2   :  { %v5273_v50 = vpop.f32.mrb[232].mxu1 }
 0x6a3   :  { %v7732_v8 = vadd.f32 %v11823_v49, %v5273_v50  ;;  %v7600_v55 = vpop.f32.mrb[233].mxu1 }
 0x6a4   :  { %v5276_v41 = vpop.f32.mrb[234].mxu1 }
 0x6a5   :  { %v7733_v15 = vadd.f32 %v11823_v49, %v5276_v41  ;;  %v7601_v24 = vpop.f32.mrb[235].mxu1  ;;  %v5418_v57 = vmax.f32 %v7732_v8, 0.0 }
 0x6a7   :  { %v5419_v63 = vmax.f32 %v7733_v15, 0.0 }
 0x6a9   :  { %v11878_v62 = vpack.c.bf16 %v5419_v63, %v5418_v57 }
 0x6aa   :  { %v5281_v16 = vpop.f32.mrb[236].mxu1 }
 0x6ab   :  { %v7734_v40 = vadd.f32 %v11823_v49, %v5281_v16  ;;  %v7604_v53 = vpop.f32.mrb[237].mxu1 }
 0x6ac   :  { %v5284_v27 = vpop.f32.mrb[238].mxu1 }
 0x6ad   :  { %v7735_v10 = vadd.f32 %v11823_v49, %v5284_v27  ;;  %v7605_v33 = vpop.f32.mrb[239].mxu1  ;;  %v5420_v28 = vmax.f32 %v7734_v40, 0.0 }
 0x6af   :  { %v5421_v4 = vmax.f32 %v7735_v10, 0.0 }
 0x6b1   :  { %v11882_v42 = vpack.c.bf16 %v5421_v4, %v5420_v28 }
 0x6b2   :  { %v5289_v9 = vpop.f32.mrb[240].mxu1 }
 0x6b3   :  { %v7736_v6 = vadd.f32 %v11823_v49, %v5289_v9  ;;  %5509 = vrot.lane.b32.xlu0 %v11882_v42, %s8059_s20  ;;  %v7608_v35 = vpop.f32.mrb[241].mxu1 }
 0x6b4   :  { %v5292_v38 = vpop.f32.mrb[242].mxu1 }
 0x6b5   :  { %v7737_v47 = vadd.f32 %v11823_v49, %v5292_v38  ;;  %v7609_v48 = vpop.f32.mrb[243].mxu1  ;;  %v5422_v61 = vmax.f32 %v7736_v6, 0.0 }
 0x6b7   :  { %v5423_v43 = vmax.f32 %v7737_v47, 0.0 }
 0x6b9   :  { %v11888_v26 = vpack.c.bf16 %v5423_v43, %v5422_v61 }
 0x6ba   :  { %v5297_v37 = vpop.f32.mrb[244].mxu1 }
 0x6bb   :  { %v7738_v22 = vadd.f32 %v11823_v49, %v5297_v37  ;;  %5496 = vrot.lane.b32.xlu1 %v11888_v26, %s8059_s20  ;;  %v7612_v59 = vpop.f32.mrb[245].mxu1 }
 0x6bc   :  { %v5300_v12 = vpop.f32.mrb[246].mxu1 }
 0x6bd   :  { %v7739_v39 = vadd.f32 %v11823_v49, %v5300_v12  ;;  %v7613_v18 = vpop.f32.mrb[247].mxu1  ;;  %v5424_v17 = vmax.f32 %v7738_v22, 0.0 }
 0x6bf   :  { %v5425_v30 = vmax.f32 %v7739_v39, 0.0  ;;  %5494 = vrot.lane.b32.xlu1 %v11871_v23, %s8059_s20 }
 0x6c1   :  { %v11896_v21 = vpack.c.bf16 %v5425_v30, %v5424_v17 }
 0x6c2   :  { %v5305_v44 = vpop.f32.mrb[248].mxu1 }
 0x6c3   :  { %v7740_v20 = vadd.f32 %v11823_v49, %v5305_v44  ;;  %5498 = vrot.lane.b32.xlu0 %v11896_v21, %s8059_s20  ;;  %v7616_v46 = vpop.f32.mrb[249].mxu1 }
 0x6c4   :  { %v5308_v36 = vpop.f32.mrb[250].mxu1 }
 0x6c5   :  { %v7741_v2 = vadd.f32 %v11823_v49, %v5308_v36  ;;  %v7617_v58 = vpop.f32.mrb[251].mxu1  ;;  %v5426_v5 = vmax.f32 %v7740_v20, 0.0 }
 0x6c7   :  { %v5427_v54 = vmax.f32 %v7741_v2, 0.0 }
 0x6c9   :  { %v11902_v34 = vpack.c.bf16 %v5427_v54, %v5426_v5 }
 0x6ca   :  { %v5313_v29 = vpop.f32.mrb[252].mxu1 }
 0x6cb   :  { %v7742_v0 = vadd.f32 %v11823_v49, %v5313_v29  ;;  %v7620_v13 = vpop.f32.mrb[253].mxu1 }
 0x6cc   :  { %v5316_v7 = vpop.f32.mrb[254].mxu1 }
 0x6cd   :  { %v7743_v19 = vadd.f32 %v11823_v49, %v5316_v7  ;;  %v7621_v14 = vpop.f32.mrb[255].mxu1  ;;  %v5428_v32 = vmax.f32 %v7742_v0, 0.0 }
 0x6cf   :  { %v5429_v3 = vmax.f32 %v7743_v19, 0.0 }
 0x6d1   :  { %v11906_v50 = vpack.c.bf16 %v5429_v3, %v5428_v32 }
 0x6d2   :  { %v5321_v8 = vpop.f32.mrb[0].mxu1 }
 0x6d3   :  { %v7744_v55 = vadd.f32 %v11823_v49, %v5321_v8  ;;  %v7624_v41 = vpop.f32.mrb[1].mxu1 }
 0x6d4   :  { %v5324_v15 = vpop.f32.mrb[2].mxu1 }
 0x6d5   :  { %v7745_v24 = vadd.f32 %v11823_v49, %v5324_v15  ;;  %v7625_v57 = vpop.f32.mrb[3].mxu1  ;;  %v5430_v63 = vmax.f32 %v7744_v55, 0.0 }
 0x6d7   :  { %v5431_v16 = vmax.f32 %v7745_v24, 0.0 }
 0x6d9   :  { %v11910_v40 = vpack.c.bf16 %v5431_v16, %v5430_v63  ;;  %v8001_v63 = vld [vmem:[%s12353_s7 + $0x80] sm:$0xff]  }
 0x6da   :  { %v5329_v53 = vpop.f32.mrb[4].mxu1 }
 0x6db   :  { %v7746_v27 = vadd.f32 %v11823_v49, %v5329_v53  ;;  %5511 = vrot.lane.b32.xlu0 %v11910_v40, %s8059_s20  ;;  %v7628_v10 = vpop.f32.mrb[5].mxu1  ;;  %v8002_v53 = vld [vmem:[%s12353_s7 + $0xc8] sm:$0xff]  }
 0x6dc   :  { %v5332_v33 = vpop.f32.mrb[6].mxu1 }
 0x6dd   :  { %v7747_v28 = vadd.f32 %v11823_v49, %v5332_v33  ;;  %v7629_v4 = vpop.f32.mrb[7].mxu1  ;;  %v5432_v9 = vmax.f32 %v7746_v27, 0.0  ;;  %v5485_v55 = vpop.permute.xlu1 %5484 }
 0x6de   :  { %v5540_v27 = vsel %vm2914_vm7, %v11827_v31, %v5485_v55  ;;  %v8003_v4 = vld [vmem:[%s12353_s7 + $0x88] sm:$0xff]  }
 0x6df   :  { %v5433_v6 = vmax.f32 %v7747_v28, 0.0 }
 0x6e1   :  { %v11916_v35 = vpack.c.bf16 %v5433_v6, %v5432_v9  ;;  %v8004_v6 = vld [vmem:[%s12353_s7 + $0xd0] sm:$0xff]  }
 0x6e2   :  { %v5337_v38 = vpop.f32.mrb[8].mxu1 }
 0x6e3   :  { %v7748_v47 = vadd.f32 %v11823_v49, %v5337_v38  ;;  %5513 = vrot.lane.b32.xlu1 %v11916_v35, %s8059_s20  ;;  %v7632_v48 = vpop.f32.mrb[9].mxu1 }
 0x6e4   :  { %v5340_v61 = vpop.f32.mrb[10].mxu1 }
 0x6e5   :  { %v7749_v43 = vadd.f32 %v11823_v49, %v5340_v61  ;;  %v7633_v37 = vpop.f32.mrb[11].mxu1  ;;  %v5434_v22 = vmax.f32 %v7748_v47, 0.0  ;;  %v5487_v47 = vpop.permute.xlu1 %5486 }
 0x6e7   :  { %v5435_v59 = vmax.f32 %v7749_v43, 0.0  ;;  %5500 = vrot.lane.b32.xlu1 %v11902_v34, %s8059_s20 }
 0x6e9   :  { %v11924_v12 = vpack.c.bf16 %v5435_v59, %v5434_v22  ;;  %v8005_v22 = vld [vmem:[%s12353_s7 + $0x90] sm:$0xff]  }
 0x6ea   :  { %v5345_v39 = vpop.f32.mrb[12].mxu1 }
 0x6eb   :  { %v7750_v18 = vadd.f32 %v11823_v49, %v5345_v39  ;;  %5515 = vrot.lane.b32.xlu0 %v11924_v12, %s8059_s20  ;;  %v7636_v17 = vpop.f32.mrb[13].mxu1  ;;  %v8006_v39 = vld [vmem:[%s12353_s7 + $0xd8] sm:$0xff]  }
 0x6ec   :  { %v5348_v30 = vpop.f32.mrb[14].mxu1 }
 0x6ed   :  { %v7751_v44 = vadd.f32 %v11823_v49, %v5348_v30  ;;  %v7637_v20 = vpop.f32.mrb[15].mxu1  ;;  %v5436_v46 = vmax.f32 %v7750_v18, 0.0  ;;  %v5544_v18 = vsel %vm2914_vm7, %v11831_v11, %v5487_v47 }
 0x6ee   :  { %v8007_v20 = vld [vmem:[%s12353_s7 + $0x98] sm:$0xff]  }
 0x6ef   :  { %v5437_v36 = vmax.f32 %v7751_v44, 0.0  ;;  %5521 = vrot.lane.b32.xlu0 %v11878_v62, %s8059_s20 }
 0x6f1   :  { %v11932_v2 = vpack.c.bf16 %v5437_v36, %v5436_v46  ;;  %v8008_v46 = vld [vmem:[%s12353_s7 + $0xe0] sm:$0xff]  }
 0x6f2   :  { %v5353_v58 = vpop.f32.mrb[16].mxu1 }
 0x6f3   :  { %v7752_v5 = vadd.f32 %v11823_v49, %v5353_v58  ;;  %5523 = vrot.lane.b32.xlu0 %v11906_v50, %s8059_s20  ;;  %5525 = vrot.lane.b32.xlu1 %v11932_v2, %s8059_s20  ;;  %v7640_v54 = vpop.f32.mrb[17].mxu1  ;;  %v5489_v58 = vpop.permute.xlu1 %5488 }
 0x6f4   :  { %v5356_v29 = vpop.f32.mrb[18].mxu1 }
 0x6f5   :  { %v7753_v0 = vadd.f32 %v11823_v49, %v5356_v29  ;;  %v7641_v13 = vpop.f32.mrb[19].mxu1  ;;  %v5438_v7 = vmax.f32 %v7752_v5, 0.0 }
 0x6f6   :  { %v8009_v13 = vld [vmem:[%s12353_s7 + $0xa0] sm:$0xff]  }
 0x6f7   :  { %v5439_v19 = vmax.f32 %v7753_v0, 0.0 }
 0x6f9   :  { %v11940_v14 = vpack.c.bf16 %v5439_v19, %v5438_v7  ;;  %v8010_v19 = vld [vmem:[%s12353_s7 + $0xe8] sm:$0xff]  }
 0x6fa   :  { %v5361_v32 = vpop.f32.mrb[20].mxu1 }
 0x6fb   :  { %v7754_v3 = vadd.f32 %v11823_v49, %v5361_v32  ;;  %v7644_v8 = vpop.f32.mrb[21].mxu1  ;;  %v5548_v32 = vsel %vm2914_vm7, %v11837_v1, %v5489_v58 }
 0x6fc   :  { %v5364_v41 = vpop.f32.mrb[22].mxu1 }
 0x6fd   :  { %v7755_v15 = vadd.f32 %v11823_v49, %v5364_v41  ;;  %v5508_v24 = vpop.permute.xlu0 %5507  ;;  %v7645_v57 = vpop.f32.mrb[23].mxu1  ;;  %v5440_v10 = vmax.f32 %v7754_v3, 0.0  ;;  %v8011_v41 = vld [vmem:[%s12353_s7 + $0xa8] sm:$0xff]  }
 0x6fe   :  { %v5575_v16 = vsel %vm2914_vm7, %v11837_v1, %v5508_v24 }
 0x6ff   :  { %v5441_v33 = vmax.f32 %v7755_v15, 0.0  ;;  %5983 = vmatprep.mubr.bf16.mxu0 %v5575_v16  ;;  %v8012_v15 = vld [vmem:[%s12353_s7 + $0xf0] sm:$0xff]  }
 0x700   :  { %5984 = vmatmul.mubr.bf16.vlgmr.msra.gmra.mrb[68].mxu0 %v5540_v27  ;;  %v8014_v27 = vld [vmem:[%s12353_s7 + $0xf8] sm:$0xff]  }
 0x701   :  { %v11954_v28 = vpack.c.bf16 %v5441_v33, %v5440_v10  ;;  %7125 = vmatpush3.bf16.msra.mxu0 %v8001_v63 }
 0x702   :  { %v5369_v9 = vpop.f32.mrb[24].mxu1  ;;  %7126 = vmatprep.subr.bf16.mxu0 %v8002_v53  ;;  %v8013_v53 = vld [vmem:[%s12353_s7 + $0xb0] sm:$0xff]  }
 0x703   :  { %v7756_v38 = vadd.f32 %v11823_v49, %v5369_v9  ;;  %v7648_v31 = vpop.f32.mrb[25].mxu1  ;;  %v8015_v9 = vld [vmem:[%s12353_s7 + $0xb8] sm:$0xff]  }
 0x704   :  { %v5372_v48 = vpop.f32.mrb[26].mxu1 }
 0x705   :  { %v7757_v61 = vadd.f32 %v11823_v49, %v5372_v48  ;;  %v11964_v43 = vpop.permute.xlu0 %5490  ;;  %v7649_v37 = vpop.f32.mrb[27].mxu1  ;;  %7127 = vmatpush3.bf16.msra.mxu0 %v8003_v4  ;;  %v5442_v17 = vmax.f32 %v7756_v38, 0.0 }
 0x706   :  { %v5578_v59 = vsel %vm2914_vm7, %v11843_v56, %v11964_v43  ;;  %7128 = vmatprep.subr.bf16.mxu0 %v8004_v6 }
 0x707   :  { %v5443_v30 = vmax.f32 %v7757_v61, 0.0  ;;  %5991 = vmatprep.mubr.bf16.mxu0 %v5578_v59 }
 0x708   :  { %5992 = vmatmul.mubr.bf16.gmra.mrb[72].mxu0 %v5544_v18 }
 0x709   :  { %v11977_v44 = vpack.c.bf16 %v5443_v30, %v5442_v17  ;;  %7129 = vmatpush3.bf16.msra.mxu0 %v8005_v22  ;;  %v5552_v17 = vsel %vm2914_vm7, %v11853_v51, %v11964_v43 }
 0x70a   :  { %v5377_v56 = vpop.f32.mrb[28].mxu1  ;;  %7130 = vmatprep.subr.bf16.mxu0 %v8006_v39 }
 0x70b   :  { %v7758_v36 = vadd.f32 %v11823_v49, %v5377_v56  ;;  %5532 = vrot.lane.b32.xlu1 %v11977_v44, %s8059_s20  ;;  %v7652_v11 = vpop.f32.mrb[29].mxu1 }
 0x70c   :  { %v5380_v5 = vpop.f32.mrb[30].mxu1 }
 0x70d   :  { %v7759_v54 = vadd.f32 %v11823_v49, %v5380_v5  ;;  %v5493_v29 = vpop.permute.xlu0 %5492  ;;  %v7653_v0 = vpop.f32.mrb[31].mxu1  ;;  %7131 = vmatpush3.bf16.msra.mxu0 %v8007_v20  ;;  %v5444_v3 = vmax.f32 %v7758_v36, 0.0 }
 0x70e   :  { %v5581_v7 = vsel %vm2914_vm7, %v11849_v52, %v5493_v29  ;;  %7132 = vmatprep.subr.bf16.mxu0 %v8008_v46  ;;  %v5556_v20 = vsel %vm2914_vm7, %v11859_v45, %v5493_v29 }
 0x70f   :  { %v5445_v8 = vmax.f32 %v7759_v54, 0.0  ;;  %5999 = vmatprep.mubr.bf16.mxu0 %v5581_v7  ;;  %v8019_v7 = vld [vmem:[%s12353_s7 + $0x118] sm:$0xff]  }
 0x710   :  { %6000 = vmatmul.mubr.bf16.gmra.mrb[76].mxu0 %v5548_v32 }
 0x711   :  { %v11999_v55 = vpack.c.bf16 %v5445_v8, %v5444_v3  ;;  %7133 = vmatpush3.bf16.msra.mxu0 %v8009_v13  ;;  %v8018_v13 = vld [vmem:[%s12353_s7 + $0x110] sm:$0xff]  }
 0x712   :  { %v5385_v52 = vpop.f32.mrb[32].mxu1  ;;  %7134 = vmatprep.subr.bf16.mxu0 %v8010_v19 }
 0x713   :  { %v7760_v24 = vadd.f32 %v11823_v49, %v5385_v52  ;;  %5534 = vrot.lane.b32.xlu0 %v11999_v55, %s8059_s20  ;;  %v7656_v1 = vpop.f32.mrb[33].mxu1 }
 0x714   :  { %v5388_v57 = vpop.f32.mrb[34].mxu1 }
 0x715   :  { %v7761_v63 = vadd.f32 %v11823_v49, %v5388_v57  ;;  %v7657_v16 = vpop.f32.mrb[35].mxu1  ;;  %7135 = vmatpush3.bf16.msra.mxu0 %v8011_v41  ;;  %v5446_v10 = vmax.f32 %v7760_v24, 0.0 }
 0x716   :  { %7136 = vmatprep.subr.bf16.mxu0 %v8012_v15 }
 0x717   :  { %v5447_v33 = vmax.f32 %v7761_v63, 0.0  ;;  %5527 = vrot.lane.b32.xlu0 %v11940_v14, %s8059_s20 }
 0x719   :  { %v12019_v4 = vpack.c.bf16 %v5447_v33, %v5446_v10  ;;  %7137 = vmatpush3.bf16.msra.mxu0 %v8013_v53 }
 0x71a   :  { %v5393_v6 = vpop.f32.mrb[36].mxu1  ;;  %7138 = vmatprep.subr.bf16.mxu0 %v8014_v27 }
 0x71b   :  { %v7762_v38 = vadd.f32 %v11823_v49, %v5393_v6  ;;  %5536 = vrot.lane.b32.xlu1 %v12019_v4, %s8059_s20  ;;  %v7660_v31 = vpop.f32.mrb[37].mxu1 }
 0x71c   :  { %v5396_v47 = vpop.f32.mrb[38].mxu1 }
 0x71d   :  { %v7763_v48 = vadd.f32 %v11823_v49, %v5396_v47  ;;  %v7661_v61 = vpop.f32.mrb[39].mxu1  ;;  %7139 = vmatpush3.bf16.msra.mxu0 %v8015_v9  ;;  %v5448_v37 = vmax.f32 %v7762_v38, 0.0 }
 0x71e   :  { %7662 = vmatprep.subr.bf16.mxu0 %v12612_v25 }
 0x71f   :  { %v5449_v22 = vmax.f32 %v7763_v48, 0.0 }
 0x721   :  { %v12029_v59 = vpack.c.bf16 %v5449_v22, %v5448_v37  ;;  %v8021_v37 = vld [vmem:[%s12355_s9] sm:$0xff]  }
 0x725   :  { %v5510_v39 = vpop.permute.xlu0 %5509 }
 0x726   :  { %v5584_v18 = vsel %vm2914_vm7, %v11865_v60, %v5510_v39 }
 0x727   :  { %6007 = vmatprep.mubr.bf16.mxu0 %v5584_v18 }
 0x728   :  { %6008 = vmatmul.mubr.bf16.gmra.mrb[80].mxu0 %v5552_v17 }
 0x72d   :  { %v5497_v30 = vpop.permute.xlu1 %5496 }
 0x72e   :  { %v5587_v49 = vsel %vm2914_vm7, %v11871_v23, %v5497_v30  ;;  %v5564_v58 = vsel %vm2914_vm7, %v11882_v42, %v5497_v30  ;;  %v8016_v42 = vld [vmem:[%s12353_s7 + $0x100] sm:$0xff]  }
 0x72f   :  { %6015 = vmatprep.mubr.bf16.mxu0 %v5587_v49 }
 0x730   :  { %6016 = vmatmul.mubr.bf16.gmra.mrb[84].mxu0 %v5556_v20 }
 0x731   :  { %v5495_v56 = vpop.permute.xlu1 %5494 }
 0x732   :  { %v5560_v11 = vsel %vm2914_vm7, %v11865_v60, %v5495_v56 }
 0x735   :  { %v5499_v46 = vpop.permute.xlu0 %5498 }
 0x736   :  { %v5590_v36 = vsel %vm2914_vm7, %v11878_v62, %v5499_v46  ;;  %v5568_v62 = vsel %vm2914_vm7, %v11888_v26, %v5499_v46  ;;  %v8017_v26 = vld [vmem:[%s12353_s7 + $0x108] sm:$0xff]  }
 0x737   :  { %6023 = vmatprep.mubr.bf16.mxu0 %v5590_v36 }
 0x738   :  { %6024 = vmatmul.mubr.bf16.gmra.mrb[88].mxu0 %v5560_v11 }
 0x74d   :  { %v5512_v51 = vpop.permute.xlu0 %5511 }
 0x74e   :  { %v5593_v43 = vsel %vm2914_vm7, %v11896_v21, %v5512_v51  ;;  %v8023_v51 = vld [vmem:[%s12355_s9 + $0x8] sm:$0xff]  }
 0x74f   :  { %6031 = vmatprep.mubr.bf16.mxu0 %v5593_v43 }
 0x750   :  { %6032 = vmatmul.mubr.bf16.gmra.mrb[92].mxu0 %v5564_v58 }
 0x755   :  { %v5514_v45 = vpop.permute.xlu1 %5513 }
 0x756   :  { %v5597_v5 = vsel %vm2914_vm7, %v11902_v34, %v5514_v45  ;;  %v5621_v3 = vsel %vm2914_vm7, %v11910_v40, %v5514_v45 }
 0x757   :  { %6039 = vmatprep.mubr.bf16.mxu0 %v5597_v5 }
 0x758   :  { %6040 = vmatmul.mubr.bf16.gmra.mrb[96].mxu0 %v5568_v62 }
 0x759   :  { %v5501_v60 = vpop.permute.xlu1 %5500 }
 0x75a   :  { %v5572_v0 = vsel %vm2914_vm7, %v11896_v21, %v5501_v60 }
 0x75d   :  { %v5516_v54 = vpop.permute.xlu0 %5515 }
 0x75e   :  { %v5601_v29 = vsel %vm2914_vm7, %v11906_v50, %v5516_v54  ;;  %v5610_v8 = vsel %vm2914_vm7, %v11916_v35, %v5516_v54  ;;  %v8024_v54 = vld [vmem:[%s12355_s9 + $0x50] sm:$0xff]  }
 0x75f   :  { %6047 = vmatprep.mubr.bf16.mxu0 %v5601_v29 }
 0x760   :  { %6048 = vmatmul.mubr.bf16.gmra.mrb[100].mxu0 %v5572_v0 }
 0x761   :  { %6088 = vmatprep.mubr.bf16.mxu0 %v5564_v58  ;;  %v5522_v19 = vpop.permute.xlu0 %5521 }
 0x762   :  { %v5604_v32 = vsel %vm2914_vm7, %v11871_v23, %v5522_v19 }
 0x765   :  { %v5526_v41 = vpop.permute.xlu1 %5525  ;;  %v5524_v15 = vpop.permute.xlu0 %5523 }
 0x766   :  { %v5614_v52 = vsel %vm2914_vm7, %v11924_v12, %v5526_v41  ;;  %v5607_v23 = vsel %vm2914_vm7, %v11902_v34, %v5524_v15 }
 0x768   :  { %6089 = vmatmul.mubr.bf16.vlgmr.msra.gmra.mrb[104].mxu0 %v5556_v20 }
 0x769   :  { %7663 = vmatpush3.bf16.msra.mxu0 %v8016_v42  ;;  %6096 = vmatprep.mubr.bf16.mxu0 %v5568_v62 }
 0x76a   :  { %7664 = vmatprep.subr.bf16.mxu0 %v12612_v25 }
 0x76d   :  { %7665 = vmatpush3.bf16.msra.mxu0 %v8017_v26 }
 0x76e   :  { %7666 = vmatprep.subr.bf16.mxu0 %v12612_v25 }
 0x770   :  { %6097 = vmatmul.mubr.bf16.gmra.mrb[108].mxu0 %v5560_v11  ;;  %v8022_v11 = vld [vmem:[%s12355_s9 + $0x48] sm:$0xff]  }
 0x771   :  { %6104 = vmatprep.mubr.bf16.mxu0 %v5572_v0  ;;  %7667 = vmatpush3.bf16.msra.mxu0 %v8018_v13 }
 0x772   :  { %7668 = vmatprep.subr.bf16.mxu0 %v12612_v25 }
 0x775   :  { %7669 = vmatpush3.bf16.msra.mxu0 %v8019_v7  ;;  %v8025_v7 = vld [vmem:[%s12355_s9 + $0x10] sm:$0xff]  }
 0x778   :  { %6105 = vmatmul.mubr.bf16.gmra.mrb[112].mxu0 %v5604_v32 }
 0x779   :  { %6112 = vmatprep.mubr.bf16.mxu0 %v5621_v3 }
 0x77d   :  { %v5533_v24 = vpop.permute.xlu1 %5532 }
 0x77e   :  { %v5625_v40 = vsel %vm2914_vm7, %v11954_v28, %v5533_v24 }
 0x780   :  { %6113 = vmatmul.mubr.bf16.gmra.mrb[116].mxu0 %v5568_v62 }
 0x781   :  { %6120 = vmatprep.mubr.bf16.mxu0 %v5610_v8 }
 0x785   :  { %v5535_v1 = vpop.permute.xlu0 %5534 }
 0x786   :  { %v5629_v35 = vsel %vm2914_vm7, %v11977_v44, %v5535_v1 }
 0x788   :  { %6121 = vmatmul.mubr.bf16.gmra.mrb[120].mxu0 %v5572_v0 }
 0x789   :  { %6128 = vmatprep.mubr.bf16.mxu0 %v5614_v52  ;;  %v5528_v16 = vpop.permute.xlu0 %5527 }
 0x78a   :  { %v5618_v53 = vsel %vm2914_vm7, %v11932_v2, %v5528_v16 }
 0x78d   :  { %v5537_v57 = vpop.permute.xlu1 %5536 }
 0x78e   :  { %v5633_v63 = vsel %vm2914_vm7, %v11999_v55, %v5537_v57 }
 0x790   :  { %6129 = vmatmul.mubr.bf16.gmra.mrb[124].mxu0 %v5607_v23 }
 0x791   :  { %6136 = vmatprep.mubr.bf16.mxu0 %v5625_v40 }
 0x798   :  { %6137 = vmatmul.mubr.bf16.gmra.mrb[128].mxu0 %v5610_v8 }
 0x799   :  { %6144 = vmatprep.mubr.bf16.mxu0 %v5629_v35 }
 0x7a0   :  { %6145 = vmatmul.mubr.bf16.gmra.mrb[132].mxu0 %v5614_v52 }
 0x7a1   :  { %6152 = vmatprep.mubr.bf16.mxu0 %v5633_v63  ;;  %v12182_v63 = vld [vmem:[%s12356_s8] ss:$0 sm:$0xff] }
 0x7a8   :  { %6153 = vmatmul.mubr.bf16.gmra.mrb[136].mxu0 %v5618_v53 }
 0x7a9   :  { %7670 = vmatprep.mubr.msk.bf16.mxu0 %vm8055_vm2, %v12612_v25 }
 0x7b0   :  { %7671 = vmatmul.mubr.msk.bf16.vlgmr.msra.gmra.mrb[140].mxu0 %vm2914_vm7, %v11896_v21 }
 0x7b1   :  { %7674 = vmatprep.mubr.msk.bf16.mxu0 %vm8055_vm2, %v12612_v25 }
 0x7b8   :  { %7675 = vmatmul.mubr.msk.bf16.gmra.mrb[144].mxu0 %vm2914_vm7, %v11902_v34 }
 0x7b9   :  { %7678 = vmatprep.mubr.msk.bf16.mxu0 %vm8055_vm2, %v12612_v25 }
 0x7c0   :  { %7679 = vmatmul.mubr.msk.bf16.gmra.mrb[148].mxu0 %vm2914_vm7, %v11906_v50 }
 0x7c1   :  { %7682 = vmatprep.mubr.msk.bf16.mxu0 %vm8055_vm2, %v12612_v25 }
 0x7c8   :  { %7683 = vmatmul.mubr.msk.bf16.gmra.mrb[152].mxu0 %vm2914_vm7, %v11924_v12 }
 0x7c9   :  { %7686 = vmatprep.mubr.msk.bf16.mxu0 %vm8055_vm2, %v12612_v25 }
 0x7d0   :  { %7687 = vmatmul.mubr.msk.bf16.gmra.mrb[156].mxu0 %vm2914_vm7, %v11932_v2 }
 0x7d1   :  { %7690 = vmatprep.mubr.msk.bf16.mxu0 %vm8055_vm2, %v12612_v25 }
 0x7d3   :  { %v7070_v21 = vpop.f32.mrb[68].mxu0 }
 0x7d4   :  { %v7071_v34 = vpop.f32.mrb[69].mxu0 }
 0x7d5   :  { %v12111_v28 = vadd.f32 %v7071_v34, %v7070_v21  ;;  %v7073_v50 = vpop.f32.mrb[70].mxu0 }
 0x7d6   :  { %v7074_v44 = vpop.f32.mrb[71].mxu0 }
 0x7d7   :  { %v12113_v27 = vadd.f32 %v7074_v44, %v7073_v50  ;;  %v5986_v21 = vadd.f32 %v12111_v28, %v12182_v63 }
 0x7d8   :  { %7691 = vmatmul.mubr.msk.bf16.gmra.mrb[160].mxu0 %vm2914_vm7, %v11940_v14 }
 0x7d9   :  { %7694 = vmatprep.mubr.msk.bf16.mxu0 %vm8055_vm2, %v12612_v25 }
 0x7db   :  { %v7076_v12 = vpop.f32.mrb[72].mxu0 }
 0x7dc   :  { %v7077_v10 = vpop.f32.mrb[73].mxu0 }
 0x7dd   :  { %v12119_v2 = vadd.f32 %v7077_v10, %v7076_v12  ;;  %v7079_v33 = vpop.f32.mrb[74].mxu0  ;;  %v8026_v12 = vld [vmem:[%s12355_s9 + $0x58] sm:$0xff]  }
 0x7de   :  { %v7080_v9 = vpop.f32.mrb[75].mxu0  ;;  %v8027_v10 = vld [vmem:[%s12355_s9 + $0x18] sm:$0xff]  }
 0x7df   :  { %v12121_v6 = vadd.f32 %v7080_v9, %v7079_v33  ;;  %v5989_v33 = vadd.f32 %v12113_v27, %v12182_v63 }
 0x7e0   :  { %7695 = vmatmul.mubr.msk.bf16.gmra.mrb[164].mxu0 %vm2914_vm7, %v11999_v55  ;;  %v8020_v55 = vld [vmem:[%s12355_s9 + $0x40] sm:$0xff]  }
 0x7e1   :  { %7698 = vmatprep.mubr.msk.bf16.mxu0 %vm8055_vm2, %v12612_v25  ;;  %7207 = vmatprep.subr.bf16.mxu1 %v8020_v55 }
 0x7e2   :  { %7208 = vmatpush3.bf16.msra.mxu1 %v8021_v37 }
 0x7e3   :  { %v7082_v38 = vpop.f32.mrb[76].mxu0  ;;  %7209 = vmatprep.subr.bf16.mxu1 %v8022_v11 }
 0x7e4   :  { %v7083_v31 = vpop.f32.mrb[77].mxu0 }
 0x7e5   :  { %v12127_v14 = vadd.f32 %v7083_v31, %v7082_v38  ;;  %v7085_v47 = vpop.f32.mrb[78].mxu0 }
 0x7e6   :  { %v7086_v48 = vpop.f32.mrb[79].mxu0  ;;  %7210 = vmatpush3.bf16.msra.mxu1 %v8023_v51 }
 0x7e7   :  { %v12129_v61 = vadd.f32 %v7086_v48, %v7085_v47  ;;  %7211 = vmatprep.subr.bf16.mxu1 %v8024_v54  ;;  %v5994_v48 = vadd.f32 %v12119_v2, %v12182_v63  ;;  %v8030_v2 = vld [vmem:[%s12355_s9 + $0x68] sm:$0xff]  }
 0x7e8   :  { %7699 = vmatmul.mubr.msk.bf16.gmra.mrb[168].mxu0 %vm2914_vm7, %v12019_v4 }
 0x7e9   :  { %7702 = vmatprep.mubr.msk.bf16.mxu0 %vm8055_vm2, %v12612_v25 }
 0x7ea   :  { %7212 = vmatpush3.bf16.msra.mxu1 %v8025_v7 }
 0x7eb   :  { %7213 = vmatprep.subr.bf16.mxu1 %v8026_v12 }
 0x7ee   :  { %7214 = vmatpush3.bf16.msra.mxu1 %v8027_v10 }
 0x7f0   :  { %7703 = vmatmul.mubr.msk.bf16.gmra.mrb[172].mxu0 %vm2914_vm7, %v12029_v59 }
 0x7fb   :  { %v7088_v22 = vpop.f32.mrb[80].mxu0 }
 0x7fc   :  { %v7089_v39 = vpop.f32.mrb[81].mxu0 }
 0x7fd   :  { %v12143_v18 = vadd.f32 %v7089_v39, %v7088_v22  ;;  %v7091_v4 = vpop.f32.mrb[82].mxu0  ;;  %v5997_v39 = vadd.f32 %v12121_v6, %v12182_v63  ;;  %v6002_v6 = vadd.f32 %v12127_v14, %v12182_v63 }
 0x7fe   :  { %v7092_v17 = vpop.f32.mrb[83].mxu0 }
 0x7ff   :  { %v12145_v30 = vadd.f32 %v7092_v17, %v7091_v4 }
 0x803   :  { %v7094_v49 = vpop.f32.mrb[84].mxu0 }
 0x804   :  { %v7095_v59 = vpop.f32.mrb[85].mxu0 }
 0x805   :  { %v12147_v20 = vadd.f32 %v7095_v59, %v7094_v49  ;;  %v7097_v56 = vpop.f32.mrb[86].mxu0  ;;  %v8028_v49 = vld [vmem:[%s12355_s9 + $0x60] sm:$0xff]  }
 0x806   :  { %v7098_v46 = vpop.f32.mrb[87].mxu0  ;;  %v8029_v59 = vld [vmem:[%s12355_s9 + $0x20] sm:$0xff]   ;;  %7215 = vmatprep.subr.bf16.mxu1 %v8028_v49 }
 0x807   :  { %v12149_v36 = vadd.f32 %v7098_v46, %v7097_v56  ;;  %7216 = vmatpush3.bf16.msra.mxu1 %v8029_v59 }
 0x808   :  { %7217 = vmatprep.subr.bf16.mxu1 %v8030_v2 }
 0x80b   :  { %v7100_v43 = vpop.f32.mrb[88].mxu0 }
 0x80c   :  { %v7101_v58 = vpop.f32.mrb[89].mxu0 }
 0x80d   :  { %v12157_v45 = vadd.f32 %v7101_v58, %v7100_v43  ;;  %v7103_v5 = vpop.f32.mrb[90].mxu0  ;;  %v8031_v43 = vld [vmem:[%s12355_s9 + $0x28] sm:$0xff]  }
 0x80e   :  { %v7104_v62 = vpop.f32.mrb[91].mxu0  ;;  %7218 = vmatpush3.bf16.msra.mxu1 %v8031_v43 }
 0x80f   :  { %v12159_v60 = vadd.f32 %v7104_v62, %v7103_v5  ;;  %v8032_v5 = vld [vmem:[%s12355_s9 + $0x70] sm:$0xff]   ;;  %v6005_v62 = vadd.f32 %v12129_v61, %v12182_v63  ;;  %v6026_v10 = vadd.f32 %v12157_v45, %v12182_v63 }
 0x810   :  { %7219 = vmatprep.subr.bf16.mxu1 %v8032_v5 }
 0x823   :  { %v7106_v29 = vpop.f32.mrb[92].mxu0 }
 0x824   :  { %v7107_v0 = vpop.f32.mrb[93].mxu0 }
 0x825   :  { %v12164_v42 = vadd.f32 %v7107_v0, %v7106_v29  ;;  %v7109_v26 = vpop.f32.mrb[94].mxu0 }
 0x826   :  { %v7110_v13 = vpop.f32.mrb[95].mxu0 }
 0x827   :  { %v12169_v19 = vadd.f32 %v7110_v13, %v7109_v26  ;;  %v6010_v13 = vadd.f32 %v12143_v18, %v12182_v63  ;;  %v6021_v18 = vadd.f32 %v12149_v36, %v12182_v63 }
 0x829   :  { %v6037_v45 = vadd.f32 %v12169_v19, %v12182_v63 }
 0x82b   :  { %v7112_v32 = vpop.f32.mrb[96].mxu0 }
 0x82c   :  { %v7113_v3 = vpop.f32.mrb[97].mxu0 }
 0x82d   :  { %v12171_v8 = vadd.f32 %v7113_v3, %v7112_v32  ;;  %v7115_v41 = vpop.f32.mrb[98].mxu0 }
 0x82e   :  { %v7116_v52 = vpop.f32.mrb[99].mxu0 }
 0x82f   :  { %v12173_v15 = vadd.f32 %v7116_v52, %v7115_v41  ;;  %v6013_v41 = vadd.f32 %v12145_v30, %v12182_v63 }
 0x833   :  { %v7118_v24 = vpop.f32.mrb[100].mxu0 }
 0x834   :  { %v7119_v23 = vpop.f32.mrb[101].mxu0 }
 0x835   :  { %v12175_v40 = vadd.f32 %v7119_v23, %v7118_v24  ;;  %v7121_v1 = vpop.f32.mrb[102].mxu0 }
 0x836   :  { %v7122_v35 = vpop.f32.mrb[103].mxu0 }
 0x837   :  { %v12177_v57 = vadd.f32 %v7122_v35, %v7121_v1  ;;  %v6018_v35 = vadd.f32 %v12147_v20, %v12182_v63  ;;  %v6029_v20 = vadd.f32 %v12159_v60, %v12182_v63 }
 0x83b   :  { %v7140_v16 = vpop.f32.mrb[104].mxu0 }
 0x83c   :  { %v7141_v53 = vpop.f32.mrb[105].mxu0 }
 0x83d   :  { %v7142_v34 = vadd.f32 %v7141_v53, %v7140_v16  ;;  %v7143_v50 = vpop.f32.mrb[106].mxu0 }
 0x83e   :  { %v7144_v44 = vpop.f32.mrb[107].mxu0 }
 0x83f   :  { %v7145_v9 = vadd.f32 %v7144_v44, %v7143_v50  ;;  %v12194_v38 = vadd.f32 %v7142_v34, %v5986_v21 }
 0x841   :  { %v12196_v31 = vadd.f32 %v7145_v9, %v5989_v33 }
 0x843   :  { %v7146_v28 = vpop.f32.mrb[108].mxu0 }
 0x844   :  { %v7147_v47 = vpop.f32.mrb[109].mxu0 }
 0x845   :  { %v7148_v55 = vadd.f32 %v7147_v47, %v7146_v28  ;;  %v7149_v37 = vpop.f32.mrb[110].mxu0 }
 0x846   :  { %v7150_v22 = vpop.f32.mrb[111].mxu0 }
 0x847   :  { %v7151_v4 = vadd.f32 %v7150_v22, %v7149_v37  ;;  %v12202_v27 = vadd.f32 %v7148_v55, %v5994_v48  ;;  %v6034_v22 = vadd.f32 %v12164_v42, %v12182_v63  ;;  %v6045_v42 = vadd.f32 %v12173_v15, %v12182_v63 }
 0x849   :  { %v12204_v17 = vadd.f32 %v7151_v4, %v5997_v39 }
 0x84b   :  { %v7152_v56 = vpop.f32.mrb[112].mxu0 }
 0x84c   :  { %v7153_v46 = vpop.f32.mrb[113].mxu0 }
 0x84d   :  { %v7154_v11 = vadd.f32 %v7153_v46, %v7152_v56  ;;  %v7155_v51 = vpop.f32.mrb[114].mxu0 }
 0x84e   :  { %v7156_v58 = vpop.f32.mrb[115].mxu0 }
 0x84f   :  { %v7157_v54 = vadd.f32 %v7156_v58, %v7155_v51  ;;  %v12225_v29 = vadd.f32 %v7154_v11, %v6002_v6  ;;  %v6042_v6 = vadd.f32 %v12171_v8, %v12182_v63  ;;  %v6053_v8 = vadd.f32 %v12177_v57, %v12182_v63 }
 0x851   :  { %v12227_v14 = vadd.f32 %v7157_v54, %v6005_v62 }
 0x853   :  { %v7158_v0 = vpop.f32.mrb[116].mxu0 }
 0x854   :  { %v7159_v26 = vpop.f32.mrb[117].mxu0 }
 0x855   :  { %v7160_v7 = vadd.f32 %v7159_v26, %v7158_v0  ;;  %v7161_v32 = vpop.f32.mrb[118].mxu0  ;;  %v6050_v0 = vadd.f32 %v12175_v40, %v12182_v63  ;;  %v8033_v40 = vld [vmem:[%s12355_s9 + $0x30] sm:$0xff]  }
 0x856   :  { %v7162_v3 = vpop.f32.mrb[119].mxu0  ;;  %7220 = vmatpush3.bf16.msra.mxu1 %v8033_v40 }
 0x857   :  { %v7163_v52 = vadd.f32 %v7162_v3, %v7161_v32  ;;  %v12233_v61 = vadd.f32 %v7160_v7, %v6010_v13 }
 0x859   :  { %v12235_v24 = vadd.f32 %v7163_v52, %v6013_v41 }
 0x85b   :  { %v7164_v23 = vpop.f32.mrb[120].mxu0 }
 0x85c   :  { %v7165_v1 = vpop.f32.mrb[121].mxu0 }
 0x85d   :  { %v7166_v16 = vadd.f32 %v7165_v1, %v7164_v23  ;;  %v7167_v53 = vpop.f32.mrb[122].mxu0 }
 0x85e   :  { %v7168_v21 = vpop.f32.mrb[123].mxu0 }
 0x85f   :  { %v7169_v34 = vadd.f32 %v7168_v21, %v7167_v53  ;;  %v12241_v50 = vadd.f32 %v7166_v16, %v6018_v35 }
 0x861   :  { %v12243_v30 = vadd.f32 %v7169_v34, %v6021_v18 }
 0x863   :  { %v7170_v44 = vpop.f32.mrb[124].mxu0 }
 0x864   :  { %v7171_v12 = vpop.f32.mrb[125].mxu0 }
 0x865   :  { %v7172_v33 = vadd.f32 %v7171_v12, %v7170_v44  ;;  %v7173_v9 = vpop.f32.mrb[126].mxu0 }
 0x866   :  { %v7174_v28 = vpop.f32.mrb[127].mxu0 }
 0x867   :  { %v7175_v47 = vadd.f32 %v7174_v28, %v7173_v9  ;;  %v12249_v48 = vadd.f32 %v7172_v33, %v6026_v10 }
 0x869   :  { %v12251_v36 = vadd.f32 %v7175_v47, %v6029_v20 }
 0x86b   :  { %v7176_v55 = vpop.f32.mrb[128].mxu0 }
 0x86c   :  { %v7177_v37 = vpop.f32.mrb[129].mxu0 }
 0x86d   :  { %v7178_v39 = vadd.f32 %v7177_v37, %v7176_v55  ;;  %v7179_v4 = vpop.f32.mrb[130].mxu0 }
 0x86e   :  { %v7180_v49 = vpop.f32.mrb[131].mxu0 }
 0x86f   :  { %v7181_v59 = vadd.f32 %v7180_v49, %v7179_v4  ;;  %v12257_v2 = vadd.f32 %v7178_v39, %v6034_v22 }
 0x871   :  { %v12259_v60 = vadd.f32 %v7181_v59, %v6037_v45 }
 0x873   :  { %v7182_v56 = vpop.f32.mrb[132].mxu0 }
 0x874   :  { %v7183_v46 = vpop.f32.mrb[133].mxu0 }
 0x875   :  { %v7184_v11 = vadd.f32 %v7183_v46, %v7182_v56  ;;  %v7185_v51 = vpop.f32.mrb[134].mxu0 }
 0x876   :  { %v7186_v43 = vpop.f32.mrb[135].mxu0 }
 0x877   :  { %v7187_v58 = vadd.f32 %v7186_v43, %v7185_v51  ;;  %v12265_v5 = vadd.f32 %v7184_v11, %v6042_v6 }
 0x879   :  { %v12267_v19 = vadd.f32 %v7187_v58, %v6045_v42 }
 0x87b   :  { %v7188_v62 = vpop.f32.mrb[136].mxu0 }
 0x87c   :  { %v7189_v54 = vpop.f32.mrb[137].mxu0 }
 0x87d   :  { %v7190_v26 = vadd.f32 %v7189_v54, %v7188_v62  ;;  %v7191_v13 = vpop.f32.mrb[138].mxu0 }
 0x87e   :  { %v7192_v7 = vpop.f32.mrb[139].mxu0 }
 0x87f   :  { %v7193_v32 = vadd.f32 %v7192_v7, %v7191_v13  ;;  %v12273_v3 = vadd.f32 %v7190_v26, %v6050_v0 }
 0x881   :  { %v12275_v15 = vadd.f32 %v7193_v32, %v6053_v8 }
 0x883   :  { %v6195_v41 = vpop.f32.mrb[140].mxu0 }
 0x884   :  { %v6196_v52 = vadd.f32 %v6195_v41, %v12194_v38  ;;  %v7672_v23 = vpop.f32.mrb[141].mxu0 }
 0x885   :  { %v6198_v1 = vpop.f32.mrb[142].mxu0 }
 0x886   :  { %v6199_v35 = vadd.f32 %v6198_v1, %v12196_v31  ;;  %v7673_v16 = vpop.f32.mrb[143].mxu0  ;;  %v6266_v53 = vmax.f32 %v6196_v52, 0.0 }
 0x888   :  { %v6267_v21 = vmax.f32 %v6199_v35, 0.0 }
 0x88a   :  { %v12282_v57 = vpack.c.bf16 %v6267_v21, %v6266_v53 }
 0x88b   :  { %v6203_v63 = vpop.f32.mrb[144].mxu0 }
 0x88c   :  { %v6204_v18 = vadd.f32 %v6203_v63, %v12202_v27  ;;  %v7676_v34 = vpop.f32.mrb[145].mxu0  ;;  %v8034_v27 = vld [vmem:[%s12355_s9 + $0x78] sm:$0xff]  }
 0x88d   :  { %v6206_v44 = vpop.f32.mrb[146].mxu0  ;;  %7221 = vmatprep.subr.bf16.mxu1 %v8034_v27 }
 0x88e   :  { %v6207_v38 = vadd.f32 %v6206_v44, %v12204_v17  ;;  %v7677_v12 = vpop.f32.mrb[147].mxu0  ;;  %v6268_v10 = vmax.f32 %v6204_v18, 0.0  ;;  %v8035_v17 = vld [vmem:[%s12355_s9 + $0x38] sm:$0xff]  }
 0x88f   :  { %7222 = vmatpush3.bf16.msra.mxu1 %v8035_v17 }
 0x890   :  { %v6269_v31 = vmax.f32 %v6207_v38, 0.0  ;;  %7706 = vmatprep.subr.bf16.mxu1 %v12612_v25 }
 0x892   :  { %v6285_v33 = vpack.c.bf16 %v6269_v31, %v6268_v10 }
 0x893   :  { %v6211_v9 = vpop.f32.mrb[148].mxu0 }
 0x894   :  { %v6212_v28 = vadd.f32 %v6211_v9, %v12225_v29  ;;  %v7680_v20 = vpop.f32.mrb[149].mxu0  ;;  %6294 = vrot.lane.b32.xlu0 %v6285_v33, %s8057_s18 }
 0x895   :  { %v6214_v47 = vpop.f32.mrb[150].mxu0 }
 0x896   :  { %v6215_v55 = vadd.f32 %v6214_v47, %v12227_v14  ;;  %v7681_v37 = vpop.f32.mrb[151].mxu0  ;;  %v6270_v22 = vmax.f32 %v6212_v28, 0.0 }
 0x898   :  { %v6271_v39 = vmax.f32 %v6215_v55, 0.0 }
 0x89a   :  { %v6286_v4 = vpack.c.bf16 %v6271_v39, %v6270_v22 }
 0x89b   :  { %v6219_v29 = vpop.f32.mrb[152].mxu0 }
 0x89c   :  { %v6220_v49 = vadd.f32 %v6219_v29, %v12233_v61  ;;  %v7684_v14 = vpop.f32.mrb[153].mxu0  ;;  %6297 = vrot.lane.b32.xlu0 %v6286_v4, %s8059_s20 }
 0x89d   :  { %v6222_v45 = vpop.f32.mrb[154].mxu0 }
 0x89e   :  { %v6223_v59 = vadd.f32 %v6222_v45, %v12235_v24  ;;  %v7685_v56 = vpop.f32.mrb[155].mxu0  ;;  %v6272_v46 = vmax.f32 %v6220_v49, 0.0 }
 0x89f   :  { %v18_v56 = vstv %s12357_s12 }
 0x8a0   :  { %v6273_v6 = vmax.f32 %v6223_v59, 0.0  ;;  %19 = vst [vmem:[#allocation2] sm:$0x1] %v18_v56 }
 0x8a2   :  { %v6287_v11 = vpack.c.bf16 %v6273_v6, %v6272_v46 }
 0x8a3   :  { %v6227_v51 = vpop.f32.mrb[156].mxu0 }
 0x8a4   :  { %v6228_v43 = vadd.f32 %v6227_v51, %v12241_v50  ;;  %v7688_v42 = vpop.f32.mrb[157].mxu0  ;;  %6300 = vrot.lane.b32.xlu0 %v6287_v11, %s8062_s30 }
 0x8a5   :  { %v6230_v58 = vpop.f32.mrb[158].mxu0 }
 0x8a6   :  { %v6231_v62 = vadd.f32 %v6230_v58, %v12243_v30  ;;  %v7689_v61 = vpop.f32.mrb[159].mxu0  ;;  %v6274_v54 = vmax.f32 %v6228_v43, 0.0  ;;  %v6921_v58 = vld [vmem:[%s12358_s10] ss:$0 sm:$0xff] }
 0x8a8   :  { %v6275_v0 = vmax.f32 %v6231_v62, 0.0 }
 0x8aa   :  { %v6288_v26 = vpack.c.bf16 %v6275_v0, %v6274_v54 }
 0x8ab   :  { %v6235_v13 = vpop.f32.mrb[160].mxu0 }
 0x8ac   :  { %v6236_v24 = vadd.f32 %v6235_v13, %v12249_v48  ;;  %v7692_v7 = vpop.f32.mrb[161].mxu0 }
 0x8ad   :  { %v6238_v8 = vpop.f32.mrb[162].mxu0 }
 0x8ae   :  { %v6239_v32 = vadd.f32 %v6238_v8, %v12251_v36  ;;  %v7693_v41 = vpop.f32.mrb[163].mxu0  ;;  %v6276_v52 = vmax.f32 %v6236_v24, 0.0 }
 0x8b0   :  { %v6277_v50 = vmax.f32 %v6239_v32, 0.0 }
 0x8b2   :  { %v6289_v23 = vpack.c.bf16 %v6277_v50, %v6276_v52 }
 0x8b3   :  { %v6243_v1 = vpop.f32.mrb[164].mxu0 }
 0x8b4   :  { %v6244_v35 = vadd.f32 %v6243_v1, %v12257_v2  ;;  %v7696_v16 = vpop.f32.mrb[165].mxu0  ;;  %6303 = vrot.lane.b32.xlu1 %v6289_v23, %s8057_s18  ;;  %v6942_v1 = vld [vmem:[#allocation2] ss:$0 sm:$0xff] }
 0x8b5   :  { %v6246_v30 = vpop.f32.mrb[166].mxu0 }
 0x8b6   :  { %v6247_v40 = vadd.f32 %v6246_v30, %v12259_v60  ;;  %v7697_v53 = vpop.f32.mrb[167].mxu0  ;;  %v6278_v21 = vmax.f32 %v6244_v35, 0.0 }
 0x8b8   :  { %v6279_v48 = vmax.f32 %v6247_v40, 0.0 }
 0x8ba   :  { %v6290_v63 = vpack.c.bf16 %v6279_v48, %v6278_v21 }
 0x8bb   :  { %v6251_v18 = vpop.f32.mrb[168].mxu0 }
 0x8bc   :  { %v6252_v36 = vadd.f32 %v6251_v18, %v12265_v5  ;;  %v7700_v34 = vpop.f32.mrb[169].mxu0  ;;  %6306 = vrot.lane.b32.xlu1 %v6290_v63, %s8059_s20 }
 0x8bd   :  { %v6254_v44 = vpop.f32.mrb[170].mxu0 }
 0x8be   :  { %v6255_v38 = vadd.f32 %v6254_v44, %v12267_v19  ;;  %v7701_v2 = vpop.f32.mrb[171].mxu0  ;;  %v6280_v12 = vmax.f32 %v6252_v36, 0.0 }
 0x8c0   :  { %v6281_v10 = vmax.f32 %v6255_v38, 0.0 }
 0x8c2   :  { %v6291_v31 = vpack.c.bf16 %v6281_v10, %v6280_v12 }
 0x8c3   :  { %v6259_v33 = vpop.f32.mrb[172].mxu0 }
 0x8c4   :  { %v6260_v60 = vadd.f32 %v6259_v33, %v12273_v3  ;;  %v7704_v9 = vpop.f32.mrb[173].mxu0  ;;  %6309 = vrot.lane.b32.xlu1 %v6291_v31, %s8062_s30 }
 0x8c5   :  { %v6262_v28 = vpop.f32.mrb[174].mxu0 }
 0x8c6   :  { %v6263_v20 = vadd.f32 %v6262_v28, %v12275_v15  ;;  %v7705_v5 = vpop.f32.mrb[175].mxu0  ;;  %v6282_v47 = vmax.f32 %v6260_v60, 0.0  ;;  %v8036_v15 = vld [vmem:[%s12355_s9 + $0x80] sm:$0xff]  }
 0x8c8   :  { %v6283_v55 = vmax.f32 %v6263_v20, 0.0 }
 0x8ca   :  { %v6292_v37 = vpack.c.bf16 %v6283_v55, %v6282_v47 }
 0x906   :  { %v6295_v27 = vpop.permute.xlu0 %6294 }
 0x907   :  { %v6313_v3 = vsel %vm2716_vm5, %v12282_v57, %v6295_v27  ;;  %v8037_v57 = vld [vmem:[%s12355_s9 + $0x88] sm:$0xff]  }
 0x90e   :  { %v6298_v19 = vpop.permute.xlu0 %6297 }
 0x90f   :  { %v6315_v14 = vsel %vm2914_vm7, %v6313_v3, %v6298_v19 }
 0x916   :  { %v6301_v39 = vpop.permute.xlu0 %6300 }
 0x917   :  { %v6317_v59 = vsel %vm3112_vm9, %v6315_v14, %v6301_v39 }
 0x926   :  { %v6304_v17 = vpop.permute.xlu1 %6303 }
 0x927   :  { %v6321_v4 = vsel %vm2716_vm5, %v6288_v26, %v6304_v17  ;;  %v6941_v26 = vld [vmem:[%s12359_s11] ss:$0 sm:$0xff] }
 0x92e   :  { %v6307_v22 = vpop.permute.xlu1 %6306 }
 0x92f   :  { %v6323_v29 = vsel %vm2914_vm7, %v6321_v4, %v6307_v22 }
 0x936   :  { %v6310_v49 = vpop.permute.xlu1 %6309 }
 0x937   :  { %v6325_v45 = vsel %vm3112_vm9, %v6323_v29, %v6310_v49 }
 0x938   :  { %6513 = vmatprep.mubr.bf16.mxu1 %v6325_v45 }
 0x939   :  { %6514 = vmatmul.mubr.bf16.vlgmr.msra.gmra.mrb[40].mxu1 %v6317_v59 }
 0x93a   :  { %7707 = vmatpush3.bf16.msra.mxu1 %v8036_v15  ;;  %7710 = vmatprep.mubr.msk.bf16.mxu1 %vm8055_vm2, %v12612_v25 }
 0x93b   :  { %7708 = vmatprep.subr.bf16.mxu1 %v12612_v25 }
 0x93e   :  { %7709 = vmatpush3.bf16.msra.mxu1 %v8037_v57 }
 0x941   :  { %7711 = vmatmul.mubr.msk.bf16.vlgmr.msra.gmra.mrb[44].mxu1 %vm2716_vm5, %v6292_v37 }
 0xa0c   :  { %v7223_v46 = vpop.f32.mrb[40].mxu1 }
 0xa0d   :  { %v7224_v6 = vpop.f32.mrb[41].mxu1 }
 0xa0e   :  { %v7225_v11 = vadd.f32 %v7224_v6, %v7223_v46  ;;  %v7226_v51 = vpop.f32.mrb[42].mxu1 }
 0xa0f   :  { %v7227_v43 = vpop.f32.mrb[43].mxu1 }
 0xa10   :  { %v7228_v42 = vadd.f32 %v7227_v43, %v7226_v51  ;;  %v6516_v62 = vadd.f32 %v7225_v11, %v6921_v58 }
 0xa12   :  { %v6519_v0 = vadd.f32 %v7228_v42, %v6921_v58 }
 0xa14   :  { %v6556_v25 = vpop.f32.mrb[44].mxu1 }
 0xa15   :  { %v6557_v61 = vadd.f32 %v6556_v25, %v6516_v62  ;;  %v7712_v54 = vpop.f32.mrb[45].mxu1 }
 0xa16   :  { %v6559_v13 = vpop.f32.mrb[46].mxu1 }
 0xa17   :  { %v6563_v24 = vmax.f32 %v6557_v61, 0.0  ;;  %v6560_v7 = vadd.f32 %v6559_v13, %v6519_v0  ;;  %v7713_v8 = vpop.f32.mrb[47].mxu1 }
 0xa19   :  { %v6572_v32 = vmul.f32 %v6941_v26, %v6563_v24  ;;  %v6564_v41 = vmax.f32 %v6560_v7, 0.0 }
 0xa1b   :  { %v6573_v52 = vmul.f32 %v6941_v26, %v6564_v41  ;;  %v6574_v50 = vsel %vm2568_vm4, %v6572_v32, 0.0 }
 0xa1c   :  { %6575 = vadd.xlane.f32.xlu1 %v6574_v50 }
 0xa1d   :  { %v6577_v23 = vsel %vm2568_vm4, %v6573_v52, 0.0 }
 0xa1e   :  { %6578 = vadd.xlane.f32.xlu0 %v6577_v23 }
 0xaa9   :  { %v6576_v35 = vpop.xlane.xlu1 %6575 }
 0xaaa   :  { %v6587_v16 = vadd.f32 %v6942_v1, %v6576_v35 }
 0xaab   :  { %v6579_v30 = vpop.xlane.xlu0 %6578 }
 0xaac   :  { %v6943_v40 = vmul.f32 -1.442695, %v6587_v16  ;;  %v6588_v53 = vadd.f32 %v6942_v1, %v6579_v30 }
 0xaae   :  { %8038 = vpow2.f32 %v6943_v40  ;;  %v6944_v21 = vmul.f32 -1.442695, %v6588_v53 }
 0xab0   :  { %8040 = vpow2.f32 %v6944_v21 }
 0xab8   :  { %v8039_v48 = vpop.eup %8038 }
 0xab9   :  { %v6595_v63 = vadd.f32 1.0, %v8039_v48 }
 0xaba   :  { %v8041_v18 = vpop.eup %8040 }
 0xabb   :  { %8042 = vrcp.f32 %v6595_v63  ;;  %v6596_v36 = vadd.f32 1.0, %v8041_v18 }
 0xabd   :  { %8044 = vrcp.f32 %v6596_v36 }
 0xac5   :  { %v8043_v34 = vpop.eup %8042 }
 0xac6   :  { %6602 = vst.msk [vmem:[%s12360_s13] sm:$0xff] %vm6601_vm11, %v8043_v34 }
 0xac7   :  { %v8045_v44 = vpop.eup %8044 }
 0xac8   :  { %6603 = vst.msk [vmem:[%s12360_s13 + $0x8] sm:$0xff] %vm6601_vm11, %v8045_v44 }

</bundles_post_ra>
